<compile_context>
chip_gen: v7x
topology: tpu7x:2x2x1
jax: 0.10.0
libtpu: 0.0.40
codegen_flags: <defaults>
</compile_context>

<pallas_src>
import jax
import jax.numpy as jnp
from jax.experimental import pallas as pl
from jax.experimental.pallas import tpu as pltpu

K = 1024
CHUNK_N = 512                       # output-column chunk of each streamed weight (1 MiB bf16)
CHUNKS_PER_LAYER = K // CHUNK_N     # 2
BIG_LAYERS = ("fc1", "fc21", "fc22", "fc3", "fc4")
TOTAL_CHUNKS = len(BIG_LAYERS) * CHUNKS_PER_LAYER   # 10
X_PAD = 8                           # input features 2 -> padded to 8 lanes
OUT_PAD = 8                         # output features 2 -> padded to 8 lanes

_SELU_ALPHA = 1.6732632423543772
_SELU_SCALE = 1.0507009873554805


def _selu(x):
    # F.selu: scale * (max(0,x) + min(0, alpha*(exp(x)-1))).
    # Keep the where-select form: exp(x) on the unselected positive branch is benign.
    return _SELU_SCALE * jnp.where(x > 0, x, _SELU_ALPHA * (jnp.exp(x) - 1.0))


def vae_kernel(x_ref, eps_ref, wstack_hbm,
               w0_ref, b0_ref, b1_ref, b21_ref, b22_ref, b3_ref, b4_ref,
               w5_ref, b5_ref,
               recon_ref, mu_ref, logvar_ref,
               wbuf, sem):
    f32, bf16 = jnp.float32, jnp.bfloat16

    def fetch(chunk, slot):
        pltpu.make_async_copy(wstack_hbm.at[chunk], wbuf.at[slot],
                              sem.at[slot]).start()

    def wait(slot):
        pltpu.make_async_copy(wstack_hbm.at[0], wbuf.at[slot],
                              sem.at[slot]).wait()

    # Prime the weight pipeline before doing any compute.
    fetch(0, 0)

    # ---- fc0 (2 -> K) on the VPU: only the 2 real input features, f32 ----
    h0 = _selu(x_ref[:, 0:1] * w0_ref[0:1, :]
               + x_ref[:, 1:2] * w0_ref[1:2, :]
               + b0_ref[...])                                     # (B, K) f32

    def stream_linear(h_f32, layer_idx):
        """(B,K) f32 @ streamed bf16 (K,K) weight -> (B,K) f32 (pre-bias)."""
        h_bf = h_f32.astype(bf16)
        parts = []
        for i in range(CHUNKS_PER_LAYER):
            g = layer_idx * CHUNKS_PER_LAYER + i
            slot = g % 2
            wait(slot)                           # chunk g has landed in wbuf[slot]
            if g + 1 < TOTAL_CHUNKS:
                fetch(g + 1, (g + 1) % 2)        # prefetch next chunk (other slot)
            parts.append(jnp.dot(h_bf, wbuf[slot],
                                 preferred_element_type=f32))    # (B, CHUNK_N)
        return jnp.concatenate(parts, axis=1)                    # (B, K)

    # ---- encode ----
    h1 = _selu(stream_linear(h0, 0) + b1_ref[...])               # fc1 + selu
    mu = stream_linear(h1, 1) + b21_ref[...]                     # fc21
    logvar = stream_linear(h1, 2) + b22_ref[...]                 # fc22
    mu_ref[...] = mu
    logvar_ref[...] = logvar

    # ---- reparameterize (eps supplied by the host) ----
    z = mu + eps_ref[...] * jnp.exp(0.5 * logvar)

    # ---- decode ----
    h3 = _selu(stream_linear(z, 3) + b3_ref[...])                # fc3 + selu
    h4 = _selu(stream_linear(h3, 4) + b4_ref[...])               # fc4 + selu
    recon_ref[...] = (jnp.dot(h4.astype(bf16), w5_ref[...],
                              preferred_element_type=f32)
                      + b5_ref[...])                             # fc5 (K -> 2, padded to 8)


def prepare_params(params):
    """One-time packing (hoisted off the per-call path):
      * big KxK weights -> bf16, transposed to (in,out), split into (K, CHUNK_N)
        column chunks and stacked into a (10, K, 512) bf16 HBM tensor,
      * fc0 kept f32 as (2, K) (consumed on the VPU),
      * fc5 -> (K, 8) bf16 with 6 zero output lanes, its bias padded to (1, 8)."""
    def wt(name):   # PyTorch Linear stores (out, in) -> transpose to (in, out)
        return params[name][0].T

    def bias(name):
        return params[name][1].reshape(1, -1)

    chunks = []
    for name in BIG_LAYERS:
        w = wt(name).astype(jnp.bfloat16)                        # (K, K) bf16
        for c in range(CHUNKS_PER_LAYER):
            chunks.append(w[:, c * CHUNK_N:(c + 1) * CHUNK_N])
    wstack = jnp.stack(chunks, axis=0)                           # (10, K, 512) bf16

    w5 = jnp.zeros((K, OUT_PAD), jnp.bfloat16).at[:, :2].set(
        wt("fc5").astype(jnp.bfloat16))
    b5 = jnp.zeros((1, OUT_PAD), jnp.float32).at[:, :2].set(bias("fc5"))

    packed = dict(
        wstack=wstack,
        w0=wt("fc0"),                                            # (2, K) f32
        b0=bias("fc0"),
        b1=bias("fc1"), b21=bias("fc21"), b22=bias("fc22"),
        b3=bias("fc3"), b4=bias("fc4"),
        w5=w5, b5=b5,
    )
    # Materialize once so no transpose/pad/cast/chunking runs per call.
    return jax.tree_util.tree_map(jax.device_put, packed)


@jax.jit
def vae_forward(x, eps, packed):
    """x: (N, 2) f32, eps: (N, K) f32, packed: output of prepare_params()."""
    B = x.shape[0]
    x_p = jnp.zeros((B, X_PAD), jnp.float32).at[:, :2].set(x)    # tiny per-call pad

    vmem = pl.BlockSpec(memory_space=pltpu.MemorySpace.VMEM)
    hbm = pl.BlockSpec(memory_space=pl.ANY)      # big weights stay in HBM, streamed

    args = (x_p, eps, packed["wstack"],
            packed["w0"], packed["b0"], packed["b1"], packed["b21"],
            packed["b22"], packed["b3"], packed["b4"],
            packed["w5"], packed["b5"])
    in_specs = [vmem, vmem, hbm] + [vmem] * 9

    recon_p, mu, logvar = pl.pallas_call(
        vae_kernel,
        out_shape=(
            jax.ShapeDtypeStruct((B, OUT_PAD), jnp.float32),
            jax.ShapeDtypeStruct((B, K), jnp.float32),
            jax.ShapeDtypeStruct((B, K), jnp.float32),
        ),
        in_specs=in_specs,
        out_specs=(vmem, vmem, vmem),
        scratch_shapes=[
            pltpu.VMEM((2, K, CHUNK_N), jnp.bfloat16),   # weight double-buffer (2 MiB)
            pltpu.SemaphoreType.DMA((2,)),
        ],
        compiler_params=pltpu.CompilerParams(
            vmem_limit_bytes=12 * 1024 * 1024,   # live footprint ~3 MiB; safe on v5e/v6e/v7x
        ),
    )(*args)

    return recon_p[:, :2], mu, logvar


def init_params(key):
    """Deterministic synthetic weights with the same shapes as the PyTorch module."""
    shapes = {
        "fc0": (K, 2),
        "fc1": (K, K),
        "fc21": (K, K),
        "fc22": (K, K),
        "fc3": (K, K),
        "fc4": (K, K),
        "fc5": (2, K),
    }
    params = {}
    for i, (name, (out_f, in_f)) in enumerate(sorted(shapes.items())):
        kw, kb = jax.random.split(jax.random.fold_in(key, i))
        bound = 1.0 / jnp.sqrt(in_f)
        params[name] = (
            jax.random.uniform(kw, (out_f, in_f), jnp.float32, -bound, bound),
            jax.random.uniform(kb, (out_f,), jnp.float32, -bound, bound),
        )
    return params


def reference_forward(x, eps, params):
    """Pure-JAX reference that mirrors the kernel's math exactly:
    bf16 weights AND bf16 activations into every big matmul (f32 accumulation),
    f32 VPU math for fc0, and the same selu formula."""
    f32, bf16 = jnp.float32, jnp.bfloat16

    def big(name, h):
        w, b = params[name]                         # w: (out, in)
        return jnp.dot(h.astype(bf16), w.T.astype(bf16),
                       preferred_element_type=f32) + b

    w0, b0 = params["fc0"]                          # (K, 2), (K,)
    h0 = _selu(x[:, 0:1] * w0[:, 0][None, :] + x[:, 1:2] * w0[:, 1][None, :] + b0)
    h1 = _selu(big("fc1", h0))
    mu, logvar = big("fc21", h1), big("fc22", h1)
    z = mu + eps * jnp.exp(0.5 * logvar)
    h3 = _selu(big("fc3", z))
    h4 = _selu(big("fc4", h3))
    w5, b5 = params["fc5"]                          # (2, K), (2,)
    recon = jnp.dot(h4.astype(bf16), w5.T.astype(bf16),
                    preferred_element_type=f32) + b5
    return recon, mu, logvar


if __name__ == "__main__":
    key = jax.random.PRNGKey(0)
    k_params, k_x, k_eps = jax.random.split(key, 3)

    B = 8
    x = jax.random.normal(k_x, (B, 2), jnp.float32)      # forward does x.view(-1, 2)
    # torch.randn_like(std): sampled once on the host so kernel & ref use the same eps.
    eps = jax.random.normal(k_eps, (B, K), jnp.float32)

    params = init_params(k_params)
    packed = prepare_params(params)            # one-time preprocessing (hoisted)

    recon, mu, logvar = vae_forward(x, eps, packed)
    jax.block_until_ready((recon, mu, logvar))

    # Compare against a pure-JAX reference applying exactly the same bf16
    # quantization of weights and activations, so the check verifies the kernel
    # math (streaming, slot bookkeeping, reparameterize) at tight tolerance.
    r_ref, m_ref, lv_ref = reference_forward(x, eps, params)
    assert recon.shape == (B, 2) and mu.shape == (B, K) and logvar.shape == (B, K)
    assert jnp.allclose(recon, r_ref, atol=2e-3, rtol=2e-3), \
        float(jnp.max(jnp.abs(recon - r_ref)))
    assert jnp.allclose(mu, m_ref, atol=2e-3, rtol=2e-3), \
        float(jnp.max(jnp.abs(mu - m_ref)))
    assert jnp.allclose(logvar, lv_ref, atol=2e-3, rtol=2e-3), \
        float(jnp.max(jnp.abs(logvar - lv_ref)))

    print("KERNEL_OK")
</pallas_src>

<mosaic_0001>
module attributes {stable_mosaic.version = 11 : i64} {
  func.func @vae_kernel(%arg0: memref<8x8xf32, #tpu.memory_space<vmem>>, %arg1: memref<8x1024xf32, #tpu.memory_space<vmem>>, %arg2: memref<10x1024x512xbf16, #tpu.memory_space<any>>, %arg3: memref<2x1024xf32, #tpu.memory_space<vmem>>, %arg4: memref<1x1024xf32, #tpu.memory_space<vmem>>, %arg5: memref<1x1024xf32, #tpu.memory_space<vmem>>, %arg6: memref<1x1024xf32, #tpu.memory_space<vmem>>, %arg7: memref<1x1024xf32, #tpu.memory_space<vmem>>, %arg8: memref<1x1024xf32, #tpu.memory_space<vmem>>, %arg9: memref<1x1024xf32, #tpu.memory_space<vmem>>, %arg10: memref<1024x8xbf16, #tpu.memory_space<vmem>>, %arg11: memref<1x8xf32, #tpu.memory_space<vmem>>, %arg12: memref<8x8xf32, #tpu.memory_space<vmem>>, %arg13: memref<8x1024xf32, #tpu.memory_space<vmem>>, %arg14: memref<8x1024xf32, #tpu.memory_space<vmem>>, %arg15: memref<2x1024x512xbf16, #tpu.memory_space<vmem>>, %arg16: memref<2x!tpu.dma_semaphore, #tpu.memory_space<semaphore_mem>>) attributes {dimension_semantics = [], scalar_prefetch = 0 : i64, scratch_operands = 2 : i64, tpu.core_type = #tpu.core_type<tc>} {
    %c0_i32 = arith.constant 0 : i32
    %c0_i32_0 = arith.constant 0 : i32
    %c0_i32_1 = arith.constant 0 : i32
    %c0_i32_2 = arith.constant 0 : i32
    %c0_i32_3 = arith.constant 0 : i32
    %0 = tpu.memref_slice %arg2[%c0_i32, %c0_i32_2, %c0_i32_3] : memref<10x1024x512xbf16, #tpu.memory_space<any>> -> memref<1x1024x512xbf16, #tpu.memory_space<any>>
    %1 = tpu.memref_squeeze %0 : memref<1x1024x512xbf16, #tpu.memory_space<any>> -> memref<1024x512xbf16, #tpu.memory_space<any>>
    %c0_i32_4 = arith.constant 0 : i32
    %c0_i32_5 = arith.constant 0 : i32
    %2 = tpu.memref_slice %arg15[%c0_i32_0, %c0_i32_4, %c0_i32_5] : memref<2x1024x512xbf16, #tpu.memory_space<vmem>> -> memref<1x1024x512xbf16, #tpu.memory_space<vmem>>
    %3 = tpu.memref_squeeze %2 : memref<1x1024x512xbf16, #tpu.memory_space<vmem>> -> memref<1024x512xbf16, #tpu.memory_space<vmem>>
    %4 = tpu.memref_slice %arg16[%c0_i32_1] : memref<2x!tpu.dma_semaphore, #tpu.memory_space<semaphore_mem>> -> memref<1x!tpu.dma_semaphore, #tpu.memory_space<semaphore_mem>>
    %5 = tpu.memref_squeeze %4 : memref<1x!tpu.dma_semaphore, #tpu.memory_space<semaphore_mem>> -> memref<!tpu.dma_semaphore, #tpu.memory_space<semaphore_mem>>
    tpu.enqueue_dma source(%1 : memref<1024x512xbf16, #tpu.memory_space<any>>) target(%3 : memref<1024x512xbf16, #tpu.memory_space<vmem>>) target_semaphore(%5 : memref<!tpu.dma_semaphore, #tpu.memory_space<semaphore_mem>>)
    %c0 = arith.constant 0 : index
    %c0_6 = arith.constant 0 : index
    %6 = vector.load %arg0[%c0, %c0_6] : memref<8x8xf32, #tpu.memory_space<vmem>>, vector<8x1xf32>
    %c0_7 = arith.constant 0 : index
    %c0_8 = arith.constant 0 : index
    %7 = vector.load %arg3[%c0_7, %c0_8] : memref<2x1024xf32, #tpu.memory_space<vmem>>, vector<1x1024xf32>
    %8 = vector.broadcast %6 : vector<8x1xf32> to vector<8x1024xf32>
    %9 = vector.broadcast %7 : vector<1x1024xf32> to vector<8x1024xf32>
    %10 = arith.mulf %8, %9 : vector<8x1024xf32>
    %c0_9 = arith.constant 0 : index
    %c1 = arith.constant 1 : index
    %11 = vector.load %arg0[%c0_9, %c1] : memref<8x8xf32, #tpu.memory_space<vmem>>, vector<8x1xf32>
    %c1_10 = arith.constant 1 : index
    %c0_11 = arith.constant 0 : index
    %12 = vector.load %arg3[%c1_10, %c0_11] : memref<2x1024xf32, #tpu.memory_space<vmem>>, vector<1x1024xf32>
    %13 = vector.broadcast %11 : vector<8x1xf32> to vector<8x1024xf32>
    %14 = vector.broadcast %12 : vector<1x1024xf32> to vector<8x1024xf32>
    %15 = arith.mulf %13, %14 : vector<8x1024xf32>
    %16 = arith.addf %10, %15 : vector<8x1024xf32>
    %c0_12 = arith.constant 0 : index
    %c0_13 = arith.constant 0 : index
    %17 = vector.load %arg4[%c0_12, %c0_13] : memref<1x1024xf32, #tpu.memory_space<vmem>>, vector<1x1024xf32>
    %18 = vector.broadcast %17 : vector<1x1024xf32> to vector<8x1024xf32>
    %19 = arith.addf %16, %18 : vector<8x1024xf32>
    %cst = arith.constant 0.000000e+00 : f32
    %20 = vector.broadcast %cst : f32 to vector<8x1024xf32>
    %21 = arith.cmpf ogt, %19, %20 : vector<8x1024xf32>
    %22 = math.exp %19 : vector<8x1024xf32>
    %cst_14 = arith.constant 1.000000e+00 : f32
    %23 = vector.broadcast %cst_14 : f32 to vector<8x1024xf32>
    %24 = arith.subf %22, %23 : vector<8x1024xf32>
    %cst_15 = arith.constant 1.67326319 : f32
    %25 = vector.broadcast %cst_15 : f32 to vector<8x1024xf32>
    %26 = arith.mulf %25, %24 : vector<8x1024xf32>
    %27 = arith.select %21, %19, %26 : vector<8x1024xi1>, vector<8x1024xf32>
    %cst_16 = arith.constant 1.05070102 : f32
    %28 = vector.broadcast %cst_16 : f32 to vector<8x1024xf32>
    %29 = arith.mulf %28, %27 : vector<8x1024xf32>
    %30 = arith.truncf %29 : vector<8x1024xf32> to vector<8x1024xbf16>
    %c0_i32_17 = arith.constant 0 : i32
    %c0_i32_18 = arith.constant 0 : i32
    %c0_i32_19 = arith.constant 0 : i32
    %c0_i32_20 = arith.constant 0 : i32
    %c0_i32_21 = arith.constant 0 : i32
    %31 = tpu.memref_slice %arg2[%c0_i32_17, %c0_i32_20, %c0_i32_21] : memref<10x1024x512xbf16, #tpu.memory_space<any>> -> memref<1x1024x512xbf16, #tpu.memory_space<any>>
    %32 = tpu.memref_squeeze %31 : memref<1x1024x512xbf16, #tpu.memory_space<any>> -> memref<1024x512xbf16, #tpu.memory_space<any>>
    %c0_i32_22 = arith.constant 0 : i32
    %c0_i32_23 = arith.constant 0 : i32
    %33 = tpu.memref_slice %arg15[%c0_i32_18, %c0_i32_22, %c0_i32_23] : memref<2x1024x512xbf16, #tpu.memory_space<vmem>> -> memref<1x1024x512xbf16, #tpu.memory_space<vmem>>
    %34 = tpu.memref_squeeze %33 : memref<1x1024x512xbf16, #tpu.memory_space<vmem>> -> memref<1024x512xbf16, #tpu.memory_space<vmem>>
    %35 = tpu.memref_slice %arg16[%c0_i32_19] : memref<2x!tpu.dma_semaphore, #tpu.memory_space<semaphore_mem>> -> memref<1x!tpu.dma_semaphore, #tpu.memory_space<semaphore_mem>>
    %36 = tpu.memref_squeeze %35 : memref<1x!tpu.dma_semaphore, #tpu.memory_space<semaphore_mem>> -> memref<!tpu.dma_semaphore, #tpu.memory_space<semaphore_mem>>
    tpu.wait_dma2 semaphore(%36 : memref<!tpu.dma_semaphore, #tpu.memory_space<semaphore_mem>>) src(%32 : memref<1024x512xbf16, #tpu.memory_space<any>>) dst(%34 : memref<1024x512xbf16, #tpu.memory_space<vmem>>)
    %c1_i32 = arith.constant 1 : i32
    %c1_i32_24 = arith.constant 1 : i32
    %c1_i32_25 = arith.constant 1 : i32
    %c0_i32_26 = arith.constant 0 : i32
    %c0_i32_27 = arith.constant 0 : i32
    %37 = tpu.memref_slice %arg2[%c1_i32, %c0_i32_26, %c0_i32_27] : memref<10x1024x512xbf16, #tpu.memory_space<any>> -> memref<1x1024x512xbf16, #tpu.memory_space<any>>
    %38 = tpu.memref_squeeze %37 : memref<1x1024x512xbf16, #tpu.memory_space<any>> -> memref<1024x512xbf16, #tpu.memory_space<any>>
    %c0_i32_28 = arith.constant 0 : i32
    %c0_i32_29 = arith.constant 0 : i32
    %39 = tpu.memref_slice %arg15[%c1_i32_24, %c0_i32_28, %c0_i32_29] : memref<2x1024x512xbf16, #tpu.memory_space<vmem>> -> memref<1x1024x512xbf16, #tpu.memory_space<vmem>>
    %40 = tpu.memref_squeeze %39 : memref<1x1024x512xbf16, #tpu.memory_space<vmem>> -> memref<1024x512xbf16, #tpu.memory_space<vmem>>
    %41 = tpu.memref_slice %arg16[%c1_i32_25] : memref<2x!tpu.dma_semaphore, #tpu.memory_space<semaphore_mem>> -> memref<1x!tpu.dma_semaphore, #tpu.memory_space<semaphore_mem>>
    %42 = tpu.memref_squeeze %41 : memref<1x!tpu.dma_semaphore, #tpu.memory_space<semaphore_mem>> -> memref<!tpu.dma_semaphore, #tpu.memory_space<semaphore_mem>>
    tpu.enqueue_dma source(%38 : memref<1024x512xbf16, #tpu.memory_space<any>>) target(%40 : memref<1024x512xbf16, #tpu.memory_space<vmem>>) target_semaphore(%42 : memref<!tpu.dma_semaphore, #tpu.memory_space<semaphore_mem>>)
    %c0_30 = arith.constant 0 : index
    %c0_31 = arith.constant 0 : index
    %c0_32 = arith.constant 0 : index
    %43 = vector.load %arg15[%c0_30, %c0_31, %c0_32] : memref<2x1024x512xbf16, #tpu.memory_space<vmem>>, vector<1x1024x512xbf16>
    %44 = vector.shape_cast %43 : vector<1x1024x512xbf16> to vector<1024x512xbf16>
    %cst_33 = arith.constant dense<0.000000e+00> : vector<8x512xf32>
    %45 = tpu.matmul %30, %44, %cst_33 {dimension_numbers = #tpu.dot_dimension_numbers<[1], [0], [0], [1], [0, 0, 1, 1], [], []>} : vector<8x1024xbf16>, vector<1024x512xbf16>, vector<8x512xf32> -> vector<8x512xf32>
    %c0_i32_34 = arith.constant 0 : i32
    %c1_i32_35 = arith.constant 1 : i32
    %c1_i32_36 = arith.constant 1 : i32
    %c0_i32_37 = arith.constant 0 : i32
    %c0_i32_38 = arith.constant 0 : i32
    %46 = tpu.memref_slice %arg2[%c0_i32_34, %c0_i32_37, %c0_i32_38] : memref<10x1024x512xbf16, #tpu.memory_space<any>> -> memref<1x1024x512xbf16, #tpu.memory_space<any>>
    %47 = tpu.memref_squeeze %46 : memref<1x1024x512xbf16, #tpu.memory_space<any>> -> memref<1024x512xbf16, #tpu.memory_space<any>>
    %c0_i32_39 = arith.constant 0 : i32
    %c0_i32_40 = arith.constant 0 : i32
    %48 = tpu.memref_slice %arg15[%c1_i32_35, %c0_i32_39, %c0_i32_40] : memref<2x1024x512xbf16, #tpu.memory_space<vmem>> -> memref<1x1024x512xbf16, #tpu.memory_space<vmem>>
    %49 = tpu.memref_squeeze %48 : memref<1x1024x512xbf16, #tpu.memory_space<vmem>> -> memref<1024x512xbf16, #tpu.memory_space<vmem>>
    %50 = tpu.memref_slice %arg16[%c1_i32_36] : memref<2x!tpu.dma_semaphore, #tpu.memory_space<semaphore_mem>> -> memref<1x!tpu.dma_semaphore, #tpu.memory_space<semaphore_mem>>
    %51 = tpu.memref_squeeze %50 : memref<1x!tpu.dma_semaphore, #tpu.memory_space<semaphore_mem>> -> memref<!tpu.dma_semaphore, #tpu.memory_space<semaphore_mem>>
    tpu.wait_dma2 semaphore(%51 : memref<!tpu.dma_semaphore, #tpu.memory_space<semaphore_mem>>) src(%47 : memref<1024x512xbf16, #tpu.memory_space<any>>) dst(%49 : memref<1024x512xbf16, #tpu.memory_space<vmem>>)
    %c2_i32 = arith.constant 2 : i32
    %c0_i32_41 = arith.constant 0 : i32
    %c0_i32_42 = arith.constant 0 : i32
    %c0_i32_43 = arith.constant 0 : i32
    %c0_i32_44 = arith.constant 0 : i32
    %52 = tpu.memref_slice %arg2[%c2_i32, %c0_i32_43, %c0_i32_44] : memref<10x1024x512xbf16, #tpu.memory_space<any>> -> memref<1x1024x512xbf16, #tpu.memory_space<any>>
    %53 = tpu.memref_squeeze %52 : memref<1x1024x512xbf16, #tpu.memory_space<any>> -> memref<1024x512xbf16, #tpu.memory_space<any>>
    %c0_i32_45 = arith.constant 0 : i32
    %c0_i32_46 = arith.constant 0 : i32
    %54 = tpu.memref_slice %arg15[%c0_i32_41, %c0_i32_45, %c0_i32_46] : memref<2x1024x512xbf16, #tpu.memory_space<vmem>> -> memref<1x1024x512xbf16, #tpu.memory_space<vmem>>
    %55 = tpu.memref_squeeze %54 : memref<1x1024x512xbf16, #tpu.memory_space<vmem>> -> memref<1024x512xbf16, #tpu.memory_space<vmem>>
    %56 = tpu.memref_slice %arg16[%c0_i32_42] : memref<2x!tpu.dma_semaphore, #tpu.memory_space<semaphore_mem>> -> memref<1x!tpu.dma_semaphore, #tpu.memory_space<semaphore_mem>>
    %57 = tpu.memref_squeeze %56 : memref<1x!tpu.dma_semaphore, #tpu.memory_space<semaphore_mem>> -> memref<!tpu.dma_semaphore, #tpu.memory_space<semaphore_mem>>
    tpu.enqueue_dma source(%53 : memref<1024x512xbf16, #tpu.memory_space<any>>) target(%55 : memref<1024x512xbf16, #tpu.memory_space<vmem>>) target_semaphore(%57 : memref<!tpu.dma_semaphore, #tpu.memory_space<semaphore_mem>>)
    %c1_47 = arith.constant 1 : index
    %c0_48 = arith.constant 0 : index
    %c0_49 = arith.constant 0 : index
    %58 = vector.load %arg15[%c1_47, %c0_48, %c0_49] : memref<2x1024x512xbf16, #tpu.memory_space<vmem>>, vector<1x1024x512xbf16>
    %59 = vector.shape_cast %58 : vector<1x1024x512xbf16> to vector<1024x512xbf16>
    %cst_50 = arith.constant dense<0.000000e+00> : vector<8x512xf32>
    %60 = tpu.matmul %30, %59, %cst_50 {dimension_numbers = #tpu.dot_dimension_numbers<[1], [0], [0], [1], [0, 0, 1, 1], [], []>} : vector<8x1024xbf16>, vector<1024x512xbf16>, vector<8x512xf32> -> vector<8x512xf32>
    %61 = tpu.concatenate %45, %60 in 1 : vector<8x512xf32>, vector<8x512xf32> -> vector<8x1024xf32>
    %c0_51 = arith.constant 0 : index
    %c0_52 = arith.constant 0 : index
    %62 = vector.load %arg5[%c0_51, %c0_52] : memref<1x1024xf32, #tpu.memory_space<vmem>>, vector<1x1024xf32>
    %63 = vector.broadcast %62 : vector<1x1024xf32> to vector<8x1024xf32>
    %64 = arith.addf %61, %63 : vector<8x1024xf32>
    %cst_53 = arith.constant 0.000000e+00 : f32
    %65 = vector.broadcast %cst_53 : f32 to vector<8x1024xf32>
    %66 = arith.cmpf ogt, %64, %65 : vector<8x1024xf32>
    %67 = math.exp %64 : vector<8x1024xf32>
    %cst_54 = arith.constant 1.000000e+00 : f32
    %68 = vector.broadcast %cst_54 : f32 to vector<8x1024xf32>
    %69 = arith.subf %67, %68 : vector<8x1024xf32>
    %cst_55 = arith.constant 1.67326319 : f32
    %70 = vector.broadcast %cst_55 : f32 to vector<8x1024xf32>
    %71 = arith.mulf %70, %69 : vector<8x1024xf32>
    %72 = arith.select %66, %64, %71 : vector<8x1024xi1>, vector<8x1024xf32>
    %cst_56 = arith.constant 1.05070102 : f32
    %73 = vector.broadcast %cst_56 : f32 to vector<8x1024xf32>
    %74 = arith.mulf %73, %72 : vector<8x1024xf32>
    %75 = arith.truncf %74 : vector<8x1024xf32> to vector<8x1024xbf16>
    %c0_i32_57 = arith.constant 0 : i32
    %c0_i32_58 = arith.constant 0 : i32
    %c0_i32_59 = arith.constant 0 : i32
    %c0_i32_60 = arith.constant 0 : i32
    %c0_i32_61 = arith.constant 0 : i32
    %76 = tpu.memref_slice %arg2[%c0_i32_57, %c0_i32_60, %c0_i32_61] : memref<10x1024x512xbf16, #tpu.memory_space<any>> -> memref<1x1024x512xbf16, #tpu.memory_space<any>>
    %77 = tpu.memref_squeeze %76 : memref<1x1024x512xbf16, #tpu.memory_space<any>> -> memref<1024x512xbf16, #tpu.memory_space<any>>
    %c0_i32_62 = arith.constant 0 : i32
    %c0_i32_63 = arith.constant 0 : i32
    %78 = tpu.memref_slice %arg15[%c0_i32_58, %c0_i32_62, %c0_i32_63] : memref<2x1024x512xbf16, #tpu.memory_space<vmem>> -> memref<1x1024x512xbf16, #tpu.memory_space<vmem>>
    %79 = tpu.memref_squeeze %78 : memref<1x1024x512xbf16, #tpu.memory_space<vmem>> -> memref<1024x512xbf16, #tpu.memory_space<vmem>>
    %80 = tpu.memref_slice %arg16[%c0_i32_59] : memref<2x!tpu.dma_semaphore, #tpu.memory_space<semaphore_mem>> -> memref<1x!tpu.dma_semaphore, #tpu.memory_space<semaphore_mem>>
    %81 = tpu.memref_squeeze %80 : memref<1x!tpu.dma_semaphore, #tpu.memory_space<semaphore_mem>> -> memref<!tpu.dma_semaphore, #tpu.memory_space<semaphore_mem>>
    tpu.wait_dma2 semaphore(%81 : memref<!tpu.dma_semaphore, #tpu.memory_space<semaphore_mem>>) src(%77 : memref<1024x512xbf16, #tpu.memory_space<any>>) dst(%79 : memref<1024x512xbf16, #tpu.memory_space<vmem>>)
    %c3_i32 = arith.constant 3 : i32
    %c1_i32_64 = arith.constant 1 : i32
    %c1_i32_65 = arith.constant 1 : i32
    %c0_i32_66 = arith.constant 0 : i32
    %c0_i32_67 = arith.constant 0 : i32
    %82 = tpu.memref_slice %arg2[%c3_i32, %c0_i32_66, %c0_i32_67] : memref<10x1024x512xbf16, #tpu.memory_space<any>> -> memref<1x1024x512xbf16, #tpu.memory_space<any>>
    %83 = tpu.memref_squeeze %82 : memref<1x1024x512xbf16, #tpu.memory_space<any>> -> memref<1024x512xbf16, #tpu.memory_space<any>>
    %c0_i32_68 = arith.constant 0 : i32
    %c0_i32_69 = arith.constant 0 : i32
    %84 = tpu.memref_slice %arg15[%c1_i32_64, %c0_i32_68, %c0_i32_69] : memref<2x1024x512xbf16, #tpu.memory_space<vmem>> -> memref<1x1024x512xbf16, #tpu.memory_space<vmem>>
    %85 = tpu.memref_squeeze %84 : memref<1x1024x512xbf16, #tpu.memory_space<vmem>> -> memref<1024x512xbf16, #tpu.memory_space<vmem>>
    %86 = tpu.memref_slice %arg16[%c1_i32_65] : memref<2x!tpu.dma_semaphore, #tpu.memory_space<semaphore_mem>> -> memref<1x!tpu.dma_semaphore, #tpu.memory_space<semaphore_mem>>
    %87 = tpu.memref_squeeze %86 : memref<1x!tpu.dma_semaphore, #tpu.memory_space<semaphore_mem>> -> memref<!tpu.dma_semaphore, #tpu.memory_space<semaphore_mem>>
    tpu.enqueue_dma source(%83 : memref<1024x512xbf16, #tpu.memory_space<any>>) target(%85 : memref<1024x512xbf16, #tpu.memory_space<vmem>>) target_semaphore(%87 : memref<!tpu.dma_semaphore, #tpu.memory_space<semaphore_mem>>)
    %c0_70 = arith.constant 0 : index
    %c0_71 = arith.constant 0 : index
    %c0_72 = arith.constant 0 : index
    %88 = vector.load %arg15[%c0_70, %c0_71, %c0_72] : memref<2x1024x512xbf16, #tpu.memory_space<vmem>>, vector<1x1024x512xbf16>
    %89 = vector.shape_cast %88 : vector<1x1024x512xbf16> to vector<1024x512xbf16>
    %cst_73 = arith.constant dense<0.000000e+00> : vector<8x512xf32>
    %90 = tpu.matmul %75, %89, %cst_73 {dimension_numbers = #tpu.dot_dimension_numbers<[1], [0], [0], [1], [0, 0, 1, 1], [], []>} : vector<8x1024xbf16>, vector<1024x512xbf16>, vector<8x512xf32> -> vector<8x512xf32>
    %c0_i32_74 = arith.constant 0 : i32
    %c1_i32_75 = arith.constant 1 : i32
    %c1_i32_76 = arith.constant 1 : i32
    %c0_i32_77 = arith.constant 0 : i32
    %c0_i32_78 = arith.constant 0 : i32
    %91 = tpu.memref_slice %arg2[%c0_i32_74, %c0_i32_77, %c0_i32_78] : memref<10x1024x512xbf16, #tpu.memory_space<any>> -> memref<1x1024x512xbf16, #tpu.memory_space<any>>
    %92 = tpu.memref_squeeze %91 : memref<1x1024x512xbf16, #tpu.memory_space<any>> -> memref<1024x512xbf16, #tpu.memory_space<any>>
    %c0_i32_79 = arith.constant 0 : i32
    %c0_i32_80 = arith.constant 0 : i32
    %93 = tpu.memref_slice %arg15[%c1_i32_75, %c0_i32_79, %c0_i32_80] : memref<2x1024x512xbf16, #tpu.memory_space<vmem>> -> memref<1x1024x512xbf16, #tpu.memory_space<vmem>>
    %94 = tpu.memref_squeeze %93 : memref<1x1024x512xbf16, #tpu.memory_space<vmem>> -> memref<1024x512xbf16, #tpu.memory_space<vmem>>
    %95 = tpu.memref_slice %arg16[%c1_i32_76] : memref<2x!tpu.dma_semaphore, #tpu.memory_space<semaphore_mem>> -> memref<1x!tpu.dma_semaphore, #tpu.memory_space<semaphore_mem>>
    %96 = tpu.memref_squeeze %95 : memref<1x!tpu.dma_semaphore, #tpu.memory_space<semaphore_mem>> -> memref<!tpu.dma_semaphore, #tpu.memory_space<semaphore_mem>>
    tpu.wait_dma2 semaphore(%96 : memref<!tpu.dma_semaphore, #tpu.memory_space<semaphore_mem>>) src(%92 : memref<1024x512xbf16, #tpu.memory_space<any>>) dst(%94 : memref<1024x512xbf16, #tpu.memory_space<vmem>>)
    %c4_i32 = arith.constant 4 : i32
    %c0_i32_81 = arith.constant 0 : i32
    %c0_i32_82 = arith.constant 0 : i32
    %c0_i32_83 = arith.constant 0 : i32
    %c0_i32_84 = arith.constant 0 : i32
    %97 = tpu.memref_slice %arg2[%c4_i32, %c0_i32_83, %c0_i32_84] : memref<10x1024x512xbf16, #tpu.memory_space<any>> -> memref<1x1024x512xbf16, #tpu.memory_space<any>>
    %98 = tpu.memref_squeeze %97 : memref<1x1024x512xbf16, #tpu.memory_space<any>> -> memref<1024x512xbf16, #tpu.memory_space<any>>
    %c0_i32_85 = arith.constant 0 : i32
    %c0_i32_86 = arith.constant 0 : i32
    %99 = tpu.memref_slice %arg15[%c0_i32_81, %c0_i32_85, %c0_i32_86] : memref<2x1024x512xbf16, #tpu.memory_space<vmem>> -> memref<1x1024x512xbf16, #tpu.memory_space<vmem>>
    %100 = tpu.memref_squeeze %99 : memref<1x1024x512xbf16, #tpu.memory_space<vmem>> -> memref<1024x512xbf16, #tpu.memory_space<vmem>>
    %101 = tpu.memref_slice %arg16[%c0_i32_82] : memref<2x!tpu.dma_semaphore, #tpu.memory_space<semaphore_mem>> -> memref<1x!tpu.dma_semaphore, #tpu.memory_space<semaphore_mem>>
    %102 = tpu.memref_squeeze %101 : memref<1x!tpu.dma_semaphore, #tpu.memory_space<semaphore_mem>> -> memref<!tpu.dma_semaphore, #tpu.memory_space<semaphore_mem>>
    tpu.enqueue_dma source(%98 : memref<1024x512xbf16, #tpu.memory_space<any>>) target(%100 : memref<1024x512xbf16, #tpu.memory_space<vmem>>) target_semaphore(%102 : memref<!tpu.dma_semaphore, #tpu.memory_space<semaphore_mem>>)
    %c1_87 = arith.constant 1 : index
    %c0_88 = arith.constant 0 : index
    %c0_89 = arith.constant 0 : index
    %103 = vector.load %arg15[%c1_87, %c0_88, %c0_89] : memref<2x1024x512xbf16, #tpu.memory_space<vmem>>, vector<1x1024x512xbf16>
    %104 = vector.shape_cast %103 : vector<1x1024x512xbf16> to vector<1024x512xbf16>
    %cst_90 = arith.constant dense<0.000000e+00> : vector<8x512xf32>
    %105 = tpu.matmul %75, %104, %cst_90 {dimension_numbers = #tpu.dot_dimension_numbers<[1], [0], [0], [1], [0, 0, 1, 1], [], []>} : vector<8x1024xbf16>, vector<1024x512xbf16>, vector<8x512xf32> -> vector<8x512xf32>
    %106 = tpu.concatenate %90, %105 in 1 : vector<8x512xf32>, vector<8x512xf32> -> vector<8x1024xf32>
    %c0_91 = arith.constant 0 : index
    %c0_92 = arith.constant 0 : index
    %107 = vector.load %arg6[%c0_91, %c0_92] : memref<1x1024xf32, #tpu.memory_space<vmem>>, vector<1x1024xf32>
    %108 = vector.broadcast %107 : vector<1x1024xf32> to vector<8x1024xf32>
    %109 = arith.addf %106, %108 : vector<8x1024xf32>
    %110 = arith.truncf %74 : vector<8x1024xf32> to vector<8x1024xbf16>
    %c0_i32_93 = arith.constant 0 : i32
    %c0_i32_94 = arith.constant 0 : i32
    %c0_i32_95 = arith.constant 0 : i32
    %c0_i32_96 = arith.constant 0 : i32
    %c0_i32_97 = arith.constant 0 : i32
    %111 = tpu.memref_slice %arg2[%c0_i32_93, %c0_i32_96, %c0_i32_97] : memref<10x1024x512xbf16, #tpu.memory_space<any>> -> memref<1x1024x512xbf16, #tpu.memory_space<any>>
    %112 = tpu.memref_squeeze %111 : memref<1x1024x512xbf16, #tpu.memory_space<any>> -> memref<1024x512xbf16, #tpu.memory_space<any>>
    %c0_i32_98 = arith.constant 0 : i32
    %c0_i32_99 = arith.constant 0 : i32
    %113 = tpu.memref_slice %arg15[%c0_i32_94, %c0_i32_98, %c0_i32_99] : memref<2x1024x512xbf16, #tpu.memory_space<vmem>> -> memref<1x1024x512xbf16, #tpu.memory_space<vmem>>
    %114 = tpu.memref_squeeze %113 : memref<1x1024x512xbf16, #tpu.memory_space<vmem>> -> memref<1024x512xbf16, #tpu.memory_space<vmem>>
    %115 = tpu.memref_slice %arg16[%c0_i32_95] : memref<2x!tpu.dma_semaphore, #tpu.memory_space<semaphore_mem>> -> memref<1x!tpu.dma_semaphore, #tpu.memory_space<semaphore_mem>>
    %116 = tpu.memref_squeeze %115 : memref<1x!tpu.dma_semaphore, #tpu.memory_space<semaphore_mem>> -> memref<!tpu.dma_semaphore, #tpu.memory_space<semaphore_mem>>
    tpu.wait_dma2 semaphore(%116 : memref<!tpu.dma_semaphore, #tpu.memory_space<semaphore_mem>>) src(%112 : memref<1024x512xbf16, #tpu.memory_space<any>>) dst(%114 : memref<1024x512xbf16, #tpu.memory_space<vmem>>)
    %c5_i32 = arith.constant 5 : i32
    %c1_i32_100 = arith.constant 1 : i32
    %c1_i32_101 = arith.constant 1 : i32
    %c0_i32_102 = arith.constant 0 : i32
    %c0_i32_103 = arith.constant 0 : i32
    %117 = tpu.memref_slice %arg2[%c5_i32, %c0_i32_102, %c0_i32_103] : memref<10x1024x512xbf16, #tpu.memory_space<any>> -> memref<1x1024x512xbf16, #tpu.memory_space<any>>
    %118 = tpu.memref_squeeze %117 : memref<1x1024x512xbf16, #tpu.memory_space<any>> -> memref<1024x512xbf16, #tpu.memory_space<any>>
    %c0_i32_104 = arith.constant 0 : i32
    %c0_i32_105 = arith.constant 0 : i32
    %119 = tpu.memref_slice %arg15[%c1_i32_100, %c0_i32_104, %c0_i32_105] : memref<2x1024x512xbf16, #tpu.memory_space<vmem>> -> memref<1x1024x512xbf16, #tpu.memory_space<vmem>>
    %120 = tpu.memref_squeeze %119 : memref<1x1024x512xbf16, #tpu.memory_space<vmem>> -> memref<1024x512xbf16, #tpu.memory_space<vmem>>
    %121 = tpu.memref_slice %arg16[%c1_i32_101] : memref<2x!tpu.dma_semaphore, #tpu.memory_space<semaphore_mem>> -> memref<1x!tpu.dma_semaphore, #tpu.memory_space<semaphore_mem>>
    %122 = tpu.memref_squeeze %121 : memref<1x!tpu.dma_semaphore, #tpu.memory_space<semaphore_mem>> -> memref<!tpu.dma_semaphore, #tpu.memory_space<semaphore_mem>>
    tpu.enqueue_dma source(%118 : memref<1024x512xbf16, #tpu.memory_space<any>>) target(%120 : memref<1024x512xbf16, #tpu.memory_space<vmem>>) target_semaphore(%122 : memref<!tpu.dma_semaphore, #tpu.memory_space<semaphore_mem>>)
    %c0_106 = arith.constant 0 : index
    %c0_107 = arith.constant 0 : index
    %c0_108 = arith.constant 0 : index
    %123 = vector.load %arg15[%c0_106, %c0_107, %c0_108] : memref<2x1024x512xbf16, #tpu.memory_space<vmem>>, vector<1x1024x512xbf16>
    %124 = vector.shape_cast %123 : vector<1x1024x512xbf16> to vector<1024x512xbf16>
    %cst_109 = arith.constant dense<0.000000e+00> : vector<8x512xf32>
    %125 = tpu.matmul %110, %124, %cst_109 {dimension_numbers = #tpu.dot_dimension_numbers<[1], [0], [0], [1], [0, 0, 1, 1], [], []>} : vector<8x1024xbf16>, vector<1024x512xbf16>, vector<8x512xf32> -> vector<8x512xf32>
    %c0_i32_110 = arith.constant 0 : i32
    %c1_i32_111 = arith.constant 1 : i32
    %c1_i32_112 = arith.constant 1 : i32
    %c0_i32_113 = arith.constant 0 : i32
    %c0_i32_114 = arith.constant 0 : i32
    %126 = tpu.memref_slice %arg2[%c0_i32_110, %c0_i32_113, %c0_i32_114] : memref<10x1024x512xbf16, #tpu.memory_space<any>> -> memref<1x1024x512xbf16, #tpu.memory_space<any>>
    %127 = tpu.memref_squeeze %126 : memref<1x1024x512xbf16, #tpu.memory_space<any>> -> memref<1024x512xbf16, #tpu.memory_space<any>>
    %c0_i32_115 = arith.constant 0 : i32
    %c0_i32_116 = arith.constant 0 : i32
    %128 = tpu.memref_slice %arg15[%c1_i32_111, %c0_i32_115, %c0_i32_116] : memref<2x1024x512xbf16, #tpu.memory_space<vmem>> -> memref<1x1024x512xbf16, #tpu.memory_space<vmem>>
    %129 = tpu.memref_squeeze %128 : memref<1x1024x512xbf16, #tpu.memory_space<vmem>> -> memref<1024x512xbf16, #tpu.memory_space<vmem>>
    %130 = tpu.memref_slice %arg16[%c1_i32_112] : memref<2x!tpu.dma_semaphore, #tpu.memory_space<semaphore_mem>> -> memref<1x!tpu.dma_semaphore, #tpu.memory_space<semaphore_mem>>
    %131 = tpu.memref_squeeze %130 : memref<1x!tpu.dma_semaphore, #tpu.memory_space<semaphore_mem>> -> memref<!tpu.dma_semaphore, #tpu.memory_space<semaphore_mem>>
    tpu.wait_dma2 semaphore(%131 : memref<!tpu.dma_semaphore, #tpu.memory_space<semaphore_mem>>) src(%127 : memref<1024x512xbf16, #tpu.memory_space<any>>) dst(%129 : memref<1024x512xbf16, #tpu.memory_space<vmem>>)
    %c6_i32 = arith.constant 6 : i32
    %c0_i32_117 = arith.constant 0 : i32
    %c0_i32_118 = arith.constant 0 : i32
    %c0_i32_119 = arith.constant 0 : i32
    %c0_i32_120 = arith.constant 0 : i32
    %132 = tpu.memref_slice %arg2[%c6_i32, %c0_i32_119, %c0_i32_120] : memref<10x1024x512xbf16, #tpu.memory_space<any>> -> memref<1x1024x512xbf16, #tpu.memory_space<any>>
    %133 = tpu.memref_squeeze %132 : memref<1x1024x512xbf16, #tpu.memory_space<any>> -> memref<1024x512xbf16, #tpu.memory_space<any>>
    %c0_i32_121 = arith.constant 0 : i32
    %c0_i32_122 = arith.constant 0 : i32
    %134 = tpu.memref_slice %arg15[%c0_i32_117, %c0_i32_121, %c0_i32_122] : memref<2x1024x512xbf16, #tpu.memory_space<vmem>> -> memref<1x1024x512xbf16, #tpu.memory_space<vmem>>
    %135 = tpu.memref_squeeze %134 : memref<1x1024x512xbf16, #tpu.memory_space<vmem>> -> memref<1024x512xbf16, #tpu.memory_space<vmem>>
    %136 = tpu.memref_slice %arg16[%c0_i32_118] : memref<2x!tpu.dma_semaphore, #tpu.memory_space<semaphore_mem>> -> memref<1x!tpu.dma_semaphore, #tpu.memory_space<semaphore_mem>>
    %137 = tpu.memref_squeeze %136 : memref<1x!tpu.dma_semaphore, #tpu.memory_space<semaphore_mem>> -> memref<!tpu.dma_semaphore, #tpu.memory_space<semaphore_mem>>
    tpu.enqueue_dma source(%133 : memref<1024x512xbf16, #tpu.memory_space<any>>) target(%135 : memref<1024x512xbf16, #tpu.memory_space<vmem>>) target_semaphore(%137 : memref<!tpu.dma_semaphore, #tpu.memory_space<semaphore_mem>>)
    %c1_123 = arith.constant 1 : index
    %c0_124 = arith.constant 0 : index
    %c0_125 = arith.constant 0 : index
    %138 = vector.load %arg15[%c1_123, %c0_124, %c0_125] : memref<2x1024x512xbf16, #tpu.memory_space<vmem>>, vector<1x1024x512xbf16>
    %139 = vector.shape_cast %138 : vector<1x1024x512xbf16> to vector<1024x512xbf16>
    %cst_126 = arith.constant dense<0.000000e+00> : vector<8x512xf32>
    %140 = tpu.matmul %110, %139, %cst_126 {dimension_numbers = #tpu.dot_dimension_numbers<[1], [0], [0], [1], [0, 0, 1, 1], [], []>} : vector<8x1024xbf16>, vector<1024x512xbf16>, vector<8x512xf32> -> vector<8x512xf32>
    %141 = tpu.concatenate %125, %140 in 1 : vector<8x512xf32>, vector<8x512xf32> -> vector<8x1024xf32>
    %c0_127 = arith.constant 0 : index
    %c0_128 = arith.constant 0 : index
    %142 = vector.load %arg7[%c0_127, %c0_128] : memref<1x1024xf32, #tpu.memory_space<vmem>>, vector<1x1024xf32>
    %143 = vector.broadcast %142 : vector<1x1024xf32> to vector<8x1024xf32>
    %144 = arith.addf %141, %143 : vector<8x1024xf32>
    %c0_129 = arith.constant 0 : index
    %c0_130 = arith.constant 0 : index
    %145 = vector.load %arg13[%c0_129, %c0_130] : memref<8x1024xf32, #tpu.memory_space<vmem>>, vector<8x1024xf32>
    tpu.vector_store %arg13[%c0_129, %c0_130], %109 {strides = array<i32>} : memref<8x1024xf32, #tpu.memory_space<vmem>>, vector<8x1024xf32>,
    %c0_131 = arith.constant 0 : index
    %c0_132 = arith.constant 0 : index
    %146 = vector.load %arg14[%c0_131, %c0_132] : memref<8x1024xf32, #tpu.memory_space<vmem>>, vector<8x1024xf32>
    tpu.vector_store %arg14[%c0_131, %c0_132], %144 {strides = array<i32>} : memref<8x1024xf32, #tpu.memory_space<vmem>>, vector<8x1024xf32>,
    %c0_133 = arith.constant 0 : index
    %c0_134 = arith.constant 0 : index
    %147 = vector.load %arg1[%c0_133, %c0_134] : memref<8x1024xf32, #tpu.memory_space<vmem>>, vector<8x1024xf32>
    %cst_135 = arith.constant 5.000000e-01 : f32
    %148 = vector.broadcast %cst_135 : f32 to vector<8x1024xf32>
    %149 = arith.mulf %148, %144 : vector<8x1024xf32>
    %150 = math.exp %149 : vector<8x1024xf32>
    %151 = arith.mulf %147, %150 : vector<8x1024xf32>
    %152 = arith.addf %109, %151 : vector<8x1024xf32>
    %153 = arith.truncf %152 : vector<8x1024xf32> to vector<8x1024xbf16>
    %c0_i32_136 = arith.constant 0 : i32
    %c0_i32_137 = arith.constant 0 : i32
    %c0_i32_138 = arith.constant 0 : i32
    %c0_i32_139 = arith.constant 0 : i32
    %c0_i32_140 = arith.constant 0 : i32
    %154 = tpu.memref_slice %arg2[%c0_i32_136, %c0_i32_139, %c0_i32_140] : memref<10x1024x512xbf16, #tpu.memory_space<any>> -> memref<1x1024x512xbf16, #tpu.memory_space<any>>
    %155 = tpu.memref_squeeze %154 : memref<1x1024x512xbf16, #tpu.memory_space<any>> -> memref<1024x512xbf16, #tpu.memory_space<any>>
    %c0_i32_141 = arith.constant 0 : i32
    %c0_i32_142 = arith.constant 0 : i32
    %156 = tpu.memref_slice %arg15[%c0_i32_137, %c0_i32_141, %c0_i32_142] : memref<2x1024x512xbf16, #tpu.memory_space<vmem>> -> memref<1x1024x512xbf16, #tpu.memory_space<vmem>>
    %157 = tpu.memref_squeeze %156 : memref<1x1024x512xbf16, #tpu.memory_space<vmem>> -> memref<1024x512xbf16, #tpu.memory_space<vmem>>
    %158 = tpu.memref_slice %arg16[%c0_i32_138] : memref<2x!tpu.dma_semaphore, #tpu.memory_space<semaphore_mem>> -> memref<1x!tpu.dma_semaphore, #tpu.memory_space<semaphore_mem>>
    %159 = tpu.memref_squeeze %158 : memref<1x!tpu.dma_semaphore, #tpu.memory_space<semaphore_mem>> -> memref<!tpu.dma_semaphore, #tpu.memory_space<semaphore_mem>>
    tpu.wait_dma2 semaphore(%159 : memref<!tpu.dma_semaphore, #tpu.memory_space<semaphore_mem>>) src(%155 : memref<1024x512xbf16, #tpu.memory_space<any>>) dst(%157 : memref<1024x512xbf16, #tpu.memory_space<vmem>>)
    %c7_i32 = arith.constant 7 : i32
    %c1_i32_143 = arith.constant 1 : i32
    %c1_i32_144 = arith.constant 1 : i32
    %c0_i32_145 = arith.constant 0 : i32
    %c0_i32_146 = arith.constant 0 : i32
    %160 = tpu.memref_slice %arg2[%c7_i32, %c0_i32_145, %c0_i32_146] : memref<10x1024x512xbf16, #tpu.memory_space<any>> -> memref<1x1024x512xbf16, #tpu.memory_space<any>>
    %161 = tpu.memref_squeeze %160 : memref<1x1024x512xbf16, #tpu.memory_space<any>> -> memref<1024x512xbf16, #tpu.memory_space<any>>
    %c0_i32_147 = arith.constant 0 : i32
    %c0_i32_148 = arith.constant 0 : i32
    %162 = tpu.memref_slice %arg15[%c1_i32_143, %c0_i32_147, %c0_i32_148] : memref<2x1024x512xbf16, #tpu.memory_space<vmem>> -> memref<1x1024x512xbf16, #tpu.memory_space<vmem>>
    %163 = tpu.memref_squeeze %162 : memref<1x1024x512xbf16, #tpu.memory_space<vmem>> -> memref<1024x512xbf16, #tpu.memory_space<vmem>>
    %164 = tpu.memref_slice %arg16[%c1_i32_144] : memref<2x!tpu.dma_semaphore, #tpu.memory_space<semaphore_mem>> -> memref<1x!tpu.dma_semaphore, #tpu.memory_space<semaphore_mem>>
    %165 = tpu.memref_squeeze %164 : memref<1x!tpu.dma_semaphore, #tpu.memory_space<semaphore_mem>> -> memref<!tpu.dma_semaphore, #tpu.memory_space<semaphore_mem>>
    tpu.enqueue_dma source(%161 : memref<1024x512xbf16, #tpu.memory_space<any>>) target(%163 : memref<1024x512xbf16, #tpu.memory_space<vmem>>) target_semaphore(%165 : memref<!tpu.dma_semaphore, #tpu.memory_space<semaphore_mem>>)
    %c0_149 = arith.constant 0 : index
    %c0_150 = arith.constant 0 : index
    %c0_151 = arith.constant 0 : index
    %166 = vector.load %arg15[%c0_149, %c0_150, %c0_151] : memref<2x1024x512xbf16, #tpu.memory_space<vmem>>, vector<1x1024x512xbf16>
    %167 = vector.shape_cast %166 : vector<1x1024x512xbf16> to vector<1024x512xbf16>
    %cst_152 = arith.constant dense<0.000000e+00> : vector<8x512xf32>
    %168 = tpu.matmul %153, %167, %cst_152 {dimension_numbers = #tpu.dot_dimension_numbers<[1], [0], [0], [1], [0, 0, 1, 1], [], []>} : vector<8x1024xbf16>, vector<1024x512xbf16>, vector<8x512xf32> -> vector<8x512xf32>
    %c0_i32_153 = arith.constant 0 : i32
    %c1_i32_154 = arith.constant 1 : i32
    %c1_i32_155 = arith.constant 1 : i32
    %c0_i32_156 = arith.constant 0 : i32
    %c0_i32_157 = arith.constant 0 : i32
    %169 = tpu.memref_slice %arg2[%c0_i32_153, %c0_i32_156, %c0_i32_157] : memref<10x1024x512xbf16, #tpu.memory_space<any>> -> memref<1x1024x512xbf16, #tpu.memory_space<any>>
    %170 = tpu.memref_squeeze %169 : memref<1x1024x512xbf16, #tpu.memory_space<any>> -> memref<1024x512xbf16, #tpu.memory_space<any>>
    %c0_i32_158 = arith.constant 0 : i32
    %c0_i32_159 = arith.constant 0 : i32
    %171 = tpu.memref_slice %arg15[%c1_i32_154, %c0_i32_158, %c0_i32_159] : memref<2x1024x512xbf16, #tpu.memory_space<vmem>> -> memref<1x1024x512xbf16, #tpu.memory_space<vmem>>
    %172 = tpu.memref_squeeze %171 : memref<1x1024x512xbf16, #tpu.memory_space<vmem>> -> memref<1024x512xbf16, #tpu.memory_space<vmem>>
    %173 = tpu.memref_slice %arg16[%c1_i32_155] : memref<2x!tpu.dma_semaphore, #tpu.memory_space<semaphore_mem>> -> memref<1x!tpu.dma_semaphore, #tpu.memory_space<semaphore_mem>>
    %174 = tpu.memref_squeeze %173 : memref<1x!tpu.dma_semaphore, #tpu.memory_space<semaphore_mem>> -> memref<!tpu.dma_semaphore, #tpu.memory_space<semaphore_mem>>
    tpu.wait_dma2 semaphore(%174 : memref<!tpu.dma_semaphore, #tpu.memory_space<semaphore_mem>>) src(%170 : memref<1024x512xbf16, #tpu.memory_space<any>>) dst(%172 : memref<1024x512xbf16, #tpu.memory_space<vmem>>)
    %c8_i32 = arith.constant 8 : i32
    %c0_i32_160 = arith.constant 0 : i32
    %c0_i32_161 = arith.constant 0 : i32
    %c0_i32_162 = arith.constant 0 : i32
    %c0_i32_163 = arith.constant 0 : i32
    %175 = tpu.memref_slice %arg2[%c8_i32, %c0_i32_162, %c0_i32_163] : memref<10x1024x512xbf16, #tpu.memory_space<any>> -> memref<1x1024x512xbf16, #tpu.memory_space<any>>
    %176 = tpu.memref_squeeze %175 : memref<1x1024x512xbf16, #tpu.memory_space<any>> -> memref<1024x512xbf16, #tpu.memory_space<any>>
    %c0_i32_164 = arith.constant 0 : i32
    %c0_i32_165 = arith.constant 0 : i32
    %177 = tpu.memref_slice %arg15[%c0_i32_160, %c0_i32_164, %c0_i32_165] : memref<2x1024x512xbf16, #tpu.memory_space<vmem>> -> memref<1x1024x512xbf16, #tpu.memory_space<vmem>>
    %178 = tpu.memref_squeeze %177 : memref<1x1024x512xbf16, #tpu.memory_space<vmem>> -> memref<1024x512xbf16, #tpu.memory_space<vmem>>
    %179 = tpu.memref_slice %arg16[%c0_i32_161] : memref<2x!tpu.dma_semaphore, #tpu.memory_space<semaphore_mem>> -> memref<1x!tpu.dma_semaphore, #tpu.memory_space<semaphore_mem>>
    %180 = tpu.memref_squeeze %179 : memref<1x!tpu.dma_semaphore, #tpu.memory_space<semaphore_mem>> -> memref<!tpu.dma_semaphore, #tpu.memory_space<semaphore_mem>>
    tpu.enqueue_dma source(%176 : memref<1024x512xbf16, #tpu.memory_space<any>>) target(%178 : memref<1024x512xbf16, #tpu.memory_space<vmem>>) target_semaphore(%180 : memref<!tpu.dma_semaphore, #tpu.memory_space<semaphore_mem>>)
    %c1_166 = arith.constant 1 : index
    %c0_167 = arith.constant 0 : index
    %c0_168 = arith.constant 0 : index
    %181 = vector.load %arg15[%c1_166, %c0_167, %c0_168] : memref<2x1024x512xbf16, #tpu.memory_space<vmem>>, vector<1x1024x512xbf16>
    %182 = vector.shape_cast %181 : vector<1x1024x512xbf16> to vector<1024x512xbf16>
    %cst_169 = arith.constant dense<0.000000e+00> : vector<8x512xf32>
    %183 = tpu.matmul %153, %182, %cst_169 {dimension_numbers = #tpu.dot_dimension_numbers<[1], [0], [0], [1], [0, 0, 1, 1], [], []>} : vector<8x1024xbf16>, vector<1024x512xbf16>, vector<8x512xf32> -> vector<8x512xf32>
    %184 = tpu.concatenate %168, %183 in 1 : vector<8x512xf32>, vector<8x512xf32> -> vector<8x1024xf32>
    %c0_170 = arith.constant 0 : index
    %c0_171 = arith.constant 0 : index
    %185 = vector.load %arg8[%c0_170, %c0_171] : memref<1x1024xf32, #tpu.memory_space<vmem>>, vector<1x1024xf32>
    %186 = vector.broadcast %185 : vector<1x1024xf32> to vector<8x1024xf32>
    %187 = arith.addf %184, %186 : vector<8x1024xf32>
    %cst_172 = arith.constant 0.000000e+00 : f32
    %188 = vector.broadcast %cst_172 : f32 to vector<8x1024xf32>
    %189 = arith.cmpf ogt, %187, %188 : vector<8x1024xf32>
    %190 = math.exp %187 : vector<8x1024xf32>
    %cst_173 = arith.constant 1.000000e+00 : f32
    %191 = vector.broadcast %cst_173 : f32 to vector<8x1024xf32>
    %192 = arith.subf %190, %191 : vector<8x1024xf32>
    %cst_174 = arith.constant 1.67326319 : f32
    %193 = vector.broadcast %cst_174 : f32 to vector<8x1024xf32>
    %194 = arith.mulf %193, %192 : vector<8x1024xf32>
    %195 = arith.select %189, %187, %194 : vector<8x1024xi1>, vector<8x1024xf32>
    %cst_175 = arith.constant 1.05070102 : f32
    %196 = vector.broadcast %cst_175 : f32 to vector<8x1024xf32>
    %197 = arith.mulf %196, %195 : vector<8x1024xf32>
    %198 = arith.truncf %197 : vector<8x1024xf32> to vector<8x1024xbf16>
    %c0_i32_176 = arith.constant 0 : i32
    %c0_i32_177 = arith.constant 0 : i32
    %c0_i32_178 = arith.constant 0 : i32
    %c0_i32_179 = arith.constant 0 : i32
    %c0_i32_180 = arith.constant 0 : i32
    %199 = tpu.memref_slice %arg2[%c0_i32_176, %c0_i32_179, %c0_i32_180] : memref<10x1024x512xbf16, #tpu.memory_space<any>> -> memref<1x1024x512xbf16, #tpu.memory_space<any>>
    %200 = tpu.memref_squeeze %199 : memref<1x1024x512xbf16, #tpu.memory_space<any>> -> memref<1024x512xbf16, #tpu.memory_space<any>>
    %c0_i32_181 = arith.constant 0 : i32
    %c0_i32_182 = arith.constant 0 : i32
    %201 = tpu.memref_slice %arg15[%c0_i32_177, %c0_i32_181, %c0_i32_182] : memref<2x1024x512xbf16, #tpu.memory_space<vmem>> -> memref<1x1024x512xbf16, #tpu.memory_space<vmem>>
    %202 = tpu.memref_squeeze %201 : memref<1x1024x512xbf16, #tpu.memory_space<vmem>> -> memref<1024x512xbf16, #tpu.memory_space<vmem>>
    %203 = tpu.memref_slice %arg16[%c0_i32_178] : memref<2x!tpu.dma_semaphore, #tpu.memory_space<semaphore_mem>> -> memref<1x!tpu.dma_semaphore, #tpu.memory_space<semaphore_mem>>
    %204 = tpu.memref_squeeze %203 : memref<1x!tpu.dma_semaphore, #tpu.memory_space<semaphore_mem>> -> memref<!tpu.dma_semaphore, #tpu.memory_space<semaphore_mem>>
    tpu.wait_dma2 semaphore(%204 : memref<!tpu.dma_semaphore, #tpu.memory_space<semaphore_mem>>) src(%200 : memref<1024x512xbf16, #tpu.memory_space<any>>) dst(%202 : memref<1024x512xbf16, #tpu.memory_space<vmem>>)
    %c9_i32 = arith.constant 9 : i32
    %c1_i32_183 = arith.constant 1 : i32
    %c1_i32_184 = arith.constant 1 : i32
    %c0_i32_185 = arith.constant 0 : i32
    %c0_i32_186 = arith.constant 0 : i32
    %205 = tpu.memref_slice %arg2[%c9_i32, %c0_i32_185, %c0_i32_186] : memref<10x1024x512xbf16, #tpu.memory_space<any>> -> memref<1x1024x512xbf16, #tpu.memory_space<any>>
    %206 = tpu.memref_squeeze %205 : memref<1x1024x512xbf16, #tpu.memory_space<any>> -> memref<1024x512xbf16, #tpu.memory_space<any>>
    %c0_i32_187 = arith.constant 0 : i32
    %c0_i32_188 = arith.constant 0 : i32
    %207 = tpu.memref_slice %arg15[%c1_i32_183, %c0_i32_187, %c0_i32_188] : memref<2x1024x512xbf16, #tpu.memory_space<vmem>> -> memref<1x1024x512xbf16, #tpu.memory_space<vmem>>
    %208 = tpu.memref_squeeze %207 : memref<1x1024x512xbf16, #tpu.memory_space<vmem>> -> memref<1024x512xbf16, #tpu.memory_space<vmem>>
    %209 = tpu.memref_slice %arg16[%c1_i32_184] : memref<2x!tpu.dma_semaphore, #tpu.memory_space<semaphore_mem>> -> memref<1x!tpu.dma_semaphore, #tpu.memory_space<semaphore_mem>>
    %210 = tpu.memref_squeeze %209 : memref<1x!tpu.dma_semaphore, #tpu.memory_space<semaphore_mem>> -> memref<!tpu.dma_semaphore, #tpu.memory_space<semaphore_mem>>
    tpu.enqueue_dma source(%206 : memref<1024x512xbf16, #tpu.memory_space<any>>) target(%208 : memref<1024x512xbf16, #tpu.memory_space<vmem>>) target_semaphore(%210 : memref<!tpu.dma_semaphore, #tpu.memory_space<semaphore_mem>>)
    %c0_189 = arith.constant 0 : index
    %c0_190 = arith.constant 0 : index
    %c0_191 = arith.constant 0 : index
    %211 = vector.load %arg15[%c0_189, %c0_190, %c0_191] : memref<2x1024x512xbf16, #tpu.memory_space<vmem>>, vector<1x1024x512xbf16>
    %212 = vector.shape_cast %211 : vector<1x1024x512xbf16> to vector<1024x512xbf16>
    %cst_192 = arith.constant dense<0.000000e+00> : vector<8x512xf32>
    %213 = tpu.matmul %198, %212, %cst_192 {dimension_numbers = #tpu.dot_dimension_numbers<[1], [0], [0], [1], [0, 0, 1, 1], [], []>} : vector<8x1024xbf16>, vector<1024x512xbf16>, vector<8x512xf32> -> vector<8x512xf32>
    %c0_i32_193 = arith.constant 0 : i32
    %c1_i32_194 = arith.constant 1 : i32
    %c1_i32_195 = arith.constant 1 : i32
    %c0_i32_196 = arith.constant 0 : i32
    %c0_i32_197 = arith.constant 0 : i32
    %214 = tpu.memref_slice %arg2[%c0_i32_193, %c0_i32_196, %c0_i32_197] : memref<10x1024x512xbf16, #tpu.memory_space<any>> -> memref<1x1024x512xbf16, #tpu.memory_space<any>>
    %215 = tpu.memref_squeeze %214 : memref<1x1024x512xbf16, #tpu.memory_space<any>> -> memref<1024x512xbf16, #tpu.memory_space<any>>
    %c0_i32_198 = arith.constant 0 : i32
    %c0_i32_199 = arith.constant 0 : i32
    %216 = tpu.memref_slice %arg15[%c1_i32_194, %c0_i32_198, %c0_i32_199] : memref<2x1024x512xbf16, #tpu.memory_space<vmem>> -> memref<1x1024x512xbf16, #tpu.memory_space<vmem>>
    %217 = tpu.memref_squeeze %216 : memref<1x1024x512xbf16, #tpu.memory_space<vmem>> -> memref<1024x512xbf16, #tpu.memory_space<vmem>>
    %218 = tpu.memref_slice %arg16[%c1_i32_195] : memref<2x!tpu.dma_semaphore, #tpu.memory_space<semaphore_mem>> -> memref<1x!tpu.dma_semaphore, #tpu.memory_space<semaphore_mem>>
    %219 = tpu.memref_squeeze %218 : memref<1x!tpu.dma_semaphore, #tpu.memory_space<semaphore_mem>> -> memref<!tpu.dma_semaphore, #tpu.memory_space<semaphore_mem>>
    tpu.wait_dma2 semaphore(%219 : memref<!tpu.dma_semaphore, #tpu.memory_space<semaphore_mem>>) src(%215 : memref<1024x512xbf16, #tpu.memory_space<any>>) dst(%217 : memref<1024x512xbf16, #tpu.memory_space<vmem>>)
    %c1_200 = arith.constant 1 : index
    %c0_201 = arith.constant 0 : index
    %c0_202 = arith.constant 0 : index
    %220 = vector.load %arg15[%c1_200, %c0_201, %c0_202] : memref<2x1024x512xbf16, #tpu.memory_space<vmem>>, vector<1x1024x512xbf16>
    %221 = vector.shape_cast %220 : vector<1x1024x512xbf16> to vector<1024x512xbf16>
    %cst_203 = arith.constant dense<0.000000e+00> : vector<8x512xf32>
    %222 = tpu.matmul %198, %221, %cst_203 {dimension_numbers = #tpu.dot_dimension_numbers<[1], [0], [0], [1], [0, 0, 1, 1], [], []>} : vector<8x1024xbf16>, vector<1024x512xbf16>, vector<8x512xf32> -> vector<8x512xf32>
    %223 = tpu.concatenate %213, %222 in 1 : vector<8x512xf32>, vector<8x512xf32> -> vector<8x1024xf32>
    %c0_204 = arith.constant 0 : index
    %c0_205 = arith.constant 0 : index
    %224 = vector.load %arg9[%c0_204, %c0_205] : memref<1x1024xf32, #tpu.memory_space<vmem>>, vector<1x1024xf32>
    %225 = vector.broadcast %224 : vector<1x1024xf32> to vector<8x1024xf32>
    %226 = arith.addf %223, %225 : vector<8x1024xf32>
    %cst_206 = arith.constant 0.000000e+00 : f32
    %227 = vector.broadcast %cst_206 : f32 to vector<8x1024xf32>
    %228 = arith.cmpf ogt, %226, %227 : vector<8x1024xf32>
    %229 = math.exp %226 : vector<8x1024xf32>
    %cst_207 = arith.constant 1.000000e+00 : f32
    %230 = vector.broadcast %cst_207 : f32 to vector<8x1024xf32>
    %231 = arith.subf %229, %230 : vector<8x1024xf32>
    %cst_208 = arith.constant 1.67326319 : f32
    %232 = vector.broadcast %cst_208 : f32 to vector<8x1024xf32>
    %233 = arith.mulf %232, %231 : vector<8x1024xf32>
    %234 = arith.select %228, %226, %233 : vector<8x1024xi1>, vector<8x1024xf32>
    %cst_209 = arith.constant 1.05070102 : f32
    %235 = vector.broadcast %cst_209 : f32 to vector<8x1024xf32>
    %236 = arith.mulf %235, %234 : vector<8x1024xf32>
    %237 = arith.truncf %236 : vector<8x1024xf32> to vector<8x1024xbf16>
    %c0_210 = arith.constant 0 : index
    %c0_211 = arith.constant 0 : index
    %238 = vector.load %arg10[%c0_210, %c0_211] : memref<1024x8xbf16, #tpu.memory_space<vmem>>, vector<1024x8xbf16>
    %cst_212 = arith.constant dense<0.000000e+00> : vector<8x8xf32>
    %239 = tpu.matmul %237, %238, %cst_212 {dimension_numbers = #tpu.dot_dimension_numbers<[1], [0], [0], [1], [0, 0, 1, 1], [], []>} : vector<8x1024xbf16>, vector<1024x8xbf16>, vector<8x8xf32> -> vector<8x8xf32>
    %c0_213 = arith.constant 0 : index
    %c0_214 = arith.constant 0 : index
    %240 = vector.load %arg11[%c0_213, %c0_214] : memref<1x8xf32, #tpu.memory_space<vmem>>, vector<1x8xf32>
    %241 = vector.broadcast %240 : vector<1x8xf32> to vector<8x8xf32>
    %242 = arith.addf %239, %241 : vector<8x8xf32>
    %c0_215 = arith.constant 0 : index
    %c0_216 = arith.constant 0 : index
    %243 = vector.load %arg12[%c0_215, %c0_216] : memref<8x8xf32, #tpu.memory_space<vmem>>, vector<8x8xf32>
    tpu.vector_store %arg12[%c0_215, %c0_216], %242 {strides = array<i32>} : memref<8x8xf32, #tpu.memory_space<vmem>>, vector<8x8xf32>,
    return
  }
}

</mosaic_0001>

<bundles_post_ra>
// kernel: vae_forward.1
= control target key start
LH: loop header
LB: loop body
LE: loop exit
PB: predicated region body
PF: predicated region fallthrough
CT: control target
= control target key end

     0   :  { %20 = vsyncpa [#allocation5], 0  ;;  %s9637_s0 = inlined_call_operand.vmem [shape: f32[8,8], index: 0, kind: input, shape index: {}]   ;;  %s9638_s1 = inlined_call_operand.hbm [shape: f32[8,1024], index: 1, kind: input, shape index: {}]   ;;  %s9639_s2 = inlined_call_operand.hbm [shape: bf16[10,1024,512], index: 2, kind: input, shape index: {}]   ;;  %s9640_s3 = inlined_call_operand.hbm [shape: f32[2,1024], index: 3, kind: input, shape index: {}]   ;;  %s9641_s4 = inlined_call_operand.hbm [shape: f32[1,1024], index: 4, kind: input, shape index: {}]   ;;  %s9642_s5 = inlined_call_operand.hbm [shape: f32[1,1024], index: 5, kind: input, shape index: {}]   ;;  %s9643_s6 = inlined_call_operand.hbm [shape: f32[1,1024], index: 6, kind: input, shape index: {}]   ;;  %s9644_s7 = inlined_call_operand.hbm [shape: f32[1,1024], index: 7, kind: input, shape index: {}]   ;;  %s9645_s8 = inlined_call_operand.hbm [shape: f32[1,1024], index: 8, kind: input, shape index: {}]   ;;  %s9646_s9 = inlined_call_operand.hbm [shape: f32[1,1024], index: 9, kind: input, shape index: {}]   ;;  %s9647_s10 = inlined_call_operand.vmem [shape: bf16[1024,8], index: 10, kind: input, shape index: {}]   ;;  %s9648_s11 = inlined_call_operand.hbm [shape: f32[1,8], index: 11, kind: input, shape index: {}]   ;;  %s9649_s12 = inlined_call_operand.vmem [shape: f32[8,8], index: 12, kind: output, shape index: {0}]   ;;  %s9650_s13 = inlined_call_operand.hbm [shape: f32[8,1024], index: 13, kind: output, shape index: {1}]   ;;  %s9651_s14 = inlined_call_operand.hbm [shape: f32[8,1024], index: 14, kind: output, shape index: {2}]  }
   0x1   :  { %21 = vsyncpa [#allocation8], 0 }
   0x2   :  { %22 = vsyncpa [#allocation11], 0 }
   0x3   :  { %23 = vsyncpa [#allocation14], 0 }
   0x4   :  { %24 = vsyncpa [#allocation17], 0 }
   0x5   :  { %25 = vsyncpa [#allocation6], 0 }
   0x6   :  { %26 = vsyncpa [#allocation21], 0  ;;  %s8511_s29 = smov [#allocation7]   ;;  %s8512_s15 = smov [#allocation10]  }
   0x7   :  { %s45_s30 = sshll.u32 %s8511_s29, 4  ;;  %s65_s16 = sshll.u32 %s8512_s15, 4  ;;  %s46_s30 = int_to_ptr.vmem [resolvable:$true] %s45_s30  ;;  %s66_s16 = int_to_ptr.vmem [resolvable:$true] %s65_s16 }
   0x8   :  { %s8235_s19 = scalar_lea.hbm %s9640_s3, 256 }
   0x9   :  { %p8236_p0 = scmp.ne.s32.totalorder %s9640_s3, %s8235_s19  ;;  %p8239_p1 = scmp.lt.u32.totalorder %s8235_s19, %s9640_s3 }
   0xb   :  { %p8241_p2 = pnand %p8239_p1, %p8236_p0 }
   0xd   :  { %8244 = shalt.err (!%p8241_p2)
}
   0xe   :  { %s8245_s24 = scalar_lea.vmem %s46_s30, 256  ;;  %p8250_p4 = scmp.lt.s32.totalorder %s46_s30, %s46_s30 }
   0xf   :  { %p8246_p3 = scmp.ne.s32.totalorder %s46_s30, %s8245_s24  ;;  %p8251_p5 = scmp.lt.s32.totalorder %s8245_s24, %s8245_s24 }
  0x11   :  { %p8252_p6 = por %p8251_p5, %p8250_p4 }
  0x13   :  { %p8253_p7 = pnand %p8252_p6, %p8246_p3 }
  0x15   :  { %8256 = shalt.err (!%p8253_p7)
}
  0x16   :  { %48 = dma.hbm_to_vmem [thread:$0]  %s9640_s3, 256, %s46_s30, [#allocation8]  }
  0x17   :  { %s8257_s29 = scalar_lea.hbm %s9642_s5, 128 }
  0x18   :  { %p8258_p8 = scmp.ne.s32.totalorder %s9642_s5, %s8257_s29  ;;  %p8261_p9 = scmp.lt.u32.totalorder %s8257_s29, %s9642_s5 }
  0x1a   :  { %p8263_p10 = pnand %p8261_p9, %p8258_p8 }
  0x1c   :  { %8266 = shalt.err (!%p8263_p10)
}
  0x1d   :  { %s8267_s20 = scalar_lea.vmem %s66_s16, 128  ;;  %p8272_p12 = scmp.lt.s32.totalorder %s66_s16, %s66_s16 }
  0x1e   :  { %p8268_p11 = scmp.ne.s32.totalorder %s66_s16, %s8267_s20  ;;  %p8273_p13 = scmp.lt.s32.totalorder %s8267_s20, %s8267_s20 }
  0x20   :  { %p8274_p0 = por %p8273_p13, %p8272_p12 }
  0x22   :  { %p8275_p1 = pnand %p8274_p0, %p8268_p11 }
  0x24   :  { %8278 = shalt.err (!%p8275_p1)
}
  0x25   :  { %68 = dma.hbm_to_vmem [thread:$0]  %s9642_s5, 128, %s66_s16, [#allocation11]  }
  0x26   :  { %s8513_s21 = smov [#allocation13]   ;;  %s8514_s23 = smov [#allocation16]  }
  0x27   :  { %s85_s22 = sshll.u32 %s8513_s21, 4  ;;  %s105_s24 = sshll.u32 %s8514_s23, 4  ;;  %s86_s22 = int_to_ptr.vmem [resolvable:$true] %s85_s22  ;;  %s106_s24 = int_to_ptr.vmem [resolvable:$true] %s105_s24 }
  0x28   :  { %s8279_s27 = scalar_lea.hbm %s9644_s7, 128 }
  0x29   :  { %p8280_p2 = scmp.ne.s32.totalorder %s9644_s7, %s8279_s27  ;;  %p8283_p3 = scmp.lt.u32.totalorder %s8279_s27, %s9644_s7 }
  0x2b   :  { %p8285_p4 = pnand %p8283_p3, %p8280_p2 }
  0x2d   :  { %8288 = shalt.err (!%p8285_p4)
}
  0x2e   :  { %s8289_s5 = scalar_lea.vmem %s86_s22, 128  ;;  %p8294_p6 = scmp.lt.s32.totalorder %s86_s22, %s86_s22 }
  0x2f   :  { %p8290_p5 = scmp.ne.s32.totalorder %s86_s22, %s8289_s5  ;;  %p8295_p7 = scmp.lt.s32.totalorder %s8289_s5, %s8289_s5 }
  0x31   :  { %p8296_p8 = por %p8295_p7, %p8294_p6 }
  0x33   :  { %p8297_p9 = pnand %p8296_p8, %p8290_p5 }
  0x35   :  { %8300 = shalt.err (!%p8297_p9)
}
  0x36   :  { %88 = dma.hbm_to_vmem [thread:$0]  %s9644_s7, 128, %s86_s22, [#allocation14]  }
  0x37   :  { %s8301_s3 = scalar_lea.hbm %s9646_s9, 128 }
  0x38   :  { %p8302_p10 = scmp.ne.s32.totalorder %s9646_s9, %s8301_s3  ;;  %p8305_p11 = scmp.lt.u32.totalorder %s8301_s3, %s9646_s9 }
  0x3a   :  { %p8307_p12 = pnand %p8305_p11, %p8302_p10 }
  0x3c   :  { %8310 = shalt.err (!%p8307_p12)
}
  0x3d   :  { %s8311_s26 = scalar_lea.vmem %s106_s24, 128  ;;  %p8316_p0 = scmp.lt.s32.totalorder %s106_s24, %s106_s24 }
  0x3e   :  { %p8312_p13 = scmp.ne.s32.totalorder %s106_s24, %s8311_s26  ;;  %p8317_p1 = scmp.lt.s32.totalorder %s8311_s26, %s8311_s26 }
  0x40   :  { %p8318_p2 = por %p8317_p1, %p8316_p0 }
  0x42   :  { %p8319_p3 = pnand %p8318_p2, %p8312_p13 }
  0x44   :  { %8322 = shalt.err (!%p8319_p3)
}
  0x45   :  { %108 = dma.hbm_to_vmem [thread:$0]  %s9646_s9, 128, %s106_s24, [#allocation17]  }
  0x46   :  { %s8515_s27 = smov [#allocation4]   ;;  %s8516_s29 = smov [#allocation9]  }
  0x47   :  { %s35_s28 = sshll.u32 %s8515_s27, 4  ;;  %s55_s15 = sshll.u32 %s8516_s29, 4  ;;  %s36_s28 = int_to_ptr.vmem [resolvable:$true] %s35_s28  ;;  %s56_s15 = int_to_ptr.vmem [resolvable:$true] %s55_s15 }
  0x48   :  { %s8323_s16 = scalar_lea.hbm %s9638_s1, 1024 }
  0x49   :  { %p8324_p4 = scmp.ne.s32.totalorder %s9638_s1, %s8323_s16  ;;  %p8327_p5 = scmp.lt.u32.totalorder %s8323_s16, %s9638_s1 }
  0x4b   :  { %p8329_p6 = pnand %p8327_p5, %p8324_p4 }
  0x4d   :  { %8332 = shalt.err (!%p8329_p6)
}
  0x4e   :  { %s8333_s9 = scalar_lea.vmem %s36_s28, 1024  ;;  %p8338_p8 = scmp.lt.s32.totalorder %s36_s28, %s36_s28 }
  0x4f   :  { %p8334_p7 = scmp.ne.s32.totalorder %s36_s28, %s8333_s9  ;;  %p8339_p9 = scmp.lt.s32.totalorder %s8333_s9, %s8333_s9 }
  0x51   :  { %p8340_p10 = por %p8339_p9, %p8338_p8 }
  0x53   :  { %p8341_p11 = pnand %p8340_p10, %p8334_p7 }
  0x55   :  { %8344 = shalt.err (!%p8341_p11)
}
  0x56   :  { %38 = dma.hbm_to_vmem [thread:$0]  %s9638_s1, 1024, %s36_s28, [#allocation5]  }
  0x57   :  { %s8345_s25 = scalar_lea.hbm %s9641_s4, 128 }
  0x58   :  { %p8346_p12 = scmp.ne.s32.totalorder %s9641_s4, %s8345_s25  ;;  %p8349_p13 = scmp.lt.u32.totalorder %s8345_s25, %s9641_s4 }
  0x5a   :  { %p8351_p0 = pnand %p8349_p13, %p8346_p12 }
  0x5c   :  { %8354 = shalt.err (!%p8351_p0)
}
  0x5d   :  { %s8355_s29 = scalar_lea.vmem %s56_s15, 128  ;;  %p8360_p2 = scmp.lt.s32.totalorder %s56_s15, %s56_s15 }
  0x5e   :  { %p8356_p1 = scmp.ne.s32.totalorder %s56_s15, %s8355_s29  ;;  %p8361_p3 = scmp.lt.s32.totalorder %s8355_s29, %s8355_s29 }
  0x60   :  { %p8362_p4 = por %p8361_p3, %p8360_p2 }
  0x62   :  { %p8363_p5 = pnand %p8362_p4, %p8356_p1 }
  0x64   :  { %8366 = shalt.err (!%p8363_p5)
}
  0x65   :  { %58 = dma.hbm_to_vmem [thread:$0]  %s9641_s4, 128, %s56_s15, [#allocation8]  }
  0x66   :  { %s8517_s17 = smov [#allocation12]   ;;  %s8518_s16 = smov [#allocation15]  }
  0x67   :  { %s75_s5 = sshll.u32 %s8517_s17, 4  ;;  %s95_s18 = sshll.u32 %s8518_s16, 4  ;;  %s76_s5 = int_to_ptr.vmem [resolvable:$true] %s75_s5  ;;  %s96_s18 = int_to_ptr.vmem [resolvable:$true] %s95_s18 }
  0x68   :  { %s8367_s3 = scalar_lea.hbm %s9643_s6, 128 }
  0x69   :  { %p8368_p6 = scmp.ne.s32.totalorder %s9643_s6, %s8367_s3  ;;  %p8371_p7 = scmp.lt.u32.totalorder %s8367_s3, %s9643_s6 }
  0x6b   :  { %p8373_p8 = pnand %p8371_p7, %p8368_p6 }
  0x6d   :  { %8376 = shalt.err (!%p8373_p8)
}
  0x6e   :  { %s8377_s4 = scalar_lea.vmem %s76_s5, 128  ;;  %p8382_p10 = scmp.lt.s32.totalorder %s76_s5, %s76_s5 }
  0x6f   :  { %p8378_p9 = scmp.ne.s32.totalorder %s76_s5, %s8377_s4  ;;  %p8383_p11 = scmp.lt.s32.totalorder %s8377_s4, %s8377_s4 }
  0x71   :  { %p8384_p12 = por %p8383_p11, %p8382_p10 }
  0x73   :  { %p8385_p13 = pnand %p8384_p12, %p8378_p9 }
  0x75   :  { %8388 = shalt.err (!%p8385_p13)
}
  0x76   :  { %78 = dma.hbm_to_vmem [thread:$0]  %s9643_s6, 128, %s76_s5, [#allocation11]  }
  0x77   :  { %s8389_s7 = scalar_lea.hbm %s9645_s8, 128 }
  0x78   :  { %p8390_p0 = scmp.ne.s32.totalorder %s9645_s8, %s8389_s7  ;;  %p8393_p1 = scmp.lt.u32.totalorder %s8389_s7, %s9645_s8 }
  0x7a   :  { %p8395_p2 = pnand %p8393_p1, %p8390_p0 }
  0x7c   :  { %8398 = shalt.err (!%p8395_p2)
}
  0x7d   :  { %s8399_s28 = scalar_lea.vmem %s96_s18, 128  ;;  %p8404_p4 = scmp.lt.s32.totalorder %s96_s18, %s96_s18 }
  0x7e   :  { %p8400_p3 = scmp.ne.s32.totalorder %s96_s18, %s8399_s28  ;;  %p8405_p5 = scmp.lt.s32.totalorder %s8399_s28, %s8399_s28 }
  0x80   :  { %p8406_p6 = por %p8405_p5, %p8404_p4 }
  0x82   :  { %p8407_p7 = pnand %p8406_p6, %p8400_p3 }
  0x84   :  { %8410 = shalt.err (!%p8407_p7)
}
  0x85   :  { %98 = dma.hbm_to_vmem [thread:$0]  %s9645_s8, 128, %s96_s18, [#allocation14]  }
  0x86   :  { %s8519_s5 = smov [#allocation18]   ;;  %s8411_s3 = scalar_lea.hbm %s9648_s11, 16 }
  0x87   :  { %s117_s16 = sshll.u32 %s8519_s5, 4  ;;  %p8412_p8 = scmp.ne.s32.totalorder %s9648_s11, %s8411_s3  ;;  %s118_s16 = int_to_ptr.vmem [resolvable:$true] %s117_s16 }
  0x88   :  { %p8415_p9 = scmp.lt.u32.totalorder %s8411_s3, %s9648_s11 }
  0x8a   :  { %p8417_p10 = pnand %p8415_p9, %p8412_p8 }
  0x8c   :  { %8420 = shalt.err (!%p8417_p10)
}
  0x8d   :  { %s8421_s4 = scalar_lea.vmem %s118_s16, 16  ;;  %s8425_s8 = scalar_lea.vmem %s118_s16, 32 }
  0x8e   :  { %p8422_p11 = scmp.ne.s32.totalorder %s118_s16, %s8421_s4  ;;  %p8426_p12 = scmp.lt.s32.totalorder %s118_s16, %s118_s16 }
  0x8f   :  { %p8427_p13 = scmp.lt.s32.totalorder %s8425_s8, %s8421_s4 }
  0x91   :  { %p8428_p0 = por %p8427_p13, %p8426_p12 }
  0x93   :  { %p8429_p1 = pnand %p8428_p0, %p8422_p11 }
  0x95   :  { %8432 = shalt.err (!%p8429_p1)
}
  0x96   :  { %120 = dma.hbm_to_vmem [thread:$0]  %s9648_s11, 16, %s118_s16, [#allocation17]  }
  0x97   :  { %8477 = dma.done.wait [#allocation5], 1024  }
  0x98   :  { %8478 = vsyncadd [#allocation5], 4294966272 }
  0x99   :  { %8479 = dma.done.wait [#allocation8], 384  }
  0x9a   :  { %8480 = vsyncadd [#allocation8], 4294966912 }
  0x9b   :  { %8481 = dma.done.wait [#allocation11], 256  }
  0x9c   :  { %8482 = vsyncadd [#allocation11], 4294967040 }
  0x9d   :  { %8483 = dma.done.wait [#allocation14], 256  }
  0x9e   :  { %8484 = vsyncadd [#allocation14], 4294967040 }
  0x9f   :  { %8485 = dma.done.wait [#allocation17], 144  }
  0xa0   :  { %8486 = vsyncadd [#allocation17], 4294967152  ;;  %s153_s23 = sld [smem:[#allocation0]]   ;;  %s8520_s25 = smov 512   ;;  %v8521_v0 = vmov 0   ;;  %v8530_v2 = vmov 1   ;;  %v192_v3 = vlaneseq }
  0xa1   :  { %165 = sst [smem:[#allocation23]] %s8520_s25  ;;  %8081 = vset.pattern.permute.xlu0 %v8521_v0  ;;  %s8522_s26 = smov 4  }
  0xa2   :  { %167 = sst [smem:[#allocation23 + $0x1]] %s8520_s25  ;;  %s8523_s11 = smov 64   ;;  %v193_v4 = vshrl.u32 %v192_v3, 7 }
  0xa3   :  { %169 = sst [smem:[#allocation23 + $0x2]] %s8522_s26  ;;  %s8524_s7 = smov 128  }
  0xa4   :  { %171 = sst [smem:[#allocation23 + $0x3]] %s8523_s11  ;;  %s8525_s22 = smov 2   ;;  %v8749_v5 = vsub.s32 0, %v193_v4  ;;  %v8751_v7 = vsub.s32 1, %v193_v4  ;;  %v8753_v8 = vsub.s32 2, %v193_v4  ;;  %v8755_v9 = vsub.s32 3, %v193_v4 }
  0xa5   :  { %173 = sst [smem:[#allocation23 + $0x4]] %s8524_s7  ;;  %s8526_s29 = smov 256   ;;  %v8757_v10 = vsub.s32 4, %v193_v4  ;;  %v8759_v11 = vsub.s32 5, %v193_v4  ;;  %v8761_v12 = vsub.s32 6, %v193_v4  ;;  %v8763_v13 = vsub.s32 7, %v193_v4 }
  0xa6   :  { %175 = sst [smem:[#allocation23 + $0x5]] %s8525_s22  ;;  %s7841_s27 = sshll.u32 %s153_s23, 26 }
  0xa7   :  { %177 = sst [smem:[#allocation23 + $0x6]] %s8526_s29  ;;  %s8734_s1 = sadd.s32 134217728, %s7841_s27 }
  0xa8   :  { %179 = sst [smem:[#allocation23 + $0x7]] %s8523_s11  ;;  %s8527_s28 = smov [#allocation2]  }
  0xa9   :  { %181 = sst [smem:[#allocation23 + $0x8]] %s8522_s26  ;;  %s161_s6 = sshll.u32 %s8527_s28, 4  ;;  %s8738_s6 = int_to_ptr.vmem [resolvable:$true] %s161_s6 }
  0xaa   :  { %s8528_s17 = smov [#allocation3]   ;;  %s8529_s5 = smov [#allocation22]  }
  0xab   :  { %183 = dma.general %s9639_s2, 32768, %s8738_s6, %s8528_s17, %s8529_s5, [#allocation23], %s8734_s1, 0  }
  0xac   :  { %v184_v1 = vld [vmem:[%s9637_s0] sm:$0xff]  ;;  %v303_v16 = vld [vmem:[#allocation9] sm:$0xff] }
  0xad   :  { %188 = vperm.xlu0 %8081, %v184_v1   ;;  %v185_v6 = vld [vmem:[#allocation7] ss:$2 sm:$0xff]  ;;  %v241_v14 = vld [vmem:[#allocation7 + $0x1] ss:$2 sm:$0xff]  ;;  %v308_v33 = vrot.slane %v303_v16, %v8749_v5  ;;  %v312_v34 = vrot.slane %v303_v16, %v8751_v7  ;;  %v316_v35 = vrot.slane %v303_v16, %v8753_v8  ;;  %v320_v36 = vrot.slane %v303_v16, %v8755_v9 }
  0xae   :  { %v195_v15 = vrot.slane %v185_v6, %v8749_v5  ;;  %v199_v17 = vrot.slane %v185_v6, %v8751_v7  ;;  %v203_v18 = vrot.slane %v185_v6, %v8753_v8  ;;  %v207_v19 = vrot.slane %v185_v6, %v8755_v9 }
  0xaf   :  { %v211_v20 = vrot.slane %v185_v6, %v8757_v10  ;;  %v215_v22 = vrot.slane %v185_v6, %v8759_v11  ;;  %v219_v23 = vrot.slane %v185_v6, %v8761_v12  ;;  %v223_v24 = vrot.slane %v185_v6, %v8763_v13 }
  0xb0   :  { %v250_v25 = vrot.slane %v241_v14, %v8749_v5  ;;  %v254_v26 = vrot.slane %v241_v14, %v8751_v7  ;;  %v258_v27 = vrot.slane %v241_v14, %v8753_v8  ;;  %v262_v28 = vrot.slane %v241_v14, %v8755_v9 }
  0xb1   :  { %8082 = vset.pattern.permute.xlu0 %v8530_v2  ;;  %v266_v29 = vrot.slane %v241_v14, %v8757_v10  ;;  %v270_v30 = vrot.slane %v241_v14, %v8759_v11  ;;  %v274_v31 = vrot.slane %v241_v14, %v8761_v12  ;;  %v278_v32 = vrot.slane %v241_v14, %v8763_v13 }
  0xb2   :  { %243 = vperm.xlu0 %8082, %v184_v1   ;;  %v324_v37 = vrot.slane %v303_v16, %v8757_v10  ;;  %v328_v41 = vrot.slane %v303_v16, %v8759_v11  ;;  %v332_v60 = vrot.slane %v303_v16, %v8761_v12  ;;  %v336_v3 = vrot.slane %v303_v16, %v8763_v13 }
 0x12c   :  { %v189_v21 = vpop.permute.xlu0 %188 }
 0x12d   :  { %v232_v38 = vmul.f32 %v195_v15, %v189_v21  ;;  %v233_v39 = vmul.f32 %v199_v17, %v189_v21  ;;  %v234_v40 = vmul.f32 %v203_v18, %v189_v21  ;;  %v235_v42 = vmul.f32 %v207_v19, %v189_v21 }
 0x12e   :  { %v236_v43 = vmul.f32 %v211_v20, %v189_v21  ;;  %v237_v44 = vmul.f32 %v215_v22, %v189_v21  ;;  %v238_v45 = vmul.f32 %v219_v23, %v189_v21  ;;  %v239_v59 = vmul.f32 %v223_v24, %v189_v21 }
 0x131   :  { %v244_v46 = vpop.permute.xlu0 %243 }
 0x132   :  { %v287_v47 = vmul.f32 %v250_v25, %v244_v46  ;;  %v288_v48 = vmul.f32 %v254_v26, %v244_v46  ;;  %v289_v49 = vmul.f32 %v258_v27, %v244_v46  ;;  %v290_v50 = vmul.f32 %v262_v28, %v244_v46 }
 0x133   :  { %v291_v51 = vmul.f32 %v266_v29, %v244_v46  ;;  %v292_v52 = vmul.f32 %v270_v30, %v244_v46  ;;  %v293_v53 = vmul.f32 %v274_v31, %v244_v46  ;;  %v294_v54 = vmul.f32 %v278_v32, %v244_v46 }
 0x134   :  { %v295_v55 = vadd.f32 %v287_v47, %v232_v38  ;;  %v296_v56 = vadd.f32 %v288_v48, %v233_v39  ;;  %v297_v57 = vadd.f32 %v289_v49, %v234_v40  ;;  %v298_v58 = vadd.f32 %v290_v50, %v235_v42 }
 0x135   :  { %v299_v61 = vadd.f32 %v291_v51, %v236_v43  ;;  %v300_v62 = vadd.f32 %v292_v52, %v237_v44  ;;  %v301_v63 = vadd.f32 %v293_v53, %v238_v45  ;;  %v302_v4 = vadd.f32 %v294_v54, %v239_v59 }
 0x136   :  { %v345_v0 = vadd.f32 %v308_v33, %v295_v55  ;;  %v346_v1 = vadd.f32 %v312_v34, %v296_v56  ;;  %v347_v2 = vadd.f32 %v316_v35, %v297_v57  ;;  %v348_v6 = vadd.f32 %v320_v36, %v298_v58 }
 0x137   :  { %v349_v14 = vadd.f32 %v324_v37, %v299_v61  ;;  %v350_v15 = vadd.f32 %v328_v41, %v300_v62  ;;  %v8789_v17 = vadd.f32 %v332_v60, %v301_v63  ;;  %v8791_v21 = vadd.f32 %v336_v3, %v302_v4 }
 0x138   :  { %v361_v18 = vmul.f32 1.442695, %v345_v0  ;;  %v363_v19 = vmul.f32 1.442695, %v346_v1  ;;  %v365_v20 = vmul.f32 1.442695, %v347_v2 }
 0x139   :  { %v367_v22 = vmul.f32 1.442695, %v348_v6  ;;  %v369_v23 = vmul.f32 1.442695, %v349_v14  ;;  %v371_v24 = vmul.f32 1.442695, %v350_v15 }
 0x13a   :  { %8083 = vpow2.f32 %v361_v18  ;;  %v373_v25 = vmul.f32 1.442695, %v8789_v17  ;;  %v375_v16 = vmul.f32 1.442695, %v8791_v21  ;;  %vm353_vm0 = vcmp.gt.f32.partialorder %v345_v0, 0.0 }
 0x13b   :  { %8085 = vpow2.f32 %v363_v19  ;;  %vm354_vm1 = vcmp.gt.f32.partialorder %v346_v1, 0.0  ;;  %vm355_vm2 = vcmp.gt.f32.partialorder %v347_v2, 0.0  ;;  %vm356_vm3 = vcmp.gt.f32.partialorder %v348_v6, 0.0 }
 0x13c   :  { %8087 = vpow2.f32 %v365_v20  ;;  %vm357_vm4 = vcmp.gt.f32.partialorder %v349_v14, 0.0  ;;  %vm358_vm5 = vcmp.gt.f32.partialorder %v350_v15, 0.0  ;;  %vm359_vm6 = vcmp.gt.f32.partialorder %v8789_v17, 0.0 }
 0x13d   :  { %8089 = vpow2.f32 %v367_v22  ;;  %vm360_vm7 = vcmp.gt.f32.partialorder %v8791_v21, 0.0 }
 0x13e   :  { %8091 = vpow2.f32 %v369_v23 }
 0x13f   :  { %8093 = vpow2.f32 %v371_v24 }
 0x140   :  { %8095 = vpow2.f32 %v373_v25 }
 0x141   :  { %8097 = vpow2.f32 %v375_v16 }
 0x144   :  { %v8084_v26 = vpop.eup %8083 }
 0x145   :  { %v8086_v27 = vpop.eup %8085  ;;  %v7843_v28 = vadd.f32 -1.0, %v8084_v26 }
 0x146   :  { %v8088_v29 = vpop.eup %8087  ;;  %v7844_v30 = vadd.f32 -1.0, %v8086_v27 }
 0x147   :  { %v8090_v31 = vpop.eup %8089  ;;  %v7845_v32 = vadd.f32 -1.0, %v8088_v29  ;;  %v385_v33 = vmul.f32 1.6732632, %v7843_v28 }
 0x148   :  { %v8092_v34 = vpop.eup %8091  ;;  %v7846_v35 = vadd.f32 -1.0, %v8090_v31  ;;  %v386_v36 = vmul.f32 1.6732632, %v7844_v30 }
 0x149   :  { %v8094_v37 = vpop.eup %8093  ;;  %v7847_v38 = vadd.f32 -1.0, %v8092_v34  ;;  %v387_v39 = vmul.f32 1.6732632, %v7845_v32  ;;  %v393_v40 = vsel %vm353_vm0, %v345_v0, %v385_v33 }
 0x14a   :  { %v8096_v41 = vpop.eup %8095  ;;  %v7848_v42 = vadd.f32 -1.0, %v8094_v37  ;;  %v388_v43 = vmul.f32 1.6732632, %v7846_v35  ;;  %v394_v44 = vsel %vm354_vm1, %v346_v1, %v386_v36  ;;  %v401_v45 = vmul.f32 1.050701, %v393_v40 }
 0x14b   :  { %v8098_v46 = vpop.eup %8097  ;;  %v7849_v47 = vadd.f32 -1.0, %v8096_v41  ;;  %v389_v48 = vmul.f32 1.6732632, %v7847_v38  ;;  %v395_v49 = vsel %vm355_vm2, %v347_v2, %v387_v39  ;;  %v402_v50 = vmul.f32 1.050701, %v394_v44 }
 0x14c   :  { %v7850_v51 = vadd.f32 -1.0, %v8098_v46  ;;  %v390_v52 = vmul.f32 1.6732632, %v7848_v42  ;;  %v396_v53 = vsel %vm356_vm3, %v348_v6, %v388_v43  ;;  %v403_v54 = vmul.f32 1.050701, %v395_v49 }
 0x14d   :  { %v391_v55 = vmul.f32 1.6732632, %v7849_v47  ;;  %v397_v56 = vsel %vm357_vm4, %v349_v14, %v389_v48  ;;  %v404_v57 = vmul.f32 1.050701, %v396_v53  ;;  %v8802_v58 = vpack.c.bf16 %v401_v45, %v401_v45 }
 0x14e   :  { %v392_v59 = vmul.f32 1.6732632, %v7850_v51  ;;  %v398_v60 = vsel %vm358_vm5, %v350_v15, %v390_v52  ;;  %v405_v61 = vmul.f32 1.050701, %v397_v56  ;;  %v8805_v62 = vpack.c.bf16 %v402_v50, %v402_v50 }
 0x14f   :  { %v399_v63 = vsel %vm359_vm6, %v8789_v17, %v391_v55  ;;  %v406_v0 = vmul.f32 1.050701, %v398_v60  ;;  %v8810_v1 = vpack.c.bf16 %v403_v54, %v403_v54  ;;  %v8812_v2 = vpack.c.bf16 %v404_v57, %v404_v57 }
 0x150   :  { %v400_v3 = vsel %vm360_vm7, %v8791_v21, %v392_v59  ;;  %v407_v4 = vmul.f32 1.050701, %v399_v63  ;;  %v8817_v6 = vpack.c.bf16 %v405_v61, %v405_v61 }
 0x151   :  { %v408_v14 = vmul.f32 1.050701, %v400_v3  ;;  %v8819_v15 = vpack.c.bf16 %v406_v0, %v406_v0 }
 0x152   :  { %v8821_v18 = vpack.c.bf16 %v407_v4, %v407_v4 }
 0x153   :  { %v8823_v19 = vpack.c.bf16 %v408_v14, %v408_v14 }
 0x154   :  { %8487 = dma.done.wait [#allocation3], 32768 }
 0x155   :  { %8488 = vsyncadd [#allocation3], 4294934528  ;;  %746 = vmatprep.mubr.bf16.mxu0 %v8805_v62  ;;  %787 = vmatprep.mubr.bf16.mxu1 %v8812_v2  ;;  %439 = sst [smem:[#allocation25]] %s8520_s25  ;;  %s8531_s0 = smov [#allocation2 + $0x800]  }
 0x156   :  { %441 = sst [smem:[#allocation25 + $0x1]] %s8520_s25  ;;  %s435_s9 = sshll.u32 %s8531_s0, 4  ;;  %s8835_s9 = int_to_ptr.vmem [resolvable:$true] %s435_s9 }
 0x157   :  { %443 = sst [smem:[#allocation25 + $0x2]] %s8522_s26  ;;  %s421_s21 = scalar_lea.hbm %s9639_s2, 32768 }
 0x158   :  { %445 = sst [smem:[#allocation25 + $0x3]] %s8523_s11  ;;  %s8532_s4 = smov [#allocation3 + $0x1]  }
 0x159   :  { %447 = sst [smem:[#allocation25 + $0x4]] %s8524_s7  ;;  %s8533_s8 = smov [#allocation24]  }
 0x15a   :  { %449 = sst [smem:[#allocation25 + $0x5]] %s8525_s22 }
 0x15b   :  { %451 = sst [smem:[#allocation25 + $0x6]] %s8526_s29 }
 0x15c   :  { %453 = sst [smem:[#allocation25 + $0x7]] %s8523_s11 }
 0x15d   :  { %455 = sst [smem:[#allocation25 + $0x8]] %s8522_s26 }
 0x15e   :  { %457 = dma.general %s421_s21, 32768, %s8835_s9, %s8532_s4, %s8533_s8, [#allocation25], %s8734_s1, 0  }
 0x15f   :  { %v459_v17 = vld [vmem:[#allocation2 + $0x8] sm:$0xff]  ;;  %v458_v21 = vld [vmem:[#allocation2] sm:$0xff] }
 0x160   :  { %v523_v20 = vld [vmem:[#allocation2 + $0x208] sm:$0xff]  ;;  %714 = vmatprep.subr.bf16.mxu0 %v459_v17  ;;  %v522_v22 = vld [vmem:[#allocation2 + $0x200] sm:$0xff] }
 0x161   :  { %755 = vmatprep.subr.bf16.mxu1 %v523_v20  ;;  %v463_v23 = vld [vmem:[#allocation2 + $0x28] sm:$0xff]  ;;  %715 = vmatpush1.bf16.msra.mxu0 %v458_v21  ;;  %v462_v25 = vld [vmem:[#allocation2 + $0x20] sm:$0xff] }
 0x162   :  { %v527_v24 = vld [vmem:[#allocation2 + $0x228] sm:$0xff]  ;;  %756 = vmatpush1.bf16.msra.mxu1 %v522_v22  ;;  %716 = vmatprep.subr.bf16.mxu0 %v463_v23  ;;  %v526_v16 = vld [vmem:[#allocation2 + $0x220] sm:$0xff] }
 0x163   :  { %757 = vmatprep.subr.bf16.mxu1 %v527_v24  ;;  %v467_v26 = vld [vmem:[#allocation2 + $0x48] sm:$0xff]  ;;  %v466_v28 = vld [vmem:[#allocation2 + $0x40] sm:$0xff] }
 0x164   :  { %v531_v27 = vld [vmem:[#allocation2 + $0x248] sm:$0xff]  ;;  %v530_v29 = vld [vmem:[#allocation2 + $0x240] sm:$0xff] }
 0x165   :  { %717 = vmatpush1.bf16.msra.mxu0 %v462_v25  ;;  %v471_v30 = vld [vmem:[#allocation2 + $0x68] sm:$0xff]  ;;  %v470_v32 = vld [vmem:[#allocation2 + $0x60] sm:$0xff] }
 0x166   :  { %758 = vmatpush1.bf16.msra.mxu1 %v526_v16  ;;  %718 = vmatprep.subr.bf16.mxu0 %v467_v26  ;;  %v535_v31 = vld [vmem:[#allocation2 + $0x268] sm:$0xff]  ;;  %v534_v33 = vld [vmem:[#allocation2 + $0x260] sm:$0xff] }
 0x167   :  { %759 = vmatprep.subr.bf16.mxu1 %v531_v27  ;;  %v475_v34 = vld [vmem:[#allocation2 + $0x88] sm:$0xff]  ;;  %v474_v36 = vld [vmem:[#allocation2 + $0x80] sm:$0xff] }
 0x168   :  { %v539_v35 = vld [vmem:[#allocation2 + $0x288] sm:$0xff]  ;;  %v538_v37 = vld [vmem:[#allocation2 + $0x280] sm:$0xff] }
 0x169   :  { %719 = vmatpush1.bf16.msra.mxu0 %v466_v28  ;;  %v479_v38 = vld [vmem:[#allocation2 + $0xa8] sm:$0xff]  ;;  %v478_v40 = vld [vmem:[#allocation2 + $0xa0] sm:$0xff] }
 0x16a   :  { %760 = vmatpush1.bf16.msra.mxu1 %v530_v29  ;;  %720 = vmatprep.subr.bf16.mxu0 %v471_v30  ;;  %v543_v39 = vld [vmem:[#allocation2 + $0x2a8] sm:$0xff]  ;;  %v542_v41 = vld [vmem:[#allocation2 + $0x2a0] sm:$0xff] }
 0x16b   :  { %761 = vmatprep.subr.bf16.mxu1 %v535_v31  ;;  %v483_v42 = vld [vmem:[#allocation2 + $0xc8] sm:$0xff]  ;;  %v482_v44 = vld [vmem:[#allocation2 + $0xc0] sm:$0xff] }
 0x16c   :  { %v547_v43 = vld [vmem:[#allocation2 + $0x2c8] sm:$0xff]  ;;  %v546_v45 = vld [vmem:[#allocation2 + $0x2c0] sm:$0xff] }
 0x16d   :  { %721 = vmatpush1.bf16.msra.mxu0 %v470_v32  ;;  %v487_v46 = vld [vmem:[#allocation2 + $0xe8] sm:$0xff]  ;;  %v486_v48 = vld [vmem:[#allocation2 + $0xe0] sm:$0xff] }
 0x16e   :  { %762 = vmatpush1.bf16.msra.mxu1 %v534_v33  ;;  %722 = vmatprep.subr.bf16.mxu0 %v475_v34  ;;  %v551_v47 = vld [vmem:[#allocation2 + $0x2e8] sm:$0xff]  ;;  %v550_v49 = vld [vmem:[#allocation2 + $0x2e0] sm:$0xff] }
 0x16f   :  { %763 = vmatprep.subr.bf16.mxu1 %v539_v35  ;;  %v491_v50 = vld [vmem:[#allocation2 + $0x108] sm:$0xff]  ;;  %v490_v52 = vld [vmem:[#allocation2 + $0x100] sm:$0xff] }
 0x170   :  { %v555_v51 = vld [vmem:[#allocation2 + $0x308] sm:$0xff]  ;;  %v554_v53 = vld [vmem:[#allocation2 + $0x300] sm:$0xff] }
 0x171   :  { %723 = vmatpush1.bf16.msra.mxu0 %v474_v36  ;;  %v495_v54 = vld [vmem:[#allocation2 + $0x128] sm:$0xff]  ;;  %v494_v56 = vld [vmem:[#allocation2 + $0x120] sm:$0xff] }
 0x172   :  { %764 = vmatpush1.bf16.msra.mxu1 %v538_v37  ;;  %724 = vmatprep.subr.bf16.mxu0 %v479_v38  ;;  %v559_v55 = vld [vmem:[#allocation2 + $0x328] sm:$0xff]  ;;  %v558_v57 = vld [vmem:[#allocation2 + $0x320] sm:$0xff] }
 0x173   :  { %765 = vmatprep.subr.bf16.mxu1 %v543_v39  ;;  %v499_v59 = vld [vmem:[#allocation2 + $0x148] sm:$0xff]  ;;  %v498_v61 = vld [vmem:[#allocation2 + $0x140] sm:$0xff] }
 0x174   :  { %v563_v60 = vld [vmem:[#allocation2 + $0x348] sm:$0xff]  ;;  %v562_v63 = vld [vmem:[#allocation2 + $0x340] sm:$0xff] }
 0x175   :  { %725 = vmatpush1.bf16.msra.mxu0 %v478_v40  ;;  %v503_v0 = vld [vmem:[#allocation2 + $0x168] sm:$0xff]  ;;  %v502_v4 = vld [vmem:[#allocation2 + $0x160] sm:$0xff] }
 0x176   :  { %766 = vmatpush1.bf16.msra.mxu1 %v542_v41  ;;  %726 = vmatprep.subr.bf16.mxu0 %v483_v42  ;;  %v567_v3 = vld [vmem:[#allocation2 + $0x368] sm:$0xff]  ;;  %v566_v14 = vld [vmem:[#allocation2 + $0x360] sm:$0xff] }
 0x177   :  { %767 = vmatprep.subr.bf16.mxu1 %v547_v43  ;;  %v507_v17 = vld [vmem:[#allocation2 + $0x188] sm:$0xff]  ;;  %v506_v21 = vld [vmem:[#allocation2 + $0x180] sm:$0xff] }
 0x178   :  { %v571_v20 = vld [vmem:[#allocation2 + $0x388] sm:$0xff]  ;;  %v570_v22 = vld [vmem:[#allocation2 + $0x380] sm:$0xff] }
 0x179   :  { %727 = vmatpush1.bf16.msra.mxu0 %v482_v44  ;;  %v511_v23 = vld [vmem:[#allocation2 + $0x1a8] sm:$0xff]  ;;  %v510_v25 = vld [vmem:[#allocation2 + $0x1a0] sm:$0xff] }
 0x17a   :  { %768 = vmatpush1.bf16.msra.mxu1 %v546_v45  ;;  %728 = vmatprep.subr.bf16.mxu0 %v487_v46  ;;  %v575_v24 = vld [vmem:[#allocation2 + $0x3a8] sm:$0xff]  ;;  %v574_v16 = vld [vmem:[#allocation2 + $0x3a0] sm:$0xff] }
 0x17b   :  { %769 = vmatprep.subr.bf16.mxu1 %v551_v47  ;;  %v515_v26 = vld [vmem:[#allocation2 + $0x1c8] sm:$0xff]  ;;  %v514_v28 = vld [vmem:[#allocation2 + $0x1c0] sm:$0xff] }
 0x17c   :  { %v579_v27 = vld [vmem:[#allocation2 + $0x3c8] sm:$0xff]  ;;  %v578_v29 = vld [vmem:[#allocation2 + $0x3c0] sm:$0xff] }
 0x17d   :  { %729 = vmatpush1.bf16.msra.mxu0 %v486_v48  ;;  %v519_v30 = vld [vmem:[#allocation2 + $0x1e8] sm:$0xff]  ;;  %v518_v32 = vld [vmem:[#allocation2 + $0x1e0] sm:$0xff] }
 0x17e   :  { %770 = vmatpush1.bf16.msra.mxu1 %v550_v49  ;;  %730 = vmatprep.subr.bf16.mxu0 %v491_v50  ;;  %v583_v31 = vld [vmem:[#allocation2 + $0x3e8] sm:$0xff]  ;;  %v582_v33 = vld [vmem:[#allocation2 + $0x3e0] sm:$0xff] }
 0x17f   :  { %771 = vmatprep.subr.bf16.mxu1 %v555_v51  ;;  %v587_v34 = vld [vmem:[#allocation2 + $0x408] sm:$0xff]  ;;  %v586_v36 = vld [vmem:[#allocation2 + $0x400] sm:$0xff] }
 0x180   :  { %v651_v35 = vld [vmem:[#allocation2 + $0x608] sm:$0xff]  ;;  %v650_v37 = vld [vmem:[#allocation2 + $0x600] sm:$0xff] }
 0x181   :  { %731 = vmatpush1.bf16.msra.mxu0 %v490_v52  ;;  %v591_v38 = vld [vmem:[#allocation2 + $0x428] sm:$0xff]  ;;  %v590_v40 = vld [vmem:[#allocation2 + $0x420] sm:$0xff] }
 0x182   :  { %772 = vmatpush1.bf16.msra.mxu1 %v554_v53  ;;  %732 = vmatprep.subr.bf16.mxu0 %v495_v54  ;;  %v655_v39 = vld [vmem:[#allocation2 + $0x628] sm:$0xff]  ;;  %v654_v41 = vld [vmem:[#allocation2 + $0x620] sm:$0xff] }
 0x183   :  { %773 = vmatprep.subr.bf16.mxu1 %v559_v55  ;;  %v595_v42 = vld [vmem:[#allocation2 + $0x448] sm:$0xff]  ;;  %v594_v44 = vld [vmem:[#allocation2 + $0x440] sm:$0xff] }
 0x184   :  { %v659_v43 = vld [vmem:[#allocation2 + $0x648] sm:$0xff]  ;;  %v658_v45 = vld [vmem:[#allocation2 + $0x640] sm:$0xff] }
 0x185   :  { %733 = vmatpush1.bf16.msra.mxu0 %v494_v56  ;;  %v599_v46 = vld [vmem:[#allocation2 + $0x468] sm:$0xff]  ;;  %v598_v48 = vld [vmem:[#allocation2 + $0x460] sm:$0xff] }
 0x186   :  { %774 = vmatpush1.bf16.msra.mxu1 %v558_v57  ;;  %734 = vmatprep.subr.bf16.mxu0 %v499_v59  ;;  %v663_v47 = vld [vmem:[#allocation2 + $0x668] sm:$0xff]  ;;  %v662_v49 = vld [vmem:[#allocation2 + $0x660] sm:$0xff] }
 0x187   :  { %775 = vmatprep.subr.bf16.mxu1 %v563_v60  ;;  %v603_v50 = vld [vmem:[#allocation2 + $0x488] sm:$0xff]  ;;  %v602_v52 = vld [vmem:[#allocation2 + $0x480] sm:$0xff] }
 0x188   :  { %v667_v51 = vld [vmem:[#allocation2 + $0x688] sm:$0xff]  ;;  %v666_v53 = vld [vmem:[#allocation2 + $0x680] sm:$0xff] }
 0x189   :  { %735 = vmatpush1.bf16.msra.mxu0 %v498_v61  ;;  %v607_v54 = vld [vmem:[#allocation2 + $0x4a8] sm:$0xff]  ;;  %v606_v56 = vld [vmem:[#allocation2 + $0x4a0] sm:$0xff] }
 0x18a   :  { %776 = vmatpush1.bf16.msra.mxu1 %v562_v63  ;;  %736 = vmatprep.subr.bf16.mxu0 %v503_v0  ;;  %v671_v55 = vld [vmem:[#allocation2 + $0x6a8] sm:$0xff]  ;;  %v670_v57 = vld [vmem:[#allocation2 + $0x6a0] sm:$0xff] }
 0x18b   :  { %777 = vmatprep.subr.bf16.mxu1 %v567_v3  ;;  %v611_v59 = vld [vmem:[#allocation2 + $0x4c8] sm:$0xff]  ;;  %v610_v61 = vld [vmem:[#allocation2 + $0x4c0] sm:$0xff] }
 0x18c   :  { %v675_v60 = vld [vmem:[#allocation2 + $0x6c8] sm:$0xff]  ;;  %v674_v63 = vld [vmem:[#allocation2 + $0x6c0] sm:$0xff] }
 0x18d   :  { %737 = vmatpush1.bf16.msra.mxu0 %v502_v4  ;;  %v615_v0 = vld [vmem:[#allocation2 + $0x4e8] sm:$0xff]  ;;  %v614_v4 = vld [vmem:[#allocation2 + $0x4e0] sm:$0xff] }
 0x18e   :  { %778 = vmatpush1.bf16.msra.mxu1 %v566_v14  ;;  %738 = vmatprep.subr.bf16.mxu0 %v507_v17  ;;  %v679_v3 = vld [vmem:[#allocation2 + $0x6e8] sm:$0xff]  ;;  %v678_v14 = vld [vmem:[#allocation2 + $0x6e0] sm:$0xff] }
 0x18f   :  { %779 = vmatprep.subr.bf16.mxu1 %v571_v20  ;;  %v619_v17 = vld [vmem:[#allocation2 + $0x508] sm:$0xff] }
 0x190   :  { %v683_v20 = vld [vmem:[#allocation2 + $0x708] sm:$0xff] }
 0x191   :  { %739 = vmatpush1.bf16.msra.mxu0 %v506_v21  ;;  %v618_v21 = vld [vmem:[#allocation2 + $0x500] sm:$0xff] }
 0x192   :  { %780 = vmatpush1.bf16.msra.mxu1 %v570_v22  ;;  %740 = vmatprep.subr.bf16.mxu0 %v511_v23  ;;  %v682_v22 = vld [vmem:[#allocation2 + $0x700] sm:$0xff]  ;;  %v623_v23 = vld [vmem:[#allocation2 + $0x528] sm:$0xff] }
 0x193   :  { %781 = vmatprep.subr.bf16.mxu1 %v575_v24  ;;  %v687_v24 = vld [vmem:[#allocation2 + $0x728] sm:$0xff] }
 0x195   :  { %741 = vmatpush1.bf16.msra.mxu0 %v510_v25  ;;  %v622_v25 = vld [vmem:[#allocation2 + $0x520] sm:$0xff] }
 0x196   :  { %782 = vmatpush1.bf16.msra.mxu1 %v574_v16  ;;  %742 = vmatprep.subr.bf16.mxu0 %v515_v26  ;;  %v686_v16 = vld [vmem:[#allocation2 + $0x720] sm:$0xff]  ;;  %v627_v26 = vld [vmem:[#allocation2 + $0x548] sm:$0xff] }
 0x197   :  { %783 = vmatprep.subr.bf16.mxu1 %v579_v27  ;;  %v691_v27 = vld [vmem:[#allocation2 + $0x748] sm:$0xff] }
 0x199   :  { %743 = vmatpush1.bf16.msra.mxu0 %v514_v28  ;;  %v626_v28 = vld [vmem:[#allocation2 + $0x540] sm:$0xff] }
 0x19a   :  { %784 = vmatpush1.bf16.msra.mxu1 %v578_v29  ;;  %744 = vmatprep.subr.bf16.mxu0 %v519_v30  ;;  %v690_v29 = vld [vmem:[#allocation2 + $0x740] sm:$0xff]  ;;  %v631_v30 = vld [vmem:[#allocation2 + $0x568] sm:$0xff] }
 0x19b   :  { %785 = vmatprep.subr.bf16.mxu1 %v583_v31  ;;  %v695_v31 = vld [vmem:[#allocation2 + $0x768] sm:$0xff] }
 0x19d   :  { %745 = vmatpush1.bf16.msra.mxu0 %v518_v32  ;;  %v630_v32 = vld [vmem:[#allocation2 + $0x560] sm:$0xff] }
 0x19e   :  { %786 = vmatpush1.bf16.msra.mxu1 %v582_v33  ;;  %796 = vmatprep.subr.bf16.mxu0 %v587_v34  ;;  %v694_v33 = vld [vmem:[#allocation2 + $0x760] sm:$0xff]  ;;  %v635_v34 = vld [vmem:[#allocation2 + $0x588] sm:$0xff] }
 0x19f   :  { %837 = vmatprep.subr.bf16.mxu1 %v651_v35  ;;  %v699_v35 = vld [vmem:[#allocation2 + $0x788] sm:$0xff] }
 0x1a0   :  { %747 = vmatmul.mubr.bf16.vlgmr.msra.gmra.mrb[0].mxu0 %v8802_v58 }
 0x1a1   :  { %788 = vmatmul.mubr.bf16.vlgmr.msra.gmra.mrb[0].mxu1 %v8810_v1  ;;  %797 = vmatpush1.bf16.msra.mxu0 %v586_v36  ;;  %v634_v36 = vld [vmem:[#allocation2 + $0x580] sm:$0xff] }
 0x1a2   :  { %838 = vmatpush1.bf16.msra.mxu1 %v650_v37  ;;  %798 = vmatprep.subr.bf16.mxu0 %v591_v38  ;;  %v698_v37 = vld [vmem:[#allocation2 + $0x780] sm:$0xff]  ;;  %v639_v38 = vld [vmem:[#allocation2 + $0x5a8] sm:$0xff] }
 0x1a3   :  { %839 = vmatprep.subr.bf16.mxu1 %v655_v39  ;;  %828 = vmatprep.mubr.bf16.mxu0 %v8819_v15  ;;  %v703_v39 = vld [vmem:[#allocation2 + $0x7a8] sm:$0xff] }
 0x1a4   :  { %869 = vmatprep.mubr.bf16.mxu1 %v8823_v19 }
 0x1a5   :  { %799 = vmatpush1.bf16.msra.mxu0 %v590_v40  ;;  %v638_v40 = vld [vmem:[#allocation2 + $0x5a0] sm:$0xff] }
 0x1a6   :  { %840 = vmatpush1.bf16.msra.mxu1 %v654_v41  ;;  %800 = vmatprep.subr.bf16.mxu0 %v595_v42  ;;  %v702_v41 = vld [vmem:[#allocation2 + $0x7a0] sm:$0xff]  ;;  %v643_v42 = vld [vmem:[#allocation2 + $0x5c8] sm:$0xff] }
 0x1a7   :  { %841 = vmatprep.subr.bf16.mxu1 %v659_v43  ;;  %v707_v43 = vld [vmem:[#allocation2 + $0x7c8] sm:$0xff] }
 0x1a9   :  { %801 = vmatpush1.bf16.msra.mxu0 %v594_v44  ;;  %v642_v44 = vld [vmem:[#allocation2 + $0x5c0] sm:$0xff] }
 0x1aa   :  { %842 = vmatpush1.bf16.msra.mxu1 %v658_v45  ;;  %802 = vmatprep.subr.bf16.mxu0 %v599_v46  ;;  %v706_v45 = vld [vmem:[#allocation2 + $0x7c0] sm:$0xff]  ;;  %v647_v46 = vld [vmem:[#allocation2 + $0x5e8] sm:$0xff] }
 0x1ab   :  { %843 = vmatprep.subr.bf16.mxu1 %v663_v47  ;;  %v711_v47 = vld [vmem:[#allocation2 + $0x7e8] sm:$0xff] }
 0x1ad   :  { %803 = vmatpush1.bf16.msra.mxu0 %v598_v48  ;;  %v646_v48 = vld [vmem:[#allocation2 + $0x5e0] sm:$0xff] }
 0x1ae   :  { %844 = vmatpush1.bf16.msra.mxu1 %v662_v49  ;;  %804 = vmatprep.subr.bf16.mxu0 %v603_v50  ;;  %v710_v49 = vld [vmem:[#allocation2 + $0x7e0] sm:$0xff]  ;;  %v461_v50 = vld [vmem:[#allocation2 + $0x18] sm:$0xff] }
 0x1af   :  { %845 = vmatprep.subr.bf16.mxu1 %v667_v51  ;;  %v525_v51 = vld [vmem:[#allocation2 + $0x218] sm:$0xff] }
 0x1b1   :  { %805 = vmatpush1.bf16.msra.mxu0 %v602_v52  ;;  %v460_v52 = vld [vmem:[#allocation2 + $0x10] sm:$0xff] }
 0x1b2   :  { %846 = vmatpush1.bf16.msra.mxu1 %v666_v53  ;;  %806 = vmatprep.subr.bf16.mxu0 %v607_v54  ;;  %v524_v53 = vld [vmem:[#allocation2 + $0x210] sm:$0xff]  ;;  %v465_v54 = vld [vmem:[#allocation2 + $0x38] sm:$0xff] }
 0x1b3   :  { %847 = vmatprep.subr.bf16.mxu1 %v671_v55  ;;  %v529_v55 = vld [vmem:[#allocation2 + $0x238] sm:$0xff] }
 0x1b5   :  { %807 = vmatpush1.bf16.msra.mxu0 %v606_v56  ;;  %v464_v56 = vld [vmem:[#allocation2 + $0x30] sm:$0xff] }
 0x1b6   :  { %848 = vmatpush1.bf16.msra.mxu1 %v670_v57  ;;  %808 = vmatprep.subr.bf16.mxu0 %v611_v59  ;;  %v528_v57 = vld [vmem:[#allocation2 + $0x230] sm:$0xff]  ;;  %v469_v59 = vld [vmem:[#allocation2 + $0x58] sm:$0xff] }
 0x1b7   :  { %849 = vmatprep.subr.bf16.mxu1 %v675_v60  ;;  %v533_v60 = vld [vmem:[#allocation2 + $0x258] sm:$0xff] }
 0x1b9   :  { %809 = vmatpush1.bf16.msra.mxu0 %v610_v61  ;;  %v468_v61 = vld [vmem:[#allocation2 + $0x50] sm:$0xff] }
 0x1ba   :  { %850 = vmatpush1.bf16.msra.mxu1 %v674_v63  ;;  %810 = vmatprep.subr.bf16.mxu0 %v615_v0  ;;  %v532_v63 = vld [vmem:[#allocation2 + $0x250] sm:$0xff]  ;;  %v473_v0 = vld [vmem:[#allocation2 + $0x78] sm:$0xff] }
 0x1bb   :  { %851 = vmatprep.subr.bf16.mxu1 %v679_v3  ;;  %v537_v3 = vld [vmem:[#allocation2 + $0x278] sm:$0xff] }
 0x1bd   :  { %811 = vmatpush1.bf16.msra.mxu0 %v614_v4  ;;  %v472_v4 = vld [vmem:[#allocation2 + $0x70] sm:$0xff] }
 0x1be   :  { %852 = vmatpush1.bf16.msra.mxu1 %v678_v14  ;;  %812 = vmatprep.subr.bf16.mxu0 %v619_v17  ;;  %v536_v14 = vld [vmem:[#allocation2 + $0x270] sm:$0xff]  ;;  %v477_v17 = vld [vmem:[#allocation2 + $0x98] sm:$0xff] }
 0x1bf   :  { %853 = vmatprep.subr.bf16.mxu1 %v683_v20  ;;  %v541_v20 = vld [vmem:[#allocation2 + $0x298] sm:$0xff] }
 0x1c1   :  { %813 = vmatpush1.bf16.msra.mxu0 %v618_v21  ;;  %v476_v21 = vld [vmem:[#allocation2 + $0x90] sm:$0xff] }
 0x1c2   :  { %854 = vmatpush1.bf16.msra.mxu1 %v682_v22  ;;  %814 = vmatprep.subr.bf16.mxu0 %v623_v23  ;;  %v540_v22 = vld [vmem:[#allocation2 + $0x290] sm:$0xff]  ;;  %v481_v23 = vld [vmem:[#allocation2 + $0xb8] sm:$0xff] }
 0x1c3   :  { %855 = vmatprep.subr.bf16.mxu1 %v687_v24  ;;  %v545_v24 = vld [vmem:[#allocation2 + $0x2b8] sm:$0xff] }
 0x1c5   :  { %815 = vmatpush1.bf16.msra.mxu0 %v622_v25  ;;  %v480_v25 = vld [vmem:[#allocation2 + $0xb0] sm:$0xff] }
 0x1c6   :  { %856 = vmatpush1.bf16.msra.mxu1 %v686_v16  ;;  %816 = vmatprep.subr.bf16.mxu0 %v627_v26  ;;  %v544_v16 = vld [vmem:[#allocation2 + $0x2b0] sm:$0xff]  ;;  %v485_v26 = vld [vmem:[#allocation2 + $0xd8] sm:$0xff] }
 0x1c7   :  { %857 = vmatprep.subr.bf16.mxu1 %v691_v27  ;;  %v549_v27 = vld [vmem:[#allocation2 + $0x2d8] sm:$0xff] }
 0x1c9   :  { %817 = vmatpush1.bf16.msra.mxu0 %v626_v28  ;;  %v484_v28 = vld [vmem:[#allocation2 + $0xd0] sm:$0xff] }
 0x1ca   :  { %858 = vmatpush1.bf16.msra.mxu1 %v690_v29  ;;  %818 = vmatprep.subr.bf16.mxu0 %v631_v30  ;;  %v548_v29 = vld [vmem:[#allocation2 + $0x2d0] sm:$0xff]  ;;  %v489_v30 = vld [vmem:[#allocation2 + $0xf8] sm:$0xff] }
 0x1cb   :  { %859 = vmatprep.subr.bf16.mxu1 %v695_v31  ;;  %v553_v31 = vld [vmem:[#allocation2 + $0x2f8] sm:$0xff] }
 0x1cd   :  { %819 = vmatpush1.bf16.msra.mxu0 %v630_v32  ;;  %v488_v32 = vld [vmem:[#allocation2 + $0xf0] sm:$0xff] }
 0x1ce   :  { %860 = vmatpush1.bf16.msra.mxu1 %v694_v33  ;;  %820 = vmatprep.subr.bf16.mxu0 %v635_v34  ;;  %v552_v33 = vld [vmem:[#allocation2 + $0x2f0] sm:$0xff]  ;;  %v493_v34 = vld [vmem:[#allocation2 + $0x118] sm:$0xff] }
 0x1cf   :  { %861 = vmatprep.subr.bf16.mxu1 %v699_v35  ;;  %v557_v35 = vld [vmem:[#allocation2 + $0x318] sm:$0xff] }
 0x1d1   :  { %821 = vmatpush1.bf16.msra.mxu0 %v634_v36  ;;  %v492_v36 = vld [vmem:[#allocation2 + $0x110] sm:$0xff] }
 0x1d2   :  { %862 = vmatpush1.bf16.msra.mxu1 %v698_v37  ;;  %822 = vmatprep.subr.bf16.mxu0 %v639_v38  ;;  %v556_v37 = vld [vmem:[#allocation2 + $0x310] sm:$0xff]  ;;  %v497_v38 = vld [vmem:[#allocation2 + $0x138] sm:$0xff] }
 0x1d3   :  { %863 = vmatprep.subr.bf16.mxu1 %v703_v39  ;;  %v561_v39 = vld [vmem:[#allocation2 + $0x338] sm:$0xff] }
 0x1d5   :  { %823 = vmatpush1.bf16.msra.mxu0 %v638_v40  ;;  %v496_v40 = vld [vmem:[#allocation2 + $0x130] sm:$0xff] }
 0x1d6   :  { %864 = vmatpush1.bf16.msra.mxu1 %v702_v41  ;;  %824 = vmatprep.subr.bf16.mxu0 %v643_v42  ;;  %v560_v41 = vld [vmem:[#allocation2 + $0x330] sm:$0xff]  ;;  %v501_v42 = vld [vmem:[#allocation2 + $0x158] sm:$0xff] }
 0x1d7   :  { %865 = vmatprep.subr.bf16.mxu1 %v707_v43  ;;  %v565_v43 = vld [vmem:[#allocation2 + $0x358] sm:$0xff] }
 0x1d9   :  { %825 = vmatpush1.bf16.msra.mxu0 %v642_v44  ;;  %v500_v44 = vld [vmem:[#allocation2 + $0x150] sm:$0xff] }
 0x1da   :  { %866 = vmatpush1.bf16.msra.mxu1 %v706_v45  ;;  %826 = vmatprep.subr.bf16.mxu0 %v647_v46  ;;  %v564_v45 = vld [vmem:[#allocation2 + $0x350] sm:$0xff]  ;;  %v505_v46 = vld [vmem:[#allocation2 + $0x178] sm:$0xff] }
 0x1db   :  { %867 = vmatprep.subr.bf16.mxu1 %v711_v47  ;;  %v569_v47 = vld [vmem:[#allocation2 + $0x378] sm:$0xff] }
 0x1dd   :  { %827 = vmatpush1.bf16.msra.mxu0 %v646_v48  ;;  %v504_v48 = vld [vmem:[#allocation2 + $0x170] sm:$0xff] }
 0x1de   :  { %868 = vmatpush1.bf16.msra.mxu1 %v710_v49  ;;  %878 = vmatprep.subr.bf16.mxu0 %v461_v50  ;;  %v568_v49 = vld [vmem:[#allocation2 + $0x370] sm:$0xff]  ;;  %v509_v50 = vld [vmem:[#allocation2 + $0x198] sm:$0xff] }
 0x1df   :  { %919 = vmatprep.subr.bf16.mxu1 %v525_v51  ;;  %v573_v51 = vld [vmem:[#allocation2 + $0x398] sm:$0xff] }
 0x1e0   :  { %829 = vmatmul.mubr.bf16.vlgmr.msra.gmra.mrb[4].mxu0 %v8817_v6 }
 0x1e1   :  { %870 = vmatmul.mubr.bf16.vlgmr.msra.gmra.mrb[4].mxu1 %v8821_v18  ;;  %879 = vmatpush1.bf16.msra.mxu0 %v460_v52  ;;  %v508_v52 = vld [vmem:[#allocation2 + $0x190] sm:$0xff] }
 0x1e2   :  { %920 = vmatpush1.bf16.msra.mxu1 %v524_v53  ;;  %880 = vmatprep.subr.bf16.mxu0 %v465_v54  ;;  %v572_v53 = vld [vmem:[#allocation2 + $0x390] sm:$0xff]  ;;  %v513_v54 = vld [vmem:[#allocation2 + $0x1b8] sm:$0xff] }
 0x1e3   :  { %921 = vmatprep.subr.bf16.mxu1 %v529_v55  ;;  %910 = vmatprep.mubr.bf16.mxu0 %v8805_v62  ;;  %v577_v55 = vld [vmem:[#allocation2 + $0x3b8] sm:$0xff] }
 0x1e4   :  { %951 = vmatprep.mubr.bf16.mxu1 %v8812_v2 }
 0x1e5   :  { %881 = vmatpush1.bf16.msra.mxu0 %v464_v56  ;;  %v512_v56 = vld [vmem:[#allocation2 + $0x1b0] sm:$0xff] }
 0x1e6   :  { %922 = vmatpush1.bf16.msra.mxu1 %v528_v57  ;;  %882 = vmatprep.subr.bf16.mxu0 %v469_v59  ;;  %v576_v57 = vld [vmem:[#allocation2 + $0x3b0] sm:$0xff]  ;;  %v517_v59 = vld [vmem:[#allocation2 + $0x1d8] sm:$0xff] }
 0x1e7   :  { %923 = vmatprep.subr.bf16.mxu1 %v533_v60  ;;  %v581_v60 = vld [vmem:[#allocation2 + $0x3d8] sm:$0xff] }
 0x1e9   :  { %883 = vmatpush1.bf16.msra.mxu0 %v468_v61  ;;  %v516_v61 = vld [vmem:[#allocation2 + $0x1d0] sm:$0xff] }
 0x1ea   :  { %924 = vmatpush1.bf16.msra.mxu1 %v532_v63  ;;  %884 = vmatprep.subr.bf16.mxu0 %v473_v0  ;;  %v580_v63 = vld [vmem:[#allocation2 + $0x3d0] sm:$0xff]  ;;  %v521_v0 = vld [vmem:[#allocation2 + $0x1f8] sm:$0xff] }
 0x1eb   :  { %925 = vmatprep.subr.bf16.mxu1 %v537_v3  ;;  %v585_v3 = vld [vmem:[#allocation2 + $0x3f8] sm:$0xff] }
 0x1ed   :  { %885 = vmatpush1.bf16.msra.mxu0 %v472_v4  ;;  %v520_v4 = vld [vmem:[#allocation2 + $0x1f0] sm:$0xff] }
 0x1ee   :  { %926 = vmatpush1.bf16.msra.mxu1 %v536_v14  ;;  %886 = vmatprep.subr.bf16.mxu0 %v477_v17  ;;  %v584_v14 = vld [vmem:[#allocation2 + $0x3f0] sm:$0xff]  ;;  %v589_v17 = vld [vmem:[#allocation2 + $0x418] sm:$0xff] }
 0x1ef   :  { %927 = vmatprep.subr.bf16.mxu1 %v541_v20  ;;  %v653_v20 = vld [vmem:[#allocation2 + $0x618] sm:$0xff] }
 0x1f1   :  { %887 = vmatpush1.bf16.msra.mxu0 %v476_v21  ;;  %v588_v21 = vld [vmem:[#allocation2 + $0x410] sm:$0xff] }
 0x1f2   :  { %928 = vmatpush1.bf16.msra.mxu1 %v540_v22  ;;  %888 = vmatprep.subr.bf16.mxu0 %v481_v23  ;;  %v652_v22 = vld [vmem:[#allocation2 + $0x610] sm:$0xff]  ;;  %v593_v23 = vld [vmem:[#allocation2 + $0x438] sm:$0xff] }
 0x1f3   :  { %929 = vmatprep.subr.bf16.mxu1 %v545_v24  ;;  %v657_v24 = vld [vmem:[#allocation2 + $0x638] sm:$0xff] }
 0x1f5   :  { %889 = vmatpush1.bf16.msra.mxu0 %v480_v25  ;;  %v592_v25 = vld [vmem:[#allocation2 + $0x430] sm:$0xff] }
 0x1f6   :  { %930 = vmatpush1.bf16.msra.mxu1 %v544_v16  ;;  %890 = vmatprep.subr.bf16.mxu0 %v485_v26  ;;  %v656_v16 = vld [vmem:[#allocation2 + $0x630] sm:$0xff]  ;;  %v597_v26 = vld [vmem:[#allocation2 + $0x458] sm:$0xff] }
 0x1f7   :  { %931 = vmatprep.subr.bf16.mxu1 %v549_v27  ;;  %v661_v27 = vld [vmem:[#allocation2 + $0x658] sm:$0xff] }
 0x1f9   :  { %891 = vmatpush1.bf16.msra.mxu0 %v484_v28  ;;  %v596_v28 = vld [vmem:[#allocation2 + $0x450] sm:$0xff] }
 0x1fa   :  { %932 = vmatpush1.bf16.msra.mxu1 %v548_v29  ;;  %892 = vmatprep.subr.bf16.mxu0 %v489_v30  ;;  %v660_v29 = vld [vmem:[#allocation2 + $0x650] sm:$0xff]  ;;  %v601_v30 = vld [vmem:[#allocation2 + $0x478] sm:$0xff] }
 0x1fb   :  { %933 = vmatprep.subr.bf16.mxu1 %v553_v31  ;;  %v665_v31 = vld [vmem:[#allocation2 + $0x678] sm:$0xff] }
 0x1fd   :  { %893 = vmatpush1.bf16.msra.mxu0 %v488_v32  ;;  %v600_v32 = vld [vmem:[#allocation2 + $0x470] sm:$0xff] }
 0x1fe   :  { %934 = vmatpush1.bf16.msra.mxu1 %v552_v33  ;;  %894 = vmatprep.subr.bf16.mxu0 %v493_v34  ;;  %v664_v33 = vld [vmem:[#allocation2 + $0x670] sm:$0xff]  ;;  %v605_v34 = vld [vmem:[#allocation2 + $0x498] sm:$0xff] }
 0x1ff   :  { %935 = vmatprep.subr.bf16.mxu1 %v557_v35  ;;  %v669_v35 = vld [vmem:[#allocation2 + $0x698] sm:$0xff] }
 0x201   :  { %895 = vmatpush1.bf16.msra.mxu0 %v492_v36  ;;  %v604_v36 = vld [vmem:[#allocation2 + $0x490] sm:$0xff] }
 0x202   :  { %936 = vmatpush1.bf16.msra.mxu1 %v556_v37  ;;  %896 = vmatprep.subr.bf16.mxu0 %v497_v38  ;;  %v668_v37 = vld [vmem:[#allocation2 + $0x690] sm:$0xff]  ;;  %v609_v38 = vld [vmem:[#allocation2 + $0x4b8] sm:$0xff] }
 0x203   :  { %937 = vmatprep.subr.bf16.mxu1 %v561_v39  ;;  %v673_v39 = vld [vmem:[#allocation2 + $0x6b8] sm:$0xff] }
 0x205   :  { %897 = vmatpush1.bf16.msra.mxu0 %v496_v40  ;;  %v608_v40 = vld [vmem:[#allocation2 + $0x4b0] sm:$0xff] }
 0x206   :  { %938 = vmatpush1.bf16.msra.mxu1 %v560_v41  ;;  %898 = vmatprep.subr.bf16.mxu0 %v501_v42  ;;  %v672_v41 = vld [vmem:[#allocation2 + $0x6b0] sm:$0xff]  ;;  %v613_v42 = vld [vmem:[#allocation2 + $0x4d8] sm:$0xff] }
 0x207   :  { %939 = vmatprep.subr.bf16.mxu1 %v565_v43  ;;  %v677_v43 = vld [vmem:[#allocation2 + $0x6d8] sm:$0xff] }
 0x209   :  { %899 = vmatpush1.bf16.msra.mxu0 %v500_v44  ;;  %v612_v44 = vld [vmem:[#allocation2 + $0x4d0] sm:$0xff] }
 0x20a   :  { %940 = vmatpush1.bf16.msra.mxu1 %v564_v45  ;;  %900 = vmatprep.subr.bf16.mxu0 %v505_v46  ;;  %v676_v45 = vld [vmem:[#allocation2 + $0x6d0] sm:$0xff]  ;;  %v617_v46 = vld [vmem:[#allocation2 + $0x4f8] sm:$0xff] }
 0x20b   :  { %941 = vmatprep.subr.bf16.mxu1 %v569_v47  ;;  %v681_v47 = vld [vmem:[#allocation2 + $0x6f8] sm:$0xff] }
 0x20d   :  { %901 = vmatpush1.bf16.msra.mxu0 %v504_v48  ;;  %v616_v48 = vld [vmem:[#allocation2 + $0x4f0] sm:$0xff] }
 0x20e   :  { %942 = vmatpush1.bf16.msra.mxu1 %v568_v49  ;;  %902 = vmatprep.subr.bf16.mxu0 %v509_v50  ;;  %v680_v49 = vld [vmem:[#allocation2 + $0x6f0] sm:$0xff]  ;;  %v621_v50 = vld [vmem:[#allocation2 + $0x518] sm:$0xff] }
 0x20f   :  { %943 = vmatprep.subr.bf16.mxu1 %v573_v51  ;;  %v685_v51 = vld [vmem:[#allocation2 + $0x718] sm:$0xff] }
 0x211   :  { %903 = vmatpush1.bf16.msra.mxu0 %v508_v52  ;;  %v620_v52 = vld [vmem:[#allocation2 + $0x510] sm:$0xff] }
 0x212   :  { %944 = vmatpush1.bf16.msra.mxu1 %v572_v53  ;;  %904 = vmatprep.subr.bf16.mxu0 %v513_v54  ;;  %v684_v53 = vld [vmem:[#allocation2 + $0x710] sm:$0xff]  ;;  %v625_v54 = vld [vmem:[#allocation2 + $0x538] sm:$0xff] }
 0x213   :  { %945 = vmatprep.subr.bf16.mxu1 %v577_v55  ;;  %v689_v55 = vld [vmem:[#allocation2 + $0x738] sm:$0xff] }
 0x215   :  { %905 = vmatpush1.bf16.msra.mxu0 %v512_v56  ;;  %v624_v56 = vld [vmem:[#allocation2 + $0x530] sm:$0xff] }
 0x216   :  { %946 = vmatpush1.bf16.msra.mxu1 %v576_v57  ;;  %906 = vmatprep.subr.bf16.mxu0 %v517_v59  ;;  %v688_v57 = vld [vmem:[#allocation2 + $0x730] sm:$0xff]  ;;  %v629_v59 = vld [vmem:[#allocation2 + $0x558] sm:$0xff] }
 0x217   :  { %947 = vmatprep.subr.bf16.mxu1 %v581_v60  ;;  %v693_v60 = vld [vmem:[#allocation2 + $0x758] sm:$0xff] }
 0x219   :  { %907 = vmatpush1.bf16.msra.mxu0 %v516_v61  ;;  %v628_v61 = vld [vmem:[#allocation2 + $0x550] sm:$0xff] }
 0x21a   :  { %948 = vmatpush1.bf16.msra.mxu1 %v580_v63  ;;  %908 = vmatprep.subr.bf16.mxu0 %v521_v0  ;;  %v692_v63 = vld [vmem:[#allocation2 + $0x750] sm:$0xff]  ;;  %v633_v0 = vld [vmem:[#allocation2 + $0x578] sm:$0xff] }
 0x21b   :  { %949 = vmatprep.subr.bf16.mxu1 %v585_v3  ;;  %v697_v3 = vld [vmem:[#allocation2 + $0x778] sm:$0xff] }
 0x21d   :  { %909 = vmatpush1.bf16.msra.mxu0 %v520_v4  ;;  %v632_v4 = vld [vmem:[#allocation2 + $0x570] sm:$0xff] }
 0x21e   :  { %950 = vmatpush1.bf16.msra.mxu1 %v584_v14  ;;  %960 = vmatprep.subr.bf16.mxu0 %v589_v17  ;;  %v696_v14 = vld [vmem:[#allocation2 + $0x770] sm:$0xff]  ;;  %v637_v17 = vld [vmem:[#allocation2 + $0x598] sm:$0xff] }
 0x21f   :  { %1001 = vmatprep.subr.bf16.mxu1 %v653_v20  ;;  %v701_v20 = vld [vmem:[#allocation2 + $0x798] sm:$0xff] }
 0x220   :  { %911 = vmatmul.mubr.bf16.vlgmr.msra.gmra.mrb[8].mxu0 %v8802_v58 }
 0x221   :  { %952 = vmatmul.mubr.bf16.vlgmr.msra.gmra.mrb[8].mxu1 %v8810_v1  ;;  %961 = vmatpush1.bf16.msra.mxu0 %v588_v21  ;;  %v636_v21 = vld [vmem:[#allocation2 + $0x590] sm:$0xff] }
 0x222   :  { %1002 = vmatpush1.bf16.msra.mxu1 %v652_v22  ;;  %962 = vmatprep.subr.bf16.mxu0 %v593_v23  ;;  %v700_v22 = vld [vmem:[#allocation2 + $0x790] sm:$0xff]  ;;  %v641_v23 = vld [vmem:[#allocation2 + $0x5b8] sm:$0xff] }
 0x223   :  { %1003 = vmatprep.subr.bf16.mxu1 %v657_v24  ;;  %992 = vmatprep.mubr.bf16.mxu0 %v8819_v15  ;;  %v705_v24 = vld [vmem:[#allocation2 + $0x7b8] sm:$0xff] }
 0x224   :  { %1033 = vmatprep.mubr.bf16.mxu1 %v8823_v19 }
 0x225   :  { %963 = vmatpush1.bf16.msra.mxu0 %v592_v25  ;;  %v640_v25 = vld [vmem:[#allocation2 + $0x5b0] sm:$0xff] }
 0x226   :  { %1004 = vmatpush1.bf16.msra.mxu1 %v656_v16  ;;  %964 = vmatprep.subr.bf16.mxu0 %v597_v26  ;;  %v704_v16 = vld [vmem:[#allocation2 + $0x7b0] sm:$0xff]  ;;  %v645_v26 = vld [vmem:[#allocation2 + $0x5d8] sm:$0xff] }
 0x227   :  { %1005 = vmatprep.subr.bf16.mxu1 %v661_v27  ;;  %v709_v27 = vld [vmem:[#allocation2 + $0x7d8] sm:$0xff] }
 0x229   :  { %965 = vmatpush1.bf16.msra.mxu0 %v596_v28  ;;  %v644_v28 = vld [vmem:[#allocation2 + $0x5d0] sm:$0xff] }
 0x22a   :  { %1006 = vmatpush1.bf16.msra.mxu1 %v660_v29  ;;  %966 = vmatprep.subr.bf16.mxu0 %v601_v30  ;;  %v708_v29 = vld [vmem:[#allocation2 + $0x7d0] sm:$0xff]  ;;  %v649_v30 = vld [vmem:[#allocation2 + $0x5f8] sm:$0xff] }
 0x22b   :  { %1007 = vmatprep.subr.bf16.mxu1 %v665_v31  ;;  %v713_v31 = vld [vmem:[#allocation2 + $0x7f8] sm:$0xff] }
 0x22d   :  { %967 = vmatpush1.bf16.msra.mxu0 %v600_v32  ;;  %v648_v32 = vld [vmem:[#allocation2 + $0x5f0] sm:$0xff] }
 0x22e   :  { %1008 = vmatpush1.bf16.msra.mxu1 %v664_v33  ;;  %968 = vmatprep.subr.bf16.mxu0 %v605_v34  ;;  %v712_v33 = vld [vmem:[#allocation2 + $0x7f0] sm:$0xff] }
 0x22f   :  { %1009 = vmatprep.subr.bf16.mxu1 %v669_v35 }
 0x231   :  { %969 = vmatpush1.bf16.msra.mxu0 %v604_v36 }
 0x232   :  { %1010 = vmatpush1.bf16.msra.mxu1 %v668_v37  ;;  %970 = vmatprep.subr.bf16.mxu0 %v609_v38 }
 0x233   :  { %1011 = vmatprep.subr.bf16.mxu1 %v673_v39 }
 0x235   :  { %971 = vmatpush1.bf16.msra.mxu0 %v608_v40 }
 0x236   :  { %1012 = vmatpush1.bf16.msra.mxu1 %v672_v41  ;;  %972 = vmatprep.subr.bf16.mxu0 %v613_v42 }
 0x237   :  { %1013 = vmatprep.subr.bf16.mxu1 %v677_v43 }
 0x239   :  { %973 = vmatpush1.bf16.msra.mxu0 %v612_v44 }
 0x23a   :  { %1014 = vmatpush1.bf16.msra.mxu1 %v676_v45  ;;  %974 = vmatprep.subr.bf16.mxu0 %v617_v46 }
 0x23b   :  { %1015 = vmatprep.subr.bf16.mxu1 %v681_v47 }
 0x23d   :  { %975 = vmatpush1.bf16.msra.mxu0 %v616_v48 }
 0x23e   :  { %1016 = vmatpush1.bf16.msra.mxu1 %v680_v49  ;;  %976 = vmatprep.subr.bf16.mxu0 %v621_v50 }
 0x23f   :  { %1017 = vmatprep.subr.bf16.mxu1 %v685_v51 }
 0x241   :  { %977 = vmatpush1.bf16.msra.mxu0 %v620_v52 }
 0x242   :  { %1018 = vmatpush1.bf16.msra.mxu1 %v684_v53  ;;  %978 = vmatprep.subr.bf16.mxu0 %v625_v54 }
 0x243   :  { %1019 = vmatprep.subr.bf16.mxu1 %v689_v55 }
 0x245   :  { %979 = vmatpush1.bf16.msra.mxu0 %v624_v56 }
 0x246   :  { %1020 = vmatpush1.bf16.msra.mxu1 %v688_v57  ;;  %980 = vmatprep.subr.bf16.mxu0 %v629_v59 }
 0x247   :  { %1021 = vmatprep.subr.bf16.mxu1 %v693_v60 }
 0x249   :  { %981 = vmatpush1.bf16.msra.mxu0 %v628_v61 }
 0x24a   :  { %1022 = vmatpush1.bf16.msra.mxu1 %v692_v63  ;;  %982 = vmatprep.subr.bf16.mxu0 %v633_v0 }
 0x24b   :  { %1023 = vmatprep.subr.bf16.mxu1 %v697_v3 }
 0x24d   :  { %983 = vmatpush1.bf16.msra.mxu0 %v632_v4 }
 0x24e   :  { %1024 = vmatpush1.bf16.msra.mxu1 %v696_v14  ;;  %984 = vmatprep.subr.bf16.mxu0 %v637_v17 }
 0x24f   :  { %1025 = vmatprep.subr.bf16.mxu1 %v701_v20 }
 0x251   :  { %985 = vmatpush1.bf16.msra.mxu0 %v636_v21 }
 0x252   :  { %1026 = vmatpush1.bf16.msra.mxu1 %v700_v22  ;;  %986 = vmatprep.subr.bf16.mxu0 %v641_v23 }
 0x253   :  { %1027 = vmatprep.subr.bf16.mxu1 %v705_v24 }
 0x255   :  { %987 = vmatpush1.bf16.msra.mxu0 %v640_v25 }
 0x256   :  { %1028 = vmatpush1.bf16.msra.mxu1 %v704_v16  ;;  %988 = vmatprep.subr.bf16.mxu0 %v645_v26 }
 0x257   :  { %1029 = vmatprep.subr.bf16.mxu1 %v709_v27 }
 0x259   :  { %989 = vmatpush1.bf16.msra.mxu0 %v644_v28 }
 0x25a   :  { %1030 = vmatpush1.bf16.msra.mxu1 %v708_v29  ;;  %990 = vmatprep.subr.bf16.mxu0 %v649_v30 }
 0x25b   :  { %1031 = vmatprep.subr.bf16.mxu1 %v713_v31 }
 0x25d   :  { %991 = vmatpush1.bf16.msra.mxu0 %v648_v32 }
 0x25e   :  { %1032 = vmatpush1.bf16.msra.mxu1 %v712_v33 }
 0x260   :  { %993 = vmatmul.mubr.bf16.vlgmr.msra.gmra.mrb[12].mxu0 %v8817_v6 }
 0x261   :  { %1034 = vmatmul.mubr.bf16.vlgmr.msra.gmra.mrb[12].mxu1 %v8821_v18 }
 0x273   :  { %v748_v34 = vpop.f32.mrb[0].mxu0 }
 0x274   :  { %v789_v35 = vpop.f32.mrb[0].mxu1  ;;  %v750_v37 = vpop.f32.mrb[1].mxu0 }
 0x275   :  { %v790_v36 = vadd.f32 %v789_v35, %v748_v34  ;;  %v791_v38 = vpop.f32.mrb[1].mxu1  ;;  %v752_v40 = vpop.f32.mrb[2].mxu0 }
 0x276   :  { %v792_v39 = vadd.f32 %v791_v38, %v750_v37  ;;  %v793_v41 = vpop.f32.mrb[2].mxu1  ;;  %v753_v42 = vpop.f32.mrb[3].mxu0 }
 0x277   :  { %v794_v43 = vpop.f32.mrb[3].mxu1 }
 0x2b3   :  { %v830_v44 = vpop.f32.mrb[4].mxu0 }
 0x2b4   :  { %v871_v45 = vpop.f32.mrb[4].mxu1  ;;  %v831_v46 = vadd.f32 %v830_v44, %v790_v36  ;;  %v832_v47 = vpop.f32.mrb[5].mxu0 }
 0x2b5   :  { %v873_v48 = vpop.f32.mrb[5].mxu1  ;;  %v833_v49 = vadd.f32 %v832_v47, %v792_v39  ;;  %v834_v50 = vpop.f32.mrb[6].mxu0 }
 0x2b6   :  { %v875_v51 = vpop.f32.mrb[6].mxu1  ;;  %v8858_v52 = vadd.f32 %v871_v45, %v831_v46  ;;  %v835_v53 = vpop.f32.mrb[7].mxu0 }
 0x2b7   :  { %v876_v54 = vpop.f32.mrb[7].mxu1  ;;  %v8860_v55 = vadd.f32 %v873_v48, %v833_v49 }
 0x2f3   :  { %v912_v56 = vpop.f32.mrb[8].mxu0 }
 0x2f4   :  { %v953_v57 = vpop.f32.mrb[8].mxu1  ;;  %v914_v60 = vpop.f32.mrb[9].mxu0 }
 0x2f5   :  { %v954_v59 = vadd.f32 %v953_v57, %v912_v56  ;;  %v955_v61 = vpop.f32.mrb[9].mxu1  ;;  %v916_v0 = vpop.f32.mrb[10].mxu0 }
 0x2f6   :  { %v956_v63 = vadd.f32 %v955_v61, %v914_v60  ;;  %v957_v3 = vpop.f32.mrb[10].mxu1  ;;  %v917_v4 = vpop.f32.mrb[11].mxu0 }
 0x2f7   :  { %v958_v14 = vpop.f32.mrb[11].mxu1 }
 0x333   :  { %v994_v17 = vpop.f32.mrb[12].mxu0 }
 0x334   :  { %v1035_v20 = vpop.f32.mrb[12].mxu1  ;;  %v995_v21 = vadd.f32 %v994_v17, %v954_v59  ;;  %v996_v22 = vpop.f32.mrb[13].mxu0 }
 0x335   :  { %v1037_v23 = vpop.f32.mrb[13].mxu1  ;;  %v997_v24 = vadd.f32 %v996_v22, %v956_v63  ;;  %v998_v25 = vpop.f32.mrb[14].mxu0 }
 0x336   :  { %v1039_v16 = vpop.f32.mrb[14].mxu1  ;;  %v8862_v26 = vadd.f32 %v1035_v20, %v995_v21  ;;  %v999_v27 = vpop.f32.mrb[15].mxu0 }
 0x337   :  { %v1040_v28 = vpop.f32.mrb[15].mxu1  ;;  %v8864_v29 = vadd.f32 %v1037_v23, %v997_v24 }
 0x338   :  { %8489 = dma.done.wait [#allocation3 + $0x1], 32768 }
 0x339   :  { %8490 = vsyncadd [#allocation3 + $0x1], 4294934528  ;;  %1367 = vmatprep.mubr.bf16.mxu0 %v8805_v62  ;;  %1408 = vmatprep.mubr.bf16.mxu1 %v8812_v2  ;;  %1060 = sst [smem:[#allocation27]] %s8520_s25  ;;  %s1044_s23 = scalar_lea.hbm %s9639_s2, 65536 }
 0x33a   :  { %1062 = sst [smem:[#allocation27 + $0x1]] %s8520_s25  ;;  %s8534_s27 = smov [#allocation26]  }
 0x33b   :  { %1064 = sst [smem:[#allocation27 + $0x2]] %s8522_s26 }
 0x33c   :  { %1066 = sst [smem:[#allocation27 + $0x3]] %s8523_s11 }
 0x33d   :  { %1068 = sst [smem:[#allocation27 + $0x4]] %s8524_s7 }
 0x33e   :  { %1070 = sst [smem:[#allocation27 + $0x5]] %s8525_s22 }
 0x33f   :  { %1072 = sst [smem:[#allocation27 + $0x6]] %s8526_s29 }
 0x340   :  { %1074 = sst [smem:[#allocation27 + $0x7]] %s8523_s11 }
 0x341   :  { %1076 = sst [smem:[#allocation27 + $0x8]] %s8522_s26 }
 0x342   :  { %1078 = dma.general %s1044_s23, 32768, %s8738_s6, %s8528_s17, %s8534_s27, [#allocation27], %s8734_s1, 0  }
 0x343   :  { %v1080_v30 = vld [vmem:[#allocation2 + $0x808] sm:$0xff]  ;;  %v1079_v32 = vld [vmem:[#allocation2 + $0x800] sm:$0xff] }
 0x344   :  { %v1144_v31 = vld [vmem:[#allocation2 + $0xa08] sm:$0xff]  ;;  %1335 = vmatprep.subr.bf16.mxu0 %v1080_v30  ;;  %v1143_v33 = vld [vmem:[#allocation2 + $0xa00] sm:$0xff] }
 0x345   :  { %1376 = vmatprep.subr.bf16.mxu1 %v1144_v31  ;;  %v1084_v34 = vld [vmem:[#allocation2 + $0x828] sm:$0xff]  ;;  %1336 = vmatpush1.bf16.msra.mxu0 %v1079_v32  ;;  %v1083_v36 = vld [vmem:[#allocation2 + $0x820] sm:$0xff] }
 0x346   :  { %v1148_v35 = vld [vmem:[#allocation2 + $0xa28] sm:$0xff]  ;;  %1377 = vmatpush1.bf16.msra.mxu1 %v1143_v33  ;;  %1337 = vmatprep.subr.bf16.mxu0 %v1084_v34  ;;  %v1147_v37 = vld [vmem:[#allocation2 + $0xa20] sm:$0xff] }
 0x347   :  { %1378 = vmatprep.subr.bf16.mxu1 %v1148_v35  ;;  %v1088_v38 = vld [vmem:[#allocation2 + $0x848] sm:$0xff]  ;;  %v1087_v40 = vld [vmem:[#allocation2 + $0x840] sm:$0xff] }
 0x348   :  { %v1152_v39 = vld [vmem:[#allocation2 + $0xa48] sm:$0xff]  ;;  %v1151_v41 = vld [vmem:[#allocation2 + $0xa40] sm:$0xff] }
 0x349   :  { %1338 = vmatpush1.bf16.msra.mxu0 %v1083_v36  ;;  %v1092_v42 = vld [vmem:[#allocation2 + $0x868] sm:$0xff]  ;;  %v1091_v44 = vld [vmem:[#allocation2 + $0x860] sm:$0xff] }
 0x34a   :  { %1379 = vmatpush1.bf16.msra.mxu1 %v1147_v37  ;;  %1339 = vmatprep.subr.bf16.mxu0 %v1088_v38  ;;  %v1156_v43 = vld [vmem:[#allocation2 + $0xa68] sm:$0xff]  ;;  %v1155_v45 = vld [vmem:[#allocation2 + $0xa60] sm:$0xff] }
 0x34b   :  { %1380 = vmatprep.subr.bf16.mxu1 %v1152_v39  ;;  %v1096_v46 = vld [vmem:[#allocation2 + $0x888] sm:$0xff]  ;;  %v1095_v48 = vld [vmem:[#allocation2 + $0x880] sm:$0xff] }
 0x34c   :  { %v1160_v47 = vld [vmem:[#allocation2 + $0xa88] sm:$0xff]  ;;  %v1159_v49 = vld [vmem:[#allocation2 + $0xa80] sm:$0xff] }
 0x34d   :  { %1340 = vmatpush1.bf16.msra.mxu0 %v1087_v40  ;;  %v1100_v50 = vld [vmem:[#allocation2 + $0x8a8] sm:$0xff]  ;;  %v1099_v53 = vld [vmem:[#allocation2 + $0x8a0] sm:$0xff] }
 0x34e   :  { %1381 = vmatpush1.bf16.msra.mxu1 %v1151_v41  ;;  %1341 = vmatprep.subr.bf16.mxu0 %v1092_v42  ;;  %v1164_v51 = vld [vmem:[#allocation2 + $0xaa8] sm:$0xff]  ;;  %v1163_v54 = vld [vmem:[#allocation2 + $0xaa0] sm:$0xff] }
 0x34f   :  { %1382 = vmatprep.subr.bf16.mxu1 %v1156_v43  ;;  %v1104_v56 = vld [vmem:[#allocation2 + $0x8c8] sm:$0xff]  ;;  %v1103_v59 = vld [vmem:[#allocation2 + $0x8c0] sm:$0xff] }
 0x350   :  { %v1168_v57 = vld [vmem:[#allocation2 + $0xac8] sm:$0xff]  ;;  %v1167_v60 = vld [vmem:[#allocation2 + $0xac0] sm:$0xff] }
 0x351   :  { %1342 = vmatpush1.bf16.msra.mxu0 %v1091_v44  ;;  %v1108_v61 = vld [vmem:[#allocation2 + $0x8e8] sm:$0xff]  ;;  %v1107_v0 = vld [vmem:[#allocation2 + $0x8e0] sm:$0xff] }
 0x352   :  { %1383 = vmatpush1.bf16.msra.mxu1 %v1155_v45  ;;  %1343 = vmatprep.subr.bf16.mxu0 %v1096_v46  ;;  %v1172_v63 = vld [vmem:[#allocation2 + $0xae8] sm:$0xff]  ;;  %v1171_v3 = vld [vmem:[#allocation2 + $0xae0] sm:$0xff] }
 0x353   :  { %1384 = vmatprep.subr.bf16.mxu1 %v1160_v47  ;;  %v1112_v4 = vld [vmem:[#allocation2 + $0x908] sm:$0xff]  ;;  %v1111_v17 = vld [vmem:[#allocation2 + $0x900] sm:$0xff] }
 0x354   :  { %v1176_v14 = vld [vmem:[#allocation2 + $0xb08] sm:$0xff]  ;;  %v1175_v20 = vld [vmem:[#allocation2 + $0xb00] sm:$0xff] }
 0x355   :  { %1344 = vmatpush1.bf16.msra.mxu0 %v1095_v48  ;;  %v1116_v21 = vld [vmem:[#allocation2 + $0x928] sm:$0xff]  ;;  %v1115_v23 = vld [vmem:[#allocation2 + $0x920] sm:$0xff] }
 0x356   :  { %1385 = vmatpush1.bf16.msra.mxu1 %v1159_v49  ;;  %1345 = vmatprep.subr.bf16.mxu0 %v1100_v50  ;;  %v1180_v22 = vld [vmem:[#allocation2 + $0xb28] sm:$0xff]  ;;  %v1179_v24 = vld [vmem:[#allocation2 + $0xb20] sm:$0xff] }
 0x357   :  { %1386 = vmatprep.subr.bf16.mxu1 %v1164_v51  ;;  %v1120_v25 = vld [vmem:[#allocation2 + $0x948] sm:$0xff]  ;;  %v1119_v27 = vld [vmem:[#allocation2 + $0x940] sm:$0xff] }
 0x358   :  { %v1184_v16 = vld [vmem:[#allocation2 + $0xb48] sm:$0xff]  ;;  %v1183_v28 = vld [vmem:[#allocation2 + $0xb40] sm:$0xff] }
 0x359   :  { %1346 = vmatpush1.bf16.msra.mxu0 %v1099_v53  ;;  %v1124_v30 = vld [vmem:[#allocation2 + $0x968] sm:$0xff]  ;;  %v1123_v32 = vld [vmem:[#allocation2 + $0x960] sm:$0xff] }
 0x35a   :  { %1387 = vmatpush1.bf16.msra.mxu1 %v1163_v54  ;;  %1347 = vmatprep.subr.bf16.mxu0 %v1104_v56  ;;  %v1188_v31 = vld [vmem:[#allocation2 + $0xb68] sm:$0xff]  ;;  %v1187_v33 = vld [vmem:[#allocation2 + $0xb60] sm:$0xff] }
 0x35b   :  { %1388 = vmatprep.subr.bf16.mxu1 %v1168_v57  ;;  %v1128_v34 = vld [vmem:[#allocation2 + $0x988] sm:$0xff]  ;;  %v1127_v36 = vld [vmem:[#allocation2 + $0x980] sm:$0xff] }
 0x35c   :  { %v1192_v35 = vld [vmem:[#allocation2 + $0xb88] sm:$0xff]  ;;  %v1191_v37 = vld [vmem:[#allocation2 + $0xb80] sm:$0xff] }
 0x35d   :  { %1348 = vmatpush1.bf16.msra.mxu0 %v1103_v59  ;;  %v1132_v38 = vld [vmem:[#allocation2 + $0x9a8] sm:$0xff]  ;;  %v1131_v40 = vld [vmem:[#allocation2 + $0x9a0] sm:$0xff] }
 0x35e   :  { %1389 = vmatpush1.bf16.msra.mxu1 %v1167_v60  ;;  %1349 = vmatprep.subr.bf16.mxu0 %v1108_v61  ;;  %v1196_v39 = vld [vmem:[#allocation2 + $0xba8] sm:$0xff]  ;;  %v1195_v41 = vld [vmem:[#allocation2 + $0xba0] sm:$0xff] }
 0x35f   :  { %1390 = vmatprep.subr.bf16.mxu1 %v1172_v63  ;;  %v1136_v42 = vld [vmem:[#allocation2 + $0x9c8] sm:$0xff]  ;;  %v1135_v44 = vld [vmem:[#allocation2 + $0x9c0] sm:$0xff] }
 0x360   :  { %v1200_v43 = vld [vmem:[#allocation2 + $0xbc8] sm:$0xff]  ;;  %v1199_v45 = vld [vmem:[#allocation2 + $0xbc0] sm:$0xff] }
 0x361   :  { %1350 = vmatpush1.bf16.msra.mxu0 %v1107_v0  ;;  %v1140_v46 = vld [vmem:[#allocation2 + $0x9e8] sm:$0xff]  ;;  %v1139_v48 = vld [vmem:[#allocation2 + $0x9e0] sm:$0xff] }
 0x362   :  { %1391 = vmatpush1.bf16.msra.mxu1 %v1171_v3  ;;  %1351 = vmatprep.subr.bf16.mxu0 %v1112_v4  ;;  %v1204_v47 = vld [vmem:[#allocation2 + $0xbe8] sm:$0xff]  ;;  %v1203_v49 = vld [vmem:[#allocation2 + $0xbe0] sm:$0xff] }
 0x363   :  { %1392 = vmatprep.subr.bf16.mxu1 %v1176_v14  ;;  %v1208_v50 = vld [vmem:[#allocation2 + $0xc08] sm:$0xff]  ;;  %v1207_v53 = vld [vmem:[#allocation2 + $0xc00] sm:$0xff] }
 0x364   :  { %v1272_v51 = vld [vmem:[#allocation2 + $0xe08] sm:$0xff]  ;;  %v1271_v54 = vld [vmem:[#allocation2 + $0xe00] sm:$0xff] }
 0x365   :  { %1352 = vmatpush1.bf16.msra.mxu0 %v1111_v17  ;;  %v1212_v56 = vld [vmem:[#allocation2 + $0xc28] sm:$0xff]  ;;  %v1211_v59 = vld [vmem:[#allocation2 + $0xc20] sm:$0xff] }
 0x366   :  { %1393 = vmatpush1.bf16.msra.mxu1 %v1175_v20  ;;  %1353 = vmatprep.subr.bf16.mxu0 %v1116_v21  ;;  %v1276_v57 = vld [vmem:[#allocation2 + $0xe28] sm:$0xff]  ;;  %v1275_v60 = vld [vmem:[#allocation2 + $0xe20] sm:$0xff] }
 0x367   :  { %1394 = vmatprep.subr.bf16.mxu1 %v1180_v22  ;;  %v1216_v61 = vld [vmem:[#allocation2 + $0xc48] sm:$0xff]  ;;  %v1215_v0 = vld [vmem:[#allocation2 + $0xc40] sm:$0xff] }
 0x368   :  { %v1280_v63 = vld [vmem:[#allocation2 + $0xe48] sm:$0xff]  ;;  %v1279_v3 = vld [vmem:[#allocation2 + $0xe40] sm:$0xff] }
 0x369   :  { %1354 = vmatpush1.bf16.msra.mxu0 %v1115_v23  ;;  %v1220_v4 = vld [vmem:[#allocation2 + $0xc68] sm:$0xff]  ;;  %v1219_v17 = vld [vmem:[#allocation2 + $0xc60] sm:$0xff] }
 0x36a   :  { %1395 = vmatpush1.bf16.msra.mxu1 %v1179_v24  ;;  %1355 = vmatprep.subr.bf16.mxu0 %v1120_v25  ;;  %v1284_v14 = vld [vmem:[#allocation2 + $0xe68] sm:$0xff]  ;;  %v1283_v20 = vld [vmem:[#allocation2 + $0xe60] sm:$0xff] }
 0x36b   :  { %1396 = vmatprep.subr.bf16.mxu1 %v1184_v16  ;;  %v1224_v21 = vld [vmem:[#allocation2 + $0xc88] sm:$0xff]  ;;  %v1223_v23 = vld [vmem:[#allocation2 + $0xc80] sm:$0xff] }
 0x36c   :  { %v1288_v22 = vld [vmem:[#allocation2 + $0xe88] sm:$0xff]  ;;  %v1287_v24 = vld [vmem:[#allocation2 + $0xe80] sm:$0xff] }
 0x36d   :  { %1356 = vmatpush1.bf16.msra.mxu0 %v1119_v27  ;;  %v1228_v25 = vld [vmem:[#allocation2 + $0xca8] sm:$0xff]  ;;  %v1227_v27 = vld [vmem:[#allocation2 + $0xca0] sm:$0xff] }
 0x36e   :  { %1397 = vmatpush1.bf16.msra.mxu1 %v1183_v28  ;;  %1357 = vmatprep.subr.bf16.mxu0 %v1124_v30  ;;  %v1292_v16 = vld [vmem:[#allocation2 + $0xea8] sm:$0xff]  ;;  %v1291_v28 = vld [vmem:[#allocation2 + $0xea0] sm:$0xff] }
 0x36f   :  { %1398 = vmatprep.subr.bf16.mxu1 %v1188_v31  ;;  %v1232_v30 = vld [vmem:[#allocation2 + $0xcc8] sm:$0xff] }
 0x370   :  { %v1296_v31 = vld [vmem:[#allocation2 + $0xec8] sm:$0xff] }
 0x371   :  { %1358 = vmatpush1.bf16.msra.mxu0 %v1123_v32  ;;  %v1231_v32 = vld [vmem:[#allocation2 + $0xcc0] sm:$0xff] }
 0x372   :  { %1399 = vmatpush1.bf16.msra.mxu1 %v1187_v33  ;;  %1359 = vmatprep.subr.bf16.mxu0 %v1128_v34  ;;  %v1295_v33 = vld [vmem:[#allocation2 + $0xec0] sm:$0xff]  ;;  %v1236_v34 = vld [vmem:[#allocation2 + $0xce8] sm:$0xff] }
 0x373   :  { %1400 = vmatprep.subr.bf16.mxu1 %v1192_v35  ;;  %v1300_v35 = vld [vmem:[#allocation2 + $0xee8] sm:$0xff] }
 0x375   :  { %1360 = vmatpush1.bf16.msra.mxu0 %v1127_v36  ;;  %v1235_v36 = vld [vmem:[#allocation2 + $0xce0] sm:$0xff] }
 0x376   :  { %1401 = vmatpush1.bf16.msra.mxu1 %v1191_v37  ;;  %1361 = vmatprep.subr.bf16.mxu0 %v1132_v38  ;;  %v1299_v37 = vld [vmem:[#allocation2 + $0xee0] sm:$0xff]  ;;  %v1240_v38 = vld [vmem:[#allocation2 + $0xd08] sm:$0xff] }
 0x377   :  { %1402 = vmatprep.subr.bf16.mxu1 %v1196_v39  ;;  %v1304_v39 = vld [vmem:[#allocation2 + $0xf08] sm:$0xff] }
 0x379   :  { %1362 = vmatpush1.bf16.msra.mxu0 %v1131_v40  ;;  %v1239_v40 = vld [vmem:[#allocation2 + $0xd00] sm:$0xff] }
 0x37a   :  { %1403 = vmatpush1.bf16.msra.mxu1 %v1195_v41  ;;  %1363 = vmatprep.subr.bf16.mxu0 %v1136_v42  ;;  %v1303_v41 = vld [vmem:[#allocation2 + $0xf00] sm:$0xff]  ;;  %v1244_v42 = vld [vmem:[#allocation2 + $0xd28] sm:$0xff] }
 0x37b   :  { %1404 = vmatprep.subr.bf16.mxu1 %v1200_v43  ;;  %v1308_v43 = vld [vmem:[#allocation2 + $0xf28] sm:$0xff] }
 0x37d   :  { %1364 = vmatpush1.bf16.msra.mxu0 %v1135_v44  ;;  %v1243_v44 = vld [vmem:[#allocation2 + $0xd20] sm:$0xff] }
 0x37e   :  { %1405 = vmatpush1.bf16.msra.mxu1 %v1199_v45  ;;  %1365 = vmatprep.subr.bf16.mxu0 %v1140_v46  ;;  %v1307_v45 = vld [vmem:[#allocation2 + $0xf20] sm:$0xff]  ;;  %v1248_v46 = vld [vmem:[#allocation2 + $0xd48] sm:$0xff] }
 0x37f   :  { %1406 = vmatprep.subr.bf16.mxu1 %v1204_v47  ;;  %v1312_v47 = vld [vmem:[#allocation2 + $0xf48] sm:$0xff] }
 0x381   :  { %1366 = vmatpush1.bf16.msra.mxu0 %v1139_v48  ;;  %v1247_v48 = vld [vmem:[#allocation2 + $0xd40] sm:$0xff] }
 0x382   :  { %1407 = vmatpush1.bf16.msra.mxu1 %v1203_v49  ;;  %1417 = vmatprep.subr.bf16.mxu0 %v1208_v50  ;;  %v1311_v49 = vld [vmem:[#allocation2 + $0xf40] sm:$0xff]  ;;  %v1252_v50 = vld [vmem:[#allocation2 + $0xd68] sm:$0xff] }
 0x383   :  { %1458 = vmatprep.subr.bf16.mxu1 %v1272_v51  ;;  %v1316_v51 = vld [vmem:[#allocation2 + $0xf68] sm:$0xff] }
 0x384   :  { %1368 = vmatmul.mubr.bf16.vlgmr.msra.gmra.mrb[16].mxu0 %v8802_v58 }
 0x385   :  { %1409 = vmatmul.mubr.bf16.vlgmr.msra.gmra.mrb[16].mxu1 %v8810_v1  ;;  %1418 = vmatpush1.bf16.msra.mxu0 %v1207_v53  ;;  %v1251_v53 = vld [vmem:[#allocation2 + $0xd60] sm:$0xff] }
 0x386   :  { %1459 = vmatpush1.bf16.msra.mxu1 %v1271_v54  ;;  %1419 = vmatprep.subr.bf16.mxu0 %v1212_v56  ;;  %v1315_v54 = vld [vmem:[#allocation2 + $0xf60] sm:$0xff]  ;;  %v1256_v56 = vld [vmem:[#allocation2 + $0xd88] sm:$0xff] }
 0x387   :  { %1460 = vmatprep.subr.bf16.mxu1 %v1276_v57  ;;  %1449 = vmatprep.mubr.bf16.mxu0 %v8819_v15  ;;  %v1320_v57 = vld [vmem:[#allocation2 + $0xf88] sm:$0xff] }
 0x388   :  { %1490 = vmatprep.mubr.bf16.mxu1 %v8823_v19 }
 0x389   :  { %1420 = vmatpush1.bf16.msra.mxu0 %v1211_v59  ;;  %v1255_v59 = vld [vmem:[#allocation2 + $0xd80] sm:$0xff] }
 0x38a   :  { %1461 = vmatpush1.bf16.msra.mxu1 %v1275_v60  ;;  %1421 = vmatprep.subr.bf16.mxu0 %v1216_v61  ;;  %v1319_v60 = vld [vmem:[#allocation2 + $0xf80] sm:$0xff]  ;;  %v1260_v61 = vld [vmem:[#allocation2 + $0xda8] sm:$0xff] }
 0x38b   :  { %1462 = vmatprep.subr.bf16.mxu1 %v1280_v63  ;;  %v1324_v63 = vld [vmem:[#allocation2 + $0xfa8] sm:$0xff] }
 0x38d   :  { %1422 = vmatpush1.bf16.msra.mxu0 %v1215_v0  ;;  %v1259_v0 = vld [vmem:[#allocation2 + $0xda0] sm:$0xff] }
 0x38e   :  { %1463 = vmatpush1.bf16.msra.mxu1 %v1279_v3  ;;  %1423 = vmatprep.subr.bf16.mxu0 %v1220_v4  ;;  %v1323_v3 = vld [vmem:[#allocation2 + $0xfa0] sm:$0xff]  ;;  %v1264_v4 = vld [vmem:[#allocation2 + $0xdc8] sm:$0xff] }
 0x38f   :  { %1464 = vmatprep.subr.bf16.mxu1 %v1284_v14  ;;  %v1328_v14 = vld [vmem:[#allocation2 + $0xfc8] sm:$0xff] }
 0x391   :  { %1424 = vmatpush1.bf16.msra.mxu0 %v1219_v17  ;;  %v1263_v17 = vld [vmem:[#allocation2 + $0xdc0] sm:$0xff] }
 0x392   :  { %1465 = vmatpush1.bf16.msra.mxu1 %v1283_v20  ;;  %1425 = vmatprep.subr.bf16.mxu0 %v1224_v21  ;;  %v1327_v20 = vld [vmem:[#allocation2 + $0xfc0] sm:$0xff]  ;;  %v1268_v21 = vld [vmem:[#allocation2 + $0xde8] sm:$0xff] }
 0x393   :  { %1466 = vmatprep.subr.bf16.mxu1 %v1288_v22  ;;  %v1332_v22 = vld [vmem:[#allocation2 + $0xfe8] sm:$0xff] }
 0x395   :  { %1426 = vmatpush1.bf16.msra.mxu0 %v1223_v23  ;;  %v1267_v23 = vld [vmem:[#allocation2 + $0xde0] sm:$0xff] }
 0x396   :  { %1467 = vmatpush1.bf16.msra.mxu1 %v1287_v24  ;;  %1427 = vmatprep.subr.bf16.mxu0 %v1228_v25  ;;  %v1331_v24 = vld [vmem:[#allocation2 + $0xfe0] sm:$0xff]  ;;  %v1082_v25 = vld [vmem:[#allocation2 + $0x818] sm:$0xff] }
 0x397   :  { %1468 = vmatprep.subr.bf16.mxu1 %v1292_v16  ;;  %v1146_v16 = vld [vmem:[#allocation2 + $0xa18] sm:$0xff] }
 0x399   :  { %1428 = vmatpush1.bf16.msra.mxu0 %v1227_v27  ;;  %v1081_v27 = vld [vmem:[#allocation2 + $0x810] sm:$0xff] }
 0x39a   :  { %1469 = vmatpush1.bf16.msra.mxu1 %v1291_v28  ;;  %1429 = vmatprep.subr.bf16.mxu0 %v1232_v30  ;;  %v1145_v28 = vld [vmem:[#allocation2 + $0xa10] sm:$0xff]  ;;  %v1086_v30 = vld [vmem:[#allocation2 + $0x838] sm:$0xff] }
 0x39b   :  { %1470 = vmatprep.subr.bf16.mxu1 %v1296_v31  ;;  %v1150_v31 = vld [vmem:[#allocation2 + $0xa38] sm:$0xff] }
 0x39d   :  { %1430 = vmatpush1.bf16.msra.mxu0 %v1231_v32  ;;  %v1085_v32 = vld [vmem:[#allocation2 + $0x830] sm:$0xff] }
 0x39e   :  { %1471 = vmatpush1.bf16.msra.mxu1 %v1295_v33  ;;  %1431 = vmatprep.subr.bf16.mxu0 %v1236_v34  ;;  %v1149_v33 = vld [vmem:[#allocation2 + $0xa30] sm:$0xff]  ;;  %v1090_v34 = vld [vmem:[#allocation2 + $0x858] sm:$0xff] }
 0x39f   :  { %1472 = vmatprep.subr.bf16.mxu1 %v1300_v35  ;;  %v1154_v35 = vld [vmem:[#allocation2 + $0xa58] sm:$0xff] }
 0x3a1   :  { %1432 = vmatpush1.bf16.msra.mxu0 %v1235_v36  ;;  %v1089_v36 = vld [vmem:[#allocation2 + $0x850] sm:$0xff] }
 0x3a2   :  { %1473 = vmatpush1.bf16.msra.mxu1 %v1299_v37  ;;  %1433 = vmatprep.subr.bf16.mxu0 %v1240_v38  ;;  %v1153_v37 = vld [vmem:[#allocation2 + $0xa50] sm:$0xff]  ;;  %v1094_v38 = vld [vmem:[#allocation2 + $0x878] sm:$0xff] }
 0x3a3   :  { %1474 = vmatprep.subr.bf16.mxu1 %v1304_v39  ;;  %v1158_v39 = vld [vmem:[#allocation2 + $0xa78] sm:$0xff] }
 0x3a5   :  { %1434 = vmatpush1.bf16.msra.mxu0 %v1239_v40  ;;  %v1093_v40 = vld [vmem:[#allocation2 + $0x870] sm:$0xff] }
 0x3a6   :  { %1475 = vmatpush1.bf16.msra.mxu1 %v1303_v41  ;;  %1435 = vmatprep.subr.bf16.mxu0 %v1244_v42  ;;  %v1157_v41 = vld [vmem:[#allocation2 + $0xa70] sm:$0xff]  ;;  %v1098_v42 = vld [vmem:[#allocation2 + $0x898] sm:$0xff] }
 0x3a7   :  { %1476 = vmatprep.subr.bf16.mxu1 %v1308_v43  ;;  %v1162_v43 = vld [vmem:[#allocation2 + $0xa98] sm:$0xff] }
 0x3a9   :  { %1436 = vmatpush1.bf16.msra.mxu0 %v1243_v44  ;;  %v1102_v44 = vld [vmem:[#allocation2 + $0x8b8] sm:$0xff] }
 0x3aa   :  { %1477 = vmatpush1.bf16.msra.mxu1 %v1307_v45  ;;  %1437 = vmatprep.subr.bf16.mxu0 %v1248_v46  ;;  %v1166_v45 = vld [vmem:[#allocation2 + $0xab8] sm:$0xff]  ;;  %v1101_v46 = vld [vmem:[#allocation2 + $0x8b0] sm:$0xff] }
 0x3ab   :  { %1478 = vmatprep.subr.bf16.mxu1 %v1312_v47  ;;  %v1165_v47 = vld [vmem:[#allocation2 + $0xab0] sm:$0xff] }
 0x3ad   :  { %1438 = vmatpush1.bf16.msra.mxu0 %v1247_v48  ;;  %v1106_v48 = vld [vmem:[#allocation2 + $0x8d8] sm:$0xff] }
 0x3ae   :  { %1479 = vmatpush1.bf16.msra.mxu1 %v1311_v49  ;;  %1439 = vmatprep.subr.bf16.mxu0 %v1252_v50  ;;  %v1170_v49 = vld [vmem:[#allocation2 + $0xad8] sm:$0xff]  ;;  %v1105_v50 = vld [vmem:[#allocation2 + $0x8d0] sm:$0xff] }
 0x3af   :  { %1480 = vmatprep.subr.bf16.mxu1 %v1316_v51  ;;  %v1169_v51 = vld [vmem:[#allocation2 + $0xad0] sm:$0xff] }
 0x3b1   :  { %1440 = vmatpush1.bf16.msra.mxu0 %v1251_v53  ;;  %v1110_v53 = vld [vmem:[#allocation2 + $0x8f8] sm:$0xff] }
 0x3b2   :  { %1481 = vmatpush1.bf16.msra.mxu1 %v1315_v54  ;;  %1441 = vmatprep.subr.bf16.mxu0 %v1256_v56  ;;  %v1174_v54 = vld [vmem:[#allocation2 + $0xaf8] sm:$0xff]  ;;  %v1109_v56 = vld [vmem:[#allocation2 + $0x8f0] sm:$0xff] }
 0x3b3   :  { %1482 = vmatprep.subr.bf16.mxu1 %v1320_v57  ;;  %v1173_v57 = vld [vmem:[#allocation2 + $0xaf0] sm:$0xff] }
 0x3b5   :  { %1442 = vmatpush1.bf16.msra.mxu0 %v1255_v59  ;;  %v1114_v59 = vld [vmem:[#allocation2 + $0x918] sm:$0xff] }
 0x3b6   :  { %1483 = vmatpush1.bf16.msra.mxu1 %v1319_v60  ;;  %1443 = vmatprep.subr.bf16.mxu0 %v1260_v61  ;;  %v1178_v60 = vld [vmem:[#allocation2 + $0xb18] sm:$0xff]  ;;  %v1113_v61 = vld [vmem:[#allocation2 + $0x910] sm:$0xff] }
 0x3b7   :  { %1484 = vmatprep.subr.bf16.mxu1 %v1324_v63  ;;  %v1177_v63 = vld [vmem:[#allocation2 + $0xb10] sm:$0xff] }
 0x3b9   :  { %1444 = vmatpush1.bf16.msra.mxu0 %v1259_v0  ;;  %v1118_v0 = vld [vmem:[#allocation2 + $0x938] sm:$0xff] }
 0x3ba   :  { %1485 = vmatpush1.bf16.msra.mxu1 %v1323_v3  ;;  %1445 = vmatprep.subr.bf16.mxu0 %v1264_v4  ;;  %v1182_v3 = vld [vmem:[#allocation2 + $0xb38] sm:$0xff]  ;;  %v1117_v4 = vld [vmem:[#allocation2 + $0x930] sm:$0xff] }
 0x3bb   :  { %1486 = vmatprep.subr.bf16.mxu1 %v1328_v14  ;;  %v1181_v14 = vld [vmem:[#allocation2 + $0xb30] sm:$0xff] }
 0x3bd   :  { %1446 = vmatpush1.bf16.msra.mxu0 %v1263_v17  ;;  %v1122_v17 = vld [vmem:[#allocation2 + $0x958] sm:$0xff] }
 0x3be   :  { %1487 = vmatpush1.bf16.msra.mxu1 %v1327_v20  ;;  %1447 = vmatprep.subr.bf16.mxu0 %v1268_v21  ;;  %v1186_v20 = vld [vmem:[#allocation2 + $0xb58] sm:$0xff]  ;;  %v1121_v21 = vld [vmem:[#allocation2 + $0x950] sm:$0xff] }
 0x3bf   :  { %1488 = vmatprep.subr.bf16.mxu1 %v1332_v22  ;;  %v1185_v22 = vld [vmem:[#allocation2 + $0xb50] sm:$0xff] }
 0x3c1   :  { %1448 = vmatpush1.bf16.msra.mxu0 %v1267_v23  ;;  %v1126_v23 = vld [vmem:[#allocation2 + $0x978] sm:$0xff] }
 0x3c2   :  { %1489 = vmatpush1.bf16.msra.mxu1 %v1331_v24  ;;  %1499 = vmatprep.subr.bf16.mxu0 %v1082_v25  ;;  %v1190_v24 = vld [vmem:[#allocation2 + $0xb78] sm:$0xff]  ;;  %v1125_v25 = vld [vmem:[#allocation2 + $0x970] sm:$0xff] }
 0x3c3   :  { %1540 = vmatprep.subr.bf16.mxu1 %v1146_v16  ;;  %v1189_v16 = vld [vmem:[#allocation2 + $0xb70] sm:$0xff] }
 0x3c4   :  { %1450 = vmatmul.mubr.bf16.vlgmr.msra.gmra.mrb[20].mxu0 %v8817_v6 }
 0x3c5   :  { %1491 = vmatmul.mubr.bf16.vlgmr.msra.gmra.mrb[20].mxu1 %v8821_v18  ;;  %1500 = vmatpush1.bf16.msra.mxu0 %v1081_v27  ;;  %v1130_v27 = vld [vmem:[#allocation2 + $0x998] sm:$0xff] }
 0x3c6   :  { %1541 = vmatpush1.bf16.msra.mxu1 %v1145_v28  ;;  %1501 = vmatprep.subr.bf16.mxu0 %v1086_v30  ;;  %v1194_v28 = vld [vmem:[#allocation2 + $0xb98] sm:$0xff]  ;;  %v1129_v30 = vld [vmem:[#allocation2 + $0x990] sm:$0xff] }
 0x3c7   :  { %1542 = vmatprep.subr.bf16.mxu1 %v1150_v31  ;;  %1531 = vmatprep.mubr.bf16.mxu0 %v8805_v62  ;;  %v1097_v62 = vld [vmem:[#allocation2 + $0x890] sm:$0xff] }
 0x3c8   :  { %1572 = vmatprep.mubr.bf16.mxu1 %v8812_v2  ;;  %v1161_v2 = vld [vmem:[#allocation2 + $0xa90] sm:$0xff] }
 0x3c9   :  { %1502 = vmatpush1.bf16.msra.mxu0 %v1085_v32  ;;  %v1193_v31 = vld [vmem:[#allocation2 + $0xb90] sm:$0xff]  ;;  %v1134_v32 = vld [vmem:[#allocation2 + $0x9b8] sm:$0xff] }
 0x3ca   :  { %1543 = vmatpush1.bf16.msra.mxu1 %v1149_v33  ;;  %1503 = vmatprep.subr.bf16.mxu0 %v1090_v34  ;;  %v1198_v33 = vld [vmem:[#allocation2 + $0xbb8] sm:$0xff]  ;;  %v1133_v34 = vld [vmem:[#allocation2 + $0x9b0] sm:$0xff] }
 0x3cb   :  { %1544 = vmatprep.subr.bf16.mxu1 %v1154_v35  ;;  %v1197_v35 = vld [vmem:[#allocation2 + $0xbb0] sm:$0xff] }
 0x3cd   :  { %1504 = vmatpush1.bf16.msra.mxu0 %v1089_v36  ;;  %v1138_v36 = vld [vmem:[#allocation2 + $0x9d8] sm:$0xff] }
 0x3ce   :  { %1545 = vmatpush1.bf16.msra.mxu1 %v1153_v37  ;;  %1505 = vmatprep.subr.bf16.mxu0 %v1094_v38  ;;  %v1202_v37 = vld [vmem:[#allocation2 + $0xbd8] sm:$0xff]  ;;  %v1137_v38 = vld [vmem:[#allocation2 + $0x9d0] sm:$0xff] }
 0x3cf   :  { %1546 = vmatprep.subr.bf16.mxu1 %v1158_v39  ;;  %v1201_v39 = vld [vmem:[#allocation2 + $0xbd0] sm:$0xff] }
 0x3d1   :  { %1506 = vmatpush1.bf16.msra.mxu0 %v1093_v40  ;;  %v1142_v40 = vld [vmem:[#allocation2 + $0x9f8] sm:$0xff] }
 0x3d2   :  { %1547 = vmatpush1.bf16.msra.mxu1 %v1157_v41  ;;  %1507 = vmatprep.subr.bf16.mxu0 %v1098_v42  ;;  %v1206_v41 = vld [vmem:[#allocation2 + $0xbf8] sm:$0xff]  ;;  %v1141_v42 = vld [vmem:[#allocation2 + $0x9f0] sm:$0xff] }
 0x3d3   :  { %1548 = vmatprep.subr.bf16.mxu1 %v1162_v43  ;;  %v1205_v43 = vld [vmem:[#allocation2 + $0xbf0] sm:$0xff] }
 0x3d5   :  { %1508 = vmatpush1.bf16.msra.mxu0 %v1097_v62  ;;  %v1210_v62 = vld [vmem:[#allocation2 + $0xc18] sm:$0xff] }
 0x3d6   :  { %1549 = vmatpush1.bf16.msra.mxu1 %v1161_v2  ;;  %1509 = vmatprep.subr.bf16.mxu0 %v1102_v44  ;;  %v1274_v2 = vld [vmem:[#allocation2 + $0xe18] sm:$0xff]  ;;  %v1209_v44 = vld [vmem:[#allocation2 + $0xc10] sm:$0xff] }
 0x3d7   :  { %1550 = vmatprep.subr.bf16.mxu1 %v1166_v45  ;;  %v1273_v45 = vld [vmem:[#allocation2 + $0xe10] sm:$0xff] }
 0x3d9   :  { %1510 = vmatpush1.bf16.msra.mxu0 %v1101_v46  ;;  %v1214_v46 = vld [vmem:[#allocation2 + $0xc38] sm:$0xff] }
 0x3da   :  { %1551 = vmatpush1.bf16.msra.mxu1 %v1165_v47  ;;  %1511 = vmatprep.subr.bf16.mxu0 %v1106_v48  ;;  %v1278_v47 = vld [vmem:[#allocation2 + $0xe38] sm:$0xff]  ;;  %v1213_v48 = vld [vmem:[#allocation2 + $0xc30] sm:$0xff] }
 0x3db   :  { %1552 = vmatprep.subr.bf16.mxu1 %v1170_v49  ;;  %v1277_v49 = vld [vmem:[#allocation2 + $0xe30] sm:$0xff] }
 0x3dd   :  { %1512 = vmatpush1.bf16.msra.mxu0 %v1105_v50  ;;  %v1218_v50 = vld [vmem:[#allocation2 + $0xc58] sm:$0xff] }
 0x3de   :  { %1553 = vmatpush1.bf16.msra.mxu1 %v1169_v51  ;;  %1513 = vmatprep.subr.bf16.mxu0 %v1110_v53  ;;  %v1282_v51 = vld [vmem:[#allocation2 + $0xe58] sm:$0xff]  ;;  %v1217_v53 = vld [vmem:[#allocation2 + $0xc50] sm:$0xff] }
 0x3df   :  { %1554 = vmatprep.subr.bf16.mxu1 %v1174_v54  ;;  %v1222_v54 = vld [vmem:[#allocation2 + $0xc78] sm:$0xff] }
 0x3e1   :  { %1514 = vmatpush1.bf16.msra.mxu0 %v1109_v56  ;;  %v1221_v56 = vld [vmem:[#allocation2 + $0xc70] sm:$0xff] }
 0x3e2   :  { %1555 = vmatpush1.bf16.msra.mxu1 %v1173_v57  ;;  %1515 = vmatprep.subr.bf16.mxu0 %v1114_v59  ;;  %v1285_v57 = vld [vmem:[#allocation2 + $0xe70] sm:$0xff]  ;;  %v1226_v59 = vld [vmem:[#allocation2 + $0xc98] sm:$0xff] }
 0x3e3   :  { %1556 = vmatprep.subr.bf16.mxu1 %v1178_v60  ;;  %v1290_v60 = vld [vmem:[#allocation2 + $0xe98] sm:$0xff] }
 0x3e5   :  { %1516 = vmatpush1.bf16.msra.mxu0 %v1113_v61  ;;  %v1230_v61 = vld [vmem:[#allocation2 + $0xcb8] sm:$0xff] }
 0x3e6   :  { %1557 = vmatpush1.bf16.msra.mxu1 %v1177_v63  ;;  %1517 = vmatprep.subr.bf16.mxu0 %v1118_v0  ;;  %v1294_v63 = vld [vmem:[#allocation2 + $0xeb8] sm:$0xff]  ;;  %v1229_v0 = vld [vmem:[#allocation2 + $0xcb0] sm:$0xff] }
 0x3e7   :  { %1558 = vmatprep.subr.bf16.mxu1 %v1182_v3  ;;  %v1293_v3 = vld [vmem:[#allocation2 + $0xeb0] sm:$0xff] }
 0x3e9   :  { %1518 = vmatpush1.bf16.msra.mxu0 %v1117_v4  ;;  %v1234_v4 = vld [vmem:[#allocation2 + $0xcd8] sm:$0xff] }
 0x3ea   :  { %1559 = vmatpush1.bf16.msra.mxu1 %v1181_v14  ;;  %1519 = vmatprep.subr.bf16.mxu0 %v1122_v17  ;;  %v1298_v14 = vld [vmem:[#allocation2 + $0xed8] sm:$0xff] }
 0x3eb   :  { %1560 = vmatprep.subr.bf16.mxu1 %v1186_v20  ;;  %v8895_v17 = vld [vmem:[#allocation10] sm:$0xff]  ;;  %v1233_v20 = vld [vmem:[#allocation2 + $0xcd0] sm:$0xff] }
 0x3ed   :  { %1520 = vmatpush1.bf16.msra.mxu0 %v1121_v21  ;;  %v1297_v21 = vld [vmem:[#allocation2 + $0xed0] sm:$0xff] }
 0x3ee   :  { %1561 = vmatpush1.bf16.msra.mxu1 %v1185_v22  ;;  %1521 = vmatprep.subr.bf16.mxu0 %v1126_v23  ;;  %v1668_v22 = vrot.slane %v8895_v17, %v8749_v5  ;;  %v1672_v23 = vrot.slane %v8895_v17, %v8751_v7 }
 0x3ef   :  { %1562 = vmatprep.subr.bf16.mxu1 %v1190_v24  ;;  %v1676_v24 = vrot.slane %v8895_v17, %v8753_v8 }
 0x3f1   :  { %1522 = vmatpush1.bf16.msra.mxu0 %v1125_v25  ;;  %v1238_v25 = vld [vmem:[#allocation2 + $0xcf8] sm:$0xff] }
 0x3f2   :  { %1563 = vmatpush1.bf16.msra.mxu1 %v1189_v16  ;;  %1523 = vmatprep.subr.bf16.mxu0 %v1130_v27  ;;  %v1302_v16 = vld [vmem:[#allocation2 + $0xef8] sm:$0xff]  ;;  %v1680_v27 = vrot.slane %v8895_v17, %v8755_v9 }
 0x3f3   :  { %1564 = vmatprep.subr.bf16.mxu1 %v1194_v28  ;;  %v8906_v28 = vadd.f32 %v1668_v22, %v8858_v52  ;;  %v1306_v52 = vld [vmem:[#allocation2 + $0xf18] sm:$0xff] }
 0x3f5   :  { %1524 = vmatpush1.bf16.msra.mxu0 %v1129_v30  ;;  %v8909_v30 = vadd.f32 %v1672_v23, %v8860_v55  ;;  %vm1713_vm8 = vcmp.gt.f32.partialorder %v8906_v28, 0.0 }
 0x3f6   :  { %1565 = vmatpush1.bf16.msra.mxu1 %v1193_v31  ;;  %1525 = vmatprep.subr.bf16.mxu0 %v1134_v32  ;;  %v8912_v31 = vadd.f32 %v1676_v24, %v8862_v26  ;;  %v8915_v32 = vadd.f32 %v1680_v27, %v8864_v29  ;;  %v1241_v29 = vld [vmem:[#allocation2 + $0xd10] sm:$0xff] }
 0x3f7   :  { %1566 = vmatprep.subr.bf16.mxu1 %v1198_v33  ;;  %v1237_v33 = vld [vmem:[#allocation2 + $0xcf0] sm:$0xff]  ;;  %vm1714_vm9 = vcmp.gt.f32.partialorder %v8909_v30, 0.0 }
 0x3f8   :  { %v1725_v55 = vmul.f32 1.442695, %v8912_v31  ;;  %v1727_v26 = vmul.f32 1.442695, %v8915_v32  ;;  %vm1715_vm10 = vcmp.gt.f32.partialorder %v8912_v31, 0.0  ;;  %vm1716_vm11 = vcmp.gt.f32.partialorder %v8915_v32, 0.0 }
 0x3f9   :  { %1526 = vmatpush1.bf16.msra.mxu0 %v1133_v34  ;;  %v1301_v34 = vld [vmem:[#allocation2 + $0xef0] sm:$0xff] }
 0x3fa   :  { %1567 = vmatpush1.bf16.msra.mxu1 %v1197_v35  ;;  %1527 = vmatprep.subr.bf16.mxu0 %v1138_v36  ;;  %v1721_v35 = vmul.f32 1.442695, %v8906_v28  ;;  %v1242_v36 = vld [vmem:[#allocation2 + $0xd18] sm:$0xff] }
 0x3fb   :  { %1568 = vmatprep.subr.bf16.mxu1 %v1202_v37  ;;  %v1723_v37 = vmul.f32 1.442695, %v8909_v30 }
 0x3fc   :  { %8099 = vpow2.f32 %v1721_v35  ;;  %v1266_v35 = vld [vmem:[#allocation2 + $0xdd8] sm:$0xff] }
 0x3fd   :  { %1528 = vmatpush1.bf16.msra.mxu0 %v1137_v38  ;;  %8101 = vpow2.f32 %v1723_v37  ;;  %v1305_v38 = vld [vmem:[#allocation2 + $0xf10] sm:$0xff]  ;;  %v1270_v37 = vld [vmem:[#allocation2 + $0xdf8] sm:$0xff] }
 0x3fe   :  { %1569 = vmatpush1.bf16.msra.mxu1 %v1201_v39  ;;  %1529 = vmatprep.subr.bf16.mxu0 %v1142_v40  ;;  %8103 = vpow2.f32 %v1725_v55  ;;  %v1246_v39 = vld [vmem:[#allocation2 + $0xd38] sm:$0xff] }
 0x3ff   :  { %1570 = vmatprep.subr.bf16.mxu1 %v1206_v41  ;;  %v1310_v40 = vld [vmem:[#allocation2 + $0xf38] sm:$0xff]  ;;  %8105 = vpow2.f32 %v1727_v26  ;;  %v1245_v41 = vld [vmem:[#allocation2 + $0xd30] sm:$0xff] }
 0x400   :  { %v1334_v55 = vld [vmem:[#allocation2 + $0xff8] sm:$0xff]  ;;  %v1269_v26 = vld [vmem:[#allocation2 + $0xdf0] sm:$0xff] }
 0x401   :  { %1530 = vmatpush1.bf16.msra.mxu0 %v1141_v42  ;;  %v1309_v42 = vld [vmem:[#allocation2 + $0xf30] sm:$0xff] }
 0x402   :  { %1571 = vmatpush1.bf16.msra.mxu1 %v1205_v43  ;;  %1581 = vmatprep.subr.bf16.mxu0 %v1210_v62  ;;  %v1250_v43 = vld [vmem:[#allocation2 + $0xd58] sm:$0xff] }
 0x403   :  { %1622 = vmatprep.subr.bf16.mxu1 %v1274_v2  ;;  %v1314_v62 = vld [vmem:[#allocation2 + $0xf58] sm:$0xff] }
 0x404   :  { %1532 = vmatmul.mubr.bf16.vlgmr.msra.gmra.mrb[24].mxu0 %v8802_v58  ;;  %v1281_v58 = vld [vmem:[#allocation2 + $0xe50] sm:$0xff] }
 0x405   :  { %1573 = vmatmul.mubr.bf16.vlgmr.msra.gmra.mrb[24].mxu1 %v8810_v1  ;;  %1582 = vmatpush1.bf16.msra.mxu0 %v1209_v44  ;;  %v1286_v1 = vld [vmem:[#allocation2 + $0xe78] sm:$0xff]  ;;  %v1249_v44 = vld [vmem:[#allocation2 + $0xd50] sm:$0xff] }
 0x406   :  { %1623 = vmatpush1.bf16.msra.mxu1 %v1273_v45  ;;  %1583 = vmatprep.subr.bf16.mxu0 %v1214_v46  ;;  %v8100_v2 = vpop.eup %8099  ;;  %v1313_v45 = vld [vmem:[#allocation2 + $0xf50] sm:$0xff] }
 0x407   :  { %1624 = vmatprep.subr.bf16.mxu1 %v1278_v47  ;;  %1613 = vmatprep.mubr.bf16.mxu0 %v8819_v15  ;;  %v1225_v15 = vld [vmem:[#allocation2 + $0xc90] sm:$0xff]  ;;  %v8102_v46 = vpop.eup %8101  ;;  %v1254_v47 = vld [vmem:[#allocation2 + $0xd78] sm:$0xff] }
 0x408   :  { %1654 = vmatprep.mubr.bf16.mxu1 %v8823_v19  ;;  %v1289_v19 = vld [vmem:[#allocation2 + $0xe90] sm:$0xff] }
 0x409   :  { %1584 = vmatpush1.bf16.msra.mxu0 %v1213_v48  ;;  %v1318_v48 = vld [vmem:[#allocation2 + $0xf78] sm:$0xff] }
 0x40a   :  { %1625 = vmatpush1.bf16.msra.mxu1 %v1277_v49  ;;  %1585 = vmatprep.subr.bf16.mxu0 %v1218_v50  ;;  %v7855_v49 = vadd.f32 -1.0, %v8100_v2  ;;  %v8104_v50 = vpop.eup %8103 }
 0x40b   :  { %1626 = vmatprep.subr.bf16.mxu1 %v1282_v51  ;;  %v7856_v51 = vadd.f32 -1.0, %v8102_v46 }
 0x40d   :  { %1586 = vmatpush1.bf16.msra.mxu0 %v1217_v53  ;;  %v8106_v53 = vpop.eup %8105 }
 0x40e   :  { %1627 = vmatpush1.bf16.msra.mxu1 %v1281_v58  ;;  %1587 = vmatprep.subr.bf16.mxu0 %v1222_v54  ;;  %v7857_v58 = vadd.f32 -1.0, %v8104_v50  ;;  %v1745_v54 = vmul.f32 1.6732632, %v7855_v49  ;;  %v1684_v49 = vrot.slane %v8895_v17, %v8757_v10 }
 0x40f   :  { %1628 = vmatprep.subr.bf16.mxu1 %v1286_v1  ;;  %v1253_v1 = vld [vmem:[#allocation2 + $0xd70] sm:$0xff] }
 0x411   :  { %1588 = vmatpush1.bf16.msra.mxu0 %v1221_v56  ;;  %v1317_v56 = vld [vmem:[#allocation2 + $0xf70] sm:$0xff] }
 0x412   :  { %1629 = vmatpush1.bf16.msra.mxu1 %v1285_v57  ;;  %1589 = vmatprep.subr.bf16.mxu0 %v1226_v59  ;;  %v7858_v57 = vadd.f32 -1.0, %v8106_v53  ;;  %v1746_v59 = vmul.f32 1.6732632, %v7856_v51 }
 0x413   :  { %1630 = vmatprep.subr.bf16.mxu1 %v1290_v60  ;;  %v1258_v60 = vld [vmem:[#allocation2 + $0xd98] sm:$0xff] }
 0x415   :  { %1590 = vmatpush1.bf16.msra.mxu0 %v1225_v15  ;;  %v1322_v15 = vld [vmem:[#allocation2 + $0xf98] sm:$0xff] }
 0x416   :  { %1631 = vmatpush1.bf16.msra.mxu1 %v1289_v19  ;;  %1591 = vmatprep.subr.bf16.mxu0 %v1230_v61  ;;  %v1747_v19 = vmul.f32 1.6732632, %v7857_v58  ;;  %v1753_v61 = vsel %vm1713_vm8, %v8906_v28, %v1745_v54 }
 0x417   :  { %1632 = vmatprep.subr.bf16.mxu1 %v1294_v63  ;;  %v1748_v63 = vmul.f32 1.6732632, %v7858_v57 }
 0x419   :  { %1592 = vmatpush1.bf16.msra.mxu0 %v1229_v0  ;;  %v1754_v0 = vsel %vm1714_vm9, %v8909_v30, %v1746_v59  ;;  %v1756_v22 = vsel %vm1716_vm11, %v8915_v32, %v1748_v63  ;;  %v1330_v32 = vld [vmem:[#allocation2 + $0xfd8] sm:$0xff] }
 0x41a   :  { %1633 = vmatpush1.bf16.msra.mxu1 %v1293_v3  ;;  %1593 = vmatprep.subr.bf16.mxu0 %v1234_v4  ;;  %v1761_v3 = vmul.f32 1.050701, %v1753_v61  ;;  %v1755_v4 = vsel %vm1715_vm10, %v8912_v31, %v1747_v19  ;;  %v1764_v27 = vmul.f32 1.050701, %v1756_v22 }
 0x41b   :  { %1634 = vmatprep.subr.bf16.mxu1 %v1298_v14  ;;  %v1762_v14 = vmul.f32 1.050701, %v1754_v0  ;;  %v1763_v23 = vmul.f32 1.050701, %v1755_v4 }
 0x41c   :  { %v8933_v24 = vpack.c.bf16 %v1761_v3, %v1761_v3  ;;  %v8939_v31 = vpack.c.bf16 %v1764_v27, %v1764_v27 }
 0x41d   :  { %1594 = vmatpush1.bf16.msra.mxu0 %v1233_v20  ;;  %v1257_v20 = vld [vmem:[#allocation2 + $0xd90] sm:$0xff]  ;;  %v8935_v28 = vpack.c.bf16 %v1762_v14, %v1762_v14  ;;  %v8937_v30 = vpack.c.bf16 %v1763_v23, %v1763_v23 }
 0x41e   :  { %1635 = vmatpush1.bf16.msra.mxu1 %v1297_v21  ;;  %1595 = vmatprep.subr.bf16.mxu0 %v1238_v25  ;;  %v1321_v21 = vld [vmem:[#allocation2 + $0xf90] sm:$0xff]  ;;  %v1262_v25 = vld [vmem:[#allocation2 + $0xdb8] sm:$0xff] }
 0x41f   :  { %1636 = vmatprep.subr.bf16.mxu1 %v1302_v16  ;;  %v1326_v16 = vld [vmem:[#allocation2 + $0xfb8] sm:$0xff] }
 0x421   :  { %1596 = vmatpush1.bf16.msra.mxu0 %v1237_v33  ;;  %v1261_v33 = vld [vmem:[#allocation2 + $0xdb0] sm:$0xff] }
 0x422   :  { %1637 = vmatpush1.bf16.msra.mxu1 %v1301_v34  ;;  %1597 = vmatprep.subr.bf16.mxu0 %v1242_v36  ;;  %v1325_v34 = vld [vmem:[#allocation2 + $0xfb0] sm:$0xff] }
 0x423   :  { %1638 = vmatprep.subr.bf16.mxu1 %v1306_v52  ;;  %v1265_v36 = vld [vmem:[#allocation2 + $0xdd0] sm:$0xff] }
 0x424   :  { %v1329_v52 = vld [vmem:[#allocation2 + $0xfd0] sm:$0xff] }
 0x425   :  { %1598 = vmatpush1.bf16.msra.mxu0 %v1241_v29  ;;  %v1333_v29 = vld [vmem:[#allocation2 + $0xff0] sm:$0xff] }
 0x426   :  { %1639 = vmatpush1.bf16.msra.mxu1 %v1305_v38  ;;  %1599 = vmatprep.subr.bf16.mxu0 %v1246_v39 }
 0x427   :  { %1640 = vmatprep.subr.bf16.mxu1 %v1310_v40 }
 0x429   :  { %1600 = vmatpush1.bf16.msra.mxu0 %v1245_v41 }
 0x42a   :  { %1641 = vmatpush1.bf16.msra.mxu1 %v1309_v42  ;;  %1601 = vmatprep.subr.bf16.mxu0 %v1250_v43 }
 0x42b   :  { %1642 = vmatprep.subr.bf16.mxu1 %v1314_v62 }
 0x42d   :  { %1602 = vmatpush1.bf16.msra.mxu0 %v1249_v44 }
 0x42e   :  { %1643 = vmatpush1.bf16.msra.mxu1 %v1313_v45  ;;  %1603 = vmatprep.subr.bf16.mxu0 %v1254_v47 }
 0x42f   :  { %1644 = vmatprep.subr.bf16.mxu1 %v1318_v48 }
 0x431   :  { %1604 = vmatpush1.bf16.msra.mxu0 %v1253_v1 }
 0x432   :  { %1645 = vmatpush1.bf16.msra.mxu1 %v1317_v56  ;;  %1605 = vmatprep.subr.bf16.mxu0 %v1258_v60 }
 0x433   :  { %1646 = vmatprep.subr.bf16.mxu1 %v1322_v15 }
 0x435   :  { %1606 = vmatpush1.bf16.msra.mxu0 %v1257_v20 }
 0x436   :  { %1647 = vmatpush1.bf16.msra.mxu1 %v1321_v21  ;;  %1607 = vmatprep.subr.bf16.mxu0 %v1262_v25 }
 0x437   :  { %1648 = vmatprep.subr.bf16.mxu1 %v1326_v16 }
 0x439   :  { %1608 = vmatpush1.bf16.msra.mxu0 %v1261_v33 }
 0x43a   :  { %1649 = vmatpush1.bf16.msra.mxu1 %v1325_v34  ;;  %1609 = vmatprep.subr.bf16.mxu0 %v1266_v35 }
 0x43b   :  { %1650 = vmatprep.subr.bf16.mxu1 %v1330_v32 }
 0x43d   :  { %1610 = vmatpush1.bf16.msra.mxu0 %v1265_v36 }
 0x43e   :  { %1651 = vmatpush1.bf16.msra.mxu1 %v1329_v52  ;;  %1611 = vmatprep.subr.bf16.mxu0 %v1270_v37 }
 0x43f   :  { %1652 = vmatprep.subr.bf16.mxu1 %v1334_v55 }
 0x441   :  { %1612 = vmatpush1.bf16.msra.mxu0 %v1269_v26 }
 0x442   :  { %1653 = vmatpush1.bf16.msra.mxu1 %v1333_v29 }
 0x444   :  { %1614 = vmatmul.mubr.bf16.vlgmr.msra.gmra.mrb[28].mxu0 %v8817_v6 }
 0x445   :  { %1655 = vmatmul.mubr.bf16.vlgmr.msra.gmra.mrb[28].mxu1 %v8821_v18  ;;  %v1688_v18 = vrot.slane %v8895_v17, %v8759_v11 }
 0x457   :  { %v1369_v38 = vpop.f32.mrb[16].mxu0 }
 0x458   :  { %v1410_v39 = vpop.f32.mrb[16].mxu1  ;;  %v1371_v41 = vpop.f32.mrb[17].mxu0 }
 0x459   :  { %v1411_v40 = vadd.f32 %v1410_v39, %v1369_v38  ;;  %v1412_v42 = vpop.f32.mrb[17].mxu1  ;;  %v1373_v62 = vpop.f32.mrb[18].mxu0 }
 0x45a   :  { %v1413_v43 = vadd.f32 %v1412_v42, %v1371_v41  ;;  %v1414_v2 = vpop.f32.mrb[18].mxu1  ;;  %v1374_v44 = vpop.f32.mrb[19].mxu0  ;;  %v1696_v62 = vrot.slane %v8895_v17, %v8763_v13 }
 0x45b   :  { %v1415_v45 = vpop.f32.mrb[19].mxu1 }
 0x497   :  { %v1451_v46 = vpop.f32.mrb[20].mxu0 }
 0x498   :  { %v1492_v47 = vpop.f32.mrb[20].mxu1  ;;  %v1452_v48 = vadd.f32 %v1451_v46, %v1411_v40  ;;  %v1453_v50 = vpop.f32.mrb[21].mxu0  ;;  %v1692_v40 = vrot.slane %v8895_v17, %v8761_v12 }
 0x499   :  { %v1494_v6 = vpop.f32.mrb[21].mxu1  ;;  %v1454_v51 = vadd.f32 %v1453_v50, %v1413_v43  ;;  %v1455_v53 = vpop.f32.mrb[22].mxu0 }
 0x49a   :  { %v1496_v58 = vpop.f32.mrb[22].mxu1  ;;  %v1493_v54 = vadd.f32 %v1492_v47, %v1452_v48  ;;  %v1456_v1 = vpop.f32.mrb[23].mxu0 }
 0x49b   :  { %v1497_v56 = vpop.f32.mrb[23].mxu1  ;;  %v1495_v57 = vadd.f32 %v1494_v6, %v1454_v51 }
 0x49c   :  { %v1709_v59 = vadd.f32 %v1684_v49, %v1493_v54 }
 0x49d   :  { %v1710_v60 = vadd.f32 %v1688_v18, %v1495_v57 }
 0x49e   :  { %v1729_v15 = vmul.f32 1.442695, %v1709_v59  ;;  %vm1717_vm12 = vcmp.gt.f32.partialorder %v1709_v59, 0.0 }
 0x49f   :  { %v1731_v19 = vmul.f32 1.442695, %v1710_v60  ;;  %vm1718_vm13 = vcmp.gt.f32.partialorder %v1710_v60, 0.0 }
 0x4a0   :  { %8107 = vpow2.f32 %v1729_v15 }
 0x4a1   :  { %8109 = vpow2.f32 %v1731_v19 }
 0x4aa   :  { %v8108_v61 = vpop.eup %8107 }
 0x4ab   :  { %v8110_v63 = vpop.eup %8109  ;;  %v7859_v0 = vadd.f32 -1.0, %v8108_v61 }
 0x4ac   :  { %v7860_v3 = vadd.f32 -1.0, %v8110_v63 }
 0x4ad   :  { %v1749_v4 = vmul.f32 1.6732632, %v7859_v0 }
 0x4ae   :  { %v1750_v14 = vmul.f32 1.6732632, %v7860_v3 }
 0x4af   :  { %v1757_v20 = vsel %vm1717_vm12, %v1709_v59, %v1749_v4 }
 0x4b0   :  { %v1765_v21 = vmul.f32 1.050701, %v1757_v20  ;;  %v1758_v22 = vsel %vm1718_vm13, %v1710_v60, %v1750_v14 }
 0x4b1   :  { %v1766_v23 = vmul.f32 1.050701, %v1758_v22 }
 0x4b2   :  { %v8947_v25 = vpack.c.bf16 %v1765_v21, %v1765_v21 }
 0x4b3   :  { %v8949_v16 = vpack.c.bf16 %v1766_v23, %v1766_v23 }
 0x4d7   :  { %v1533_v27 = vpop.f32.mrb[24].mxu0 }
 0x4d8   :  { %v1574_v33 = vpop.f32.mrb[24].mxu1  ;;  %v1535_v35 = vpop.f32.mrb[25].mxu0 }
 0x4d9   :  { %v1575_v34 = vadd.f32 %v1574_v33, %v1533_v27  ;;  %v1576_v32 = vpop.f32.mrb[25].mxu1  ;;  %v1537_v52 = vpop.f32.mrb[26].mxu0 }
 0x4da   :  { %v1577_v36 = vadd.f32 %v1576_v32, %v1535_v35  ;;  %v1578_v37 = vpop.f32.mrb[26].mxu1  ;;  %v1538_v55 = vpop.f32.mrb[27].mxu0 }
 0x4db   :  { %v1579_v26 = vpop.f32.mrb[27].mxu1 }
 0x517   :  { %v1615_v29 = vpop.f32.mrb[28].mxu0 }
 0x518   :  { %v1656_v38 = vpop.f32.mrb[28].mxu1  ;;  %v1616_v39 = vadd.f32 %v1615_v29, %v1575_v34  ;;  %v1617_v41 = vpop.f32.mrb[29].mxu0 }
 0x519   :  { %v1658_v42 = vpop.f32.mrb[29].mxu1  ;;  %v1618_v43 = vadd.f32 %v1617_v41, %v1577_v36  ;;  %v1619_v2 = vpop.f32.mrb[30].mxu0 }
 0x51a   :  { %v1660_v44 = vpop.f32.mrb[30].mxu1  ;;  %v1657_v45 = vadd.f32 %v1656_v38, %v1616_v39  ;;  %v1620_v46 = vpop.f32.mrb[31].mxu0 }
 0x51b   :  { %v1661_v47 = vpop.f32.mrb[31].mxu1  ;;  %v1659_v48 = vadd.f32 %v1658_v42, %v1618_v43 }
 0x51c   :  { %v1711_v49 = vadd.f32 %v1692_v40, %v1657_v45 }
 0x51d   :  { %v1712_v50 = vadd.f32 %v1696_v62, %v1659_v48 }
 0x51e   :  { %v1733_v6 = vmul.f32 1.442695, %v1711_v49  ;;  %vm1719_vm14 = vcmp.gt.f32.partialorder %v1711_v49, 0.0 }
 0x51f   :  { %v1735_v51 = vmul.f32 1.442695, %v1712_v50  ;;  %vm1720_vm15 = vcmp.gt.f32.partialorder %v1712_v50, 0.0 }
 0x520   :  { %8111 = vpow2.f32 %v1733_v6 }
 0x521   :  { %8113 = vpow2.f32 %v1735_v51 }
 0x52a   :  { %v8112_v18 = vpop.eup %8111 }
 0x52b   :  { %v8114_v53 = vpop.eup %8113  ;;  %v7861_v58 = vadd.f32 -1.0, %v8112_v18 }
 0x52c   :  { %v7862_v54 = vadd.f32 -1.0, %v8114_v53 }
 0x52d   :  { %v1751_v1 = vmul.f32 1.6732632, %v7861_v58 }
 0x52e   :  { %v1752_v56 = vmul.f32 1.6732632, %v7862_v54 }
 0x52f   :  { %v1759_v17 = vsel %vm1719_vm14, %v1711_v49, %v1751_v1 }
 0x530   :  { %v1767_v57 = vmul.f32 1.050701, %v1759_v17  ;;  %v1760_v59 = vsel %vm1720_vm15, %v1712_v50, %v1752_v56 }
 0x531   :  { %v1768_v60 = vmul.f32 1.050701, %v1760_v59 }
 0x532   :  { %v8955_v15 = vpack.c.bf16 %v1767_v57, %v1767_v57 }
 0x533   :  { %v8957_v19 = vpack.c.bf16 %v1768_v60, %v1768_v60 }
 0x534   :  { %8491 = dma.done.wait [#allocation3], 32768 }
 0x535   :  { %8492 = vsyncadd [#allocation3], 4294934528  ;;  %2102 = vmatprep.mubr.bf16.mxu0 %v8935_v28  ;;  %2143 = vmatprep.mubr.bf16.mxu1 %v8939_v31  ;;  %1795 = sst [smem:[#allocation29]] %s8520_s25  ;;  %s1779_s16 = scalar_lea.hbm %s9639_s2, 98304 }
 0x536   :  { %1797 = sst [smem:[#allocation29 + $0x1]] %s8520_s25  ;;  %s8535_s19 = smov [#allocation28]  }
 0x537   :  { %1799 = sst [smem:[#allocation29 + $0x2]] %s8522_s26 }
 0x538   :  { %1801 = sst [smem:[#allocation29 + $0x3]] %s8523_s11 }
 0x539   :  { %1803 = sst [smem:[#allocation29 + $0x4]] %s8524_s7 }
 0x53a   :  { %1805 = sst [smem:[#allocation29 + $0x5]] %s8525_s22 }
 0x53b   :  { %1807 = sst [smem:[#allocation29 + $0x6]] %s8526_s29 }
 0x53c   :  { %1809 = sst [smem:[#allocation29 + $0x7]] %s8523_s11 }
 0x53d   :  { %1811 = sst [smem:[#allocation29 + $0x8]] %s8522_s26 }
 0x53e   :  { %1813 = dma.general %s1779_s16, 32768, %s8835_s9, %s8532_s4, %s8535_s19, [#allocation29], %s8734_s1, 0  }
 0x53f   :  { %v1815_v61 = vld [vmem:[#allocation2 + $0x8] sm:$0xff]  ;;  %v1814_v0 = vld [vmem:[#allocation2] sm:$0xff] }
 0x540   :  { %v1879_v63 = vld [vmem:[#allocation2 + $0x208] sm:$0xff]  ;;  %2070 = vmatprep.subr.bf16.mxu0 %v1815_v61  ;;  %v1878_v3 = vld [vmem:[#allocation2 + $0x200] sm:$0xff] }
 0x541   :  { %2111 = vmatprep.subr.bf16.mxu1 %v1879_v63  ;;  %v1819_v4 = vld [vmem:[#allocation2 + $0x28] sm:$0xff]  ;;  %2071 = vmatpush1.bf16.msra.mxu0 %v1814_v0  ;;  %v1818_v20 = vld [vmem:[#allocation2 + $0x20] sm:$0xff] }
 0x542   :  { %v1883_v14 = vld [vmem:[#allocation2 + $0x228] sm:$0xff]  ;;  %2112 = vmatpush1.bf16.msra.mxu1 %v1878_v3  ;;  %2072 = vmatprep.subr.bf16.mxu0 %v1819_v4  ;;  %v1882_v21 = vld [vmem:[#allocation2 + $0x220] sm:$0xff] }
 0x543   :  { %2113 = vmatprep.subr.bf16.mxu1 %v1883_v14  ;;  %v1823_v22 = vld [vmem:[#allocation2 + $0x48] sm:$0xff]  ;;  %v1822_v27 = vld [vmem:[#allocation2 + $0x40] sm:$0xff] }
 0x544   :  { %v1887_v23 = vld [vmem:[#allocation2 + $0x248] sm:$0xff]  ;;  %v1886_v33 = vld [vmem:[#allocation2 + $0x240] sm:$0xff] }
 0x545   :  { %2073 = vmatpush1.bf16.msra.mxu0 %v1818_v20  ;;  %v1827_v34 = vld [vmem:[#allocation2 + $0x68] sm:$0xff]  ;;  %v1826_v32 = vld [vmem:[#allocation2 + $0x60] sm:$0xff] }
 0x546   :  { %2114 = vmatpush1.bf16.msra.mxu1 %v1882_v21  ;;  %2074 = vmatprep.subr.bf16.mxu0 %v1823_v22  ;;  %v1891_v35 = vld [vmem:[#allocation2 + $0x268] sm:$0xff]  ;;  %v1890_v36 = vld [vmem:[#allocation2 + $0x260] sm:$0xff] }
 0x547   :  { %2115 = vmatprep.subr.bf16.mxu1 %v1887_v23  ;;  %v1831_v52 = vld [vmem:[#allocation2 + $0x88] sm:$0xff]  ;;  %v1830_v55 = vld [vmem:[#allocation2 + $0x80] sm:$0xff] }
 0x548   :  { %v1895_v37 = vld [vmem:[#allocation2 + $0x288] sm:$0xff]  ;;  %v1894_v26 = vld [vmem:[#allocation2 + $0x280] sm:$0xff] }
 0x549   :  { %2075 = vmatpush1.bf16.msra.mxu0 %v1822_v27  ;;  %v1835_v29 = vld [vmem:[#allocation2 + $0xa8] sm:$0xff]  ;;  %v1834_v39 = vld [vmem:[#allocation2 + $0xa0] sm:$0xff] }
 0x54a   :  { %2116 = vmatpush1.bf16.msra.mxu1 %v1886_v33  ;;  %2076 = vmatprep.subr.bf16.mxu0 %v1827_v34  ;;  %v1899_v38 = vld [vmem:[#allocation2 + $0x2a8] sm:$0xff]  ;;  %v1898_v40 = vld [vmem:[#allocation2 + $0x2a0] sm:$0xff] }
 0x54b   :  { %2117 = vmatprep.subr.bf16.mxu1 %v1891_v35  ;;  %v1839_v41 = vld [vmem:[#allocation2 + $0xc8] sm:$0xff]  ;;  %v1838_v43 = vld [vmem:[#allocation2 + $0xc0] sm:$0xff] }
 0x54c   :  { %v1903_v42 = vld [vmem:[#allocation2 + $0x2c8] sm:$0xff]  ;;  %v1902_v62 = vld [vmem:[#allocation2 + $0x2c0] sm:$0xff] }
 0x54d   :  { %2077 = vmatpush1.bf16.msra.mxu0 %v1826_v32  ;;  %v1843_v2 = vld [vmem:[#allocation2 + $0xe8] sm:$0xff]  ;;  %v1842_v45 = vld [vmem:[#allocation2 + $0xe0] sm:$0xff] }
 0x54e   :  { %2118 = vmatpush1.bf16.msra.mxu1 %v1890_v36  ;;  %2078 = vmatprep.subr.bf16.mxu0 %v1831_v52  ;;  %v1907_v44 = vld [vmem:[#allocation2 + $0x2e8] sm:$0xff]  ;;  %v1906_v46 = vld [vmem:[#allocation2 + $0x2e0] sm:$0xff] }
 0x54f   :  { %2119 = vmatprep.subr.bf16.mxu1 %v1895_v37  ;;  %v1847_v47 = vld [vmem:[#allocation2 + $0x108] sm:$0xff]  ;;  %v1846_v49 = vld [vmem:[#allocation2 + $0x100] sm:$0xff] }
 0x550   :  { %v1911_v48 = vld [vmem:[#allocation2 + $0x308] sm:$0xff]  ;;  %v1910_v50 = vld [vmem:[#allocation2 + $0x300] sm:$0xff] }
 0x551   :  { %2079 = vmatpush1.bf16.msra.mxu0 %v1830_v55  ;;  %v1851_v6 = vld [vmem:[#allocation2 + $0x128] sm:$0xff]  ;;  %v1850_v18 = vld [vmem:[#allocation2 + $0x120] sm:$0xff] }
 0x552   :  { %2120 = vmatpush1.bf16.msra.mxu1 %v1894_v26  ;;  %2080 = vmatprep.subr.bf16.mxu0 %v1835_v29  ;;  %v1915_v51 = vld [vmem:[#allocation2 + $0x328] sm:$0xff]  ;;  %v1914_v53 = vld [vmem:[#allocation2 + $0x320] sm:$0xff] }
 0x553   :  { %2121 = vmatprep.subr.bf16.mxu1 %v1899_v38  ;;  %v1855_v58 = vld [vmem:[#allocation2 + $0x148] sm:$0xff]  ;;  %v1854_v1 = vld [vmem:[#allocation2 + $0x140] sm:$0xff] }
 0x554   :  { %v1919_v54 = vld [vmem:[#allocation2 + $0x348] sm:$0xff]  ;;  %v1918_v56 = vld [vmem:[#allocation2 + $0x340] sm:$0xff] }
 0x555   :  { %2081 = vmatpush1.bf16.msra.mxu0 %v1834_v39  ;;  %v1859_v17 = vld [vmem:[#allocation2 + $0x168] sm:$0xff]  ;;  %v1858_v59 = vld [vmem:[#allocation2 + $0x160] sm:$0xff] }
 0x556   :  { %2122 = vmatpush1.bf16.msra.mxu1 %v1898_v40  ;;  %2082 = vmatprep.subr.bf16.mxu0 %v1839_v41  ;;  %v1923_v57 = vld [vmem:[#allocation2 + $0x368] sm:$0xff]  ;;  %v1922_v60 = vld [vmem:[#allocation2 + $0x360] sm:$0xff] }
 0x557   :  { %2123 = vmatprep.subr.bf16.mxu1 %v1903_v42  ;;  %v1863_v61 = vld [vmem:[#allocation2 + $0x188] sm:$0xff]  ;;  %v1862_v0 = vld [vmem:[#allocation2 + $0x180] sm:$0xff] }
 0x558   :  { %v1927_v63 = vld [vmem:[#allocation2 + $0x388] sm:$0xff]  ;;  %v1926_v3 = vld [vmem:[#allocation2 + $0x380] sm:$0xff] }
 0x559   :  { %2083 = vmatpush1.bf16.msra.mxu0 %v1838_v43  ;;  %v1867_v4 = vld [vmem:[#allocation2 + $0x1a8] sm:$0xff]  ;;  %v1866_v20 = vld [vmem:[#allocation2 + $0x1a0] sm:$0xff] }
 0x55a   :  { %2124 = vmatpush1.bf16.msra.mxu1 %v1902_v62  ;;  %2084 = vmatprep.subr.bf16.mxu0 %v1843_v2  ;;  %v1931_v14 = vld [vmem:[#allocation2 + $0x3a8] sm:$0xff]  ;;  %v1930_v21 = vld [vmem:[#allocation2 + $0x3a0] sm:$0xff] }
 0x55b   :  { %2125 = vmatprep.subr.bf16.mxu1 %v1907_v44  ;;  %v1871_v22 = vld [vmem:[#allocation2 + $0x1c8] sm:$0xff]  ;;  %v1870_v27 = vld [vmem:[#allocation2 + $0x1c0] sm:$0xff] }
 0x55c   :  { %v1935_v23 = vld [vmem:[#allocation2 + $0x3c8] sm:$0xff]  ;;  %v1934_v33 = vld [vmem:[#allocation2 + $0x3c0] sm:$0xff] }
 0x55d   :  { %2085 = vmatpush1.bf16.msra.mxu0 %v1842_v45  ;;  %v1875_v34 = vld [vmem:[#allocation2 + $0x1e8] sm:$0xff]  ;;  %v1874_v32 = vld [vmem:[#allocation2 + $0x1e0] sm:$0xff] }
 0x55e   :  { %2126 = vmatpush1.bf16.msra.mxu1 %v1906_v46  ;;  %2086 = vmatprep.subr.bf16.mxu0 %v1847_v47  ;;  %v1939_v35 = vld [vmem:[#allocation2 + $0x3e8] sm:$0xff]  ;;  %v1938_v36 = vld [vmem:[#allocation2 + $0x3e0] sm:$0xff] }
 0x55f   :  { %2127 = vmatprep.subr.bf16.mxu1 %v1911_v48  ;;  %v1943_v52 = vld [vmem:[#allocation2 + $0x408] sm:$0xff]  ;;  %v1942_v55 = vld [vmem:[#allocation2 + $0x400] sm:$0xff] }
 0x560   :  { %v2007_v37 = vld [vmem:[#allocation2 + $0x608] sm:$0xff]  ;;  %v2006_v26 = vld [vmem:[#allocation2 + $0x600] sm:$0xff] }
 0x561   :  { %2087 = vmatpush1.bf16.msra.mxu0 %v1846_v49  ;;  %v1947_v29 = vld [vmem:[#allocation2 + $0x428] sm:$0xff]  ;;  %v1946_v39 = vld [vmem:[#allocation2 + $0x420] sm:$0xff] }
 0x562   :  { %2128 = vmatpush1.bf16.msra.mxu1 %v1910_v50  ;;  %2088 = vmatprep.subr.bf16.mxu0 %v1851_v6  ;;  %v2011_v38 = vld [vmem:[#allocation2 + $0x628] sm:$0xff]  ;;  %v2010_v40 = vld [vmem:[#allocation2 + $0x620] sm:$0xff] }
 0x563   :  { %2129 = vmatprep.subr.bf16.mxu1 %v1915_v51  ;;  %v1951_v41 = vld [vmem:[#allocation2 + $0x448] sm:$0xff]  ;;  %v1950_v43 = vld [vmem:[#allocation2 + $0x440] sm:$0xff] }
 0x564   :  { %v2015_v42 = vld [vmem:[#allocation2 + $0x648] sm:$0xff]  ;;  %v2014_v62 = vld [vmem:[#allocation2 + $0x640] sm:$0xff] }
 0x565   :  { %2089 = vmatpush1.bf16.msra.mxu0 %v1850_v18  ;;  %v1955_v2 = vld [vmem:[#allocation2 + $0x468] sm:$0xff]  ;;  %v1954_v45 = vld [vmem:[#allocation2 + $0x460] sm:$0xff] }
 0x566   :  { %2130 = vmatpush1.bf16.msra.mxu1 %v1914_v53  ;;  %2090 = vmatprep.subr.bf16.mxu0 %v1855_v58  ;;  %v2019_v44 = vld [vmem:[#allocation2 + $0x668] sm:$0xff]  ;;  %v2018_v46 = vld [vmem:[#allocation2 + $0x660] sm:$0xff] }
 0x567   :  { %2131 = vmatprep.subr.bf16.mxu1 %v1919_v54  ;;  %v1959_v47 = vld [vmem:[#allocation2 + $0x488] sm:$0xff]  ;;  %v1958_v49 = vld [vmem:[#allocation2 + $0x480] sm:$0xff] }
 0x568   :  { %v2023_v48 = vld [vmem:[#allocation2 + $0x688] sm:$0xff]  ;;  %v2022_v50 = vld [vmem:[#allocation2 + $0x680] sm:$0xff] }
 0x569   :  { %2091 = vmatpush1.bf16.msra.mxu0 %v1854_v1  ;;  %v1963_v6 = vld [vmem:[#allocation2 + $0x4a8] sm:$0xff]  ;;  %v1962_v18 = vld [vmem:[#allocation2 + $0x4a0] sm:$0xff] }
 0x56a   :  { %2132 = vmatpush1.bf16.msra.mxu1 %v1918_v56  ;;  %2092 = vmatprep.subr.bf16.mxu0 %v1859_v17  ;;  %v2027_v51 = vld [vmem:[#allocation2 + $0x6a8] sm:$0xff]  ;;  %v2026_v53 = vld [vmem:[#allocation2 + $0x6a0] sm:$0xff] }
 0x56b   :  { %2133 = vmatprep.subr.bf16.mxu1 %v1923_v57  ;;  %v1967_v58 = vld [vmem:[#allocation2 + $0x4c8] sm:$0xff]  ;;  %v1966_v1 = vld [vmem:[#allocation2 + $0x4c0] sm:$0xff] }
 0x56c   :  { %v2031_v54 = vld [vmem:[#allocation2 + $0x6c8] sm:$0xff]  ;;  %v2030_v56 = vld [vmem:[#allocation2 + $0x6c0] sm:$0xff] }
 0x56d   :  { %2093 = vmatpush1.bf16.msra.mxu0 %v1858_v59  ;;  %v1971_v17 = vld [vmem:[#allocation2 + $0x4e8] sm:$0xff]  ;;  %v1970_v59 = vld [vmem:[#allocation2 + $0x4e0] sm:$0xff] }
 0x56e   :  { %2134 = vmatpush1.bf16.msra.mxu1 %v1922_v60  ;;  %2094 = vmatprep.subr.bf16.mxu0 %v1863_v61  ;;  %v2035_v57 = vld [vmem:[#allocation2 + $0x6e8] sm:$0xff]  ;;  %v2034_v60 = vld [vmem:[#allocation2 + $0x6e0] sm:$0xff] }
 0x56f   :  { %2135 = vmatprep.subr.bf16.mxu1 %v1927_v63  ;;  %v1975_v61 = vld [vmem:[#allocation2 + $0x508] sm:$0xff] }
 0x570   :  { %v2039_v63 = vld [vmem:[#allocation2 + $0x708] sm:$0xff] }
 0x571   :  { %2095 = vmatpush1.bf16.msra.mxu0 %v1862_v0  ;;  %v1974_v0 = vld [vmem:[#allocation2 + $0x500] sm:$0xff] }
 0x572   :  { %2136 = vmatpush1.bf16.msra.mxu1 %v1926_v3  ;;  %2096 = vmatprep.subr.bf16.mxu0 %v1867_v4  ;;  %v2038_v3 = vld [vmem:[#allocation2 + $0x700] sm:$0xff]  ;;  %v1979_v4 = vld [vmem:[#allocation2 + $0x528] sm:$0xff] }
 0x573   :  { %2137 = vmatprep.subr.bf16.mxu1 %v1931_v14  ;;  %v2043_v14 = vld [vmem:[#allocation2 + $0x728] sm:$0xff] }
 0x575   :  { %2097 = vmatpush1.bf16.msra.mxu0 %v1866_v20  ;;  %v1978_v20 = vld [vmem:[#allocation2 + $0x520] sm:$0xff] }
 0x576   :  { %2138 = vmatpush1.bf16.msra.mxu1 %v1930_v21  ;;  %2098 = vmatprep.subr.bf16.mxu0 %v1871_v22  ;;  %v2042_v21 = vld [vmem:[#allocation2 + $0x720] sm:$0xff]  ;;  %v1983_v22 = vld [vmem:[#allocation2 + $0x548] sm:$0xff] }
 0x577   :  { %2139 = vmatprep.subr.bf16.mxu1 %v1935_v23  ;;  %v2047_v23 = vld [vmem:[#allocation2 + $0x748] sm:$0xff] }
 0x579   :  { %2099 = vmatpush1.bf16.msra.mxu0 %v1870_v27  ;;  %v1982_v27 = vld [vmem:[#allocation2 + $0x540] sm:$0xff] }
 0x57a   :  { %2140 = vmatpush1.bf16.msra.mxu1 %v1934_v33  ;;  %2100 = vmatprep.subr.bf16.mxu0 %v1875_v34  ;;  %v2046_v33 = vld [vmem:[#allocation2 + $0x740] sm:$0xff]  ;;  %v1987_v34 = vld [vmem:[#allocation2 + $0x568] sm:$0xff] }
 0x57b   :  { %2141 = vmatprep.subr.bf16.mxu1 %v1939_v35  ;;  %v2051_v35 = vld [vmem:[#allocation2 + $0x768] sm:$0xff] }
 0x57d   :  { %2101 = vmatpush1.bf16.msra.mxu0 %v1874_v32  ;;  %v1986_v32 = vld [vmem:[#allocation2 + $0x560] sm:$0xff] }
 0x57e   :  { %2142 = vmatpush1.bf16.msra.mxu1 %v1938_v36  ;;  %2152 = vmatprep.subr.bf16.mxu0 %v1943_v52  ;;  %v2050_v36 = vld [vmem:[#allocation2 + $0x760] sm:$0xff]  ;;  %v1991_v52 = vld [vmem:[#allocation2 + $0x588] sm:$0xff] }
 0x57f   :  { %2193 = vmatprep.subr.bf16.mxu1 %v2007_v37  ;;  %v2055_v37 = vld [vmem:[#allocation2 + $0x788] sm:$0xff] }
 0x580   :  { %2103 = vmatmul.mubr.bf16.vlgmr.msra.gmra.mrb[32].mxu0 %v8933_v24 }
 0x581   :  { %2144 = vmatmul.mubr.bf16.vlgmr.msra.gmra.mrb[32].mxu1 %v8937_v30  ;;  %2153 = vmatpush1.bf16.msra.mxu0 %v1942_v55  ;;  %v1990_v55 = vld [vmem:[#allocation2 + $0x580] sm:$0xff] }
 0x582   :  { %2194 = vmatpush1.bf16.msra.mxu1 %v2006_v26  ;;  %2154 = vmatprep.subr.bf16.mxu0 %v1947_v29  ;;  %v2054_v26 = vld [vmem:[#allocation2 + $0x780] sm:$0xff]  ;;  %v1995_v29 = vld [vmem:[#allocation2 + $0x5a8] sm:$0xff] }
 0x583   :  { %2195 = vmatprep.subr.bf16.mxu1 %v2011_v38  ;;  %2184 = vmatprep.mubr.bf16.mxu0 %v8949_v16  ;;  %v2059_v38 = vld [vmem:[#allocation2 + $0x7a8] sm:$0xff] }
 0x584   :  { %2225 = vmatprep.mubr.bf16.mxu1 %v8957_v19 }
 0x585   :  { %2155 = vmatpush1.bf16.msra.mxu0 %v1946_v39  ;;  %v1994_v39 = vld [vmem:[#allocation2 + $0x5a0] sm:$0xff] }
 0x586   :  { %2196 = vmatpush1.bf16.msra.mxu1 %v2010_v40  ;;  %2156 = vmatprep.subr.bf16.mxu0 %v1951_v41  ;;  %v2058_v40 = vld [vmem:[#allocation2 + $0x7a0] sm:$0xff]  ;;  %v1999_v41 = vld [vmem:[#allocation2 + $0x5c8] sm:$0xff] }
 0x587   :  { %2197 = vmatprep.subr.bf16.mxu1 %v2015_v42  ;;  %v2063_v42 = vld [vmem:[#allocation2 + $0x7c8] sm:$0xff] }
 0x589   :  { %2157 = vmatpush1.bf16.msra.mxu0 %v1950_v43  ;;  %v1998_v43 = vld [vmem:[#allocation2 + $0x5c0] sm:$0xff] }
 0x58a   :  { %2198 = vmatpush1.bf16.msra.mxu1 %v2014_v62  ;;  %2158 = vmatprep.subr.bf16.mxu0 %v1955_v2  ;;  %v2062_v62 = vld [vmem:[#allocation2 + $0x7c0] sm:$0xff]  ;;  %v2003_v2 = vld [vmem:[#allocation2 + $0x5e8] sm:$0xff] }
 0x58b   :  { %2199 = vmatprep.subr.bf16.mxu1 %v2019_v44  ;;  %v2067_v44 = vld [vmem:[#allocation2 + $0x7e8] sm:$0xff] }
 0x58d   :  { %2159 = vmatpush1.bf16.msra.mxu0 %v1954_v45  ;;  %v2002_v45 = vld [vmem:[#allocation2 + $0x5e0] sm:$0xff] }
 0x58e   :  { %2200 = vmatpush1.bf16.msra.mxu1 %v2018_v46  ;;  %2160 = vmatprep.subr.bf16.mxu0 %v1959_v47  ;;  %v2066_v46 = vld [vmem:[#allocation2 + $0x7e0] sm:$0xff]  ;;  %v1817_v47 = vld [vmem:[#allocation2 + $0x18] sm:$0xff] }
 0x58f   :  { %2201 = vmatprep.subr.bf16.mxu1 %v2023_v48  ;;  %v1881_v48 = vld [vmem:[#allocation2 + $0x218] sm:$0xff] }
 0x591   :  { %2161 = vmatpush1.bf16.msra.mxu0 %v1958_v49  ;;  %v1816_v49 = vld [vmem:[#allocation2 + $0x10] sm:$0xff] }
 0x592   :  { %2202 = vmatpush1.bf16.msra.mxu1 %v2022_v50  ;;  %2162 = vmatprep.subr.bf16.mxu0 %v1963_v6  ;;  %v1880_v50 = vld [vmem:[#allocation2 + $0x210] sm:$0xff]  ;;  %v1821_v6 = vld [vmem:[#allocation2 + $0x38] sm:$0xff] }
 0x593   :  { %2203 = vmatprep.subr.bf16.mxu1 %v2027_v51  ;;  %v1885_v51 = vld [vmem:[#allocation2 + $0x238] sm:$0xff] }
 0x595   :  { %2163 = vmatpush1.bf16.msra.mxu0 %v1962_v18  ;;  %v1820_v18 = vld [vmem:[#allocation2 + $0x30] sm:$0xff] }
 0x596   :  { %2204 = vmatpush1.bf16.msra.mxu1 %v2026_v53  ;;  %2164 = vmatprep.subr.bf16.mxu0 %v1967_v58  ;;  %v1884_v53 = vld [vmem:[#allocation2 + $0x230] sm:$0xff]  ;;  %v1825_v58 = vld [vmem:[#allocation2 + $0x58] sm:$0xff] }
 0x597   :  { %2205 = vmatprep.subr.bf16.mxu1 %v2031_v54  ;;  %v1889_v54 = vld [vmem:[#allocation2 + $0x258] sm:$0xff] }
 0x599   :  { %2165 = vmatpush1.bf16.msra.mxu0 %v1966_v1  ;;  %v1824_v1 = vld [vmem:[#allocation2 + $0x50] sm:$0xff] }
 0x59a   :  { %2206 = vmatpush1.bf16.msra.mxu1 %v2030_v56  ;;  %2166 = vmatprep.subr.bf16.mxu0 %v1971_v17  ;;  %v1888_v56 = vld [vmem:[#allocation2 + $0x250] sm:$0xff]  ;;  %v1829_v17 = vld [vmem:[#allocation2 + $0x78] sm:$0xff] }
 0x59b   :  { %2207 = vmatprep.subr.bf16.mxu1 %v2035_v57  ;;  %v1893_v57 = vld [vmem:[#allocation2 + $0x278] sm:$0xff] }
 0x59d   :  { %2167 = vmatpush1.bf16.msra.mxu0 %v1970_v59  ;;  %v1828_v59 = vld [vmem:[#allocation2 + $0x70] sm:$0xff] }
 0x59e   :  { %2208 = vmatpush1.bf16.msra.mxu1 %v2034_v60  ;;  %2168 = vmatprep.subr.bf16.mxu0 %v1975_v61  ;;  %v1892_v60 = vld [vmem:[#allocation2 + $0x270] sm:$0xff]  ;;  %v1833_v61 = vld [vmem:[#allocation2 + $0x98] sm:$0xff] }
 0x59f   :  { %2209 = vmatprep.subr.bf16.mxu1 %v2039_v63  ;;  %v1897_v63 = vld [vmem:[#allocation2 + $0x298] sm:$0xff] }
 0x5a1   :  { %2169 = vmatpush1.bf16.msra.mxu0 %v1974_v0  ;;  %v1832_v0 = vld [vmem:[#allocation2 + $0x90] sm:$0xff] }
 0x5a2   :  { %2210 = vmatpush1.bf16.msra.mxu1 %v2038_v3  ;;  %2170 = vmatprep.subr.bf16.mxu0 %v1979_v4  ;;  %v1896_v3 = vld [vmem:[#allocation2 + $0x290] sm:$0xff]  ;;  %v1837_v4 = vld [vmem:[#allocation2 + $0xb8] sm:$0xff] }
 0x5a3   :  { %2211 = vmatprep.subr.bf16.mxu1 %v2043_v14  ;;  %v1901_v14 = vld [vmem:[#allocation2 + $0x2b8] sm:$0xff] }
 0x5a5   :  { %2171 = vmatpush1.bf16.msra.mxu0 %v1978_v20  ;;  %v1836_v20 = vld [vmem:[#allocation2 + $0xb0] sm:$0xff] }
 0x5a6   :  { %2212 = vmatpush1.bf16.msra.mxu1 %v2042_v21  ;;  %2172 = vmatprep.subr.bf16.mxu0 %v1983_v22  ;;  %v1900_v21 = vld [vmem:[#allocation2 + $0x2b0] sm:$0xff]  ;;  %v1841_v22 = vld [vmem:[#allocation2 + $0xd8] sm:$0xff] }
 0x5a7   :  { %2213 = vmatprep.subr.bf16.mxu1 %v2047_v23  ;;  %v1905_v23 = vld [vmem:[#allocation2 + $0x2d8] sm:$0xff] }
 0x5a9   :  { %2173 = vmatpush1.bf16.msra.mxu0 %v1982_v27  ;;  %v1840_v27 = vld [vmem:[#allocation2 + $0xd0] sm:$0xff] }
 0x5aa   :  { %2214 = vmatpush1.bf16.msra.mxu1 %v2046_v33  ;;  %2174 = vmatprep.subr.bf16.mxu0 %v1987_v34  ;;  %v1904_v33 = vld [vmem:[#allocation2 + $0x2d0] sm:$0xff]  ;;  %v1845_v34 = vld [vmem:[#allocation2 + $0xf8] sm:$0xff] }
 0x5ab   :  { %2215 = vmatprep.subr.bf16.mxu1 %v2051_v35  ;;  %v1909_v35 = vld [vmem:[#allocation2 + $0x2f8] sm:$0xff] }
 0x5ad   :  { %2175 = vmatpush1.bf16.msra.mxu0 %v1986_v32  ;;  %v1844_v32 = vld [vmem:[#allocation2 + $0xf0] sm:$0xff] }
 0x5ae   :  { %2216 = vmatpush1.bf16.msra.mxu1 %v2050_v36  ;;  %2176 = vmatprep.subr.bf16.mxu0 %v1991_v52  ;;  %v1908_v36 = vld [vmem:[#allocation2 + $0x2f0] sm:$0xff]  ;;  %v1849_v52 = vld [vmem:[#allocation2 + $0x118] sm:$0xff] }
 0x5af   :  { %2217 = vmatprep.subr.bf16.mxu1 %v2055_v37  ;;  %v1913_v37 = vld [vmem:[#allocation2 + $0x318] sm:$0xff] }
 0x5b1   :  { %2177 = vmatpush1.bf16.msra.mxu0 %v1990_v55  ;;  %v1848_v55 = vld [vmem:[#allocation2 + $0x110] sm:$0xff] }
 0x5b2   :  { %2218 = vmatpush1.bf16.msra.mxu1 %v2054_v26  ;;  %2178 = vmatprep.subr.bf16.mxu0 %v1995_v29  ;;  %v1912_v26 = vld [vmem:[#allocation2 + $0x310] sm:$0xff]  ;;  %v1853_v29 = vld [vmem:[#allocation2 + $0x138] sm:$0xff] }
 0x5b3   :  { %2219 = vmatprep.subr.bf16.mxu1 %v2059_v38  ;;  %v1917_v38 = vld [vmem:[#allocation2 + $0x338] sm:$0xff] }
 0x5b5   :  { %2179 = vmatpush1.bf16.msra.mxu0 %v1994_v39  ;;  %v1852_v39 = vld [vmem:[#allocation2 + $0x130] sm:$0xff] }
 0x5b6   :  { %2220 = vmatpush1.bf16.msra.mxu1 %v2058_v40  ;;  %2180 = vmatprep.subr.bf16.mxu0 %v1999_v41  ;;  %v1916_v40 = vld [vmem:[#allocation2 + $0x330] sm:$0xff]  ;;  %v1857_v41 = vld [vmem:[#allocation2 + $0x158] sm:$0xff] }
 0x5b7   :  { %2221 = vmatprep.subr.bf16.mxu1 %v2063_v42  ;;  %v1921_v42 = vld [vmem:[#allocation2 + $0x358] sm:$0xff] }
 0x5b9   :  { %2181 = vmatpush1.bf16.msra.mxu0 %v1998_v43  ;;  %v1856_v43 = vld [vmem:[#allocation2 + $0x150] sm:$0xff] }
 0x5ba   :  { %2222 = vmatpush1.bf16.msra.mxu1 %v2062_v62  ;;  %2182 = vmatprep.subr.bf16.mxu0 %v2003_v2  ;;  %v1920_v62 = vld [vmem:[#allocation2 + $0x350] sm:$0xff]  ;;  %v1861_v2 = vld [vmem:[#allocation2 + $0x178] sm:$0xff] }
 0x5bb   :  { %2223 = vmatprep.subr.bf16.mxu1 %v2067_v44  ;;  %v1925_v44 = vld [vmem:[#allocation2 + $0x378] sm:$0xff] }
 0x5bd   :  { %2183 = vmatpush1.bf16.msra.mxu0 %v2002_v45  ;;  %v1860_v45 = vld [vmem:[#allocation2 + $0x170] sm:$0xff] }
 0x5be   :  { %2224 = vmatpush1.bf16.msra.mxu1 %v2066_v46  ;;  %2234 = vmatprep.subr.bf16.mxu0 %v1817_v47  ;;  %v1924_v46 = vld [vmem:[#allocation2 + $0x370] sm:$0xff]  ;;  %v1865_v47 = vld [vmem:[#allocation2 + $0x198] sm:$0xff] }
 0x5bf   :  { %2275 = vmatprep.subr.bf16.mxu1 %v1881_v48  ;;  %v1929_v48 = vld [vmem:[#allocation2 + $0x398] sm:$0xff] }
 0x5c0   :  { %2185 = vmatmul.mubr.bf16.vlgmr.msra.gmra.mrb[36].mxu0 %v8947_v25 }
 0x5c1   :  { %2226 = vmatmul.mubr.bf16.vlgmr.msra.gmra.mrb[36].mxu1 %v8955_v15  ;;  %2235 = vmatpush1.bf16.msra.mxu0 %v1816_v49  ;;  %v1864_v49 = vld [vmem:[#allocation2 + $0x190] sm:$0xff] }
 0x5c2   :  { %2276 = vmatpush1.bf16.msra.mxu1 %v1880_v50  ;;  %2236 = vmatprep.subr.bf16.mxu0 %v1821_v6  ;;  %v1928_v50 = vld [vmem:[#allocation2 + $0x390] sm:$0xff]  ;;  %v1869_v6 = vld [vmem:[#allocation2 + $0x1b8] sm:$0xff] }
 0x5c3   :  { %2277 = vmatprep.subr.bf16.mxu1 %v1885_v51  ;;  %2266 = vmatprep.mubr.bf16.mxu0 %v8935_v28  ;;  %v1933_v51 = vld [vmem:[#allocation2 + $0x3b8] sm:$0xff] }
 0x5c4   :  { %2307 = vmatprep.mubr.bf16.mxu1 %v8939_v31 }
 0x5c5   :  { %2237 = vmatpush1.bf16.msra.mxu0 %v1820_v18  ;;  %v1868_v18 = vld [vmem:[#allocation2 + $0x1b0] sm:$0xff] }
 0x5c6   :  { %2278 = vmatpush1.bf16.msra.mxu1 %v1884_v53  ;;  %2238 = vmatprep.subr.bf16.mxu0 %v1825_v58  ;;  %v1932_v53 = vld [vmem:[#allocation2 + $0x3b0] sm:$0xff]  ;;  %v1873_v58 = vld [vmem:[#allocation2 + $0x1d8] sm:$0xff] }
 0x5c7   :  { %2279 = vmatprep.subr.bf16.mxu1 %v1889_v54  ;;  %v1937_v54 = vld [vmem:[#allocation2 + $0x3d8] sm:$0xff] }
 0x5c9   :  { %2239 = vmatpush1.bf16.msra.mxu0 %v1824_v1  ;;  %v1872_v1 = vld [vmem:[#allocation2 + $0x1d0] sm:$0xff] }
 0x5ca   :  { %2280 = vmatpush1.bf16.msra.mxu1 %v1888_v56  ;;  %2240 = vmatprep.subr.bf16.mxu0 %v1829_v17  ;;  %v1936_v56 = vld [vmem:[#allocation2 + $0x3d0] sm:$0xff]  ;;  %v1877_v17 = vld [vmem:[#allocation2 + $0x1f8] sm:$0xff] }
 0x5cb   :  { %2281 = vmatprep.subr.bf16.mxu1 %v1893_v57  ;;  %v1941_v57 = vld [vmem:[#allocation2 + $0x3f8] sm:$0xff] }
 0x5cd   :  { %2241 = vmatpush1.bf16.msra.mxu0 %v1828_v59  ;;  %v1876_v59 = vld [vmem:[#allocation2 + $0x1f0] sm:$0xff] }
 0x5ce   :  { %2282 = vmatpush1.bf16.msra.mxu1 %v1892_v60  ;;  %2242 = vmatprep.subr.bf16.mxu0 %v1833_v61  ;;  %v1940_v60 = vld [vmem:[#allocation2 + $0x3f0] sm:$0xff]  ;;  %v1945_v61 = vld [vmem:[#allocation2 + $0x418] sm:$0xff] }
 0x5cf   :  { %2283 = vmatprep.subr.bf16.mxu1 %v1897_v63  ;;  %v2009_v63 = vld [vmem:[#allocation2 + $0x618] sm:$0xff] }
 0x5d1   :  { %2243 = vmatpush1.bf16.msra.mxu0 %v1832_v0  ;;  %v1944_v0 = vld [vmem:[#allocation2 + $0x410] sm:$0xff] }
 0x5d2   :  { %2284 = vmatpush1.bf16.msra.mxu1 %v1896_v3  ;;  %2244 = vmatprep.subr.bf16.mxu0 %v1837_v4  ;;  %v2008_v3 = vld [vmem:[#allocation2 + $0x610] sm:$0xff]  ;;  %v1949_v4 = vld [vmem:[#allocation2 + $0x438] sm:$0xff] }
 0x5d3   :  { %2285 = vmatprep.subr.bf16.mxu1 %v1901_v14  ;;  %v2013_v14 = vld [vmem:[#allocation2 + $0x638] sm:$0xff] }
 0x5d5   :  { %2245 = vmatpush1.bf16.msra.mxu0 %v1836_v20  ;;  %v1948_v20 = vld [vmem:[#allocation2 + $0x430] sm:$0xff] }
 0x5d6   :  { %2286 = vmatpush1.bf16.msra.mxu1 %v1900_v21  ;;  %2246 = vmatprep.subr.bf16.mxu0 %v1841_v22  ;;  %v2012_v21 = vld [vmem:[#allocation2 + $0x630] sm:$0xff]  ;;  %v1953_v22 = vld [vmem:[#allocation2 + $0x458] sm:$0xff] }
 0x5d7   :  { %2287 = vmatprep.subr.bf16.mxu1 %v1905_v23  ;;  %v2017_v23 = vld [vmem:[#allocation2 + $0x658] sm:$0xff] }
 0x5d9   :  { %2247 = vmatpush1.bf16.msra.mxu0 %v1840_v27  ;;  %v1952_v27 = vld [vmem:[#allocation2 + $0x450] sm:$0xff] }
 0x5da   :  { %2288 = vmatpush1.bf16.msra.mxu1 %v1904_v33  ;;  %2248 = vmatprep.subr.bf16.mxu0 %v1845_v34  ;;  %v2016_v33 = vld [vmem:[#allocation2 + $0x650] sm:$0xff]  ;;  %v1957_v34 = vld [vmem:[#allocation2 + $0x478] sm:$0xff] }
 0x5db   :  { %2289 = vmatprep.subr.bf16.mxu1 %v1909_v35  ;;  %v2021_v35 = vld [vmem:[#allocation2 + $0x678] sm:$0xff] }
 0x5dd   :  { %2249 = vmatpush1.bf16.msra.mxu0 %v1844_v32  ;;  %v1956_v32 = vld [vmem:[#allocation2 + $0x470] sm:$0xff] }
 0x5de   :  { %2290 = vmatpush1.bf16.msra.mxu1 %v1908_v36  ;;  %2250 = vmatprep.subr.bf16.mxu0 %v1849_v52  ;;  %v2020_v36 = vld [vmem:[#allocation2 + $0x670] sm:$0xff]  ;;  %v1961_v52 = vld [vmem:[#allocation2 + $0x498] sm:$0xff] }
 0x5df   :  { %2291 = vmatprep.subr.bf16.mxu1 %v1913_v37  ;;  %v2025_v37 = vld [vmem:[#allocation2 + $0x698] sm:$0xff] }
 0x5e1   :  { %2251 = vmatpush1.bf16.msra.mxu0 %v1848_v55  ;;  %v1960_v55 = vld [vmem:[#allocation2 + $0x490] sm:$0xff] }
 0x5e2   :  { %2292 = vmatpush1.bf16.msra.mxu1 %v1912_v26  ;;  %2252 = vmatprep.subr.bf16.mxu0 %v1853_v29  ;;  %v2024_v26 = vld [vmem:[#allocation2 + $0x690] sm:$0xff]  ;;  %v1965_v29 = vld [vmem:[#allocation2 + $0x4b8] sm:$0xff] }
 0x5e3   :  { %2293 = vmatprep.subr.bf16.mxu1 %v1917_v38  ;;  %v2029_v38 = vld [vmem:[#allocation2 + $0x6b8] sm:$0xff] }
 0x5e5   :  { %2253 = vmatpush1.bf16.msra.mxu0 %v1852_v39  ;;  %v1964_v39 = vld [vmem:[#allocation2 + $0x4b0] sm:$0xff] }
 0x5e6   :  { %2294 = vmatpush1.bf16.msra.mxu1 %v1916_v40  ;;  %2254 = vmatprep.subr.bf16.mxu0 %v1857_v41  ;;  %v2028_v40 = vld [vmem:[#allocation2 + $0x6b0] sm:$0xff]  ;;  %v1969_v41 = vld [vmem:[#allocation2 + $0x4d8] sm:$0xff] }
 0x5e7   :  { %2295 = vmatprep.subr.bf16.mxu1 %v1921_v42  ;;  %v2033_v42 = vld [vmem:[#allocation2 + $0x6d8] sm:$0xff] }
 0x5e9   :  { %2255 = vmatpush1.bf16.msra.mxu0 %v1856_v43  ;;  %v1968_v43 = vld [vmem:[#allocation2 + $0x4d0] sm:$0xff] }
 0x5ea   :  { %2296 = vmatpush1.bf16.msra.mxu1 %v1920_v62  ;;  %2256 = vmatprep.subr.bf16.mxu0 %v1861_v2  ;;  %v2032_v62 = vld [vmem:[#allocation2 + $0x6d0] sm:$0xff]  ;;  %v1973_v2 = vld [vmem:[#allocation2 + $0x4f8] sm:$0xff] }
 0x5eb   :  { %2297 = vmatprep.subr.bf16.mxu1 %v1925_v44  ;;  %v2037_v44 = vld [vmem:[#allocation2 + $0x6f8] sm:$0xff] }
 0x5ed   :  { %2257 = vmatpush1.bf16.msra.mxu0 %v1860_v45  ;;  %v1972_v45 = vld [vmem:[#allocation2 + $0x4f0] sm:$0xff] }
 0x5ee   :  { %2298 = vmatpush1.bf16.msra.mxu1 %v1924_v46  ;;  %2258 = vmatprep.subr.bf16.mxu0 %v1865_v47  ;;  %v2036_v46 = vld [vmem:[#allocation2 + $0x6f0] sm:$0xff]  ;;  %v1977_v47 = vld [vmem:[#allocation2 + $0x518] sm:$0xff] }
 0x5ef   :  { %2299 = vmatprep.subr.bf16.mxu1 %v1929_v48  ;;  %v2041_v48 = vld [vmem:[#allocation2 + $0x718] sm:$0xff] }
 0x5f1   :  { %2259 = vmatpush1.bf16.msra.mxu0 %v1864_v49  ;;  %v1976_v49 = vld [vmem:[#allocation2 + $0x510] sm:$0xff] }
 0x5f2   :  { %2300 = vmatpush1.bf16.msra.mxu1 %v1928_v50  ;;  %2260 = vmatprep.subr.bf16.mxu0 %v1869_v6  ;;  %v2040_v50 = vld [vmem:[#allocation2 + $0x710] sm:$0xff]  ;;  %v1981_v6 = vld [vmem:[#allocation2 + $0x538] sm:$0xff] }
 0x5f3   :  { %2301 = vmatprep.subr.bf16.mxu1 %v1933_v51  ;;  %v2045_v51 = vld [vmem:[#allocation2 + $0x738] sm:$0xff] }
 0x5f5   :  { %2261 = vmatpush1.bf16.msra.mxu0 %v1868_v18  ;;  %v1980_v18 = vld [vmem:[#allocation2 + $0x530] sm:$0xff] }
 0x5f6   :  { %2302 = vmatpush1.bf16.msra.mxu1 %v1932_v53  ;;  %2262 = vmatprep.subr.bf16.mxu0 %v1873_v58  ;;  %v2044_v53 = vld [vmem:[#allocation2 + $0x730] sm:$0xff]  ;;  %v1985_v58 = vld [vmem:[#allocation2 + $0x558] sm:$0xff] }
 0x5f7   :  { %2303 = vmatprep.subr.bf16.mxu1 %v1937_v54  ;;  %v2049_v54 = vld [vmem:[#allocation2 + $0x758] sm:$0xff] }
 0x5f9   :  { %2263 = vmatpush1.bf16.msra.mxu0 %v1872_v1  ;;  %v1984_v1 = vld [vmem:[#allocation2 + $0x550] sm:$0xff] }
 0x5fa   :  { %2304 = vmatpush1.bf16.msra.mxu1 %v1936_v56  ;;  %2264 = vmatprep.subr.bf16.mxu0 %v1877_v17  ;;  %v2048_v56 = vld [vmem:[#allocation2 + $0x750] sm:$0xff]  ;;  %v1989_v17 = vld [vmem:[#allocation2 + $0x578] sm:$0xff] }
 0x5fb   :  { %2305 = vmatprep.subr.bf16.mxu1 %v1941_v57  ;;  %v2053_v57 = vld [vmem:[#allocation2 + $0x778] sm:$0xff] }
 0x5fd   :  { %2265 = vmatpush1.bf16.msra.mxu0 %v1876_v59  ;;  %v1988_v59 = vld [vmem:[#allocation2 + $0x570] sm:$0xff] }
 0x5fe   :  { %2306 = vmatpush1.bf16.msra.mxu1 %v1940_v60  ;;  %2316 = vmatprep.subr.bf16.mxu0 %v1945_v61  ;;  %v2052_v60 = vld [vmem:[#allocation2 + $0x770] sm:$0xff]  ;;  %v1993_v61 = vld [vmem:[#allocation2 + $0x598] sm:$0xff] }
 0x5ff   :  { %2357 = vmatprep.subr.bf16.mxu1 %v2009_v63  ;;  %v2057_v63 = vld [vmem:[#allocation2 + $0x798] sm:$0xff] }
 0x600   :  { %2267 = vmatmul.mubr.bf16.vlgmr.msra.gmra.mrb[40].mxu0 %v8933_v24 }
 0x601   :  { %2308 = vmatmul.mubr.bf16.vlgmr.msra.gmra.mrb[40].mxu1 %v8937_v30  ;;  %2317 = vmatpush1.bf16.msra.mxu0 %v1944_v0  ;;  %v1992_v0 = vld [vmem:[#allocation2 + $0x590] sm:$0xff] }
 0x602   :  { %2358 = vmatpush1.bf16.msra.mxu1 %v2008_v3  ;;  %2318 = vmatprep.subr.bf16.mxu0 %v1949_v4  ;;  %v2056_v3 = vld [vmem:[#allocation2 + $0x790] sm:$0xff]  ;;  %v1997_v4 = vld [vmem:[#allocation2 + $0x5b8] sm:$0xff] }
 0x603   :  { %2359 = vmatprep.subr.bf16.mxu1 %v2013_v14  ;;  %2348 = vmatprep.mubr.bf16.mxu0 %v8949_v16  ;;  %v2061_v14 = vld [vmem:[#allocation2 + $0x7b8] sm:$0xff] }
 0x604   :  { %2389 = vmatprep.mubr.bf16.mxu1 %v8957_v19 }
 0x605   :  { %2319 = vmatpush1.bf16.msra.mxu0 %v1948_v20  ;;  %v1996_v20 = vld [vmem:[#allocation2 + $0x5b0] sm:$0xff] }
 0x606   :  { %2360 = vmatpush1.bf16.msra.mxu1 %v2012_v21  ;;  %2320 = vmatprep.subr.bf16.mxu0 %v1953_v22  ;;  %v2060_v21 = vld [vmem:[#allocation2 + $0x7b0] sm:$0xff]  ;;  %v2001_v22 = vld [vmem:[#allocation2 + $0x5d8] sm:$0xff] }
 0x607   :  { %2361 = vmatprep.subr.bf16.mxu1 %v2017_v23  ;;  %v2065_v23 = vld [vmem:[#allocation2 + $0x7d8] sm:$0xff] }
 0x609   :  { %2321 = vmatpush1.bf16.msra.mxu0 %v1952_v27  ;;  %v2000_v27 = vld [vmem:[#allocation2 + $0x5d0] sm:$0xff] }
 0x60a   :  { %2362 = vmatpush1.bf16.msra.mxu1 %v2016_v33  ;;  %2322 = vmatprep.subr.bf16.mxu0 %v1957_v34  ;;  %v2064_v33 = vld [vmem:[#allocation2 + $0x7d0] sm:$0xff]  ;;  %v2005_v34 = vld [vmem:[#allocation2 + $0x5f8] sm:$0xff] }
 0x60b   :  { %2363 = vmatprep.subr.bf16.mxu1 %v2021_v35  ;;  %v2069_v35 = vld [vmem:[#allocation2 + $0x7f8] sm:$0xff] }
 0x60d   :  { %2323 = vmatpush1.bf16.msra.mxu0 %v1956_v32  ;;  %v2004_v32 = vld [vmem:[#allocation2 + $0x5f0] sm:$0xff] }
 0x60e   :  { %2364 = vmatpush1.bf16.msra.mxu1 %v2020_v36  ;;  %2324 = vmatprep.subr.bf16.mxu0 %v1961_v52  ;;  %v2068_v36 = vld [vmem:[#allocation2 + $0x7f0] sm:$0xff] }
 0x60f   :  { %2365 = vmatprep.subr.bf16.mxu1 %v2025_v37 }
 0x611   :  { %2325 = vmatpush1.bf16.msra.mxu0 %v1960_v55 }
 0x612   :  { %2366 = vmatpush1.bf16.msra.mxu1 %v2024_v26  ;;  %2326 = vmatprep.subr.bf16.mxu0 %v1965_v29 }
 0x613   :  { %2367 = vmatprep.subr.bf16.mxu1 %v2029_v38 }
 0x615   :  { %2327 = vmatpush1.bf16.msra.mxu0 %v1964_v39 }
 0x616   :  { %2368 = vmatpush1.bf16.msra.mxu1 %v2028_v40  ;;  %2328 = vmatprep.subr.bf16.mxu0 %v1969_v41 }
 0x617   :  { %2369 = vmatprep.subr.bf16.mxu1 %v2033_v42 }
 0x619   :  { %2329 = vmatpush1.bf16.msra.mxu0 %v1968_v43 }
 0x61a   :  { %2370 = vmatpush1.bf16.msra.mxu1 %v2032_v62  ;;  %2330 = vmatprep.subr.bf16.mxu0 %v1973_v2 }
 0x61b   :  { %2371 = vmatprep.subr.bf16.mxu1 %v2037_v44 }
 0x61d   :  { %2331 = vmatpush1.bf16.msra.mxu0 %v1972_v45 }
 0x61e   :  { %2372 = vmatpush1.bf16.msra.mxu1 %v2036_v46  ;;  %2332 = vmatprep.subr.bf16.mxu0 %v1977_v47 }
 0x61f   :  { %2373 = vmatprep.subr.bf16.mxu1 %v2041_v48 }
 0x621   :  { %2333 = vmatpush1.bf16.msra.mxu0 %v1976_v49 }
 0x622   :  { %2374 = vmatpush1.bf16.msra.mxu1 %v2040_v50  ;;  %2334 = vmatprep.subr.bf16.mxu0 %v1981_v6 }
 0x623   :  { %2375 = vmatprep.subr.bf16.mxu1 %v2045_v51 }
 0x625   :  { %2335 = vmatpush1.bf16.msra.mxu0 %v1980_v18 }
 0x626   :  { %2376 = vmatpush1.bf16.msra.mxu1 %v2044_v53  ;;  %2336 = vmatprep.subr.bf16.mxu0 %v1985_v58 }
 0x627   :  { %2377 = vmatprep.subr.bf16.mxu1 %v2049_v54 }
 0x629   :  { %2337 = vmatpush1.bf16.msra.mxu0 %v1984_v1 }
 0x62a   :  { %2378 = vmatpush1.bf16.msra.mxu1 %v2048_v56  ;;  %2338 = vmatprep.subr.bf16.mxu0 %v1989_v17 }
 0x62b   :  { %2379 = vmatprep.subr.bf16.mxu1 %v2053_v57 }
 0x62d   :  { %2339 = vmatpush1.bf16.msra.mxu0 %v1988_v59 }
 0x62e   :  { %2380 = vmatpush1.bf16.msra.mxu1 %v2052_v60  ;;  %2340 = vmatprep.subr.bf16.mxu0 %v1993_v61 }
 0x62f   :  { %2381 = vmatprep.subr.bf16.mxu1 %v2057_v63 }
 0x631   :  { %2341 = vmatpush1.bf16.msra.mxu0 %v1992_v0 }
 0x632   :  { %2382 = vmatpush1.bf16.msra.mxu1 %v2056_v3  ;;  %2342 = vmatprep.subr.bf16.mxu0 %v1997_v4 }
 0x633   :  { %2383 = vmatprep.subr.bf16.mxu1 %v2061_v14 }
 0x635   :  { %2343 = vmatpush1.bf16.msra.mxu0 %v1996_v20 }
 0x636   :  { %2384 = vmatpush1.bf16.msra.mxu1 %v2060_v21  ;;  %2344 = vmatprep.subr.bf16.mxu0 %v2001_v22 }
 0x637   :  { %2385 = vmatprep.subr.bf16.mxu1 %v2065_v23 }
 0x639   :  { %2345 = vmatpush1.bf16.msra.mxu0 %v2000_v27 }
 0x63a   :  { %2386 = vmatpush1.bf16.msra.mxu1 %v2064_v33  ;;  %2346 = vmatprep.subr.bf16.mxu0 %v2005_v34 }
 0x63b   :  { %2387 = vmatprep.subr.bf16.mxu1 %v2069_v35 }
 0x63d   :  { %2347 = vmatpush1.bf16.msra.mxu0 %v2004_v32 }
 0x63e   :  { %2388 = vmatpush1.bf16.msra.mxu1 %v2068_v36 }
 0x640   :  { %2349 = vmatmul.mubr.bf16.vlgmr.msra.gmra.mrb[44].mxu0 %v8947_v25 }
 0x641   :  { %2390 = vmatmul.mubr.bf16.vlgmr.msra.gmra.mrb[44].mxu1 %v8955_v15 }
 0x653   :  { %v2104_v52 = vpop.f32.mrb[32].mxu0 }
 0x654   :  { %v2145_v37 = vpop.f32.mrb[32].mxu1  ;;  %v2106_v26 = vpop.f32.mrb[33].mxu0 }
 0x655   :  { %v2146_v55 = vadd.f32 %v2145_v37, %v2104_v52  ;;  %v2147_v29 = vpop.f32.mrb[33].mxu1  ;;  %v2108_v39 = vpop.f32.mrb[34].mxu0 }
 0x656   :  { %v2148_v38 = vadd.f32 %v2147_v29, %v2106_v26  ;;  %v2149_v40 = vpop.f32.mrb[34].mxu1  ;;  %v2109_v41 = vpop.f32.mrb[35].mxu0 }
 0x657   :  { %v2150_v42 = vpop.f32.mrb[35].mxu1 }
 0x693   :  { %v2186_v43 = vpop.f32.mrb[36].mxu0 }
 0x694   :  { %v2227_v62 = vpop.f32.mrb[36].mxu1  ;;  %v2187_v2 = vadd.f32 %v2186_v43, %v2146_v55  ;;  %v2188_v44 = vpop.f32.mrb[37].mxu0 }
 0x695   :  { %v2229_v45 = vpop.f32.mrb[37].mxu1  ;;  %v2189_v46 = vadd.f32 %v2188_v44, %v2148_v38  ;;  %v2190_v47 = vpop.f32.mrb[38].mxu0 }
 0x696   :  { %v2231_v48 = vpop.f32.mrb[38].mxu1  ;;  %v8990_v49 = vadd.f32 %v2227_v62, %v2187_v2  ;;  %v2191_v50 = vpop.f32.mrb[39].mxu0 }
 0x697   :  { %v2232_v6 = vpop.f32.mrb[39].mxu1  ;;  %v8992_v51 = vadd.f32 %v2229_v45, %v2189_v46 }
 0x6d3   :  { %v2268_v18 = vpop.f32.mrb[40].mxu0 }
 0x6d4   :  { %v2309_v53 = vpop.f32.mrb[40].mxu1  ;;  %v2270_v54 = vpop.f32.mrb[41].mxu0 }
 0x6d5   :  { %v2310_v58 = vadd.f32 %v2309_v53, %v2268_v18  ;;  %v2311_v1 = vpop.f32.mrb[41].mxu1  ;;  %v2272_v17 = vpop.f32.mrb[42].mxu0 }
 0x6d6   :  { %v2312_v56 = vadd.f32 %v2311_v1, %v2270_v54  ;;  %v2313_v57 = vpop.f32.mrb[42].mxu1  ;;  %v2273_v59 = vpop.f32.mrb[43].mxu0 }
 0x6d7   :  { %v2314_v60 = vpop.f32.mrb[43].mxu1 }
 0x713   :  { %v2350_v61 = vpop.f32.mrb[44].mxu0 }
 0x714   :  { %v2391_v63 = vpop.f32.mrb[44].mxu1  ;;  %v2351_v0 = vadd.f32 %v2350_v61, %v2310_v58  ;;  %v2352_v3 = vpop.f32.mrb[45].mxu0 }
 0x715   :  { %v2393_v4 = vpop.f32.mrb[45].mxu1  ;;  %v2353_v14 = vadd.f32 %v2352_v3, %v2312_v56  ;;  %v2354_v20 = vpop.f32.mrb[46].mxu0 }
 0x716   :  { %v2395_v21 = vpop.f32.mrb[46].mxu1  ;;  %v8994_v22 = vadd.f32 %v2391_v63, %v2351_v0  ;;  %v2355_v23 = vpop.f32.mrb[47].mxu0 }
 0x717   :  { %v2396_v27 = vpop.f32.mrb[47].mxu1  ;;  %v8996_v33 = vadd.f32 %v2393_v4, %v2353_v14 }
 0x718   :  { %8493 = dma.done.wait [#allocation3 + $0x1], 32768 }
 0x719   :  { %8494 = vsyncadd [#allocation3 + $0x1], 4294934528  ;;  %2723 = vmatprep.mubr.bf16.mxu0 %v8935_v28  ;;  %2764 = vmatprep.mubr.bf16.mxu1 %v8939_v31  ;;  %2416 = sst [smem:[#allocation31]] %s8520_s25  ;;  %s2400_s0 = scalar_lea.hbm %s9639_s2, 131072 }
 0x71a   :  { %2418 = sst [smem:[#allocation31 + $0x1]] %s8520_s25  ;;  %s8536_s24 = smov [#allocation30]  }
 0x71b   :  { %2420 = sst [smem:[#allocation31 + $0x2]] %s8522_s26 }
 0x71c   :  { %2422 = sst [smem:[#allocation31 + $0x3]] %s8523_s11 }
 0x71d   :  { %2424 = sst [smem:[#allocation31 + $0x4]] %s8524_s7 }
 0x71e   :  { %2426 = sst [smem:[#allocation31 + $0x5]] %s8525_s22 }
 0x71f   :  { %2428 = sst [smem:[#allocation31 + $0x6]] %s8526_s29 }
 0x720   :  { %2430 = sst [smem:[#allocation31 + $0x7]] %s8523_s11 }
 0x721   :  { %2432 = sst [smem:[#allocation31 + $0x8]] %s8522_s26 }
 0x722   :  { %2434 = dma.general %s2400_s0, 32768, %s8738_s6, %s8528_s17, %s8536_s24, [#allocation31], %s8734_s1, 0  }
 0x723   :  { %v2436_v34 = vld [vmem:[#allocation2 + $0x808] sm:$0xff]  ;;  %v2435_v32 = vld [vmem:[#allocation2 + $0x800] sm:$0xff] }
 0x724   :  { %v2500_v35 = vld [vmem:[#allocation2 + $0xa08] sm:$0xff]  ;;  %2691 = vmatprep.subr.bf16.mxu0 %v2436_v34  ;;  %v2499_v36 = vld [vmem:[#allocation2 + $0xa00] sm:$0xff] }
 0x725   :  { %2732 = vmatprep.subr.bf16.mxu1 %v2500_v35  ;;  %v2440_v52 = vld [vmem:[#allocation2 + $0x828] sm:$0xff]  ;;  %2692 = vmatpush1.bf16.msra.mxu0 %v2435_v32  ;;  %v2439_v55 = vld [vmem:[#allocation2 + $0x820] sm:$0xff] }
 0x726   :  { %v2504_v37 = vld [vmem:[#allocation2 + $0xa28] sm:$0xff]  ;;  %2733 = vmatpush1.bf16.msra.mxu1 %v2499_v36  ;;  %2693 = vmatprep.subr.bf16.mxu0 %v2440_v52  ;;  %v2503_v26 = vld [vmem:[#allocation2 + $0xa20] sm:$0xff] }
 0x727   :  { %2734 = vmatprep.subr.bf16.mxu1 %v2504_v37  ;;  %v2444_v29 = vld [vmem:[#allocation2 + $0x848] sm:$0xff]  ;;  %v2443_v39 = vld [vmem:[#allocation2 + $0x840] sm:$0xff] }
 0x728   :  { %v2508_v38 = vld [vmem:[#allocation2 + $0xa48] sm:$0xff]  ;;  %v2507_v40 = vld [vmem:[#allocation2 + $0xa40] sm:$0xff] }
 0x729   :  { %2694 = vmatpush1.bf16.msra.mxu0 %v2439_v55  ;;  %v2448_v41 = vld [vmem:[#allocation2 + $0x868] sm:$0xff]  ;;  %v2447_v43 = vld [vmem:[#allocation2 + $0x860] sm:$0xff] }
 0x72a   :  { %2735 = vmatpush1.bf16.msra.mxu1 %v2503_v26  ;;  %2695 = vmatprep.subr.bf16.mxu0 %v2444_v29  ;;  %v2512_v42 = vld [vmem:[#allocation2 + $0xa68] sm:$0xff]  ;;  %v2511_v62 = vld [vmem:[#allocation2 + $0xa60] sm:$0xff] }
 0x72b   :  { %2736 = vmatprep.subr.bf16.mxu1 %v2508_v38  ;;  %v2452_v2 = vld [vmem:[#allocation2 + $0x888] sm:$0xff]  ;;  %v2451_v45 = vld [vmem:[#allocation2 + $0x880] sm:$0xff] }
 0x72c   :  { %v2516_v44 = vld [vmem:[#allocation2 + $0xa88] sm:$0xff]  ;;  %v2515_v46 = vld [vmem:[#allocation2 + $0xa80] sm:$0xff] }
 0x72d   :  { %2696 = vmatpush1.bf16.msra.mxu0 %v2443_v39  ;;  %v2456_v47 = vld [vmem:[#allocation2 + $0x8a8] sm:$0xff]  ;;  %v2455_v50 = vld [vmem:[#allocation2 + $0x8a0] sm:$0xff] }
 0x72e   :  { %2737 = vmatpush1.bf16.msra.mxu1 %v2507_v40  ;;  %2697 = vmatprep.subr.bf16.mxu0 %v2448_v41  ;;  %v2520_v48 = vld [vmem:[#allocation2 + $0xaa8] sm:$0xff]  ;;  %v2519_v6 = vld [vmem:[#allocation2 + $0xaa0] sm:$0xff] }
 0x72f   :  { %2738 = vmatprep.subr.bf16.mxu1 %v2512_v42  ;;  %v2460_v18 = vld [vmem:[#allocation2 + $0x8c8] sm:$0xff]  ;;  %v2459_v58 = vld [vmem:[#allocation2 + $0x8c0] sm:$0xff] }
 0x730   :  { %v2524_v53 = vld [vmem:[#allocation2 + $0xac8] sm:$0xff]  ;;  %v2523_v54 = vld [vmem:[#allocation2 + $0xac0] sm:$0xff] }
 0x731   :  { %2698 = vmatpush1.bf16.msra.mxu0 %v2447_v43  ;;  %v2464_v1 = vld [vmem:[#allocation2 + $0x8e8] sm:$0xff]  ;;  %v2463_v17 = vld [vmem:[#allocation2 + $0x8e0] sm:$0xff] }
 0x732   :  { %2739 = vmatpush1.bf16.msra.mxu1 %v2511_v62  ;;  %2699 = vmatprep.subr.bf16.mxu0 %v2452_v2  ;;  %v2528_v56 = vld [vmem:[#allocation2 + $0xae8] sm:$0xff]  ;;  %v2527_v57 = vld [vmem:[#allocation2 + $0xae0] sm:$0xff] }
 0x733   :  { %2740 = vmatprep.subr.bf16.mxu1 %v2516_v44  ;;  %v2468_v59 = vld [vmem:[#allocation2 + $0x908] sm:$0xff]  ;;  %v2467_v61 = vld [vmem:[#allocation2 + $0x900] sm:$0xff] }
 0x734   :  { %v2532_v60 = vld [vmem:[#allocation2 + $0xb08] sm:$0xff]  ;;  %v2531_v63 = vld [vmem:[#allocation2 + $0xb00] sm:$0xff] }
 0x735   :  { %2700 = vmatpush1.bf16.msra.mxu0 %v2451_v45  ;;  %v2472_v0 = vld [vmem:[#allocation2 + $0x928] sm:$0xff]  ;;  %v2471_v4 = vld [vmem:[#allocation2 + $0x920] sm:$0xff] }
 0x736   :  { %2741 = vmatpush1.bf16.msra.mxu1 %v2515_v46  ;;  %2701 = vmatprep.subr.bf16.mxu0 %v2456_v47  ;;  %v2536_v3 = vld [vmem:[#allocation2 + $0xb28] sm:$0xff]  ;;  %v2535_v14 = vld [vmem:[#allocation2 + $0xb20] sm:$0xff] }
 0x737   :  { %2742 = vmatprep.subr.bf16.mxu1 %v2520_v48  ;;  %v2476_v20 = vld [vmem:[#allocation2 + $0x948] sm:$0xff]  ;;  %v2475_v23 = vld [vmem:[#allocation2 + $0x940] sm:$0xff] }
 0x738   :  { %v2540_v21 = vld [vmem:[#allocation2 + $0xb48] sm:$0xff]  ;;  %v2539_v27 = vld [vmem:[#allocation2 + $0xb40] sm:$0xff] }
 0x739   :  { %2702 = vmatpush1.bf16.msra.mxu0 %v2455_v50  ;;  %v2480_v34 = vld [vmem:[#allocation2 + $0x968] sm:$0xff]  ;;  %v2479_v32 = vld [vmem:[#allocation2 + $0x960] sm:$0xff] }
 0x73a   :  { %2743 = vmatpush1.bf16.msra.mxu1 %v2519_v6  ;;  %2703 = vmatprep.subr.bf16.mxu0 %v2460_v18  ;;  %v2544_v35 = vld [vmem:[#allocation2 + $0xb68] sm:$0xff]  ;;  %v2543_v36 = vld [vmem:[#allocation2 + $0xb60] sm:$0xff] }
 0x73b   :  { %2744 = vmatprep.subr.bf16.mxu1 %v2524_v53  ;;  %v2484_v52 = vld [vmem:[#allocation2 + $0x988] sm:$0xff]  ;;  %v2483_v55 = vld [vmem:[#allocation2 + $0x980] sm:$0xff] }
 0x73c   :  { %v2548_v37 = vld [vmem:[#allocation2 + $0xb88] sm:$0xff]  ;;  %v2547_v26 = vld [vmem:[#allocation2 + $0xb80] sm:$0xff] }
 0x73d   :  { %2704 = vmatpush1.bf16.msra.mxu0 %v2459_v58  ;;  %v2488_v29 = vld [vmem:[#allocation2 + $0x9a8] sm:$0xff]  ;;  %v2487_v39 = vld [vmem:[#allocation2 + $0x9a0] sm:$0xff] }
 0x73e   :  { %2745 = vmatpush1.bf16.msra.mxu1 %v2523_v54  ;;  %2705 = vmatprep.subr.bf16.mxu0 %v2464_v1  ;;  %v2552_v38 = vld [vmem:[#allocation2 + $0xba8] sm:$0xff]  ;;  %v2551_v40 = vld [vmem:[#allocation2 + $0xba0] sm:$0xff] }
 0x73f   :  { %2746 = vmatprep.subr.bf16.mxu1 %v2528_v56  ;;  %v2492_v41 = vld [vmem:[#allocation2 + $0x9c8] sm:$0xff]  ;;  %v2491_v43 = vld [vmem:[#allocation2 + $0x9c0] sm:$0xff] }
 0x740   :  { %v2556_v42 = vld [vmem:[#allocation2 + $0xbc8] sm:$0xff]  ;;  %v2555_v62 = vld [vmem:[#allocation2 + $0xbc0] sm:$0xff] }
 0x741   :  { %2706 = vmatpush1.bf16.msra.mxu0 %v2463_v17  ;;  %v2496_v2 = vld [vmem:[#allocation2 + $0x9e8] sm:$0xff]  ;;  %v2495_v45 = vld [vmem:[#allocation2 + $0x9e0] sm:$0xff] }
 0x742   :  { %2747 = vmatpush1.bf16.msra.mxu1 %v2527_v57  ;;  %2707 = vmatprep.subr.bf16.mxu0 %v2468_v59  ;;  %v2560_v44 = vld [vmem:[#allocation2 + $0xbe8] sm:$0xff]  ;;  %v2559_v46 = vld [vmem:[#allocation2 + $0xbe0] sm:$0xff] }
 0x743   :  { %2748 = vmatprep.subr.bf16.mxu1 %v2532_v60  ;;  %v2564_v47 = vld [vmem:[#allocation2 + $0xc08] sm:$0xff]  ;;  %v2563_v50 = vld [vmem:[#allocation2 + $0xc00] sm:$0xff] }
 0x744   :  { %v2628_v48 = vld [vmem:[#allocation2 + $0xe08] sm:$0xff]  ;;  %v2627_v6 = vld [vmem:[#allocation2 + $0xe00] sm:$0xff] }
 0x745   :  { %2708 = vmatpush1.bf16.msra.mxu0 %v2467_v61  ;;  %v2568_v18 = vld [vmem:[#allocation2 + $0xc28] sm:$0xff]  ;;  %v2567_v58 = vld [vmem:[#allocation2 + $0xc20] sm:$0xff] }
 0x746   :  { %2749 = vmatpush1.bf16.msra.mxu1 %v2531_v63  ;;  %2709 = vmatprep.subr.bf16.mxu0 %v2472_v0  ;;  %v2632_v53 = vld [vmem:[#allocation2 + $0xe28] sm:$0xff]  ;;  %v2631_v54 = vld [vmem:[#allocation2 + $0xe20] sm:$0xff] }
 0x747   :  { %2750 = vmatprep.subr.bf16.mxu1 %v2536_v3  ;;  %v2572_v1 = vld [vmem:[#allocation2 + $0xc48] sm:$0xff]  ;;  %v2571_v17 = vld [vmem:[#allocation2 + $0xc40] sm:$0xff] }
 0x748   :  { %v2636_v56 = vld [vmem:[#allocation2 + $0xe48] sm:$0xff]  ;;  %v2635_v57 = vld [vmem:[#allocation2 + $0xe40] sm:$0xff] }
 0x749   :  { %2710 = vmatpush1.bf16.msra.mxu0 %v2471_v4  ;;  %v2576_v59 = vld [vmem:[#allocation2 + $0xc68] sm:$0xff]  ;;  %v2575_v61 = vld [vmem:[#allocation2 + $0xc60] sm:$0xff] }
 0x74a   :  { %2751 = vmatpush1.bf16.msra.mxu1 %v2535_v14  ;;  %2711 = vmatprep.subr.bf16.mxu0 %v2476_v20  ;;  %v2640_v60 = vld [vmem:[#allocation2 + $0xe68] sm:$0xff]  ;;  %v2639_v63 = vld [vmem:[#allocation2 + $0xe60] sm:$0xff] }
 0x74b   :  { %2752 = vmatprep.subr.bf16.mxu1 %v2540_v21  ;;  %v2580_v0 = vld [vmem:[#allocation2 + $0xc88] sm:$0xff]  ;;  %v2579_v4 = vld [vmem:[#allocation2 + $0xc80] sm:$0xff] }
 0x74c   :  { %v2644_v3 = vld [vmem:[#allocation2 + $0xe88] sm:$0xff]  ;;  %v2643_v14 = vld [vmem:[#allocation2 + $0xe80] sm:$0xff] }
 0x74d   :  { %2712 = vmatpush1.bf16.msra.mxu0 %v2475_v23  ;;  %v2584_v20 = vld [vmem:[#allocation2 + $0xca8] sm:$0xff]  ;;  %v2583_v23 = vld [vmem:[#allocation2 + $0xca0] sm:$0xff] }
 0x74e   :  { %2753 = vmatpush1.bf16.msra.mxu1 %v2539_v27  ;;  %2713 = vmatprep.subr.bf16.mxu0 %v2480_v34  ;;  %v2648_v21 = vld [vmem:[#allocation2 + $0xea8] sm:$0xff]  ;;  %v2647_v27 = vld [vmem:[#allocation2 + $0xea0] sm:$0xff] }
 0x74f   :  { %2754 = vmatprep.subr.bf16.mxu1 %v2544_v35  ;;  %v2588_v34 = vld [vmem:[#allocation2 + $0xcc8] sm:$0xff] }
 0x750   :  { %v2652_v35 = vld [vmem:[#allocation2 + $0xec8] sm:$0xff] }
 0x751   :  { %2714 = vmatpush1.bf16.msra.mxu0 %v2479_v32  ;;  %v2587_v32 = vld [vmem:[#allocation2 + $0xcc0] sm:$0xff] }
 0x752   :  { %2755 = vmatpush1.bf16.msra.mxu1 %v2543_v36  ;;  %2715 = vmatprep.subr.bf16.mxu0 %v2484_v52  ;;  %v2651_v36 = vld [vmem:[#allocation2 + $0xec0] sm:$0xff]  ;;  %v2592_v52 = vld [vmem:[#allocation2 + $0xce8] sm:$0xff] }
 0x753   :  { %2756 = vmatprep.subr.bf16.mxu1 %v2548_v37  ;;  %v2656_v37 = vld [vmem:[#allocation2 + $0xee8] sm:$0xff] }
 0x755   :  { %2716 = vmatpush1.bf16.msra.mxu0 %v2483_v55  ;;  %v2591_v55 = vld [vmem:[#allocation2 + $0xce0] sm:$0xff] }
 0x756   :  { %2757 = vmatpush1.bf16.msra.mxu1 %v2547_v26  ;;  %2717 = vmatprep.subr.bf16.mxu0 %v2488_v29  ;;  %v2655_v26 = vld [vmem:[#allocation2 + $0xee0] sm:$0xff]  ;;  %v2596_v29 = vld [vmem:[#allocation2 + $0xd08] sm:$0xff] }
 0x757   :  { %2758 = vmatprep.subr.bf16.mxu1 %v2552_v38  ;;  %v2660_v38 = vld [vmem:[#allocation2 + $0xf08] sm:$0xff] }
 0x759   :  { %2718 = vmatpush1.bf16.msra.mxu0 %v2487_v39  ;;  %v2595_v39 = vld [vmem:[#allocation2 + $0xd00] sm:$0xff] }
 0x75a   :  { %2759 = vmatpush1.bf16.msra.mxu1 %v2551_v40  ;;  %2719 = vmatprep.subr.bf16.mxu0 %v2492_v41  ;;  %v2659_v40 = vld [vmem:[#allocation2 + $0xf00] sm:$0xff]  ;;  %v2600_v41 = vld [vmem:[#allocation2 + $0xd28] sm:$0xff] }
 0x75b   :  { %2760 = vmatprep.subr.bf16.mxu1 %v2556_v42  ;;  %v2664_v42 = vld [vmem:[#allocation2 + $0xf28] sm:$0xff] }
 0x75d   :  { %2720 = vmatpush1.bf16.msra.mxu0 %v2491_v43  ;;  %v2599_v43 = vld [vmem:[#allocation2 + $0xd20] sm:$0xff] }
 0x75e   :  { %2761 = vmatpush1.bf16.msra.mxu1 %v2555_v62  ;;  %2721 = vmatprep.subr.bf16.mxu0 %v2496_v2  ;;  %v2663_v62 = vld [vmem:[#allocation2 + $0xf20] sm:$0xff]  ;;  %v2604_v2 = vld [vmem:[#allocation2 + $0xd48] sm:$0xff] }
 0x75f   :  { %2762 = vmatprep.subr.bf16.mxu1 %v2560_v44  ;;  %v2668_v44 = vld [vmem:[#allocation2 + $0xf48] sm:$0xff] }
 0x761   :  { %2722 = vmatpush1.bf16.msra.mxu0 %v2495_v45  ;;  %v2603_v45 = vld [vmem:[#allocation2 + $0xd40] sm:$0xff] }
 0x762   :  { %2763 = vmatpush1.bf16.msra.mxu1 %v2559_v46  ;;  %2773 = vmatprep.subr.bf16.mxu0 %v2564_v47  ;;  %v2667_v46 = vld [vmem:[#allocation2 + $0xf40] sm:$0xff]  ;;  %v2608_v47 = vld [vmem:[#allocation2 + $0xd68] sm:$0xff] }
 0x763   :  { %2814 = vmatprep.subr.bf16.mxu1 %v2628_v48  ;;  %v2672_v48 = vld [vmem:[#allocation2 + $0xf68] sm:$0xff] }
 0x764   :  { %2724 = vmatmul.mubr.bf16.vlgmr.msra.gmra.mrb[48].mxu0 %v8933_v24 }
 0x765   :  { %2765 = vmatmul.mubr.bf16.vlgmr.msra.gmra.mrb[48].mxu1 %v8937_v30  ;;  %2774 = vmatpush1.bf16.msra.mxu0 %v2563_v50  ;;  %v2607_v50 = vld [vmem:[#allocation2 + $0xd60] sm:$0xff] }
 0x766   :  { %2815 = vmatpush1.bf16.msra.mxu1 %v2627_v6  ;;  %2775 = vmatprep.subr.bf16.mxu0 %v2568_v18  ;;  %v2671_v6 = vld [vmem:[#allocation2 + $0xf60] sm:$0xff]  ;;  %v2612_v18 = vld [vmem:[#allocation2 + $0xd88] sm:$0xff] }
 0x767   :  { %2816 = vmatprep.subr.bf16.mxu1 %v2632_v53  ;;  %2805 = vmatprep.mubr.bf16.mxu0 %v8949_v16  ;;  %v2676_v53 = vld [vmem:[#allocation2 + $0xf88] sm:$0xff] }
 0x768   :  { %2846 = vmatprep.mubr.bf16.mxu1 %v8957_v19 }
 0x769   :  { %2776 = vmatpush1.bf16.msra.mxu0 %v2567_v58  ;;  %v2611_v58 = vld [vmem:[#allocation2 + $0xd80] sm:$0xff] }
 0x76a   :  { %2817 = vmatpush1.bf16.msra.mxu1 %v2631_v54  ;;  %2777 = vmatprep.subr.bf16.mxu0 %v2572_v1  ;;  %v2675_v54 = vld [vmem:[#allocation2 + $0xf80] sm:$0xff]  ;;  %v2616_v1 = vld [vmem:[#allocation2 + $0xda8] sm:$0xff] }
 0x76b   :  { %2818 = vmatprep.subr.bf16.mxu1 %v2636_v56  ;;  %v2680_v56 = vld [vmem:[#allocation2 + $0xfa8] sm:$0xff] }
 0x76d   :  { %2778 = vmatpush1.bf16.msra.mxu0 %v2571_v17  ;;  %v2615_v17 = vld [vmem:[#allocation2 + $0xda0] sm:$0xff] }
 0x76e   :  { %2819 = vmatpush1.bf16.msra.mxu1 %v2635_v57  ;;  %2779 = vmatprep.subr.bf16.mxu0 %v2576_v59  ;;  %v2679_v57 = vld [vmem:[#allocation2 + $0xfa0] sm:$0xff]  ;;  %v2620_v59 = vld [vmem:[#allocation2 + $0xdc8] sm:$0xff] }
 0x76f   :  { %2820 = vmatprep.subr.bf16.mxu1 %v2640_v60  ;;  %v2684_v60 = vld [vmem:[#allocation2 + $0xfc8] sm:$0xff] }
 0x771   :  { %2780 = vmatpush1.bf16.msra.mxu0 %v2575_v61  ;;  %v2619_v61 = vld [vmem:[#allocation2 + $0xdc0] sm:$0xff] }
 0x772   :  { %2821 = vmatpush1.bf16.msra.mxu1 %v2639_v63  ;;  %2781 = vmatprep.subr.bf16.mxu0 %v2580_v0  ;;  %v2683_v63 = vld [vmem:[#allocation2 + $0xfc0] sm:$0xff]  ;;  %v2624_v0 = vld [vmem:[#allocation2 + $0xde8] sm:$0xff] }
 0x773   :  { %2822 = vmatprep.subr.bf16.mxu1 %v2644_v3  ;;  %v2688_v3 = vld [vmem:[#allocation2 + $0xfe8] sm:$0xff] }
 0x775   :  { %2782 = vmatpush1.bf16.msra.mxu0 %v2579_v4  ;;  %v2623_v4 = vld [vmem:[#allocation2 + $0xde0] sm:$0xff] }
 0x776   :  { %2823 = vmatpush1.bf16.msra.mxu1 %v2643_v14  ;;  %2783 = vmatprep.subr.bf16.mxu0 %v2584_v20  ;;  %v2687_v14 = vld [vmem:[#allocation2 + $0xfe0] sm:$0xff]  ;;  %v2438_v20 = vld [vmem:[#allocation2 + $0x818] sm:$0xff] }
 0x777   :  { %2824 = vmatprep.subr.bf16.mxu1 %v2648_v21  ;;  %v2502_v21 = vld [vmem:[#allocation2 + $0xa18] sm:$0xff] }
 0x779   :  { %2784 = vmatpush1.bf16.msra.mxu0 %v2583_v23  ;;  %v2437_v23 = vld [vmem:[#allocation2 + $0x810] sm:$0xff] }
 0x77a   :  { %2825 = vmatpush1.bf16.msra.mxu1 %v2647_v27  ;;  %2785 = vmatprep.subr.bf16.mxu0 %v2588_v34  ;;  %v2501_v27 = vld [vmem:[#allocation2 + $0xa10] sm:$0xff]  ;;  %v2442_v34 = vld [vmem:[#allocation2 + $0x838] sm:$0xff] }
 0x77b   :  { %2826 = vmatprep.subr.bf16.mxu1 %v2652_v35  ;;  %v2506_v35 = vld [vmem:[#allocation2 + $0xa38] sm:$0xff] }
 0x77d   :  { %2786 = vmatpush1.bf16.msra.mxu0 %v2587_v32  ;;  %v2441_v32 = vld [vmem:[#allocation2 + $0x830] sm:$0xff] }
 0x77e   :  { %2827 = vmatpush1.bf16.msra.mxu1 %v2651_v36  ;;  %2787 = vmatprep.subr.bf16.mxu0 %v2592_v52  ;;  %v2505_v36 = vld [vmem:[#allocation2 + $0xa30] sm:$0xff]  ;;  %v2446_v52 = vld [vmem:[#allocation2 + $0x858] sm:$0xff] }
 0x77f   :  { %2828 = vmatprep.subr.bf16.mxu1 %v2656_v37  ;;  %v2510_v37 = vld [vmem:[#allocation2 + $0xa58] sm:$0xff] }
 0x781   :  { %2788 = vmatpush1.bf16.msra.mxu0 %v2591_v55  ;;  %v2445_v55 = vld [vmem:[#allocation2 + $0x850] sm:$0xff] }
 0x782   :  { %2829 = vmatpush1.bf16.msra.mxu1 %v2655_v26  ;;  %2789 = vmatprep.subr.bf16.mxu0 %v2596_v29  ;;  %v2509_v26 = vld [vmem:[#allocation2 + $0xa50] sm:$0xff]  ;;  %v2450_v29 = vld [vmem:[#allocation2 + $0x878] sm:$0xff] }
 0x783   :  { %2830 = vmatprep.subr.bf16.mxu1 %v2660_v38  ;;  %v2514_v38 = vld [vmem:[#allocation2 + $0xa78] sm:$0xff] }
 0x785   :  { %2790 = vmatpush1.bf16.msra.mxu0 %v2595_v39  ;;  %v2449_v39 = vld [vmem:[#allocation2 + $0x870] sm:$0xff] }
 0x786   :  { %2831 = vmatpush1.bf16.msra.mxu1 %v2659_v40  ;;  %2791 = vmatprep.subr.bf16.mxu0 %v2600_v41  ;;  %v2513_v40 = vld [vmem:[#allocation2 + $0xa70] sm:$0xff]  ;;  %v2454_v41 = vld [vmem:[#allocation2 + $0x898] sm:$0xff] }
 0x787   :  { %2832 = vmatprep.subr.bf16.mxu1 %v2664_v42  ;;  %v2518_v42 = vld [vmem:[#allocation2 + $0xa98] sm:$0xff] }
 0x789   :  { %2792 = vmatpush1.bf16.msra.mxu0 %v2599_v43  ;;  %v2453_v43 = vld [vmem:[#allocation2 + $0x890] sm:$0xff] }
 0x78a   :  { %2833 = vmatpush1.bf16.msra.mxu1 %v2663_v62  ;;  %2793 = vmatprep.subr.bf16.mxu0 %v2604_v2  ;;  %v2517_v62 = vld [vmem:[#allocation2 + $0xa90] sm:$0xff]  ;;  %v2458_v2 = vld [vmem:[#allocation2 + $0x8b8] sm:$0xff] }
 0x78b   :  { %2834 = vmatprep.subr.bf16.mxu1 %v2668_v44  ;;  %v2522_v44 = vld [vmem:[#allocation2 + $0xab8] sm:$0xff] }
 0x78d   :  { %2794 = vmatpush1.bf16.msra.mxu0 %v2603_v45  ;;  %v2457_v45 = vld [vmem:[#allocation2 + $0x8b0] sm:$0xff] }
 0x78e   :  { %2835 = vmatpush1.bf16.msra.mxu1 %v2667_v46  ;;  %2795 = vmatprep.subr.bf16.mxu0 %v2608_v47  ;;  %v2521_v46 = vld [vmem:[#allocation2 + $0xab0] sm:$0xff]  ;;  %v2462_v47 = vld [vmem:[#allocation2 + $0x8d8] sm:$0xff] }
 0x78f   :  { %2836 = vmatprep.subr.bf16.mxu1 %v2672_v48  ;;  %v2526_v48 = vld [vmem:[#allocation2 + $0xad8] sm:$0xff] }
 0x791   :  { %2796 = vmatpush1.bf16.msra.mxu0 %v2607_v50  ;;  %v2461_v50 = vld [vmem:[#allocation2 + $0x8d0] sm:$0xff] }
 0x792   :  { %2837 = vmatpush1.bf16.msra.mxu1 %v2671_v6  ;;  %2797 = vmatprep.subr.bf16.mxu0 %v2612_v18  ;;  %v2525_v6 = vld [vmem:[#allocation2 + $0xad0] sm:$0xff]  ;;  %v2466_v18 = vld [vmem:[#allocation2 + $0x8f8] sm:$0xff] }
 0x793   :  { %2838 = vmatprep.subr.bf16.mxu1 %v2676_v53  ;;  %v2530_v53 = vld [vmem:[#allocation2 + $0xaf8] sm:$0xff] }
 0x795   :  { %2798 = vmatpush1.bf16.msra.mxu0 %v2611_v58  ;;  %v2465_v58 = vld [vmem:[#allocation2 + $0x8f0] sm:$0xff] }
 0x796   :  { %2839 = vmatpush1.bf16.msra.mxu1 %v2675_v54  ;;  %2799 = vmatprep.subr.bf16.mxu0 %v2616_v1  ;;  %v2529_v54 = vld [vmem:[#allocation2 + $0xaf0] sm:$0xff]  ;;  %v2470_v1 = vld [vmem:[#allocation2 + $0x918] sm:$0xff] }
 0x797   :  { %2840 = vmatprep.subr.bf16.mxu1 %v2680_v56  ;;  %v2534_v56 = vld [vmem:[#allocation2 + $0xb18] sm:$0xff] }
 0x799   :  { %2800 = vmatpush1.bf16.msra.mxu0 %v2615_v17  ;;  %v2469_v17 = vld [vmem:[#allocation2 + $0x910] sm:$0xff] }
 0x79a   :  { %2841 = vmatpush1.bf16.msra.mxu1 %v2679_v57  ;;  %2801 = vmatprep.subr.bf16.mxu0 %v2620_v59  ;;  %v2533_v57 = vld [vmem:[#allocation2 + $0xb10] sm:$0xff]  ;;  %v2474_v59 = vld [vmem:[#allocation2 + $0x938] sm:$0xff] }
 0x79b   :  { %2842 = vmatprep.subr.bf16.mxu1 %v2684_v60  ;;  %v2538_v60 = vld [vmem:[#allocation2 + $0xb38] sm:$0xff] }
 0x79d   :  { %2802 = vmatpush1.bf16.msra.mxu0 %v2619_v61  ;;  %v2473_v61 = vld [vmem:[#allocation2 + $0x930] sm:$0xff] }
 0x79e   :  { %2843 = vmatpush1.bf16.msra.mxu1 %v2683_v63  ;;  %2803 = vmatprep.subr.bf16.mxu0 %v2624_v0  ;;  %v2537_v63 = vld [vmem:[#allocation2 + $0xb30] sm:$0xff]  ;;  %v2478_v0 = vld [vmem:[#allocation2 + $0x958] sm:$0xff] }
 0x79f   :  { %2844 = vmatprep.subr.bf16.mxu1 %v2688_v3  ;;  %v2542_v3 = vld [vmem:[#allocation2 + $0xb58] sm:$0xff] }
 0x7a1   :  { %2804 = vmatpush1.bf16.msra.mxu0 %v2623_v4  ;;  %v2477_v4 = vld [vmem:[#allocation2 + $0x950] sm:$0xff] }
 0x7a2   :  { %2845 = vmatpush1.bf16.msra.mxu1 %v2687_v14  ;;  %2855 = vmatprep.subr.bf16.mxu0 %v2438_v20  ;;  %v2541_v14 = vld [vmem:[#allocation2 + $0xb50] sm:$0xff]  ;;  %v2482_v20 = vld [vmem:[#allocation2 + $0x978] sm:$0xff] }
 0x7a3   :  { %2896 = vmatprep.subr.bf16.mxu1 %v2502_v21  ;;  %v2546_v21 = vld [vmem:[#allocation2 + $0xb78] sm:$0xff] }
 0x7a4   :  { %2806 = vmatmul.mubr.bf16.vlgmr.msra.gmra.mrb[52].mxu0 %v8947_v25 }
 0x7a5   :  { %2847 = vmatmul.mubr.bf16.vlgmr.msra.gmra.mrb[52].mxu1 %v8955_v15  ;;  %2856 = vmatpush1.bf16.msra.mxu0 %v2437_v23  ;;  %v2481_v23 = vld [vmem:[#allocation2 + $0x970] sm:$0xff] }
 0x7a6   :  { %2897 = vmatpush1.bf16.msra.mxu1 %v2501_v27  ;;  %2857 = vmatprep.subr.bf16.mxu0 %v2442_v34  ;;  %v2545_v27 = vld [vmem:[#allocation2 + $0xb70] sm:$0xff]  ;;  %v2486_v34 = vld [vmem:[#allocation2 + $0x998] sm:$0xff] }
 0x7a7   :  { %2898 = vmatprep.subr.bf16.mxu1 %v2506_v35  ;;  %2887 = vmatprep.mubr.bf16.mxu0 %v8935_v28  ;;  %v2550_v35 = vld [vmem:[#allocation2 + $0xb98] sm:$0xff] }
 0x7a8   :  { %2928 = vmatprep.mubr.bf16.mxu1 %v8939_v31 }
 0x7a9   :  { %2858 = vmatpush1.bf16.msra.mxu0 %v2441_v32  ;;  %v2485_v32 = vld [vmem:[#allocation2 + $0x990] sm:$0xff] }
 0x7aa   :  { %2899 = vmatpush1.bf16.msra.mxu1 %v2505_v36  ;;  %2859 = vmatprep.subr.bf16.mxu0 %v2446_v52  ;;  %v2549_v36 = vld [vmem:[#allocation2 + $0xb90] sm:$0xff]  ;;  %v2490_v52 = vld [vmem:[#allocation2 + $0x9b8] sm:$0xff] }
 0x7ab   :  { %2900 = vmatprep.subr.bf16.mxu1 %v2510_v37  ;;  %v2554_v37 = vld [vmem:[#allocation2 + $0xbb8] sm:$0xff] }
 0x7ad   :  { %2860 = vmatpush1.bf16.msra.mxu0 %v2445_v55  ;;  %v2489_v55 = vld [vmem:[#allocation2 + $0x9b0] sm:$0xff] }
 0x7ae   :  { %2901 = vmatpush1.bf16.msra.mxu1 %v2509_v26  ;;  %2861 = vmatprep.subr.bf16.mxu0 %v2450_v29  ;;  %v2553_v26 = vld [vmem:[#allocation2 + $0xbb0] sm:$0xff]  ;;  %v2494_v29 = vld [vmem:[#allocation2 + $0x9d8] sm:$0xff] }
 0x7af   :  { %2902 = vmatprep.subr.bf16.mxu1 %v2514_v38  ;;  %v2558_v38 = vld [vmem:[#allocation2 + $0xbd8] sm:$0xff] }
 0x7b1   :  { %2862 = vmatpush1.bf16.msra.mxu0 %v2449_v39  ;;  %v2493_v39 = vld [vmem:[#allocation2 + $0x9d0] sm:$0xff] }
 0x7b2   :  { %2903 = vmatpush1.bf16.msra.mxu1 %v2513_v40  ;;  %2863 = vmatprep.subr.bf16.mxu0 %v2454_v41  ;;  %v2557_v40 = vld [vmem:[#allocation2 + $0xbd0] sm:$0xff]  ;;  %v2498_v41 = vld [vmem:[#allocation2 + $0x9f8] sm:$0xff] }
 0x7b3   :  { %2904 = vmatprep.subr.bf16.mxu1 %v2518_v42  ;;  %v2562_v42 = vld [vmem:[#allocation2 + $0xbf8] sm:$0xff] }
 0x7b5   :  { %2864 = vmatpush1.bf16.msra.mxu0 %v2453_v43  ;;  %v2497_v43 = vld [vmem:[#allocation2 + $0x9f0] sm:$0xff] }
 0x7b6   :  { %2905 = vmatpush1.bf16.msra.mxu1 %v2517_v62  ;;  %2865 = vmatprep.subr.bf16.mxu0 %v2458_v2  ;;  %v2561_v62 = vld [vmem:[#allocation2 + $0xbf0] sm:$0xff]  ;;  %v2566_v2 = vld [vmem:[#allocation2 + $0xc18] sm:$0xff] }
 0x7b7   :  { %2906 = vmatprep.subr.bf16.mxu1 %v2522_v44  ;;  %v2630_v44 = vld [vmem:[#allocation2 + $0xe18] sm:$0xff] }
 0x7b9   :  { %2866 = vmatpush1.bf16.msra.mxu0 %v2457_v45  ;;  %v2565_v45 = vld [vmem:[#allocation2 + $0xc10] sm:$0xff] }
 0x7ba   :  { %2907 = vmatpush1.bf16.msra.mxu1 %v2521_v46  ;;  %2867 = vmatprep.subr.bf16.mxu0 %v2462_v47  ;;  %v2629_v46 = vld [vmem:[#allocation2 + $0xe10] sm:$0xff]  ;;  %v2570_v47 = vld [vmem:[#allocation2 + $0xc38] sm:$0xff] }
 0x7bb   :  { %2908 = vmatprep.subr.bf16.mxu1 %v2526_v48  ;;  %v2634_v48 = vld [vmem:[#allocation2 + $0xe38] sm:$0xff] }
 0x7bd   :  { %2868 = vmatpush1.bf16.msra.mxu0 %v2461_v50  ;;  %v2569_v50 = vld [vmem:[#allocation2 + $0xc30] sm:$0xff] }
 0x7be   :  { %2909 = vmatpush1.bf16.msra.mxu1 %v2525_v6  ;;  %2869 = vmatprep.subr.bf16.mxu0 %v2466_v18  ;;  %v2633_v6 = vld [vmem:[#allocation2 + $0xe30] sm:$0xff]  ;;  %v2574_v18 = vld [vmem:[#allocation2 + $0xc58] sm:$0xff] }
 0x7bf   :  { %2910 = vmatprep.subr.bf16.mxu1 %v2530_v53  ;;  %v2638_v53 = vld [vmem:[#allocation2 + $0xe58] sm:$0xff] }
 0x7c1   :  { %2870 = vmatpush1.bf16.msra.mxu0 %v2465_v58  ;;  %v2573_v58 = vld [vmem:[#allocation2 + $0xc50] sm:$0xff] }
 0x7c2   :  { %2911 = vmatpush1.bf16.msra.mxu1 %v2529_v54  ;;  %2871 = vmatprep.subr.bf16.mxu0 %v2470_v1  ;;  %v2637_v54 = vld [vmem:[#allocation2 + $0xe50] sm:$0xff]  ;;  %v2578_v1 = vld [vmem:[#allocation2 + $0xc78] sm:$0xff] }
 0x7c3   :  { %2912 = vmatprep.subr.bf16.mxu1 %v2534_v56  ;;  %v2642_v56 = vld [vmem:[#allocation2 + $0xe78] sm:$0xff] }
 0x7c5   :  { %2872 = vmatpush1.bf16.msra.mxu0 %v2469_v17  ;;  %v2577_v17 = vld [vmem:[#allocation2 + $0xc70] sm:$0xff] }
 0x7c6   :  { %2913 = vmatpush1.bf16.msra.mxu1 %v2533_v57  ;;  %2873 = vmatprep.subr.bf16.mxu0 %v2474_v59  ;;  %v2641_v57 = vld [vmem:[#allocation2 + $0xe70] sm:$0xff]  ;;  %v2582_v59 = vld [vmem:[#allocation2 + $0xc98] sm:$0xff] }
 0x7c7   :  { %2914 = vmatprep.subr.bf16.mxu1 %v2538_v60  ;;  %v2646_v60 = vld [vmem:[#allocation2 + $0xe98] sm:$0xff] }
 0x7c9   :  { %2874 = vmatpush1.bf16.msra.mxu0 %v2473_v61  ;;  %v2581_v61 = vld [vmem:[#allocation2 + $0xc90] sm:$0xff] }
 0x7ca   :  { %2915 = vmatpush1.bf16.msra.mxu1 %v2537_v63  ;;  %2875 = vmatprep.subr.bf16.mxu0 %v2478_v0  ;;  %v2645_v63 = vld [vmem:[#allocation2 + $0xe90] sm:$0xff]  ;;  %v2586_v0 = vld [vmem:[#allocation2 + $0xcb8] sm:$0xff] }
 0x7cb   :  { %2916 = vmatprep.subr.bf16.mxu1 %v2542_v3  ;;  %v2650_v3 = vld [vmem:[#allocation2 + $0xeb8] sm:$0xff] }
 0x7cd   :  { %2876 = vmatpush1.bf16.msra.mxu0 %v2477_v4  ;;  %v2585_v4 = vld [vmem:[#allocation2 + $0xcb0] sm:$0xff] }
 0x7ce   :  { %2917 = vmatpush1.bf16.msra.mxu1 %v2541_v14  ;;  %2877 = vmatprep.subr.bf16.mxu0 %v2482_v20  ;;  %v2649_v14 = vld [vmem:[#allocation2 + $0xeb0] sm:$0xff]  ;;  %v2590_v20 = vld [vmem:[#allocation2 + $0xcd8] sm:$0xff] }
 0x7cf   :  { %2918 = vmatprep.subr.bf16.mxu1 %v2546_v21  ;;  %v2654_v21 = vld [vmem:[#allocation2 + $0xed8] sm:$0xff] }
 0x7d1   :  { %2878 = vmatpush1.bf16.msra.mxu0 %v2481_v23  ;;  %v9027_v23 = vld [vmem:[#allocation12] sm:$0xff] }
 0x7d2   :  { %2919 = vmatpush1.bf16.msra.mxu1 %v2545_v27  ;;  %2879 = vmatprep.subr.bf16.mxu0 %v2486_v34  ;;  %v2589_v27 = vld [vmem:[#allocation2 + $0xcd0] sm:$0xff] }
 0x7d3   :  { %2920 = vmatprep.subr.bf16.mxu1 %v2550_v35  ;;  %v2653_v34 = vld [vmem:[#allocation2 + $0xed0] sm:$0xff]  ;;  %v3024_v35 = vrot.slane %v9027_v23, %v8749_v5 }
 0x7d5   :  { %2880 = vmatpush1.bf16.msra.mxu0 %v2485_v32  ;;  %v3028_v32 = vrot.slane %v9027_v23, %v8751_v7 }
 0x7d6   :  { %2921 = vmatpush1.bf16.msra.mxu1 %v2549_v36  ;;  %2881 = vmatprep.subr.bf16.mxu0 %v2490_v52  ;;  %v3032_v36 = vrot.slane %v9027_v23, %v8753_v8  ;;  %v2594_v52 = vld [vmem:[#allocation2 + $0xcf8] sm:$0xff] }
 0x7d7   :  { %2922 = vmatprep.subr.bf16.mxu1 %v2554_v37  ;;  %v2658_v37 = vld [vmem:[#allocation2 + $0xef8] sm:$0xff] }
 0x7d9   :  { %2882 = vmatpush1.bf16.msra.mxu0 %v2489_v55  ;;  %v3036_v55 = vrot.slane %v9027_v23, %v8755_v9 }
 0x7da   :  { %2923 = vmatpush1.bf16.msra.mxu1 %v2553_v26  ;;  %2883 = vmatprep.subr.bf16.mxu0 %v2494_v29  ;;  %v9038_v26 = vadd.f32 %v3024_v35, %v8990_v49  ;;  %v9041_v29 = vadd.f32 %v3028_v32, %v8992_v51  ;;  %v2597_v49 = vld [vmem:[#allocation2 + $0xd10] sm:$0xff] }
 0x7db   :  { %2924 = vmatprep.subr.bf16.mxu1 %v2558_v38  ;;  %v9044_v38 = vadd.f32 %v3032_v36, %v8994_v22  ;;  %v2661_v51 = vld [vmem:[#allocation2 + $0xf10] sm:$0xff]  ;;  %v2666_v22 = vld [vmem:[#allocation2 + $0xf38] sm:$0xff] }
 0x7dd   :  { %2884 = vmatpush1.bf16.msra.mxu0 %v2493_v39  ;;  %v9047_v39 = vadd.f32 %v3036_v55, %v8996_v33  ;;  %v2601_v33 = vld [vmem:[#allocation2 + $0xd30] sm:$0xff] }
 0x7de   :  { %2925 = vmatpush1.bf16.msra.mxu1 %v2557_v40  ;;  %2885 = vmatprep.subr.bf16.mxu0 %v2498_v41  ;;  %v2593_v40 = vld [vmem:[#allocation2 + $0xcf0] sm:$0xff] }
 0x7df   :  { %2926 = vmatprep.subr.bf16.mxu1 %v2562_v42  ;;  %v2657_v41 = vld [vmem:[#allocation2 + $0xef0] sm:$0xff]  ;;  %v2598_v42 = vld [vmem:[#allocation2 + $0xd18] sm:$0xff] }
 0x7e1   :  { %2886 = vmatpush1.bf16.msra.mxu0 %v2497_v43  ;;  %v2662_v43 = vld [vmem:[#allocation2 + $0xf18] sm:$0xff] }
 0x7e2   :  { %2927 = vmatpush1.bf16.msra.mxu1 %v2561_v62  ;;  %2937 = vmatprep.subr.bf16.mxu0 %v2566_v2  ;;  %v2602_v62 = vld [vmem:[#allocation2 + $0xd38] sm:$0xff]  ;;  %v2665_v2 = vld [vmem:[#allocation2 + $0xf30] sm:$0xff] }
 0x7e3   :  { %2978 = vmatprep.subr.bf16.mxu1 %v2630_v44  ;;  %v2606_v44 = vld [vmem:[#allocation2 + $0xd58] sm:$0xff] }
 0x7e4   :  { %2888 = vmatmul.mubr.bf16.vlgmr.msra.gmra.mrb[56].mxu0 %v8933_v24 }
 0x7e5   :  { %2929 = vmatmul.mubr.bf16.vlgmr.msra.gmra.mrb[56].mxu1 %v8937_v30  ;;  %2938 = vmatpush1.bf16.msra.mxu0 %v2565_v45  ;;  %v2670_v45 = vld [vmem:[#allocation2 + $0xf58] sm:$0xff] }
 0x7e6   :  { %2979 = vmatpush1.bf16.msra.mxu1 %v2629_v46  ;;  %2939 = vmatprep.subr.bf16.mxu0 %v2570_v47  ;;  %v2605_v46 = vld [vmem:[#allocation2 + $0xd50] sm:$0xff] }
 0x7e7   :  { %2980 = vmatprep.subr.bf16.mxu1 %v2634_v48  ;;  %2969 = vmatprep.mubr.bf16.mxu0 %v8949_v16  ;;  %v2669_v47 = vld [vmem:[#allocation2 + $0xf50] sm:$0xff]  ;;  %v2610_v48 = vld [vmem:[#allocation2 + $0xd78] sm:$0xff] }
 0x7e8   :  { %3010 = vmatprep.mubr.bf16.mxu1 %v8957_v19 }
 0x7e9   :  { %2940 = vmatpush1.bf16.msra.mxu0 %v2569_v50  ;;  %v2674_v50 = vld [vmem:[#allocation2 + $0xf78] sm:$0xff] }
 0x7ea   :  { %2981 = vmatpush1.bf16.msra.mxu1 %v2633_v6  ;;  %2941 = vmatprep.subr.bf16.mxu0 %v2574_v18  ;;  %v2609_v6 = vld [vmem:[#allocation2 + $0xd70] sm:$0xff] }
 0x7eb   :  { %2982 = vmatprep.subr.bf16.mxu1 %v2638_v53  ;;  %v2673_v18 = vld [vmem:[#allocation2 + $0xf70] sm:$0xff]  ;;  %v2614_v53 = vld [vmem:[#allocation2 + $0xd98] sm:$0xff] }
 0x7ed   :  { %2942 = vmatpush1.bf16.msra.mxu0 %v2573_v58  ;;  %v2678_v58 = vld [vmem:[#allocation2 + $0xf98] sm:$0xff] }
 0x7ee   :  { %2983 = vmatpush1.bf16.msra.mxu1 %v2637_v54  ;;  %2943 = vmatprep.subr.bf16.mxu0 %v2578_v1  ;;  %v2613_v54 = vld [vmem:[#allocation2 + $0xd90] sm:$0xff] }
 0x7ef   :  { %2984 = vmatprep.subr.bf16.mxu1 %v2642_v56  ;;  %v2677_v1 = vld [vmem:[#allocation2 + $0xf90] sm:$0xff]  ;;  %v2618_v56 = vld [vmem:[#allocation2 + $0xdb8] sm:$0xff] }
 0x7f1   :  { %2944 = vmatpush1.bf16.msra.mxu0 %v2577_v17  ;;  %v2682_v17 = vld [vmem:[#allocation2 + $0xfb8] sm:$0xff] }
 0x7f2   :  { %2985 = vmatpush1.bf16.msra.mxu1 %v2641_v57  ;;  %2945 = vmatprep.subr.bf16.mxu0 %v2582_v59  ;;  %v2617_v57 = vld [vmem:[#allocation2 + $0xdb0] sm:$0xff] }
 0x7f3   :  { %2986 = vmatprep.subr.bf16.mxu1 %v2646_v60  ;;  %v2681_v59 = vld [vmem:[#allocation2 + $0xfb0] sm:$0xff]  ;;  %v2622_v60 = vld [vmem:[#allocation2 + $0xdd8] sm:$0xff] }
 0x7f5   :  { %2946 = vmatpush1.bf16.msra.mxu0 %v2581_v61  ;;  %v2686_v61 = vld [vmem:[#allocation2 + $0xfd8] sm:$0xff] }
 0x7f6   :  { %2987 = vmatpush1.bf16.msra.mxu1 %v2645_v63  ;;  %2947 = vmatprep.subr.bf16.mxu0 %v2586_v0  ;;  %v2621_v63 = vld [vmem:[#allocation2 + $0xdd0] sm:$0xff] }
 0x7f7   :  { %2988 = vmatprep.subr.bf16.mxu1 %v2650_v3  ;;  %v2685_v0 = vld [vmem:[#allocation2 + $0xfd0] sm:$0xff]  ;;  %v2626_v3 = vld [vmem:[#allocation2 + $0xdf8] sm:$0xff] }
 0x7f9   :  { %2948 = vmatpush1.bf16.msra.mxu0 %v2585_v4  ;;  %v2690_v4 = vld [vmem:[#allocation2 + $0xff8] sm:$0xff] }
 0x7fa   :  { %2989 = vmatpush1.bf16.msra.mxu1 %v2649_v14  ;;  %2949 = vmatprep.subr.bf16.mxu0 %v2590_v20  ;;  %v2625_v14 = vld [vmem:[#allocation2 + $0xdf0] sm:$0xff] }
 0x7fb   :  { %2990 = vmatprep.subr.bf16.mxu1 %v2654_v21  ;;  %v2689_v20 = vld [vmem:[#allocation2 + $0xff0] sm:$0xff] }
 0x7fd   :  { %2950 = vmatpush1.bf16.msra.mxu0 %v2589_v27 }
 0x7fe   :  { %2991 = vmatpush1.bf16.msra.mxu1 %v2653_v34  ;;  %2951 = vmatprep.subr.bf16.mxu0 %v2594_v52 }
 0x7ff   :  { %2992 = vmatprep.subr.bf16.mxu1 %v2658_v37 }
 0x801   :  { %2952 = vmatpush1.bf16.msra.mxu0 %v2593_v40 }
 0x802   :  { %2993 = vmatpush1.bf16.msra.mxu1 %v2657_v41  ;;  %2953 = vmatprep.subr.bf16.mxu0 %v2598_v42 }
 0x803   :  { %2994 = vmatprep.subr.bf16.mxu1 %v2662_v43 }
 0x805   :  { %2954 = vmatpush1.bf16.msra.mxu0 %v2597_v49  ;;  %v3040_v49 = vrot.slane %v9027_v23, %v8757_v10 }
 0x806   :  { %2995 = vmatpush1.bf16.msra.mxu1 %v2661_v51  ;;  %2955 = vmatprep.subr.bf16.mxu0 %v2602_v62 }
 0x807   :  { %2996 = vmatprep.subr.bf16.mxu1 %v2666_v22 }
 0x809   :  { %2956 = vmatpush1.bf16.msra.mxu0 %v2601_v33  ;;  %v3044_v33 = vrot.slane %v9027_v23, %v8759_v11 }
 0x80a   :  { %2997 = vmatpush1.bf16.msra.mxu1 %v2665_v2  ;;  %2957 = vmatprep.subr.bf16.mxu0 %v2606_v44 }
 0x80b   :  { %2998 = vmatprep.subr.bf16.mxu1 %v2670_v45 }
 0x80d   :  { %2958 = vmatpush1.bf16.msra.mxu0 %v2605_v46 }
 0x80e   :  { %2999 = vmatpush1.bf16.msra.mxu1 %v2669_v47  ;;  %2959 = vmatprep.subr.bf16.mxu0 %v2610_v48 }
 0x80f   :  { %3000 = vmatprep.subr.bf16.mxu1 %v2674_v50 }
 0x811   :  { %2960 = vmatpush1.bf16.msra.mxu0 %v2609_v6 }
 0x812   :  { %3001 = vmatpush1.bf16.msra.mxu1 %v2673_v18  ;;  %2961 = vmatprep.subr.bf16.mxu0 %v2614_v53 }
 0x813   :  { %3002 = vmatprep.subr.bf16.mxu1 %v2678_v58 }
 0x815   :  { %2962 = vmatpush1.bf16.msra.mxu0 %v2613_v54 }
 0x816   :  { %3003 = vmatpush1.bf16.msra.mxu1 %v2677_v1  ;;  %2963 = vmatprep.subr.bf16.mxu0 %v2618_v56 }
 0x817   :  { %3004 = vmatprep.subr.bf16.mxu1 %v2682_v17 }
 0x819   :  { %2964 = vmatpush1.bf16.msra.mxu0 %v2617_v57 }
 0x81a   :  { %3005 = vmatpush1.bf16.msra.mxu1 %v2681_v59  ;;  %2965 = vmatprep.subr.bf16.mxu0 %v2622_v60 }
 0x81b   :  { %3006 = vmatprep.subr.bf16.mxu1 %v2686_v61 }
 0x81d   :  { %2966 = vmatpush1.bf16.msra.mxu0 %v2621_v63 }
 0x81e   :  { %3007 = vmatpush1.bf16.msra.mxu1 %v2685_v0  ;;  %2967 = vmatprep.subr.bf16.mxu0 %v2626_v3  ;;  %v3048_v3 = vrot.slane %v9027_v23, %v8761_v12 }
 0x81f   :  { %3008 = vmatprep.subr.bf16.mxu1 %v2690_v4 }
 0x821   :  { %2968 = vmatpush1.bf16.msra.mxu0 %v2625_v14 }
 0x822   :  { %3009 = vmatpush1.bf16.msra.mxu1 %v2689_v20 }
 0x824   :  { %2970 = vmatmul.mubr.bf16.vlgmr.msra.gmra.mrb[60].mxu0 %v8947_v25 }
 0x825   :  { %3011 = vmatmul.mubr.bf16.vlgmr.msra.gmra.mrb[60].mxu1 %v8955_v15 }
 0x837   :  { %v2725_v21 = vpop.f32.mrb[48].mxu0 }
 0x838   :  { %v2766_v27 = vpop.f32.mrb[48].mxu1  ;;  %v2727_v35 = vpop.f32.mrb[49].mxu0 }
 0x839   :  { %v2767_v34 = vadd.f32 %v2766_v27, %v2725_v21  ;;  %v2768_v32 = vpop.f32.mrb[49].mxu1  ;;  %v2729_v52 = vpop.f32.mrb[50].mxu0  ;;  %v3052_v21 = vrot.slane %v9027_v23, %v8763_v13 }
 0x83a   :  { %v2769_v36 = vadd.f32 %v2768_v32, %v2727_v35  ;;  %v2770_v37 = vpop.f32.mrb[50].mxu1  ;;  %v2730_v55 = vpop.f32.mrb[51].mxu0 }
 0x83b   :  { %v2771_v40 = vpop.f32.mrb[51].mxu1 }
 0x877   :  { %v2807_v41 = vpop.f32.mrb[52].mxu0 }
 0x878   :  { %v2848_v42 = vpop.f32.mrb[52].mxu1  ;;  %v2808_v43 = vadd.f32 %v2807_v41, %v2767_v34  ;;  %v2809_v51 = vpop.f32.mrb[53].mxu0 }
 0x879   :  { %v2850_v62 = vpop.f32.mrb[53].mxu1  ;;  %v2810_v22 = vadd.f32 %v2809_v51, %v2769_v36  ;;  %v2811_v2 = vpop.f32.mrb[54].mxu0 }
 0x87a   :  { %v2852_v44 = vpop.f32.mrb[54].mxu1  ;;  %v2849_v45 = vadd.f32 %v2848_v42, %v2808_v43  ;;  %v2812_v46 = vpop.f32.mrb[55].mxu0 }
 0x87b   :  { %v2853_v47 = vpop.f32.mrb[55].mxu1  ;;  %v2851_v48 = vadd.f32 %v2850_v62, %v2810_v22 }
 0x87c   :  { %v9055_v50 = vadd.f32 %v3040_v49, %v2849_v45 }
 0x87d   :  { %v9057_v6 = vadd.f32 %v3044_v33, %v2851_v48 }
 0x8b7   :  { %v2889_v18 = vpop.f32.mrb[56].mxu0 }
 0x8b8   :  { %v2930_v53 = vpop.f32.mrb[56].mxu1  ;;  %v2891_v54 = vpop.f32.mrb[57].mxu0 }
 0x8b9   :  { %v2931_v58 = vadd.f32 %v2930_v53, %v2889_v18  ;;  %v2932_v1 = vpop.f32.mrb[57].mxu1  ;;  %v2893_v17 = vpop.f32.mrb[58].mxu0 }
 0x8ba   :  { %v2933_v56 = vadd.f32 %v2932_v1, %v2891_v54  ;;  %v2934_v57 = vpop.f32.mrb[58].mxu1  ;;  %v2894_v59 = vpop.f32.mrb[59].mxu0 }
 0x8bb   :  { %v2935_v60 = vpop.f32.mrb[59].mxu1 }
 0x8f7   :  { %v2971_v61 = vpop.f32.mrb[60].mxu0 }
 0x8f8   :  { %v3012_v63 = vpop.f32.mrb[60].mxu1  ;;  %v2972_v0 = vadd.f32 %v2971_v61, %v2931_v58  ;;  %v2973_v4 = vpop.f32.mrb[61].mxu0 }
 0x8f9   :  { %v3014_v14 = vpop.f32.mrb[61].mxu1  ;;  %v2974_v20 = vadd.f32 %v2973_v4, %v2933_v56  ;;  %v2975_v27 = vpop.f32.mrb[62].mxu0 }
 0x8fa   :  { %v3016_v34 = vpop.f32.mrb[62].mxu1  ;;  %v3013_v35 = vadd.f32 %v3012_v63, %v2972_v0  ;;  %v2976_v32 = vpop.f32.mrb[63].mxu0 }
 0x8fb   :  { %v3017_v36 = vpop.f32.mrb[63].mxu1  ;;  %v3015_v52 = vadd.f32 %v3014_v14, %v2974_v20 }
 0x8fc   :  { %v9063_v37 = vadd.f32 %v3048_v3, %v3013_v35 }
 0x8fd   :  { %v9065_v55 = vadd.f32 %v3052_v21, %v3015_v52 }
 0x8fe   :  { %8495 = dma.done.wait [#allocation3], 32768 }
 0x8ff   :  { %8496 = vsyncadd [#allocation3], 4294934528  ;;  %3394 = vmatprep.mubr.bf16.mxu0 %v8935_v28  ;;  %3435 = vmatprep.mubr.bf16.mxu1 %v8939_v31  ;;  %3087 = sst [smem:[#allocation33]] %s8520_s25  ;;  %s3071_s8 = scalar_lea.hbm %s9639_s2, 163840 }
 0x900   :  { %3089 = sst [smem:[#allocation33 + $0x1]] %s8520_s25  ;;  %s8537_s18 = smov [#allocation32]  }
 0x901   :  { %3091 = sst [smem:[#allocation33 + $0x2]] %s8522_s26 }
 0x902   :  { %3093 = sst [smem:[#allocation33 + $0x3]] %s8523_s11 }
 0x903   :  { %3095 = sst [smem:[#allocation33 + $0x4]] %s8524_s7 }
 0x904   :  { %3097 = sst [smem:[#allocation33 + $0x5]] %s8525_s22 }
 0x905   :  { %3099 = sst [smem:[#allocation33 + $0x6]] %s8526_s29 }
 0x906   :  { %3101 = sst [smem:[#allocation33 + $0x7]] %s8523_s11 }
 0x907   :  { %3103 = sst [smem:[#allocation33 + $0x8]] %s8522_s26 }
 0x908   :  { %3105 = dma.general %s3071_s8, 32768, %s8835_s9, %s8532_s4, %s8537_s18, [#allocation33], %s8734_s1, 0  }
 0x909   :  { %v3107_v23 = vld [vmem:[#allocation2 + $0x8] sm:$0xff]  ;;  %v3106_v41 = vld [vmem:[#allocation2] sm:$0xff] }
 0x90a   :  { %v3171_v40 = vld [vmem:[#allocation2 + $0x208] sm:$0xff]  ;;  %3362 = vmatprep.subr.bf16.mxu0 %v3107_v23  ;;  %v3170_v42 = vld [vmem:[#allocation2 + $0x200] sm:$0xff] }
 0x90b   :  { %3403 = vmatprep.subr.bf16.mxu1 %v3171_v40  ;;  %v3111_v43 = vld [vmem:[#allocation2 + $0x28] sm:$0xff]  ;;  %3363 = vmatpush1.bf16.msra.mxu0 %v3106_v41  ;;  %v3110_v51 = vld [vmem:[#allocation2 + $0x20] sm:$0xff] }
 0x90c   :  { %v3175_v49 = vld [vmem:[#allocation2 + $0x228] sm:$0xff]  ;;  %3404 = vmatpush1.bf16.msra.mxu1 %v3170_v42  ;;  %3364 = vmatprep.subr.bf16.mxu0 %v3111_v43  ;;  %v3174_v62 = vld [vmem:[#allocation2 + $0x220] sm:$0xff] }
 0x90d   :  { %3405 = vmatprep.subr.bf16.mxu1 %v3175_v49  ;;  %v3115_v22 = vld [vmem:[#allocation2 + $0x48] sm:$0xff]  ;;  %v3114_v2 = vld [vmem:[#allocation2 + $0x40] sm:$0xff] }
 0x90e   :  { %v3179_v33 = vld [vmem:[#allocation2 + $0x248] sm:$0xff]  ;;  %v3178_v44 = vld [vmem:[#allocation2 + $0x240] sm:$0xff] }
 0x90f   :  { %3365 = vmatpush1.bf16.msra.mxu0 %v3110_v51  ;;  %v3119_v45 = vld [vmem:[#allocation2 + $0x68] sm:$0xff]  ;;  %v3118_v47 = vld [vmem:[#allocation2 + $0x60] sm:$0xff] }
 0x910   :  { %3406 = vmatpush1.bf16.msra.mxu1 %v3174_v62  ;;  %3366 = vmatprep.subr.bf16.mxu0 %v3115_v22  ;;  %v3183_v46 = vld [vmem:[#allocation2 + $0x268] sm:$0xff]  ;;  %v3182_v48 = vld [vmem:[#allocation2 + $0x260] sm:$0xff] }
 0x911   :  { %3407 = vmatprep.subr.bf16.mxu1 %v3179_v33  ;;  %v3123_v18 = vld [vmem:[#allocation2 + $0x88] sm:$0xff]  ;;  %v3122_v58 = vld [vmem:[#allocation2 + $0x80] sm:$0xff] }
 0x912   :  { %v3187_v53 = vld [vmem:[#allocation2 + $0x288] sm:$0xff]  ;;  %v3186_v54 = vld [vmem:[#allocation2 + $0x280] sm:$0xff] }
 0x913   :  { %3367 = vmatpush1.bf16.msra.mxu0 %v3114_v2  ;;  %v3127_v1 = vld [vmem:[#allocation2 + $0xa8] sm:$0xff]  ;;  %v3126_v17 = vld [vmem:[#allocation2 + $0xa0] sm:$0xff] }
 0x914   :  { %3408 = vmatpush1.bf16.msra.mxu1 %v3178_v44  ;;  %3368 = vmatprep.subr.bf16.mxu0 %v3119_v45  ;;  %v3191_v56 = vld [vmem:[#allocation2 + $0x2a8] sm:$0xff]  ;;  %v3190_v57 = vld [vmem:[#allocation2 + $0x2a0] sm:$0xff] }
 0x915   :  { %3409 = vmatprep.subr.bf16.mxu1 %v3183_v46  ;;  %v3131_v59 = vld [vmem:[#allocation2 + $0xc8] sm:$0xff]  ;;  %v3130_v61 = vld [vmem:[#allocation2 + $0xc0] sm:$0xff] }
 0x916   :  { %v3195_v60 = vld [vmem:[#allocation2 + $0x2c8] sm:$0xff]  ;;  %v3194_v63 = vld [vmem:[#allocation2 + $0x2c0] sm:$0xff] }
 0x917   :  { %3369 = vmatpush1.bf16.msra.mxu0 %v3118_v47  ;;  %v3135_v0 = vld [vmem:[#allocation2 + $0xe8] sm:$0xff]  ;;  %v3134_v4 = vld [vmem:[#allocation2 + $0xe0] sm:$0xff] }
 0x918   :  { %3410 = vmatpush1.bf16.msra.mxu1 %v3182_v48  ;;  %3370 = vmatprep.subr.bf16.mxu0 %v3123_v18  ;;  %v3199_v3 = vld [vmem:[#allocation2 + $0x2e8] sm:$0xff]  ;;  %v3198_v14 = vld [vmem:[#allocation2 + $0x2e0] sm:$0xff] }
 0x919   :  { %3411 = vmatprep.subr.bf16.mxu1 %v3187_v53  ;;  %v3139_v20 = vld [vmem:[#allocation2 + $0x108] sm:$0xff]  ;;  %v3138_v27 = vld [vmem:[#allocation2 + $0x100] sm:$0xff] }
 0x91a   :  { %v3203_v21 = vld [vmem:[#allocation2 + $0x308] sm:$0xff]  ;;  %v3202_v34 = vld [vmem:[#allocation2 + $0x300] sm:$0xff] }
 0x91b   :  { %3371 = vmatpush1.bf16.msra.mxu0 %v3122_v58  ;;  %v3143_v35 = vld [vmem:[#allocation2 + $0x128] sm:$0xff]  ;;  %v3142_v36 = vld [vmem:[#allocation2 + $0x120] sm:$0xff] }
 0x91c   :  { %3412 = vmatpush1.bf16.msra.mxu1 %v3186_v54  ;;  %3372 = vmatprep.subr.bf16.mxu0 %v3127_v1  ;;  %v3207_v32 = vld [vmem:[#allocation2 + $0x328] sm:$0xff]  ;;  %v3206_v52 = vld [vmem:[#allocation2 + $0x320] sm:$0xff] }
 0x91d   :  { %3413 = vmatprep.subr.bf16.mxu1 %v3191_v56  ;;  %v3147_v23 = vld [vmem:[#allocation2 + $0x148] sm:$0xff]  ;;  %v3146_v41 = vld [vmem:[#allocation2 + $0x140] sm:$0xff] }
 0x91e   :  { %v3211_v40 = vld [vmem:[#allocation2 + $0x348] sm:$0xff]  ;;  %v3210_v42 = vld [vmem:[#allocation2 + $0x340] sm:$0xff] }
 0x91f   :  { %3373 = vmatpush1.bf16.msra.mxu0 %v3126_v17  ;;  %v3151_v43 = vld [vmem:[#allocation2 + $0x168] sm:$0xff]  ;;  %v3150_v51 = vld [vmem:[#allocation2 + $0x160] sm:$0xff] }
 0x920   :  { %3414 = vmatpush1.bf16.msra.mxu1 %v3190_v57  ;;  %3374 = vmatprep.subr.bf16.mxu0 %v3131_v59  ;;  %v3215_v49 = vld [vmem:[#allocation2 + $0x368] sm:$0xff]  ;;  %v3214_v62 = vld [vmem:[#allocation2 + $0x360] sm:$0xff] }
 0x921   :  { %3415 = vmatprep.subr.bf16.mxu1 %v3195_v60  ;;  %v3155_v22 = vld [vmem:[#allocation2 + $0x188] sm:$0xff]  ;;  %v3154_v2 = vld [vmem:[#allocation2 + $0x180] sm:$0xff] }
 0x922   :  { %v3219_v33 = vld [vmem:[#allocation2 + $0x388] sm:$0xff]  ;;  %v3218_v44 = vld [vmem:[#allocation2 + $0x380] sm:$0xff] }
 0x923   :  { %3375 = vmatpush1.bf16.msra.mxu0 %v3130_v61  ;;  %v3159_v45 = vld [vmem:[#allocation2 + $0x1a8] sm:$0xff]  ;;  %v3158_v47 = vld [vmem:[#allocation2 + $0x1a0] sm:$0xff] }
 0x924   :  { %3416 = vmatpush1.bf16.msra.mxu1 %v3194_v63  ;;  %3376 = vmatprep.subr.bf16.mxu0 %v3135_v0  ;;  %v3223_v46 = vld [vmem:[#allocation2 + $0x3a8] sm:$0xff]  ;;  %v3222_v48 = vld [vmem:[#allocation2 + $0x3a0] sm:$0xff] }
 0x925   :  { %3417 = vmatprep.subr.bf16.mxu1 %v3199_v3  ;;  %v3163_v18 = vld [vmem:[#allocation2 + $0x1c8] sm:$0xff]  ;;  %v3162_v58 = vld [vmem:[#allocation2 + $0x1c0] sm:$0xff] }
 0x926   :  { %v3227_v53 = vld [vmem:[#allocation2 + $0x3c8] sm:$0xff]  ;;  %v3226_v54 = vld [vmem:[#allocation2 + $0x3c0] sm:$0xff] }
 0x927   :  { %3377 = vmatpush1.bf16.msra.mxu0 %v3134_v4  ;;  %v3167_v1 = vld [vmem:[#allocation2 + $0x1e8] sm:$0xff]  ;;  %v3166_v17 = vld [vmem:[#allocation2 + $0x1e0] sm:$0xff] }
 0x928   :  { %3418 = vmatpush1.bf16.msra.mxu1 %v3198_v14  ;;  %3378 = vmatprep.subr.bf16.mxu0 %v3139_v20  ;;  %v3231_v56 = vld [vmem:[#allocation2 + $0x3e8] sm:$0xff]  ;;  %v3230_v57 = vld [vmem:[#allocation2 + $0x3e0] sm:$0xff] }
 0x929   :  { %3419 = vmatprep.subr.bf16.mxu1 %v3203_v21  ;;  %v3235_v59 = vld [vmem:[#allocation2 + $0x408] sm:$0xff]  ;;  %v3234_v61 = vld [vmem:[#allocation2 + $0x400] sm:$0xff] }
 0x92a   :  { %v3299_v60 = vld [vmem:[#allocation2 + $0x608] sm:$0xff]  ;;  %v3298_v63 = vld [vmem:[#allocation2 + $0x600] sm:$0xff] }
 0x92b   :  { %3379 = vmatpush1.bf16.msra.mxu0 %v3138_v27  ;;  %v3239_v0 = vld [vmem:[#allocation2 + $0x428] sm:$0xff]  ;;  %v3238_v4 = vld [vmem:[#allocation2 + $0x420] sm:$0xff] }
 0x92c   :  { %3420 = vmatpush1.bf16.msra.mxu1 %v3202_v34  ;;  %3380 = vmatprep.subr.bf16.mxu0 %v3143_v35  ;;  %v3303_v3 = vld [vmem:[#allocation2 + $0x628] sm:$0xff]  ;;  %v3302_v14 = vld [vmem:[#allocation2 + $0x620] sm:$0xff] }
 0x92d   :  { %3421 = vmatprep.subr.bf16.mxu1 %v3207_v32  ;;  %v3243_v20 = vld [vmem:[#allocation2 + $0x448] sm:$0xff]  ;;  %v3242_v27 = vld [vmem:[#allocation2 + $0x440] sm:$0xff] }
 0x92e   :  { %v3307_v21 = vld [vmem:[#allocation2 + $0x648] sm:$0xff]  ;;  %v3306_v34 = vld [vmem:[#allocation2 + $0x640] sm:$0xff] }
 0x92f   :  { %3381 = vmatpush1.bf16.msra.mxu0 %v3142_v36  ;;  %v3247_v35 = vld [vmem:[#allocation2 + $0x468] sm:$0xff]  ;;  %v3246_v36 = vld [vmem:[#allocation2 + $0x460] sm:$0xff] }
 0x930   :  { %3422 = vmatpush1.bf16.msra.mxu1 %v3206_v52  ;;  %3382 = vmatprep.subr.bf16.mxu0 %v3147_v23  ;;  %v3311_v32 = vld [vmem:[#allocation2 + $0x668] sm:$0xff]  ;;  %v3310_v52 = vld [vmem:[#allocation2 + $0x660] sm:$0xff] }
 0x931   :  { %3423 = vmatprep.subr.bf16.mxu1 %v3211_v40  ;;  %v3251_v23 = vld [vmem:[#allocation2 + $0x488] sm:$0xff] }
 0x932   :  { %v3315_v40 = vld [vmem:[#allocation2 + $0x688] sm:$0xff] }
 0x933   :  { %3383 = vmatpush1.bf16.msra.mxu0 %v3146_v41  ;;  %v3250_v41 = vld [vmem:[#allocation2 + $0x480] sm:$0xff] }
 0x934   :  { %3424 = vmatpush1.bf16.msra.mxu1 %v3210_v42  ;;  %3384 = vmatprep.subr.bf16.mxu0 %v3151_v43  ;;  %v3314_v42 = vld [vmem:[#allocation2 + $0x680] sm:$0xff]  ;;  %v3255_v43 = vld [vmem:[#allocation2 + $0x4a8] sm:$0xff] }
 0x935   :  { %3425 = vmatprep.subr.bf16.mxu1 %v3215_v49  ;;  %v3319_v49 = vld [vmem:[#allocation2 + $0x6a8] sm:$0xff] }
 0x937   :  { %3385 = vmatpush1.bf16.msra.mxu0 %v3150_v51  ;;  %v3254_v51 = vld [vmem:[#allocation2 + $0x4a0] sm:$0xff] }
 0x938   :  { %3426 = vmatpush1.bf16.msra.mxu1 %v3214_v62  ;;  %3386 = vmatprep.subr.bf16.mxu0 %v3155_v22  ;;  %v3318_v62 = vld [vmem:[#allocation2 + $0x6a0] sm:$0xff]  ;;  %v3259_v22 = vld [vmem:[#allocation2 + $0x4c8] sm:$0xff] }
 0x939   :  { %3427 = vmatprep.subr.bf16.mxu1 %v3219_v33  ;;  %v3323_v33 = vld [vmem:[#allocation2 + $0x6c8] sm:$0xff] }
 0x93b   :  { %3387 = vmatpush1.bf16.msra.mxu0 %v3154_v2  ;;  %v3258_v2 = vld [vmem:[#allocation2 + $0x4c0] sm:$0xff] }
 0x93c   :  { %3428 = vmatpush1.bf16.msra.mxu1 %v3218_v44  ;;  %3388 = vmatprep.subr.bf16.mxu0 %v3159_v45  ;;  %v3322_v44 = vld [vmem:[#allocation2 + $0x6c0] sm:$0xff]  ;;  %v3263_v45 = vld [vmem:[#allocation2 + $0x4e8] sm:$0xff] }
 0x93d   :  { %3429 = vmatprep.subr.bf16.mxu1 %v3223_v46  ;;  %v3327_v46 = vld [vmem:[#allocation2 + $0x6e8] sm:$0xff] }
 0x93f   :  { %3389 = vmatpush1.bf16.msra.mxu0 %v3158_v47  ;;  %v3262_v47 = vld [vmem:[#allocation2 + $0x4e0] sm:$0xff] }
 0x940   :  { %3430 = vmatpush1.bf16.msra.mxu1 %v3222_v48  ;;  %3390 = vmatprep.subr.bf16.mxu0 %v3163_v18  ;;  %v3326_v48 = vld [vmem:[#allocation2 + $0x6e0] sm:$0xff]  ;;  %v3267_v18 = vld [vmem:[#allocation2 + $0x508] sm:$0xff] }
 0x941   :  { %3431 = vmatprep.subr.bf16.mxu1 %v3227_v53  ;;  %v3331_v53 = vld [vmem:[#allocation2 + $0x708] sm:$0xff] }
 0x943   :  { %3391 = vmatpush1.bf16.msra.mxu0 %v3162_v58  ;;  %v3266_v58 = vld [vmem:[#allocation2 + $0x500] sm:$0xff] }
 0x944   :  { %3432 = vmatpush1.bf16.msra.mxu1 %v3226_v54  ;;  %3392 = vmatprep.subr.bf16.mxu0 %v3167_v1  ;;  %v3330_v54 = vld [vmem:[#allocation2 + $0x700] sm:$0xff]  ;;  %v3271_v1 = vld [vmem:[#allocation2 + $0x528] sm:$0xff] }
 0x945   :  { %3433 = vmatprep.subr.bf16.mxu1 %v3231_v56  ;;  %v3335_v56 = vld [vmem:[#allocation2 + $0x728] sm:$0xff] }
 0x947   :  { %3393 = vmatpush1.bf16.msra.mxu0 %v3166_v17  ;;  %v3270_v17 = vld [vmem:[#allocation2 + $0x520] sm:$0xff] }
 0x948   :  { %3434 = vmatpush1.bf16.msra.mxu1 %v3230_v57  ;;  %3444 = vmatprep.subr.bf16.mxu0 %v3235_v59  ;;  %v3334_v57 = vld [vmem:[#allocation2 + $0x720] sm:$0xff]  ;;  %v3275_v59 = vld [vmem:[#allocation2 + $0x548] sm:$0xff] }
 0x949   :  { %3485 = vmatprep.subr.bf16.mxu1 %v3299_v60  ;;  %v3339_v60 = vld [vmem:[#allocation2 + $0x748] sm:$0xff] }
 0x94a   :  { %3395 = vmatmul.mubr.bf16.vlgmr.msra.gmra.mrb[64].mxu0 %v8933_v24 }
 0x94b   :  { %3436 = vmatmul.mubr.bf16.vlgmr.msra.gmra.mrb[64].mxu1 %v8937_v30  ;;  %3445 = vmatpush1.bf16.msra.mxu0 %v3234_v61  ;;  %v3274_v61 = vld [vmem:[#allocation2 + $0x540] sm:$0xff] }
 0x94c   :  { %3486 = vmatpush1.bf16.msra.mxu1 %v3298_v63  ;;  %3446 = vmatprep.subr.bf16.mxu0 %v3239_v0  ;;  %v3338_v63 = vld [vmem:[#allocation2 + $0x740] sm:$0xff]  ;;  %v3279_v0 = vld [vmem:[#allocation2 + $0x568] sm:$0xff] }
 0x94d   :  { %3487 = vmatprep.subr.bf16.mxu1 %v3303_v3  ;;  %3476 = vmatprep.mubr.bf16.mxu0 %v8949_v16  ;;  %v3343_v3 = vld [vmem:[#allocation2 + $0x768] sm:$0xff] }
 0x94e   :  { %3517 = vmatprep.mubr.bf16.mxu1 %v8957_v19 }
 0x94f   :  { %3447 = vmatpush1.bf16.msra.mxu0 %v3238_v4  ;;  %v3278_v4 = vld [vmem:[#allocation2 + $0x560] sm:$0xff] }
 0x950   :  { %3488 = vmatpush1.bf16.msra.mxu1 %v3302_v14  ;;  %3448 = vmatprep.subr.bf16.mxu0 %v3243_v20  ;;  %v3342_v14 = vld [vmem:[#allocation2 + $0x760] sm:$0xff]  ;;  %v3283_v20 = vld [vmem:[#allocation2 + $0x588] sm:$0xff] }
 0x951   :  { %3489 = vmatprep.subr.bf16.mxu1 %v3307_v21  ;;  %v3347_v21 = vld [vmem:[#allocation2 + $0x788] sm:$0xff] }
 0x953   :  { %3449 = vmatpush1.bf16.msra.mxu0 %v3242_v27  ;;  %v3282_v27 = vld [vmem:[#allocation2 + $0x580] sm:$0xff] }
 0x954   :  { %3490 = vmatpush1.bf16.msra.mxu1 %v3306_v34  ;;  %3450 = vmatprep.subr.bf16.mxu0 %v3247_v35  ;;  %v3346_v34 = vld [vmem:[#allocation2 + $0x780] sm:$0xff]  ;;  %v3287_v35 = vld [vmem:[#allocation2 + $0x5a8] sm:$0xff] }
 0x955   :  { %3491 = vmatprep.subr.bf16.mxu1 %v3311_v32  ;;  %v3351_v32 = vld [vmem:[#allocation2 + $0x7a8] sm:$0xff] }
 0x957   :  { %3451 = vmatpush1.bf16.msra.mxu0 %v3246_v36  ;;  %v3286_v36 = vld [vmem:[#allocation2 + $0x5a0] sm:$0xff] }
 0x958   :  { %3492 = vmatpush1.bf16.msra.mxu1 %v3310_v52  ;;  %3452 = vmatprep.subr.bf16.mxu0 %v3251_v23  ;;  %v3350_v52 = vld [vmem:[#allocation2 + $0x7a0] sm:$0xff]  ;;  %v3291_v23 = vld [vmem:[#allocation2 + $0x5c8] sm:$0xff] }
 0x959   :  { %3493 = vmatprep.subr.bf16.mxu1 %v3315_v40  ;;  %v3355_v40 = vld [vmem:[#allocation2 + $0x7c8] sm:$0xff] }
 0x95b   :  { %3453 = vmatpush1.bf16.msra.mxu0 %v3250_v41  ;;  %v3290_v41 = vld [vmem:[#allocation2 + $0x5c0] sm:$0xff] }
 0x95c   :  { %3494 = vmatpush1.bf16.msra.mxu1 %v3314_v42  ;;  %3454 = vmatprep.subr.bf16.mxu0 %v3255_v43  ;;  %v3354_v42 = vld [vmem:[#allocation2 + $0x7c0] sm:$0xff]  ;;  %v3295_v43 = vld [vmem:[#allocation2 + $0x5e8] sm:$0xff] }
 0x95d   :  { %3495 = vmatprep.subr.bf16.mxu1 %v3319_v49  ;;  %v3359_v49 = vld [vmem:[#allocation2 + $0x7e8] sm:$0xff] }
 0x95f   :  { %3455 = vmatpush1.bf16.msra.mxu0 %v3254_v51  ;;  %v3294_v51 = vld [vmem:[#allocation2 + $0x5e0] sm:$0xff] }
 0x960   :  { %3496 = vmatpush1.bf16.msra.mxu1 %v3318_v62  ;;  %3456 = vmatprep.subr.bf16.mxu0 %v3259_v22  ;;  %v3358_v62 = vld [vmem:[#allocation2 + $0x7e0] sm:$0xff]  ;;  %v3109_v22 = vld [vmem:[#allocation2 + $0x18] sm:$0xff] }
 0x961   :  { %3497 = vmatprep.subr.bf16.mxu1 %v3323_v33  ;;  %v3173_v33 = vld [vmem:[#allocation2 + $0x218] sm:$0xff] }
 0x963   :  { %3457 = vmatpush1.bf16.msra.mxu0 %v3258_v2  ;;  %v3108_v2 = vld [vmem:[#allocation2 + $0x10] sm:$0xff] }
 0x964   :  { %3498 = vmatpush1.bf16.msra.mxu1 %v3322_v44  ;;  %3458 = vmatprep.subr.bf16.mxu0 %v3263_v45  ;;  %v3172_v44 = vld [vmem:[#allocation2 + $0x210] sm:$0xff]  ;;  %v3113_v45 = vld [vmem:[#allocation2 + $0x38] sm:$0xff] }
 0x965   :  { %3499 = vmatprep.subr.bf16.mxu1 %v3327_v46  ;;  %v3177_v46 = vld [vmem:[#allocation2 + $0x238] sm:$0xff] }
 0x967   :  { %3459 = vmatpush1.bf16.msra.mxu0 %v3262_v47  ;;  %v3112_v47 = vld [vmem:[#allocation2 + $0x30] sm:$0xff] }
 0x968   :  { %3500 = vmatpush1.bf16.msra.mxu1 %v3326_v48  ;;  %3460 = vmatprep.subr.bf16.mxu0 %v3267_v18  ;;  %v3176_v48 = vld [vmem:[#allocation2 + $0x230] sm:$0xff]  ;;  %v3117_v18 = vld [vmem:[#allocation2 + $0x58] sm:$0xff] }
 0x969   :  { %3501 = vmatprep.subr.bf16.mxu1 %v3331_v53  ;;  %v3181_v53 = vld [vmem:[#allocation2 + $0x258] sm:$0xff] }
 0x96b   :  { %3461 = vmatpush1.bf16.msra.mxu0 %v3266_v58  ;;  %v3116_v58 = vld [vmem:[#allocation2 + $0x50] sm:$0xff] }
 0x96c   :  { %3502 = vmatpush1.bf16.msra.mxu1 %v3330_v54  ;;  %3462 = vmatprep.subr.bf16.mxu0 %v3271_v1  ;;  %v3180_v54 = vld [vmem:[#allocation2 + $0x250] sm:$0xff]  ;;  %v3121_v1 = vld [vmem:[#allocation2 + $0x78] sm:$0xff] }
 0x96d   :  { %3503 = vmatprep.subr.bf16.mxu1 %v3335_v56  ;;  %v3185_v56 = vld [vmem:[#allocation2 + $0x278] sm:$0xff] }
 0x96f   :  { %3463 = vmatpush1.bf16.msra.mxu0 %v3270_v17  ;;  %v3120_v17 = vld [vmem:[#allocation2 + $0x70] sm:$0xff] }
 0x970   :  { %3504 = vmatpush1.bf16.msra.mxu1 %v3334_v57  ;;  %3464 = vmatprep.subr.bf16.mxu0 %v3275_v59  ;;  %v3184_v57 = vld [vmem:[#allocation2 + $0x270] sm:$0xff]  ;;  %v3125_v59 = vld [vmem:[#allocation2 + $0x98] sm:$0xff] }
 0x971   :  { %3505 = vmatprep.subr.bf16.mxu1 %v3339_v60  ;;  %v3189_v60 = vld [vmem:[#allocation2 + $0x298] sm:$0xff] }
 0x973   :  { %3465 = vmatpush1.bf16.msra.mxu0 %v3274_v61  ;;  %v3124_v61 = vld [vmem:[#allocation2 + $0x90] sm:$0xff] }
 0x974   :  { %3506 = vmatpush1.bf16.msra.mxu1 %v3338_v63  ;;  %3466 = vmatprep.subr.bf16.mxu0 %v3279_v0  ;;  %v3188_v63 = vld [vmem:[#allocation2 + $0x290] sm:$0xff]  ;;  %v3129_v0 = vld [vmem:[#allocation2 + $0xb8] sm:$0xff] }
 0x975   :  { %3507 = vmatprep.subr.bf16.mxu1 %v3343_v3  ;;  %v3193_v3 = vld [vmem:[#allocation2 + $0x2b8] sm:$0xff] }
 0x977   :  { %3467 = vmatpush1.bf16.msra.mxu0 %v3278_v4  ;;  %v3128_v4 = vld [vmem:[#allocation2 + $0xb0] sm:$0xff] }
 0x978   :  { %3508 = vmatpush1.bf16.msra.mxu1 %v3342_v14  ;;  %3468 = vmatprep.subr.bf16.mxu0 %v3283_v20  ;;  %v3192_v14 = vld [vmem:[#allocation2 + $0x2b0] sm:$0xff]  ;;  %v3133_v20 = vld [vmem:[#allocation2 + $0xd8] sm:$0xff] }
 0x979   :  { %3509 = vmatprep.subr.bf16.mxu1 %v3347_v21  ;;  %v3197_v21 = vld [vmem:[#allocation2 + $0x2d8] sm:$0xff] }
 0x97b   :  { %3469 = vmatpush1.bf16.msra.mxu0 %v3282_v27  ;;  %v3132_v27 = vld [vmem:[#allocation2 + $0xd0] sm:$0xff] }
 0x97c   :  { %3510 = vmatpush1.bf16.msra.mxu1 %v3346_v34  ;;  %3470 = vmatprep.subr.bf16.mxu0 %v3287_v35  ;;  %v3196_v34 = vld [vmem:[#allocation2 + $0x2d0] sm:$0xff]  ;;  %v3137_v35 = vld [vmem:[#allocation2 + $0xf8] sm:$0xff] }
 0x97d   :  { %3511 = vmatprep.subr.bf16.mxu1 %v3351_v32  ;;  %v3201_v32 = vld [vmem:[#allocation2 + $0x2f8] sm:$0xff] }
 0x97f   :  { %3471 = vmatpush1.bf16.msra.mxu0 %v3286_v36  ;;  %v3136_v36 = vld [vmem:[#allocation2 + $0xf0] sm:$0xff] }
 0x980   :  { %3512 = vmatpush1.bf16.msra.mxu1 %v3350_v52  ;;  %3472 = vmatprep.subr.bf16.mxu0 %v3291_v23  ;;  %v3200_v52 = vld [vmem:[#allocation2 + $0x2f0] sm:$0xff]  ;;  %v3141_v23 = vld [vmem:[#allocation2 + $0x118] sm:$0xff] }
 0x981   :  { %3513 = vmatprep.subr.bf16.mxu1 %v3355_v40  ;;  %v3205_v40 = vld [vmem:[#allocation2 + $0x318] sm:$0xff] }
 0x983   :  { %3473 = vmatpush1.bf16.msra.mxu0 %v3290_v41  ;;  %v3140_v41 = vld [vmem:[#allocation2 + $0x110] sm:$0xff] }
 0x984   :  { %3514 = vmatpush1.bf16.msra.mxu1 %v3354_v42  ;;  %3474 = vmatprep.subr.bf16.mxu0 %v3295_v43  ;;  %v3204_v42 = vld [vmem:[#allocation2 + $0x310] sm:$0xff]  ;;  %v3145_v43 = vld [vmem:[#allocation2 + $0x138] sm:$0xff] }
 0x985   :  { %3515 = vmatprep.subr.bf16.mxu1 %v3359_v49  ;;  %v3209_v49 = vld [vmem:[#allocation2 + $0x338] sm:$0xff] }
 0x987   :  { %3475 = vmatpush1.bf16.msra.mxu0 %v3294_v51  ;;  %v3144_v51 = vld [vmem:[#allocation2 + $0x130] sm:$0xff] }
 0x988   :  { %3516 = vmatpush1.bf16.msra.mxu1 %v3358_v62  ;;  %3526 = vmatprep.subr.bf16.mxu0 %v3109_v22  ;;  %v3208_v62 = vld [vmem:[#allocation2 + $0x330] sm:$0xff]  ;;  %v3149_v22 = vld [vmem:[#allocation2 + $0x158] sm:$0xff] }
 0x989   :  { %3567 = vmatprep.subr.bf16.mxu1 %v3173_v33  ;;  %v3213_v33 = vld [vmem:[#allocation2 + $0x358] sm:$0xff] }
 0x98a   :  { %3477 = vmatmul.mubr.bf16.vlgmr.msra.gmra.mrb[68].mxu0 %v8947_v25 }
 0x98b   :  { %3518 = vmatmul.mubr.bf16.vlgmr.msra.gmra.mrb[68].mxu1 %v8955_v15  ;;  %3527 = vmatpush1.bf16.msra.mxu0 %v3108_v2  ;;  %v3148_v2 = vld [vmem:[#allocation2 + $0x150] sm:$0xff] }
 0x98c   :  { %3568 = vmatpush1.bf16.msra.mxu1 %v3172_v44  ;;  %3528 = vmatprep.subr.bf16.mxu0 %v3113_v45  ;;  %v3212_v44 = vld [vmem:[#allocation2 + $0x350] sm:$0xff]  ;;  %v3153_v45 = vld [vmem:[#allocation2 + $0x178] sm:$0xff] }
 0x98d   :  { %3569 = vmatprep.subr.bf16.mxu1 %v3177_v46  ;;  %3558 = vmatprep.mubr.bf16.mxu0 %v8935_v28  ;;  %v3217_v46 = vld [vmem:[#allocation2 + $0x378] sm:$0xff] }
 0x98e   :  { %3599 = vmatprep.mubr.bf16.mxu1 %v8939_v31 }
 0x98f   :  { %3529 = vmatpush1.bf16.msra.mxu0 %v3112_v47  ;;  %v3152_v47 = vld [vmem:[#allocation2 + $0x170] sm:$0xff] }
 0x990   :  { %3570 = vmatpush1.bf16.msra.mxu1 %v3176_v48  ;;  %3530 = vmatprep.subr.bf16.mxu0 %v3117_v18  ;;  %v3216_v48 = vld [vmem:[#allocation2 + $0x370] sm:$0xff]  ;;  %v3157_v18 = vld [vmem:[#allocation2 + $0x198] sm:$0xff] }
 0x991   :  { %3571 = vmatprep.subr.bf16.mxu1 %v3181_v53  ;;  %v3221_v53 = vld [vmem:[#allocation2 + $0x398] sm:$0xff] }
 0x993   :  { %3531 = vmatpush1.bf16.msra.mxu0 %v3116_v58  ;;  %v3156_v58 = vld [vmem:[#allocation2 + $0x190] sm:$0xff] }
 0x994   :  { %3572 = vmatpush1.bf16.msra.mxu1 %v3180_v54  ;;  %3532 = vmatprep.subr.bf16.mxu0 %v3121_v1  ;;  %v3220_v54 = vld [vmem:[#allocation2 + $0x390] sm:$0xff]  ;;  %v3161_v1 = vld [vmem:[#allocation2 + $0x1b8] sm:$0xff] }
 0x995   :  { %3573 = vmatprep.subr.bf16.mxu1 %v3185_v56  ;;  %v3225_v56 = vld [vmem:[#allocation2 + $0x3b8] sm:$0xff] }
 0x997   :  { %3533 = vmatpush1.bf16.msra.mxu0 %v3120_v17  ;;  %v3160_v17 = vld [vmem:[#allocation2 + $0x1b0] sm:$0xff] }
 0x998   :  { %3574 = vmatpush1.bf16.msra.mxu1 %v3184_v57  ;;  %3534 = vmatprep.subr.bf16.mxu0 %v3125_v59  ;;  %v3224_v57 = vld [vmem:[#allocation2 + $0x3b0] sm:$0xff]  ;;  %v3165_v59 = vld [vmem:[#allocation2 + $0x1d8] sm:$0xff] }
 0x999   :  { %3575 = vmatprep.subr.bf16.mxu1 %v3189_v60  ;;  %v3229_v60 = vld [vmem:[#allocation2 + $0x3d8] sm:$0xff] }
 0x99b   :  { %3535 = vmatpush1.bf16.msra.mxu0 %v3124_v61  ;;  %v3164_v61 = vld [vmem:[#allocation2 + $0x1d0] sm:$0xff] }
 0x99c   :  { %3576 = vmatpush1.bf16.msra.mxu1 %v3188_v63  ;;  %3536 = vmatprep.subr.bf16.mxu0 %v3129_v0  ;;  %v3228_v63 = vld [vmem:[#allocation2 + $0x3d0] sm:$0xff]  ;;  %v3169_v0 = vld [vmem:[#allocation2 + $0x1f8] sm:$0xff] }
 0x99d   :  { %3577 = vmatprep.subr.bf16.mxu1 %v3193_v3  ;;  %v3233_v3 = vld [vmem:[#allocation2 + $0x3f8] sm:$0xff] }
 0x99f   :  { %3537 = vmatpush1.bf16.msra.mxu0 %v3128_v4  ;;  %v3168_v4 = vld [vmem:[#allocation2 + $0x1f0] sm:$0xff] }
 0x9a0   :  { %3578 = vmatpush1.bf16.msra.mxu1 %v3192_v14  ;;  %3538 = vmatprep.subr.bf16.mxu0 %v3133_v20  ;;  %v3232_v14 = vld [vmem:[#allocation2 + $0x3f0] sm:$0xff]  ;;  %v3237_v20 = vld [vmem:[#allocation2 + $0x418] sm:$0xff] }
 0x9a1   :  { %3579 = vmatprep.subr.bf16.mxu1 %v3197_v21  ;;  %v3301_v21 = vld [vmem:[#allocation2 + $0x618] sm:$0xff] }
 0x9a3   :  { %3539 = vmatpush1.bf16.msra.mxu0 %v3132_v27  ;;  %v3236_v27 = vld [vmem:[#allocation2 + $0x410] sm:$0xff] }
 0x9a4   :  { %3580 = vmatpush1.bf16.msra.mxu1 %v3196_v34  ;;  %3540 = vmatprep.subr.bf16.mxu0 %v3137_v35  ;;  %v3300_v34 = vld [vmem:[#allocation2 + $0x610] sm:$0xff]  ;;  %v3241_v35 = vld [vmem:[#allocation2 + $0x438] sm:$0xff] }
 0x9a5   :  { %3581 = vmatprep.subr.bf16.mxu1 %v3201_v32  ;;  %v3305_v32 = vld [vmem:[#allocation2 + $0x638] sm:$0xff] }
 0x9a7   :  { %3541 = vmatpush1.bf16.msra.mxu0 %v3136_v36  ;;  %v3240_v36 = vld [vmem:[#allocation2 + $0x430] sm:$0xff] }
 0x9a8   :  { %3582 = vmatpush1.bf16.msra.mxu1 %v3200_v52  ;;  %3542 = vmatprep.subr.bf16.mxu0 %v3141_v23  ;;  %v3304_v52 = vld [vmem:[#allocation2 + $0x630] sm:$0xff]  ;;  %v3245_v23 = vld [vmem:[#allocation2 + $0x458] sm:$0xff] }
 0x9a9   :  { %3583 = vmatprep.subr.bf16.mxu1 %v3205_v40  ;;  %v3309_v40 = vld [vmem:[#allocation2 + $0x658] sm:$0xff] }
 0x9ab   :  { %3543 = vmatpush1.bf16.msra.mxu0 %v3140_v41  ;;  %v3244_v41 = vld [vmem:[#allocation2 + $0x450] sm:$0xff] }
 0x9ac   :  { %3584 = vmatpush1.bf16.msra.mxu1 %v3204_v42  ;;  %3544 = vmatprep.subr.bf16.mxu0 %v3145_v43  ;;  %v3308_v42 = vld [vmem:[#allocation2 + $0x650] sm:$0xff]  ;;  %v3249_v43 = vld [vmem:[#allocation2 + $0x478] sm:$0xff] }
 0x9ad   :  { %3585 = vmatprep.subr.bf16.mxu1 %v3209_v49  ;;  %v3313_v49 = vld [vmem:[#allocation2 + $0x678] sm:$0xff] }
 0x9af   :  { %3545 = vmatpush1.bf16.msra.mxu0 %v3144_v51  ;;  %v3248_v51 = vld [vmem:[#allocation2 + $0x470] sm:$0xff] }
 0x9b0   :  { %3586 = vmatpush1.bf16.msra.mxu1 %v3208_v62  ;;  %3546 = vmatprep.subr.bf16.mxu0 %v3149_v22  ;;  %v3312_v62 = vld [vmem:[#allocation2 + $0x670] sm:$0xff]  ;;  %v3253_v22 = vld [vmem:[#allocation2 + $0x498] sm:$0xff] }
 0x9b1   :  { %3587 = vmatprep.subr.bf16.mxu1 %v3213_v33  ;;  %v3317_v33 = vld [vmem:[#allocation2 + $0x698] sm:$0xff] }
 0x9b3   :  { %3547 = vmatpush1.bf16.msra.mxu0 %v3148_v2  ;;  %v3252_v2 = vld [vmem:[#allocation2 + $0x490] sm:$0xff] }
 0x9b4   :  { %3588 = vmatpush1.bf16.msra.mxu1 %v3212_v44  ;;  %3548 = vmatprep.subr.bf16.mxu0 %v3153_v45  ;;  %v3316_v44 = vld [vmem:[#allocation2 + $0x690] sm:$0xff]  ;;  %v3257_v45 = vld [vmem:[#allocation2 + $0x4b8] sm:$0xff] }
 0x9b5   :  { %3589 = vmatprep.subr.bf16.mxu1 %v3217_v46  ;;  %v3321_v46 = vld [vmem:[#allocation2 + $0x6b8] sm:$0xff] }
 0x9b7   :  { %3549 = vmatpush1.bf16.msra.mxu0 %v3152_v47  ;;  %v3256_v47 = vld [vmem:[#allocation2 + $0x4b0] sm:$0xff] }
 0x9b8   :  { %3590 = vmatpush1.bf16.msra.mxu1 %v3216_v48  ;;  %3550 = vmatprep.subr.bf16.mxu0 %v3157_v18  ;;  %v3320_v48 = vld [vmem:[#allocation2 + $0x6b0] sm:$0xff]  ;;  %v3261_v18 = vld [vmem:[#allocation2 + $0x4d8] sm:$0xff] }
 0x9b9   :  { %3591 = vmatprep.subr.bf16.mxu1 %v3221_v53  ;;  %v3325_v53 = vld [vmem:[#allocation2 + $0x6d8] sm:$0xff] }
 0x9bb   :  { %3551 = vmatpush1.bf16.msra.mxu0 %v3156_v58  ;;  %v3260_v58 = vld [vmem:[#allocation2 + $0x4d0] sm:$0xff] }
 0x9bc   :  { %3592 = vmatpush1.bf16.msra.mxu1 %v3220_v54  ;;  %3552 = vmatprep.subr.bf16.mxu0 %v3161_v1  ;;  %v3324_v54 = vld [vmem:[#allocation2 + $0x6d0] sm:$0xff]  ;;  %v3265_v1 = vld [vmem:[#allocation2 + $0x4f8] sm:$0xff] }
 0x9bd   :  { %3593 = vmatprep.subr.bf16.mxu1 %v3225_v56  ;;  %v3329_v56 = vld [vmem:[#allocation2 + $0x6f8] sm:$0xff] }
 0x9bf   :  { %3553 = vmatpush1.bf16.msra.mxu0 %v3160_v17  ;;  %v3264_v17 = vld [vmem:[#allocation2 + $0x4f0] sm:$0xff] }
 0x9c0   :  { %3594 = vmatpush1.bf16.msra.mxu1 %v3224_v57  ;;  %3554 = vmatprep.subr.bf16.mxu0 %v3165_v59  ;;  %v3328_v57 = vld [vmem:[#allocation2 + $0x6f0] sm:$0xff]  ;;  %v3269_v59 = vld [vmem:[#allocation2 + $0x518] sm:$0xff] }
 0x9c1   :  { %3595 = vmatprep.subr.bf16.mxu1 %v3229_v60  ;;  %v3333_v60 = vld [vmem:[#allocation2 + $0x718] sm:$0xff] }
 0x9c3   :  { %3555 = vmatpush1.bf16.msra.mxu0 %v3164_v61  ;;  %v3268_v61 = vld [vmem:[#allocation2 + $0x510] sm:$0xff] }
 0x9c4   :  { %3596 = vmatpush1.bf16.msra.mxu1 %v3228_v63  ;;  %3556 = vmatprep.subr.bf16.mxu0 %v3169_v0  ;;  %v3332_v63 = vld [vmem:[#allocation2 + $0x710] sm:$0xff]  ;;  %v3273_v0 = vld [vmem:[#allocation2 + $0x538] sm:$0xff] }
 0x9c5   :  { %3597 = vmatprep.subr.bf16.mxu1 %v3233_v3  ;;  %v3337_v3 = vld [vmem:[#allocation2 + $0x738] sm:$0xff] }
 0x9c7   :  { %3557 = vmatpush1.bf16.msra.mxu0 %v3168_v4  ;;  %v3272_v4 = vld [vmem:[#allocation2 + $0x530] sm:$0xff] }
 0x9c8   :  { %3598 = vmatpush1.bf16.msra.mxu1 %v3232_v14  ;;  %3608 = vmatprep.subr.bf16.mxu0 %v3237_v20  ;;  %v3336_v14 = vld [vmem:[#allocation2 + $0x730] sm:$0xff]  ;;  %v3277_v20 = vld [vmem:[#allocation2 + $0x558] sm:$0xff] }
 0x9c9   :  { %3649 = vmatprep.subr.bf16.mxu1 %v3301_v21  ;;  %v3341_v21 = vld [vmem:[#allocation2 + $0x758] sm:$0xff] }
 0x9ca   :  { %3559 = vmatmul.mubr.bf16.vlgmr.msra.gmra.mrb[72].mxu0 %v8933_v24 }
 0x9cb   :  { %3600 = vmatmul.mubr.bf16.vlgmr.msra.gmra.mrb[72].mxu1 %v8937_v30  ;;  %3609 = vmatpush1.bf16.msra.mxu0 %v3236_v27  ;;  %v3276_v27 = vld [vmem:[#allocation2 + $0x550] sm:$0xff] }
 0x9cc   :  { %3650 = vmatpush1.bf16.msra.mxu1 %v3300_v34  ;;  %3610 = vmatprep.subr.bf16.mxu0 %v3241_v35  ;;  %v3340_v34 = vld [vmem:[#allocation2 + $0x750] sm:$0xff]  ;;  %v3281_v35 = vld [vmem:[#allocation2 + $0x578] sm:$0xff] }
 0x9cd   :  { %3651 = vmatprep.subr.bf16.mxu1 %v3305_v32  ;;  %3640 = vmatprep.mubr.bf16.mxu0 %v8949_v16  ;;  %v3345_v32 = vld [vmem:[#allocation2 + $0x778] sm:$0xff] }
 0x9ce   :  { %3681 = vmatprep.mubr.bf16.mxu1 %v8957_v19 }
 0x9cf   :  { %3611 = vmatpush1.bf16.msra.mxu0 %v3240_v36  ;;  %v3280_v36 = vld [vmem:[#allocation2 + $0x570] sm:$0xff] }
 0x9d0   :  { %3652 = vmatpush1.bf16.msra.mxu1 %v3304_v52  ;;  %3612 = vmatprep.subr.bf16.mxu0 %v3245_v23  ;;  %v3344_v52 = vld [vmem:[#allocation2 + $0x770] sm:$0xff]  ;;  %v3285_v23 = vld [vmem:[#allocation2 + $0x598] sm:$0xff] }
 0x9d1   :  { %3653 = vmatprep.subr.bf16.mxu1 %v3309_v40  ;;  %v3349_v40 = vld [vmem:[#allocation2 + $0x798] sm:$0xff] }
 0x9d3   :  { %3613 = vmatpush1.bf16.msra.mxu0 %v3244_v41  ;;  %v3284_v41 = vld [vmem:[#allocation2 + $0x590] sm:$0xff] }
 0x9d4   :  { %3654 = vmatpush1.bf16.msra.mxu1 %v3308_v42  ;;  %3614 = vmatprep.subr.bf16.mxu0 %v3249_v43  ;;  %v3348_v42 = vld [vmem:[#allocation2 + $0x790] sm:$0xff]  ;;  %v3289_v43 = vld [vmem:[#allocation2 + $0x5b8] sm:$0xff] }
 0x9d5   :  { %3655 = vmatprep.subr.bf16.mxu1 %v3313_v49  ;;  %v3353_v49 = vld [vmem:[#allocation2 + $0x7b8] sm:$0xff] }
 0x9d7   :  { %3615 = vmatpush1.bf16.msra.mxu0 %v3248_v51  ;;  %v3288_v51 = vld [vmem:[#allocation2 + $0x5b0] sm:$0xff] }
 0x9d8   :  { %3656 = vmatpush1.bf16.msra.mxu1 %v3312_v62  ;;  %3616 = vmatprep.subr.bf16.mxu0 %v3253_v22  ;;  %v3352_v62 = vld [vmem:[#allocation2 + $0x7b0] sm:$0xff]  ;;  %v3293_v22 = vld [vmem:[#allocation2 + $0x5d8] sm:$0xff] }
 0x9d9   :  { %3657 = vmatprep.subr.bf16.mxu1 %v3317_v33  ;;  %v3357_v33 = vld [vmem:[#allocation2 + $0x7d8] sm:$0xff] }
 0x9db   :  { %3617 = vmatpush1.bf16.msra.mxu0 %v3252_v2  ;;  %v3292_v2 = vld [vmem:[#allocation2 + $0x5d0] sm:$0xff] }
 0x9dc   :  { %3658 = vmatpush1.bf16.msra.mxu1 %v3316_v44  ;;  %3618 = vmatprep.subr.bf16.mxu0 %v3257_v45  ;;  %v3356_v44 = vld [vmem:[#allocation2 + $0x7d0] sm:$0xff]  ;;  %v3297_v45 = vld [vmem:[#allocation2 + $0x5f8] sm:$0xff] }
 0x9dd   :  { %3659 = vmatprep.subr.bf16.mxu1 %v3321_v46  ;;  %v3361_v46 = vld [vmem:[#allocation2 + $0x7f8] sm:$0xff] }
 0x9df   :  { %3619 = vmatpush1.bf16.msra.mxu0 %v3256_v47  ;;  %v3296_v47 = vld [vmem:[#allocation2 + $0x5f0] sm:$0xff] }
 0x9e0   :  { %3660 = vmatpush1.bf16.msra.mxu1 %v3320_v48  ;;  %3620 = vmatprep.subr.bf16.mxu0 %v3261_v18  ;;  %v3360_v48 = vld [vmem:[#allocation2 + $0x7f0] sm:$0xff] }
 0x9e1   :  { %3661 = vmatprep.subr.bf16.mxu1 %v3325_v53 }
 0x9e3   :  { %3621 = vmatpush1.bf16.msra.mxu0 %v3260_v58 }
 0x9e4   :  { %3662 = vmatpush1.bf16.msra.mxu1 %v3324_v54  ;;  %3622 = vmatprep.subr.bf16.mxu0 %v3265_v1 }
 0x9e5   :  { %3663 = vmatprep.subr.bf16.mxu1 %v3329_v56 }
 0x9e7   :  { %3623 = vmatpush1.bf16.msra.mxu0 %v3264_v17 }
 0x9e8   :  { %3664 = vmatpush1.bf16.msra.mxu1 %v3328_v57  ;;  %3624 = vmatprep.subr.bf16.mxu0 %v3269_v59 }
 0x9e9   :  { %3665 = vmatprep.subr.bf16.mxu1 %v3333_v60 }
 0x9eb   :  { %3625 = vmatpush1.bf16.msra.mxu0 %v3268_v61 }
 0x9ec   :  { %3666 = vmatpush1.bf16.msra.mxu1 %v3332_v63  ;;  %3626 = vmatprep.subr.bf16.mxu0 %v3273_v0 }
 0x9ed   :  { %3667 = vmatprep.subr.bf16.mxu1 %v3337_v3 }
 0x9ef   :  { %3627 = vmatpush1.bf16.msra.mxu0 %v3272_v4 }
 0x9f0   :  { %3668 = vmatpush1.bf16.msra.mxu1 %v3336_v14  ;;  %3628 = vmatprep.subr.bf16.mxu0 %v3277_v20 }
 0x9f1   :  { %3669 = vmatprep.subr.bf16.mxu1 %v3341_v21 }
 0x9f3   :  { %3629 = vmatpush1.bf16.msra.mxu0 %v3276_v27 }
 0x9f4   :  { %3670 = vmatpush1.bf16.msra.mxu1 %v3340_v34  ;;  %3630 = vmatprep.subr.bf16.mxu0 %v3281_v35 }
 0x9f5   :  { %3671 = vmatprep.subr.bf16.mxu1 %v3345_v32 }
 0x9f7   :  { %3631 = vmatpush1.bf16.msra.mxu0 %v3280_v36 }
 0x9f8   :  { %3672 = vmatpush1.bf16.msra.mxu1 %v3344_v52  ;;  %3632 = vmatprep.subr.bf16.mxu0 %v3285_v23 }
 0x9f9   :  { %3673 = vmatprep.subr.bf16.mxu1 %v3349_v40 }
 0x9fb   :  { %3633 = vmatpush1.bf16.msra.mxu0 %v3284_v41 }
 0x9fc   :  { %3674 = vmatpush1.bf16.msra.mxu1 %v3348_v42  ;;  %3634 = vmatprep.subr.bf16.mxu0 %v3289_v43 }
 0x9fd   :  { %3675 = vmatprep.subr.bf16.mxu1 %v3353_v49 }
 0x9ff   :  { %3635 = vmatpush1.bf16.msra.mxu0 %v3288_v51 }
 0xa00   :  { %3676 = vmatpush1.bf16.msra.mxu1 %v3352_v62  ;;  %3636 = vmatprep.subr.bf16.mxu0 %v3293_v22 }
 0xa01   :  { %3677 = vmatprep.subr.bf16.mxu1 %v3357_v33 }
 0xa03   :  { %3637 = vmatpush1.bf16.msra.mxu0 %v3292_v2 }
 0xa04   :  { %3678 = vmatpush1.bf16.msra.mxu1 %v3356_v44  ;;  %3638 = vmatprep.subr.bf16.mxu0 %v3297_v45 }
 0xa05   :  { %3679 = vmatprep.subr.bf16.mxu1 %v3361_v46 }
 0xa07   :  { %3639 = vmatpush1.bf16.msra.mxu0 %v3296_v47 }
 0xa08   :  { %3680 = vmatpush1.bf16.msra.mxu1 %v3360_v48 }
 0xa0a   :  { %3641 = vmatmul.mubr.bf16.vlgmr.msra.gmra.mrb[76].mxu0 %v8947_v25 }
 0xa0b   :  { %3682 = vmatmul.mubr.bf16.vlgmr.msra.gmra.mrb[76].mxu1 %v8955_v15 }
 0xa1d   :  { %v3396_v18 = vpop.f32.mrb[64].mxu0 }
 0xa1e   :  { %v3437_v53 = vpop.f32.mrb[64].mxu1  ;;  %v3398_v54 = vpop.f32.mrb[65].mxu0 }
 0xa1f   :  { %v3438_v58 = vadd.f32 %v3437_v53, %v3396_v18  ;;  %v3439_v1 = vpop.f32.mrb[65].mxu1  ;;  %v3400_v17 = vpop.f32.mrb[66].mxu0 }
 0xa20   :  { %v3440_v56 = vadd.f32 %v3439_v1, %v3398_v54  ;;  %v3441_v57 = vpop.f32.mrb[66].mxu1  ;;  %v3401_v59 = vpop.f32.mrb[67].mxu0 }
 0xa21   :  { %v3442_v60 = vpop.f32.mrb[67].mxu1 }
 0xa5d   :  { %v3478_v61 = vpop.f32.mrb[68].mxu0 }
 0xa5e   :  { %v3519_v63 = vpop.f32.mrb[68].mxu1  ;;  %v3479_v0 = vadd.f32 %v3478_v61, %v3438_v58  ;;  %v3480_v3 = vpop.f32.mrb[69].mxu0 }
 0xa5f   :  { %v3521_v4 = vpop.f32.mrb[69].mxu1  ;;  %v3481_v14 = vadd.f32 %v3480_v3, %v3440_v56  ;;  %v3482_v20 = vpop.f32.mrb[70].mxu0 }
 0xa60   :  { %v3523_v21 = vpop.f32.mrb[70].mxu1  ;;  %v9098_v27 = vadd.f32 %v3519_v63, %v3479_v0  ;;  %v3483_v34 = vpop.f32.mrb[71].mxu0 }
 0xa61   :  { %v3524_v35 = vpop.f32.mrb[71].mxu1  ;;  %v9100_v32 = vadd.f32 %v3521_v4, %v3481_v14 }
 0xa9d   :  { %v3560_v36 = vpop.f32.mrb[72].mxu0 }
 0xa9e   :  { %v3601_v52 = vpop.f32.mrb[72].mxu1  ;;  %v3562_v40 = vpop.f32.mrb[73].mxu0 }
 0xa9f   :  { %v3602_v23 = vadd.f32 %v3601_v52, %v3560_v36  ;;  %v3603_v41 = vpop.f32.mrb[73].mxu1  ;;  %v3564_v43 = vpop.f32.mrb[74].mxu0 }
 0xaa0   :  { %v3604_v42 = vadd.f32 %v3603_v41, %v3562_v40  ;;  %v3605_v49 = vpop.f32.mrb[74].mxu1  ;;  %v3565_v51 = vpop.f32.mrb[75].mxu0 }
 0xaa1   :  { %v3606_v62 = vpop.f32.mrb[75].mxu1 }
 0xadd   :  { %v3642_v22 = vpop.f32.mrb[76].mxu0 }
 0xade   :  { %v3683_v33 = vpop.f32.mrb[76].mxu1  ;;  %v3643_v2 = vadd.f32 %v3642_v22, %v3602_v23  ;;  %v3644_v44 = vpop.f32.mrb[77].mxu0 }
 0xadf   :  { %v3685_v45 = vpop.f32.mrb[77].mxu1  ;;  %v3645_v46 = vadd.f32 %v3644_v44, %v3604_v42  ;;  %v3646_v47 = vpop.f32.mrb[78].mxu0 }
 0xae0   :  { %v3687_v48 = vpop.f32.mrb[78].mxu1  ;;  %v9102_v18 = vadd.f32 %v3683_v33, %v3643_v2  ;;  %v3647_v53 = vpop.f32.mrb[79].mxu0 }
 0xae1   :  { %v3688_v58 = vpop.f32.mrb[79].mxu1  ;;  %v9104_v54 = vadd.f32 %v3685_v45, %v3645_v46 }
 0xae2   :  { %8497 = dma.done.wait [#allocation3 + $0x1], 32768 }
 0xae3   :  { %8498 = vsyncadd [#allocation3 + $0x1], 4294934528  ;;  %4015 = vmatprep.mubr.bf16.mxu0 %v8935_v28  ;;  %4056 = vmatprep.mubr.bf16.mxu1 %v8939_v31  ;;  %3708 = sst [smem:[#allocation35]] %s8520_s25  ;;  %s3692_s27 = scalar_lea.hbm %s9639_s2, 196608 }
 0xae4   :  { %3710 = sst [smem:[#allocation35 + $0x1]] %s8520_s25  ;;  %s8538_s28 = smov [#allocation34]  }
 0xae5   :  { %3712 = sst [smem:[#allocation35 + $0x2]] %s8522_s26 }
 0xae6   :  { %3714 = sst [smem:[#allocation35 + $0x3]] %s8523_s11 }
 0xae7   :  { %3716 = sst [smem:[#allocation35 + $0x4]] %s8524_s7 }
 0xae8   :  { %3718 = sst [smem:[#allocation35 + $0x5]] %s8525_s22 }
 0xae9   :  { %3720 = sst [smem:[#allocation35 + $0x6]] %s8526_s29 }
 0xaea   :  { %3722 = sst [smem:[#allocation35 + $0x7]] %s8523_s11 }
 0xaeb   :  { %3724 = sst [smem:[#allocation35 + $0x8]] %s8522_s26 }
 0xaec   :  { %3726 = dma.general %s3692_s27, 32768, %s8738_s6, %s8528_s17, %s8538_s28, [#allocation35], %s8734_s1, 0  }
 0xaed   :  { %4361 = vst [vmem:[#allocation19] sm:$0xff] %v9038_v26  ;;  %4362 = vst [vmem:[#allocation19 + $0x8] sm:$0xff] %v9041_v29  ;;  %v3728_v1 = vld [vmem:[#allocation2 + $0x808] sm:$0xff]  ;;  %v3727_v17 = vld [vmem:[#allocation2 + $0x800] sm:$0xff] }
 0xaee   :  { %4363 = vst [vmem:[#allocation19 + $0x10] sm:$0xff] %v9044_v38  ;;  %4364 = vst [vmem:[#allocation19 + $0x18] sm:$0xff] %v9047_v39  ;;  %v3792_v56 = vld [vmem:[#allocation2 + $0xa08] sm:$0xff]  ;;  %3983 = vmatprep.subr.bf16.mxu0 %v3728_v1  ;;  %v3791_v26 = vld [vmem:[#allocation2 + $0xa00] sm:$0xff] }
 0xaef   :  { %4365 = vst [vmem:[#allocation19 + $0x20] sm:$0xff] %v9055_v50  ;;  %4366 = vst [vmem:[#allocation19 + $0x28] sm:$0xff] %v9057_v6  ;;  %4024 = vmatprep.subr.bf16.mxu1 %v3792_v56  ;;  %v3732_v57 = vld [vmem:[#allocation2 + $0x828] sm:$0xff]  ;;  %3984 = vmatpush1.bf16.msra.mxu0 %v3727_v17  ;;  %v3731_v38 = vld [vmem:[#allocation2 + $0x820] sm:$0xff] }
 0xaf0   :  { %4367 = vst [vmem:[#allocation19 + $0x30] sm:$0xff] %v9063_v37  ;;  %4368 = vst [vmem:[#allocation19 + $0x38] sm:$0xff] %v9065_v55  ;;  %v3796_v29 = vld [vmem:[#allocation2 + $0xa28] sm:$0xff]  ;;  %4025 = vmatpush1.bf16.msra.mxu1 %v3791_v26  ;;  %3985 = vmatprep.subr.bf16.mxu0 %v3732_v57  ;;  %v3795_v39 = vld [vmem:[#allocation2 + $0xa20] sm:$0xff] }
 0xaf1   :  { %4026 = vmatprep.subr.bf16.mxu1 %v3796_v29  ;;  %v3736_v50 = vld [vmem:[#allocation2 + $0x848] sm:$0xff]  ;;  %v3735_v37 = vld [vmem:[#allocation2 + $0x840] sm:$0xff] }
 0xaf2   :  { %v3800_v6 = vld [vmem:[#allocation2 + $0xa48] sm:$0xff]  ;;  %v3799_v55 = vld [vmem:[#allocation2 + $0xa40] sm:$0xff] }
 0xaf3   :  { %3986 = vmatpush1.bf16.msra.mxu0 %v3731_v38  ;;  %v3740_v59 = vld [vmem:[#allocation2 + $0x868] sm:$0xff]  ;;  %v3739_v61 = vld [vmem:[#allocation2 + $0x860] sm:$0xff] }
 0xaf4   :  { %4027 = vmatpush1.bf16.msra.mxu1 %v3795_v39  ;;  %3987 = vmatprep.subr.bf16.mxu0 %v3736_v50  ;;  %v3804_v60 = vld [vmem:[#allocation2 + $0xa68] sm:$0xff]  ;;  %v3803_v63 = vld [vmem:[#allocation2 + $0xa60] sm:$0xff] }
 0xaf5   :  { %4028 = vmatprep.subr.bf16.mxu1 %v3800_v6  ;;  %v3744_v0 = vld [vmem:[#allocation2 + $0x888] sm:$0xff]  ;;  %v3743_v4 = vld [vmem:[#allocation2 + $0x880] sm:$0xff] }
 0xaf6   :  { %v3808_v3 = vld [vmem:[#allocation2 + $0xa88] sm:$0xff]  ;;  %v3807_v14 = vld [vmem:[#allocation2 + $0xa80] sm:$0xff] }
 0xaf7   :  { %3988 = vmatpush1.bf16.msra.mxu0 %v3735_v37  ;;  %v3748_v20 = vld [vmem:[#allocation2 + $0x8a8] sm:$0xff]  ;;  %v3747_v34 = vld [vmem:[#allocation2 + $0x8a0] sm:$0xff] }
 0xaf8   :  { %4029 = vmatpush1.bf16.msra.mxu1 %v3799_v55  ;;  %3989 = vmatprep.subr.bf16.mxu0 %v3740_v59  ;;  %v3812_v21 = vld [vmem:[#allocation2 + $0xaa8] sm:$0xff]  ;;  %v3811_v35 = vld [vmem:[#allocation2 + $0xaa0] sm:$0xff] }
 0xaf9   :  { %4030 = vmatprep.subr.bf16.mxu1 %v3804_v60  ;;  %v3752_v36 = vld [vmem:[#allocation2 + $0x8c8] sm:$0xff]  ;;  %v3751_v23 = vld [vmem:[#allocation2 + $0x8c0] sm:$0xff] }
 0xafa   :  { %v3816_v52 = vld [vmem:[#allocation2 + $0xac8] sm:$0xff]  ;;  %v3815_v40 = vld [vmem:[#allocation2 + $0xac0] sm:$0xff] }
 0xafb   :  { %3990 = vmatpush1.bf16.msra.mxu0 %v3739_v61  ;;  %v3756_v41 = vld [vmem:[#allocation2 + $0x8e8] sm:$0xff]  ;;  %v3755_v43 = vld [vmem:[#allocation2 + $0x8e0] sm:$0xff] }
 0xafc   :  { %4031 = vmatpush1.bf16.msra.mxu1 %v3803_v63  ;;  %3991 = vmatprep.subr.bf16.mxu0 %v3744_v0  ;;  %v3820_v42 = vld [vmem:[#allocation2 + $0xae8] sm:$0xff]  ;;  %v3819_v49 = vld [vmem:[#allocation2 + $0xae0] sm:$0xff] }
 0xafd   :  { %4032 = vmatprep.subr.bf16.mxu1 %v3808_v3  ;;  %v3760_v51 = vld [vmem:[#allocation2 + $0x908] sm:$0xff]  ;;  %v3759_v22 = vld [vmem:[#allocation2 + $0x900] sm:$0xff] }
 0xafe   :  { %v3824_v62 = vld [vmem:[#allocation2 + $0xb08] sm:$0xff]  ;;  %v3823_v33 = vld [vmem:[#allocation2 + $0xb00] sm:$0xff] }
 0xaff   :  { %3992 = vmatpush1.bf16.msra.mxu0 %v3743_v4  ;;  %v3764_v2 = vld [vmem:[#allocation2 + $0x928] sm:$0xff]  ;;  %v3763_v45 = vld [vmem:[#allocation2 + $0x920] sm:$0xff] }
 0xb00   :  { %4033 = vmatpush1.bf16.msra.mxu1 %v3807_v14  ;;  %3993 = vmatprep.subr.bf16.mxu0 %v3748_v20  ;;  %v3828_v44 = vld [vmem:[#allocation2 + $0xb28] sm:$0xff]  ;;  %v3827_v46 = vld [vmem:[#allocation2 + $0xb20] sm:$0xff] }
 0xb01   :  { %4034 = vmatprep.subr.bf16.mxu1 %v3812_v21  ;;  %v3768_v47 = vld [vmem:[#allocation2 + $0x948] sm:$0xff]  ;;  %v3767_v53 = vld [vmem:[#allocation2 + $0x940] sm:$0xff] }
 0xb02   :  { %v3832_v48 = vld [vmem:[#allocation2 + $0xb48] sm:$0xff]  ;;  %v3831_v58 = vld [vmem:[#allocation2 + $0xb40] sm:$0xff] }
 0xb03   :  { %3994 = vmatpush1.bf16.msra.mxu0 %v3747_v34  ;;  %v3772_v1 = vld [vmem:[#allocation2 + $0x968] sm:$0xff]  ;;  %v3771_v17 = vld [vmem:[#allocation2 + $0x960] sm:$0xff] }
 0xb04   :  { %4035 = vmatpush1.bf16.msra.mxu1 %v3811_v35  ;;  %3995 = vmatprep.subr.bf16.mxu0 %v3752_v36  ;;  %v3836_v56 = vld [vmem:[#allocation2 + $0xb68] sm:$0xff]  ;;  %v3835_v26 = vld [vmem:[#allocation2 + $0xb60] sm:$0xff] }
 0xb05   :  { %4036 = vmatprep.subr.bf16.mxu1 %v3816_v52  ;;  %v3776_v57 = vld [vmem:[#allocation2 + $0x988] sm:$0xff]  ;;  %v3775_v38 = vld [vmem:[#allocation2 + $0x980] sm:$0xff] }
 0xb06   :  { %v3840_v29 = vld [vmem:[#allocation2 + $0xb88] sm:$0xff]  ;;  %v3839_v39 = vld [vmem:[#allocation2 + $0xb80] sm:$0xff] }
 0xb07   :  { %3996 = vmatpush1.bf16.msra.mxu0 %v3751_v23  ;;  %v3780_v50 = vld [vmem:[#allocation2 + $0x9a8] sm:$0xff]  ;;  %v3779_v37 = vld [vmem:[#allocation2 + $0x9a0] sm:$0xff] }
 0xb08   :  { %4037 = vmatpush1.bf16.msra.mxu1 %v3815_v40  ;;  %3997 = vmatprep.subr.bf16.mxu0 %v3756_v41  ;;  %v3844_v6 = vld [vmem:[#allocation2 + $0xba8] sm:$0xff]  ;;  %v3843_v55 = vld [vmem:[#allocation2 + $0xba0] sm:$0xff] }
 0xb09   :  { %4038 = vmatprep.subr.bf16.mxu1 %v3820_v42  ;;  %v3784_v59 = vld [vmem:[#allocation2 + $0x9c8] sm:$0xff]  ;;  %v3783_v61 = vld [vmem:[#allocation2 + $0x9c0] sm:$0xff] }
 0xb0a   :  { %v3848_v60 = vld [vmem:[#allocation2 + $0xbc8] sm:$0xff]  ;;  %v3847_v63 = vld [vmem:[#allocation2 + $0xbc0] sm:$0xff] }
 0xb0b   :  { %3998 = vmatpush1.bf16.msra.mxu0 %v3755_v43  ;;  %v3788_v0 = vld [vmem:[#allocation2 + $0x9e8] sm:$0xff]  ;;  %v3787_v4 = vld [vmem:[#allocation2 + $0x9e0] sm:$0xff] }
 0xb0c   :  { %4039 = vmatpush1.bf16.msra.mxu1 %v3819_v49  ;;  %3999 = vmatprep.subr.bf16.mxu0 %v3760_v51  ;;  %v3852_v3 = vld [vmem:[#allocation2 + $0xbe8] sm:$0xff]  ;;  %v3851_v14 = vld [vmem:[#allocation2 + $0xbe0] sm:$0xff] }
 0xb0d   :  { %4040 = vmatprep.subr.bf16.mxu1 %v3824_v62  ;;  %v3856_v20 = vld [vmem:[#allocation2 + $0xc08] sm:$0xff]  ;;  %v3855_v34 = vld [vmem:[#allocation2 + $0xc00] sm:$0xff] }
 0xb0e   :  { %v3920_v21 = vld [vmem:[#allocation2 + $0xe08] sm:$0xff]  ;;  %v3919_v35 = vld [vmem:[#allocation2 + $0xe00] sm:$0xff] }
 0xb0f   :  { %4000 = vmatpush1.bf16.msra.mxu0 %v3759_v22  ;;  %v3860_v36 = vld [vmem:[#allocation2 + $0xc28] sm:$0xff]  ;;  %v3859_v23 = vld [vmem:[#allocation2 + $0xc20] sm:$0xff] }
 0xb10   :  { %4041 = vmatpush1.bf16.msra.mxu1 %v3823_v33  ;;  %4001 = vmatprep.subr.bf16.mxu0 %v3764_v2  ;;  %v3924_v52 = vld [vmem:[#allocation2 + $0xe28] sm:$0xff]  ;;  %v3923_v40 = vld [vmem:[#allocation2 + $0xe20] sm:$0xff] }
 0xb11   :  { %4042 = vmatprep.subr.bf16.mxu1 %v3828_v44  ;;  %v3864_v41 = vld [vmem:[#allocation2 + $0xc48] sm:$0xff]  ;;  %v3863_v43 = vld [vmem:[#allocation2 + $0xc40] sm:$0xff] }
 0xb12   :  { %v3928_v42 = vld [vmem:[#allocation2 + $0xe48] sm:$0xff]  ;;  %v3927_v49 = vld [vmem:[#allocation2 + $0xe40] sm:$0xff] }
 0xb13   :  { %4002 = vmatpush1.bf16.msra.mxu0 %v3763_v45  ;;  %v3868_v51 = vld [vmem:[#allocation2 + $0xc68] sm:$0xff]  ;;  %v3867_v22 = vld [vmem:[#allocation2 + $0xc60] sm:$0xff] }
 0xb14   :  { %4043 = vmatpush1.bf16.msra.mxu1 %v3827_v46  ;;  %4003 = vmatprep.subr.bf16.mxu0 %v3768_v47  ;;  %v3932_v62 = vld [vmem:[#allocation2 + $0xe68] sm:$0xff]  ;;  %v3931_v33 = vld [vmem:[#allocation2 + $0xe60] sm:$0xff] }
 0xb15   :  { %4044 = vmatprep.subr.bf16.mxu1 %v3832_v48  ;;  %v3872_v2 = vld [vmem:[#allocation2 + $0xc88] sm:$0xff]  ;;  %v3871_v45 = vld [vmem:[#allocation2 + $0xc80] sm:$0xff] }
 0xb16   :  { %v3936_v44 = vld [vmem:[#allocation2 + $0xe88] sm:$0xff]  ;;  %v3935_v46 = vld [vmem:[#allocation2 + $0xe80] sm:$0xff] }
 0xb17   :  { %4004 = vmatpush1.bf16.msra.mxu0 %v3767_v53  ;;  %v3876_v47 = vld [vmem:[#allocation2 + $0xca8] sm:$0xff]  ;;  %v3875_v53 = vld [vmem:[#allocation2 + $0xca0] sm:$0xff] }
 0xb18   :  { %4045 = vmatpush1.bf16.msra.mxu1 %v3831_v58  ;;  %4005 = vmatprep.subr.bf16.mxu0 %v3772_v1  ;;  %v3940_v48 = vld [vmem:[#allocation2 + $0xea8] sm:$0xff]  ;;  %v3939_v58 = vld [vmem:[#allocation2 + $0xea0] sm:$0xff] }
 0xb19   :  { %4046 = vmatprep.subr.bf16.mxu1 %v3836_v56  ;;  %v3880_v1 = vld [vmem:[#allocation2 + $0xcc8] sm:$0xff] }
 0xb1a   :  { %v3944_v56 = vld [vmem:[#allocation2 + $0xec8] sm:$0xff] }
 0xb1b   :  { %4006 = vmatpush1.bf16.msra.mxu0 %v3771_v17  ;;  %v3879_v17 = vld [vmem:[#allocation2 + $0xcc0] sm:$0xff] }
 0xb1c   :  { %4047 = vmatpush1.bf16.msra.mxu1 %v3835_v26  ;;  %4007 = vmatprep.subr.bf16.mxu0 %v3776_v57  ;;  %v3943_v26 = vld [vmem:[#allocation2 + $0xec0] sm:$0xff]  ;;  %v3884_v57 = vld [vmem:[#allocation2 + $0xce8] sm:$0xff] }
 0xb1d   :  { %4048 = vmatprep.subr.bf16.mxu1 %v3840_v29  ;;  %v3948_v29 = vld [vmem:[#allocation2 + $0xee8] sm:$0xff] }
 0xb1f   :  { %4008 = vmatpush1.bf16.msra.mxu0 %v3775_v38  ;;  %v3883_v38 = vld [vmem:[#allocation2 + $0xce0] sm:$0xff] }
 0xb20   :  { %4049 = vmatpush1.bf16.msra.mxu1 %v3839_v39  ;;  %4009 = vmatprep.subr.bf16.mxu0 %v3780_v50  ;;  %v3947_v39 = vld [vmem:[#allocation2 + $0xee0] sm:$0xff]  ;;  %v3888_v50 = vld [vmem:[#allocation2 + $0xd08] sm:$0xff] }
 0xb21   :  { %4050 = vmatprep.subr.bf16.mxu1 %v3844_v6  ;;  %v3952_v6 = vld [vmem:[#allocation2 + $0xf08] sm:$0xff] }
 0xb23   :  { %4010 = vmatpush1.bf16.msra.mxu0 %v3779_v37  ;;  %v3887_v37 = vld [vmem:[#allocation2 + $0xd00] sm:$0xff] }
 0xb24   :  { %4051 = vmatpush1.bf16.msra.mxu1 %v3843_v55  ;;  %4011 = vmatprep.subr.bf16.mxu0 %v3784_v59  ;;  %v3951_v55 = vld [vmem:[#allocation2 + $0xf00] sm:$0xff]  ;;  %v3892_v59 = vld [vmem:[#allocation2 + $0xd28] sm:$0xff] }
 0xb25   :  { %4052 = vmatprep.subr.bf16.mxu1 %v3848_v60  ;;  %v3956_v60 = vld [vmem:[#allocation2 + $0xf28] sm:$0xff] }
 0xb27   :  { %4012 = vmatpush1.bf16.msra.mxu0 %v3783_v61  ;;  %v3891_v61 = vld [vmem:[#allocation2 + $0xd20] sm:$0xff] }
 0xb28   :  { %4053 = vmatpush1.bf16.msra.mxu1 %v3847_v63  ;;  %4013 = vmatprep.subr.bf16.mxu0 %v3788_v0  ;;  %v3955_v63 = vld [vmem:[#allocation2 + $0xf20] sm:$0xff]  ;;  %v3896_v0 = vld [vmem:[#allocation2 + $0xd48] sm:$0xff] }
 0xb29   :  { %4054 = vmatprep.subr.bf16.mxu1 %v3852_v3  ;;  %v3960_v3 = vld [vmem:[#allocation2 + $0xf48] sm:$0xff] }
 0xb2b   :  { %4014 = vmatpush1.bf16.msra.mxu0 %v3787_v4  ;;  %v3895_v4 = vld [vmem:[#allocation2 + $0xd40] sm:$0xff] }
 0xb2c   :  { %4055 = vmatpush1.bf16.msra.mxu1 %v3851_v14  ;;  %4065 = vmatprep.subr.bf16.mxu0 %v3856_v20  ;;  %v3959_v14 = vld [vmem:[#allocation2 + $0xf40] sm:$0xff]  ;;  %v3900_v20 = vld [vmem:[#allocation2 + $0xd68] sm:$0xff] }
 0xb2d   :  { %4106 = vmatprep.subr.bf16.mxu1 %v3920_v21  ;;  %v3964_v21 = vld [vmem:[#allocation2 + $0xf68] sm:$0xff] }
 0xb2e   :  { %4016 = vmatmul.mubr.bf16.vlgmr.msra.gmra.mrb[80].mxu0 %v8933_v24 }
 0xb2f   :  { %4057 = vmatmul.mubr.bf16.vlgmr.msra.gmra.mrb[80].mxu1 %v8937_v30  ;;  %4066 = vmatpush1.bf16.msra.mxu0 %v3855_v34  ;;  %v3899_v34 = vld [vmem:[#allocation2 + $0xd60] sm:$0xff] }
 0xb30   :  { %4107 = vmatpush1.bf16.msra.mxu1 %v3919_v35  ;;  %4067 = vmatprep.subr.bf16.mxu0 %v3860_v36  ;;  %v3963_v35 = vld [vmem:[#allocation2 + $0xf60] sm:$0xff]  ;;  %v3904_v36 = vld [vmem:[#allocation2 + $0xd88] sm:$0xff] }
 0xb31   :  { %4108 = vmatprep.subr.bf16.mxu1 %v3924_v52  ;;  %4097 = vmatprep.mubr.bf16.mxu0 %v8949_v16  ;;  %v3968_v52 = vld [vmem:[#allocation2 + $0xf88] sm:$0xff] }
 0xb32   :  { %4138 = vmatprep.mubr.bf16.mxu1 %v8957_v19 }
 0xb33   :  { %4068 = vmatpush1.bf16.msra.mxu0 %v3859_v23  ;;  %v3903_v23 = vld [vmem:[#allocation2 + $0xd80] sm:$0xff] }
 0xb34   :  { %4109 = vmatpush1.bf16.msra.mxu1 %v3923_v40  ;;  %4069 = vmatprep.subr.bf16.mxu0 %v3864_v41  ;;  %v3967_v40 = vld [vmem:[#allocation2 + $0xf80] sm:$0xff]  ;;  %v3908_v41 = vld [vmem:[#allocation2 + $0xda8] sm:$0xff] }
 0xb35   :  { %4110 = vmatprep.subr.bf16.mxu1 %v3928_v42  ;;  %v3972_v42 = vld [vmem:[#allocation2 + $0xfa8] sm:$0xff] }
 0xb37   :  { %4070 = vmatpush1.bf16.msra.mxu0 %v3863_v43  ;;  %v3907_v43 = vld [vmem:[#allocation2 + $0xda0] sm:$0xff] }
 0xb38   :  { %4111 = vmatpush1.bf16.msra.mxu1 %v3927_v49  ;;  %4071 = vmatprep.subr.bf16.mxu0 %v3868_v51  ;;  %v3971_v49 = vld [vmem:[#allocation2 + $0xfa0] sm:$0xff]  ;;  %v3912_v51 = vld [vmem:[#allocation2 + $0xdc8] sm:$0xff] }
 0xb39   :  { %4112 = vmatprep.subr.bf16.mxu1 %v3932_v62  ;;  %v3976_v62 = vld [vmem:[#allocation2 + $0xfc8] sm:$0xff] }
 0xb3b   :  { %4072 = vmatpush1.bf16.msra.mxu0 %v3867_v22  ;;  %v3911_v22 = vld [vmem:[#allocation2 + $0xdc0] sm:$0xff] }
 0xb3c   :  { %4113 = vmatpush1.bf16.msra.mxu1 %v3931_v33  ;;  %4073 = vmatprep.subr.bf16.mxu0 %v3872_v2  ;;  %v3975_v33 = vld [vmem:[#allocation2 + $0xfc0] sm:$0xff]  ;;  %v3916_v2 = vld [vmem:[#allocation2 + $0xde8] sm:$0xff] }
 0xb3d   :  { %4114 = vmatprep.subr.bf16.mxu1 %v3936_v44  ;;  %v3980_v44 = vld [vmem:[#allocation2 + $0xfe8] sm:$0xff] }
 0xb3f   :  { %4074 = vmatpush1.bf16.msra.mxu0 %v3871_v45  ;;  %v3915_v45 = vld [vmem:[#allocation2 + $0xde0] sm:$0xff] }
 0xb40   :  { %4115 = vmatpush1.bf16.msra.mxu1 %v3935_v46  ;;  %4075 = vmatprep.subr.bf16.mxu0 %v3876_v47  ;;  %v3979_v46 = vld [vmem:[#allocation2 + $0xfe0] sm:$0xff]  ;;  %v3730_v47 = vld [vmem:[#allocation2 + $0x818] sm:$0xff] }
 0xb41   :  { %4116 = vmatprep.subr.bf16.mxu1 %v3940_v48  ;;  %v3794_v48 = vld [vmem:[#allocation2 + $0xa18] sm:$0xff] }
 0xb43   :  { %4076 = vmatpush1.bf16.msra.mxu0 %v3875_v53  ;;  %v3729_v53 = vld [vmem:[#allocation2 + $0x810] sm:$0xff] }
 0xb44   :  { %4117 = vmatpush1.bf16.msra.mxu1 %v3939_v58  ;;  %4077 = vmatprep.subr.bf16.mxu0 %v3880_v1  ;;  %v3793_v58 = vld [vmem:[#allocation2 + $0xa10] sm:$0xff]  ;;  %v3734_v1 = vld [vmem:[#allocation2 + $0x838] sm:$0xff] }
 0xb45   :  { %4118 = vmatprep.subr.bf16.mxu1 %v3944_v56  ;;  %v3798_v56 = vld [vmem:[#allocation2 + $0xa38] sm:$0xff] }
 0xb47   :  { %4078 = vmatpush1.bf16.msra.mxu0 %v3879_v17  ;;  %v3733_v17 = vld [vmem:[#allocation2 + $0x830] sm:$0xff] }
 0xb48   :  { %4119 = vmatpush1.bf16.msra.mxu1 %v3943_v26  ;;  %4079 = vmatprep.subr.bf16.mxu0 %v3884_v57  ;;  %v3797_v26 = vld [vmem:[#allocation2 + $0xa30] sm:$0xff]  ;;  %v3738_v57 = vld [vmem:[#allocation2 + $0x858] sm:$0xff] }
 0xb49   :  { %4120 = vmatprep.subr.bf16.mxu1 %v3948_v29  ;;  %v3802_v29 = vld [vmem:[#allocation2 + $0xa58] sm:$0xff] }
 0xb4b   :  { %4080 = vmatpush1.bf16.msra.mxu0 %v3883_v38  ;;  %v3737_v38 = vld [vmem:[#allocation2 + $0x850] sm:$0xff] }
 0xb4c   :  { %4121 = vmatpush1.bf16.msra.mxu1 %v3947_v39  ;;  %4081 = vmatprep.subr.bf16.mxu0 %v3888_v50  ;;  %v3801_v39 = vld [vmem:[#allocation2 + $0xa50] sm:$0xff]  ;;  %v3742_v50 = vld [vmem:[#allocation2 + $0x878] sm:$0xff] }
 0xb4d   :  { %4122 = vmatprep.subr.bf16.mxu1 %v3952_v6  ;;  %v3806_v6 = vld [vmem:[#allocation2 + $0xa78] sm:$0xff] }
 0xb4f   :  { %4082 = vmatpush1.bf16.msra.mxu0 %v3887_v37  ;;  %v3741_v37 = vld [vmem:[#allocation2 + $0x870] sm:$0xff] }
 0xb50   :  { %4123 = vmatpush1.bf16.msra.mxu1 %v3951_v55  ;;  %4083 = vmatprep.subr.bf16.mxu0 %v3892_v59  ;;  %v3805_v55 = vld [vmem:[#allocation2 + $0xa70] sm:$0xff]  ;;  %v3746_v59 = vld [vmem:[#allocation2 + $0x898] sm:$0xff] }
 0xb51   :  { %4124 = vmatprep.subr.bf16.mxu1 %v3956_v60  ;;  %v3810_v60 = vld [vmem:[#allocation2 + $0xa98] sm:$0xff] }
 0xb53   :  { %4084 = vmatpush1.bf16.msra.mxu0 %v3891_v61  ;;  %v3750_v61 = vld [vmem:[#allocation2 + $0x8b8] sm:$0xff] }
 0xb54   :  { %4125 = vmatpush1.bf16.msra.mxu1 %v3955_v63  ;;  %4085 = vmatprep.subr.bf16.mxu0 %v3896_v0  ;;  %v3814_v63 = vld [vmem:[#allocation2 + $0xab8] sm:$0xff]  ;;  %v3749_v0 = vld [vmem:[#allocation2 + $0x8b0] sm:$0xff] }
 0xb55   :  { %4126 = vmatprep.subr.bf16.mxu1 %v3960_v3  ;;  %v3813_v3 = vld [vmem:[#allocation2 + $0xab0] sm:$0xff] }
 0xb57   :  { %4086 = vmatpush1.bf16.msra.mxu0 %v3895_v4  ;;  %v3754_v4 = vld [vmem:[#allocation2 + $0x8d8] sm:$0xff] }
 0xb58   :  { %4127 = vmatpush1.bf16.msra.mxu1 %v3959_v14  ;;  %4087 = vmatprep.subr.bf16.mxu0 %v3900_v20  ;;  %v3818_v14 = vld [vmem:[#allocation2 + $0xad8] sm:$0xff]  ;;  %v3753_v20 = vld [vmem:[#allocation2 + $0x8d0] sm:$0xff] }
 0xb59   :  { %4128 = vmatprep.subr.bf16.mxu1 %v3964_v21  ;;  %v3817_v21 = vld [vmem:[#allocation2 + $0xad0] sm:$0xff] }
 0xb5b   :  { %4088 = vmatpush1.bf16.msra.mxu0 %v3899_v34  ;;  %v3758_v34 = vld [vmem:[#allocation2 + $0x8f8] sm:$0xff] }
 0xb5c   :  { %4129 = vmatpush1.bf16.msra.mxu1 %v3963_v35  ;;  %4089 = vmatprep.subr.bf16.mxu0 %v3904_v36  ;;  %v3822_v35 = vld [vmem:[#allocation2 + $0xaf8] sm:$0xff]  ;;  %v3757_v36 = vld [vmem:[#allocation2 + $0x8f0] sm:$0xff] }
 0xb5d   :  { %4130 = vmatprep.subr.bf16.mxu1 %v3968_v52  ;;  %v3821_v52 = vld [vmem:[#allocation2 + $0xaf0] sm:$0xff] }
 0xb5f   :  { %4090 = vmatpush1.bf16.msra.mxu0 %v3903_v23  ;;  %v3762_v23 = vld [vmem:[#allocation2 + $0x918] sm:$0xff] }
 0xb60   :  { %4131 = vmatpush1.bf16.msra.mxu1 %v3967_v40  ;;  %4091 = vmatprep.subr.bf16.mxu0 %v3908_v41  ;;  %v3826_v40 = vld [vmem:[#allocation2 + $0xb18] sm:$0xff]  ;;  %v3761_v41 = vld [vmem:[#allocation2 + $0x910] sm:$0xff] }
 0xb61   :  { %4132 = vmatprep.subr.bf16.mxu1 %v3972_v42  ;;  %v3825_v42 = vld [vmem:[#allocation2 + $0xb10] sm:$0xff] }
 0xb63   :  { %4092 = vmatpush1.bf16.msra.mxu0 %v3907_v43  ;;  %v3766_v43 = vld [vmem:[#allocation2 + $0x938] sm:$0xff] }
 0xb64   :  { %4133 = vmatpush1.bf16.msra.mxu1 %v3971_v49  ;;  %4093 = vmatprep.subr.bf16.mxu0 %v3912_v51  ;;  %v3830_v49 = vld [vmem:[#allocation2 + $0xb38] sm:$0xff]  ;;  %v3765_v51 = vld [vmem:[#allocation2 + $0x930] sm:$0xff] }
 0xb65   :  { %4134 = vmatprep.subr.bf16.mxu1 %v3976_v62  ;;  %v3829_v62 = vld [vmem:[#allocation2 + $0xb30] sm:$0xff] }
 0xb67   :  { %4094 = vmatpush1.bf16.msra.mxu0 %v3911_v22  ;;  %v3770_v22 = vld [vmem:[#allocation2 + $0x958] sm:$0xff] }
 0xb68   :  { %4135 = vmatpush1.bf16.msra.mxu1 %v3975_v33  ;;  %4095 = vmatprep.subr.bf16.mxu0 %v3916_v2  ;;  %v3834_v33 = vld [vmem:[#allocation2 + $0xb58] sm:$0xff]  ;;  %v3769_v2 = vld [vmem:[#allocation2 + $0x950] sm:$0xff] }
 0xb69   :  { %4136 = vmatprep.subr.bf16.mxu1 %v3980_v44  ;;  %v3833_v44 = vld [vmem:[#allocation2 + $0xb50] sm:$0xff] }
 0xb6b   :  { %4096 = vmatpush1.bf16.msra.mxu0 %v3915_v45  ;;  %v3774_v45 = vld [vmem:[#allocation2 + $0x978] sm:$0xff] }
 0xb6c   :  { %4137 = vmatpush1.bf16.msra.mxu1 %v3979_v46  ;;  %4147 = vmatprep.subr.bf16.mxu0 %v3730_v47  ;;  %v3838_v46 = vld [vmem:[#allocation2 + $0xb78] sm:$0xff]  ;;  %v3773_v47 = vld [vmem:[#allocation2 + $0x970] sm:$0xff] }
 0xb6d   :  { %4188 = vmatprep.subr.bf16.mxu1 %v3794_v48  ;;  %v3837_v48 = vld [vmem:[#allocation2 + $0xb70] sm:$0xff] }
 0xb6e   :  { %4098 = vmatmul.mubr.bf16.vlgmr.msra.gmra.mrb[84].mxu0 %v8947_v25 }
 0xb6f   :  { %4139 = vmatmul.mubr.bf16.vlgmr.msra.gmra.mrb[84].mxu1 %v8955_v15  ;;  %4148 = vmatpush1.bf16.msra.mxu0 %v3729_v53  ;;  %v3778_v53 = vld [vmem:[#allocation2 + $0x998] sm:$0xff] }
 0xb70   :  { %4189 = vmatpush1.bf16.msra.mxu1 %v3793_v58  ;;  %4149 = vmatprep.subr.bf16.mxu0 %v3734_v1  ;;  %v3842_v58 = vld [vmem:[#allocation2 + $0xb98] sm:$0xff]  ;;  %v3777_v1 = vld [vmem:[#allocation2 + $0x990] sm:$0xff] }
 0xb71   :  { %4190 = vmatprep.subr.bf16.mxu1 %v3798_v56  ;;  %4179 = vmatprep.mubr.bf16.mxu0 %v8935_v28  ;;  %v3745_v28 = vld [vmem:[#allocation2 + $0x890] sm:$0xff] }
 0xb72   :  { %4220 = vmatprep.mubr.bf16.mxu1 %v8939_v31  ;;  %v3809_v31 = vld [vmem:[#allocation2 + $0xa90] sm:$0xff] }
 0xb73   :  { %4150 = vmatpush1.bf16.msra.mxu0 %v3733_v17  ;;  %v3841_v56 = vld [vmem:[#allocation2 + $0xb90] sm:$0xff]  ;;  %v3782_v17 = vld [vmem:[#allocation2 + $0x9b8] sm:$0xff] }
 0xb74   :  { %4191 = vmatpush1.bf16.msra.mxu1 %v3797_v26  ;;  %4151 = vmatprep.subr.bf16.mxu0 %v3738_v57  ;;  %v3846_v26 = vld [vmem:[#allocation2 + $0xbb8] sm:$0xff]  ;;  %v3781_v57 = vld [vmem:[#allocation2 + $0x9b0] sm:$0xff] }
 0xb75   :  { %4192 = vmatprep.subr.bf16.mxu1 %v3802_v29  ;;  %v3845_v29 = vld [vmem:[#allocation2 + $0xbb0] sm:$0xff] }
 0xb77   :  { %4152 = vmatpush1.bf16.msra.mxu0 %v3737_v38  ;;  %v3786_v38 = vld [vmem:[#allocation2 + $0x9d8] sm:$0xff] }
 0xb78   :  { %4193 = vmatpush1.bf16.msra.mxu1 %v3801_v39  ;;  %4153 = vmatprep.subr.bf16.mxu0 %v3742_v50  ;;  %v3850_v39 = vld [vmem:[#allocation2 + $0xbd8] sm:$0xff]  ;;  %v3785_v50 = vld [vmem:[#allocation2 + $0x9d0] sm:$0xff] }
 0xb79   :  { %4194 = vmatprep.subr.bf16.mxu1 %v3806_v6  ;;  %v3849_v6 = vld [vmem:[#allocation2 + $0xbd0] sm:$0xff] }
 0xb7b   :  { %4154 = vmatpush1.bf16.msra.mxu0 %v3741_v37  ;;  %v3790_v37 = vld [vmem:[#allocation2 + $0x9f8] sm:$0xff] }
 0xb7c   :  { %4195 = vmatpush1.bf16.msra.mxu1 %v3805_v55  ;;  %4155 = vmatprep.subr.bf16.mxu0 %v3746_v59  ;;  %v3854_v55 = vld [vmem:[#allocation2 + $0xbf8] sm:$0xff]  ;;  %v3789_v59 = vld [vmem:[#allocation2 + $0x9f0] sm:$0xff] }
 0xb7d   :  { %4196 = vmatprep.subr.bf16.mxu1 %v3810_v60  ;;  %v3853_v60 = vld [vmem:[#allocation2 + $0xbf0] sm:$0xff] }
 0xb7f   :  { %4156 = vmatpush1.bf16.msra.mxu0 %v3745_v28  ;;  %v3858_v28 = vld [vmem:[#allocation2 + $0xc18] sm:$0xff] }
 0xb80   :  { %4197 = vmatpush1.bf16.msra.mxu1 %v3809_v31  ;;  %4157 = vmatprep.subr.bf16.mxu0 %v3750_v61  ;;  %v3922_v31 = vld [vmem:[#allocation2 + $0xe18] sm:$0xff]  ;;  %v3857_v61 = vld [vmem:[#allocation2 + $0xc10] sm:$0xff] }
 0xb81   :  { %4198 = vmatprep.subr.bf16.mxu1 %v3814_v63  ;;  %v3921_v63 = vld [vmem:[#allocation2 + $0xe10] sm:$0xff] }
 0xb83   :  { %4158 = vmatpush1.bf16.msra.mxu0 %v3749_v0  ;;  %v3862_v0 = vld [vmem:[#allocation2 + $0xc38] sm:$0xff] }
 0xb84   :  { %4199 = vmatpush1.bf16.msra.mxu1 %v3813_v3  ;;  %4159 = vmatprep.subr.bf16.mxu0 %v3754_v4  ;;  %v3926_v3 = vld [vmem:[#allocation2 + $0xe38] sm:$0xff]  ;;  %v3861_v4 = vld [vmem:[#allocation2 + $0xc30] sm:$0xff] }
 0xb85   :  { %4200 = vmatprep.subr.bf16.mxu1 %v3818_v14  ;;  %v3925_v14 = vld [vmem:[#allocation2 + $0xe30] sm:$0xff] }
 0xb87   :  { %4160 = vmatpush1.bf16.msra.mxu0 %v3753_v20  ;;  %v3866_v20 = vld [vmem:[#allocation2 + $0xc58] sm:$0xff] }
 0xb88   :  { %4201 = vmatpush1.bf16.msra.mxu1 %v3817_v21  ;;  %4161 = vmatprep.subr.bf16.mxu0 %v3758_v34  ;;  %v3930_v21 = vld [vmem:[#allocation2 + $0xe58] sm:$0xff]  ;;  %v3865_v34 = vld [vmem:[#allocation2 + $0xc50] sm:$0xff] }
 0xb89   :  { %4202 = vmatprep.subr.bf16.mxu1 %v3822_v35  ;;  %v3870_v35 = vld [vmem:[#allocation2 + $0xc78] sm:$0xff] }
 0xb8b   :  { %4162 = vmatpush1.bf16.msra.mxu0 %v3757_v36  ;;  %v3869_v36 = vld [vmem:[#allocation2 + $0xc70] sm:$0xff] }
 0xb8c   :  { %4203 = vmatpush1.bf16.msra.mxu1 %v3821_v52  ;;  %4163 = vmatprep.subr.bf16.mxu0 %v3762_v23  ;;  %v3933_v52 = vld [vmem:[#allocation2 + $0xe70] sm:$0xff]  ;;  %v3874_v23 = vld [vmem:[#allocation2 + $0xc98] sm:$0xff] }
 0xb8d   :  { %4204 = vmatprep.subr.bf16.mxu1 %v3826_v40  ;;  %v3938_v40 = vld [vmem:[#allocation2 + $0xe98] sm:$0xff] }
 0xb8f   :  { %4164 = vmatpush1.bf16.msra.mxu0 %v3761_v41  ;;  %v3878_v41 = vld [vmem:[#allocation2 + $0xcb8] sm:$0xff] }
 0xb90   :  { %4205 = vmatpush1.bf16.msra.mxu1 %v3825_v42  ;;  %4165 = vmatprep.subr.bf16.mxu0 %v3766_v43  ;;  %v3942_v42 = vld [vmem:[#allocation2 + $0xeb8] sm:$0xff]  ;;  %v3877_v43 = vld [vmem:[#allocation2 + $0xcb0] sm:$0xff] }
 0xb91   :  { %4206 = vmatprep.subr.bf16.mxu1 %v3830_v49  ;;  %v3941_v49 = vld [vmem:[#allocation2 + $0xeb0] sm:$0xff] }
 0xb93   :  { %4166 = vmatpush1.bf16.msra.mxu0 %v3765_v51  ;;  %v3882_v51 = vld [vmem:[#allocation2 + $0xcd8] sm:$0xff] }
 0xb94   :  { %4207 = vmatpush1.bf16.msra.mxu1 %v3829_v62  ;;  %4167 = vmatprep.subr.bf16.mxu0 %v3770_v22  ;;  %v3946_v62 = vld [vmem:[#allocation2 + $0xed8] sm:$0xff]  ;;  %v9143_v22 = vld [vmem:[#allocation13] sm:$0xff] }
 0xb95   :  { %4208 = vmatprep.subr.bf16.mxu1 %v3834_v33  ;;  %v3881_v33 = vld [vmem:[#allocation2 + $0xcd0] sm:$0xff] }
 0xb97   :  { %4168 = vmatpush1.bf16.msra.mxu0 %v3769_v2  ;;  %v3945_v2 = vld [vmem:[#allocation2 + $0xed0] sm:$0xff] }
 0xb98   :  { %4209 = vmatpush1.bf16.msra.mxu1 %v3833_v44  ;;  %4169 = vmatprep.subr.bf16.mxu0 %v3774_v45  ;;  %v4316_v44 = vrot.slane %v9143_v22, %v8749_v5  ;;  %v4320_v45 = vrot.slane %v9143_v22, %v8751_v7 }
 0xb99   :  { %4210 = vmatprep.subr.bf16.mxu1 %v3838_v46  ;;  %v4324_v46 = vrot.slane %v9143_v22, %v8753_v8 }
 0xb9b   :  { %4170 = vmatpush1.bf16.msra.mxu0 %v3773_v47  ;;  %v3886_v47 = vld [vmem:[#allocation2 + $0xcf8] sm:$0xff] }
 0xb9c   :  { %4211 = vmatpush1.bf16.msra.mxu1 %v3837_v48  ;;  %4171 = vmatprep.subr.bf16.mxu0 %v3778_v53  ;;  %v3950_v48 = vld [vmem:[#allocation2 + $0xef8] sm:$0xff]  ;;  %v4328_v53 = vrot.slane %v9143_v22, %v8755_v9 }
 0xb9d   :  { %4212 = vmatprep.subr.bf16.mxu1 %v3842_v58  ;;  %v4353_v58 = vadd.f32 %v4316_v44, %v9098_v27  ;;  %v3954_v27 = vld [vmem:[#allocation2 + $0xf18] sm:$0xff] }
 0xb9f   :  { %4172 = vmatpush1.bf16.msra.mxu0 %v3777_v1  ;;  %v4354_v1 = vadd.f32 %v4320_v45, %v9100_v32  ;;  %4369 = vst [vmem:[#allocation20] sm:$0xff] %v4353_v58  ;;  %v8133_v45 = vld [vmem:[#allocation19 + $0x10] sm:$0xff] }
 0xba0   :  { %4213 = vmatpush1.bf16.msra.mxu1 %v3841_v56  ;;  %4173 = vmatprep.subr.bf16.mxu0 %v3782_v17  ;;  %v4355_v56 = vadd.f32 %v4324_v46, %v9102_v18  ;;  %v4356_v17 = vadd.f32 %v4328_v53, %v9104_v54  ;;  %v3969_v53 = vld [vmem:[#allocation2 + $0xf90] sm:$0xff] }
 0xba1   :  { %4214 = vmatprep.subr.bf16.mxu1 %v3846_v26  ;;  %v3885_v26 = vld [vmem:[#allocation2 + $0xcf0] sm:$0xff]  ;;  %4370 = vst [vmem:[#allocation20 + $0x8] sm:$0xff] %v4354_v1 }
 0xba2   :  { %4371 = vst [vmem:[#allocation20 + $0x10] sm:$0xff] %v4355_v56  ;;  %4372 = vst [vmem:[#allocation20 + $0x18] sm:$0xff] %v4356_v17  ;;  %v4388_v32 = vmul.f32 0.5, %v4356_v17  ;;  %v3910_v17 = vld [vmem:[#allocation2 + $0xdb8] sm:$0xff] }
 0xba3   :  { %4174 = vmatpush1.bf16.msra.mxu0 %v3781_v57  ;;  %v3949_v57 = vld [vmem:[#allocation2 + $0xef0] sm:$0xff] }
 0xba4   :  { %4215 = vmatpush1.bf16.msra.mxu1 %v3845_v29  ;;  %4175 = vmatprep.subr.bf16.mxu0 %v3786_v38  ;;  %v4385_v29 = vmul.f32 0.5, %v4353_v58  ;;  %v4386_v38 = vmul.f32 0.5, %v4354_v1  ;;  %v4399_v54 = vmul.f32 1.442695, %v4388_v32  ;;  %v8134_v58 = vld [vmem:[#allocation19 + $0x18] sm:$0xff]  ;;  %v3913_v32 = vld [vmem:[#allocation2 + $0xdd0] sm:$0xff] }
 0xba5   :  { %4216 = vmatprep.subr.bf16.mxu1 %v3850_v39  ;;  %v4387_v39 = vmul.f32 0.5, %v4355_v56 }
 0xba6   :  { %v4395_v18 = vmul.f32 1.442695, %v4386_v38  ;;  %v3909_v38 = vld [vmem:[#allocation2 + $0xdb0] sm:$0xff] }
 0xba7   :  { %4176 = vmatpush1.bf16.msra.mxu0 %v3785_v50  ;;  %v3890_v50 = vld [vmem:[#allocation2 + $0xd18] sm:$0xff] }
 0xba8   :  { %4217 = vmatpush1.bf16.msra.mxu1 %v3849_v6  ;;  %4177 = vmatprep.subr.bf16.mxu0 %v3790_v37  ;;  %v4393_v6 = vmul.f32 1.442695, %v4385_v29  ;;  %v4397_v37 = vmul.f32 1.442695, %v4387_v39  ;;  %v3973_v39 = vld [vmem:[#allocation2 + $0xfb0] sm:$0xff] }
 0xba9   :  { %4218 = vmatprep.subr.bf16.mxu1 %v3854_v55  ;;  %v3889_v55 = vld [vmem:[#allocation2 + $0xd10] sm:$0xff] }
 0xbaa   :  { %8115 = vpow2.f32 %v4393_v6  ;;  %v3977_v6 = vld [vmem:[#allocation2 + $0xfd0] sm:$0xff] }
 0xbab   :  { %4178 = vmatpush1.bf16.msra.mxu0 %v3789_v59  ;;  %v3953_v59 = vld [vmem:[#allocation2 + $0xf10] sm:$0xff]  ;;  %8117 = vpow2.f32 %v4395_v18  ;;  %v3918_v18 = vld [vmem:[#allocation2 + $0xdf8] sm:$0xff] }
 0xbac   :  { %4219 = vmatpush1.bf16.msra.mxu1 %v3853_v60  ;;  %4229 = vmatprep.subr.bf16.mxu0 %v3858_v28  ;;  %v3894_v60 = vld [vmem:[#allocation2 + $0xd38] sm:$0xff]  ;;  %8119 = vpow2.f32 %v4397_v37 }
 0xbad   :  { %4270 = vmatprep.subr.bf16.mxu1 %v3922_v31  ;;  %v3958_v28 = vld [vmem:[#allocation2 + $0xf38] sm:$0xff]  ;;  %8121 = vpow2.f32 %v4399_v54  ;;  %v3893_v31 = vld [vmem:[#allocation2 + $0xd30] sm:$0xff] }
 0xbae   :  { %4180 = vmatmul.mubr.bf16.vlgmr.msra.gmra.mrb[88].mxu0 %v8933_v24  ;;  %v3929_v24 = vld [vmem:[#allocation2 + $0xe50] sm:$0xff]  ;;  %v3982_v37 = vld [vmem:[#allocation2 + $0xff8] sm:$0xff] }
 0xbaf   :  { %4221 = vmatmul.mubr.bf16.vlgmr.msra.gmra.mrb[88].mxu1 %v8937_v30  ;;  %4230 = vmatpush1.bf16.msra.mxu0 %v3857_v61  ;;  %v3934_v30 = vld [vmem:[#allocation2 + $0xe78] sm:$0xff]  ;;  %v3957_v61 = vld [vmem:[#allocation2 + $0xf30] sm:$0xff] }
 0xbb0   :  { %4271 = vmatpush1.bf16.msra.mxu1 %v3921_v63  ;;  %4231 = vmatprep.subr.bf16.mxu0 %v3862_v0  ;;  %v3898_v63 = vld [vmem:[#allocation2 + $0xd58] sm:$0xff]  ;;  %v3917_v54 = vld [vmem:[#allocation2 + $0xdf0] sm:$0xff] }
 0xbb1   :  { %4272 = vmatprep.subr.bf16.mxu1 %v3926_v3  ;;  %4261 = vmatprep.mubr.bf16.mxu0 %v8949_v16  ;;  %v3873_v16 = vld [vmem:[#allocation2 + $0xc90] sm:$0xff]  ;;  %v3962_v0 = vld [vmem:[#allocation2 + $0xf58] sm:$0xff] }
 0xbb2   :  { %4302 = vmatprep.mubr.bf16.mxu1 %v8957_v19  ;;  %v3937_v19 = vld [vmem:[#allocation2 + $0xe90] sm:$0xff] }
 0xbb3   :  { %4232 = vmatpush1.bf16.msra.mxu0 %v3861_v4  ;;  %v3897_v3 = vld [vmem:[#allocation2 + $0xd50] sm:$0xff] }
 0xbb4   :  { %4273 = vmatpush1.bf16.msra.mxu1 %v3925_v14  ;;  %4233 = vmatprep.subr.bf16.mxu0 %v3866_v20  ;;  %v3961_v4 = vld [vmem:[#allocation2 + $0xf50] sm:$0xff]  ;;  %v4377_v14 = vld [vmem:[#allocation4] sm:$0xff]  ;;  %v3902_v20 = vld [vmem:[#allocation2 + $0xd78] sm:$0xff] }
 0xbb5   :  { %4274 = vmatprep.subr.bf16.mxu1 %v3930_v21  ;;  %v3966_v21 = vld [vmem:[#allocation2 + $0xf78] sm:$0xff] }
 0xbb7   :  { %4234 = vmatpush1.bf16.msra.mxu0 %v3865_v34  ;;  %v4378_v34 = vld [vmem:[#allocation4 + $0x8] sm:$0xff] }
 0xbb8   :  { %4275 = vmatpush1.bf16.msra.mxu1 %v3929_v24  ;;  %4235 = vmatprep.subr.bf16.mxu0 %v3870_v35  ;;  %v8116_v24 = vpop.eup %8115  ;;  %v4379_v35 = vld [vmem:[#allocation4 + $0x10] sm:$0xff] }
 0xbb9   :  { %4276 = vmatprep.subr.bf16.mxu1 %v3934_v30  ;;  %v8118_v30 = vpop.eup %8117 }
 0xbbb   :  { %4236 = vmatpush1.bf16.msra.mxu0 %v3869_v36  ;;  %v4380_v36 = vld [vmem:[#allocation4 + $0x18] sm:$0xff] }
 0xbbc   :  { %4277 = vmatpush1.bf16.msra.mxu1 %v3933_v52  ;;  %4237 = vmatprep.subr.bf16.mxu0 %v3874_v23  ;;  %v4409_v52 = vmul.f32 %v8116_v24, %v4377_v14  ;;  %v8120_v23 = vpop.eup %8119  ;;  %v4332_v24 = vrot.slane %v9143_v22, %v8757_v10 }
 0xbbd   :  { %4278 = vmatprep.subr.bf16.mxu1 %v3938_v40  ;;  %v3901_v40 = vld [vmem:[#allocation2 + $0xd70] sm:$0xff] }
 0xbbf   :  { %4238 = vmatpush1.bf16.msra.mxu0 %v3873_v16  ;;  %v3965_v16 = vld [vmem:[#allocation2 + $0xf70] sm:$0xff] }
 0xbc0   :  { %4279 = vmatpush1.bf16.msra.mxu1 %v3937_v19  ;;  %4239 = vmatprep.subr.bf16.mxu0 %v3878_v41  ;;  %v4410_v19 = vmul.f32 %v8118_v30, %v4378_v34  ;;  %v8122_v41 = vpop.eup %8121 }
 0xbc1   :  { %4280 = vmatprep.subr.bf16.mxu1 %v3942_v42  ;;  %v3906_v42 = vld [vmem:[#allocation2 + $0xd98] sm:$0xff] }
 0xbc3   :  { %4240 = vmatpush1.bf16.msra.mxu0 %v3877_v43  ;;  %v3970_v43 = vld [vmem:[#allocation2 + $0xf98] sm:$0xff] }
 0xbc4   :  { %4281 = vmatpush1.bf16.msra.mxu1 %v3941_v49  ;;  %4241 = vmatprep.subr.bf16.mxu0 %v3882_v51  ;;  %v4411_v49 = vmul.f32 %v8120_v23, %v4379_v35  ;;  %v8131_v51 = vld [vmem:[#allocation19] sm:$0xff] }
 0xbc5   :  { %4282 = vmatprep.subr.bf16.mxu1 %v3946_v62  ;;  %v4417_v62 = vadd.f32 %v8131_v51, %v4409_v52 }
 0xbc6   :  { %v4419_v46 = vadd.f32 %v8133_v45, %v4411_v49 }
 0xbc7   :  { %4242 = vmatpush1.bf16.msra.mxu0 %v3881_v33  ;;  %v4412_v33 = vmul.f32 %v8122_v41, %v4380_v36 }
 0xbc8   :  { %4283 = vmatpush1.bf16.msra.mxu1 %v3945_v2  ;;  %4243 = vmatprep.subr.bf16.mxu0 %v3886_v47  ;;  %v8132_v2 = vld [vmem:[#allocation19 + $0x8] sm:$0xff]  ;;  %v9157_v47 = vpack.c.bf16 %v4417_v62, %v4417_v62 }
 0xbc9   :  { %4284 = vmatprep.subr.bf16.mxu1 %v3950_v48  ;;  %v4418_v44 = vadd.f32 %v8132_v2, %v4410_v19  ;;  %v3905_v48 = vld [vmem:[#allocation2 + $0xd90] sm:$0xff]  ;;  %v4420_v1 = vadd.f32 %v8134_v58, %v4412_v33  ;;  %v4381_v33 = vld [vmem:[#allocation4 + $0x20] sm:$0xff]  ;;  %v4382_v2 = vld [vmem:[#allocation4 + $0x28] sm:$0xff] }
 0xbcb   :  { %4244 = vmatpush1.bf16.msra.mxu0 %v3885_v26  ;;  %v9159_v56 = vpack.c.bf16 %v4418_v44, %v4418_v44  ;;  %v3974_v26 = vld [vmem:[#allocation2 + $0xfb8] sm:$0xff]  ;;  %v9163_v29 = vpack.c.bf16 %v4420_v1, %v4420_v1  ;;  %v8136_v1 = vld [vmem:[#allocation19 + $0x28] sm:$0xff] }
 0xbcc   :  { %4285 = vmatpush1.bf16.msra.mxu1 %v3949_v57  ;;  %4245 = vmatprep.subr.bf16.mxu0 %v3890_v50  ;;  %v9161_v57 = vpack.c.bf16 %v4419_v46, %v4419_v46  ;;  %v3914_v50 = vld [vmem:[#allocation2 + $0xdd8] sm:$0xff] }
 0xbcd   :  { %4286 = vmatprep.subr.bf16.mxu1 %v3954_v27  ;;  %v3978_v27 = vld [vmem:[#allocation2 + $0xfd8] sm:$0xff] }
 0xbcf   :  { %4246 = vmatpush1.bf16.msra.mxu0 %v3889_v55  ;;  %v3981_v55 = vld [vmem:[#allocation2 + $0xff0] sm:$0xff] }
 0xbd0   :  { %4287 = vmatpush1.bf16.msra.mxu1 %v3953_v59  ;;  %4247 = vmatprep.subr.bf16.mxu0 %v3894_v60 }
 0xbd1   :  { %4288 = vmatprep.subr.bf16.mxu1 %v3958_v28 }
 0xbd3   :  { %4248 = vmatpush1.bf16.msra.mxu0 %v3893_v31 }
 0xbd4   :  { %4289 = vmatpush1.bf16.msra.mxu1 %v3957_v61  ;;  %4249 = vmatprep.subr.bf16.mxu0 %v3898_v63 }
 0xbd5   :  { %4290 = vmatprep.subr.bf16.mxu1 %v3962_v0 }
 0xbd7   :  { %4250 = vmatpush1.bf16.msra.mxu0 %v3897_v3 }
 0xbd8   :  { %4291 = vmatpush1.bf16.msra.mxu1 %v3961_v4  ;;  %4251 = vmatprep.subr.bf16.mxu0 %v3902_v20 }
 0xbd9   :  { %4292 = vmatprep.subr.bf16.mxu1 %v3966_v21 }
 0xbdb   :  { %4252 = vmatpush1.bf16.msra.mxu0 %v3901_v40 }
 0xbdc   :  { %4293 = vmatpush1.bf16.msra.mxu1 %v3965_v16  ;;  %4253 = vmatprep.subr.bf16.mxu0 %v3906_v42 }
 0xbdd   :  { %4294 = vmatprep.subr.bf16.mxu1 %v3970_v43 }
 0xbdf   :  { %4254 = vmatpush1.bf16.msra.mxu0 %v3905_v48 }
 0xbe0   :  { %4295 = vmatpush1.bf16.msra.mxu1 %v3969_v53  ;;  %4255 = vmatprep.subr.bf16.mxu0 %v3910_v17  ;;  %v8135_v53 = vld [vmem:[#allocation19 + $0x20] sm:$0xff] }
 0xbe1   :  { %4296 = vmatprep.subr.bf16.mxu1 %v3974_v26 }
 0xbe3   :  { %4256 = vmatpush1.bf16.msra.mxu0 %v3909_v38 }
 0xbe4   :  { %4297 = vmatpush1.bf16.msra.mxu1 %v3973_v39  ;;  %4257 = vmatprep.subr.bf16.mxu0 %v3914_v50 }
 0xbe5   :  { %4298 = vmatprep.subr.bf16.mxu1 %v3978_v27 }
 0xbe7   :  { %4258 = vmatpush1.bf16.msra.mxu0 %v3913_v32 }
 0xbe8   :  { %4299 = vmatpush1.bf16.msra.mxu1 %v3977_v6  ;;  %4259 = vmatprep.subr.bf16.mxu0 %v3918_v18 }
 0xbe9   :  { %4300 = vmatprep.subr.bf16.mxu1 %v3982_v37 }
 0xbeb   :  { %4260 = vmatpush1.bf16.msra.mxu0 %v3917_v54 }
 0xbec   :  { %4301 = vmatpush1.bf16.msra.mxu1 %v3981_v55 }
 0xbee   :  { %4262 = vmatmul.mubr.bf16.vlgmr.msra.gmra.mrb[92].mxu0 %v8947_v25 }
 0xbef   :  { %4303 = vmatmul.mubr.bf16.vlgmr.msra.gmra.mrb[92].mxu1 %v8955_v15  ;;  %v4336_v15 = vrot.slane %v9143_v22, %v8759_v11 }
 0xc01   :  { %v4017_v59 = vpop.f32.mrb[80].mxu0 }
 0xc02   :  { %v4058_v60 = vpop.f32.mrb[80].mxu1  ;;  %v4019_v31 = vpop.f32.mrb[81].mxu0 }
 0xc03   :  { %v4059_v28 = vadd.f32 %v4058_v60, %v4017_v59  ;;  %v4060_v61 = vpop.f32.mrb[81].mxu1  ;;  %v4021_v0 = vpop.f32.mrb[82].mxu0 }
 0xc04   :  { %v4061_v63 = vadd.f32 %v4060_v61, %v4019_v31  ;;  %v4062_v3 = vpop.f32.mrb[82].mxu1  ;;  %v4022_v4 = vpop.f32.mrb[83].mxu0  ;;  %v4340_v61 = vrot.slane %v9143_v22, %v8761_v12 }
 0xc05   :  { %v4063_v14 = vpop.f32.mrb[83].mxu1  ;;  %v4344_v4 = vrot.slane %v9143_v22, %v8763_v13 }
 0xc41   :  { %v4099_v20 = vpop.f32.mrb[84].mxu0 }
 0xc42   :  { %v4140_v21 = vpop.f32.mrb[84].mxu1  ;;  %v4100_v34 = vadd.f32 %v4099_v20, %v4059_v28  ;;  %v4101_v35 = vpop.f32.mrb[85].mxu0 }
 0xc43   :  { %v4142_v25 = vpop.f32.mrb[85].mxu1  ;;  %v4102_v30 = vadd.f32 %v4101_v35, %v4061_v63  ;;  %v4103_v36 = vpop.f32.mrb[86].mxu0 }
 0xc44   :  { %v4144_v52 = vpop.f32.mrb[86].mxu1  ;;  %v4141_v23 = vadd.f32 %v4140_v21, %v4100_v34  ;;  %v4104_v40 = vpop.f32.mrb[87].mxu0 }
 0xc45   :  { %v4145_v16 = vpop.f32.mrb[87].mxu1  ;;  %v4143_v19 = vadd.f32 %v4142_v25, %v4102_v30  ;;  %v4383_v40 = vld [vmem:[#allocation4 + $0x30] sm:$0xff] }
 0xc46   :  { %v4357_v41 = vadd.f32 %v4332_v24, %v4141_v23  ;;  %v4384_v16 = vld [vmem:[#allocation4 + $0x38] sm:$0xff] }
 0xc47   :  { %v4358_v42 = vadd.f32 %v4336_v15, %v4143_v19 }
 0xc48   :  { %4373 = vst [vmem:[#allocation20 + $0x20] sm:$0xff] %v4357_v41  ;;  %v4389_v43 = vmul.f32 0.5, %v4357_v41 }
 0xc49   :  { %4374 = vst [vmem:[#allocation20 + $0x28] sm:$0xff] %v4358_v42  ;;  %v4390_v49 = vmul.f32 0.5, %v4358_v42 }
 0xc4a   :  { %v4401_v51 = vmul.f32 1.442695, %v4389_v43  ;;  %v8137_v43 = vld [vmem:[#allocation19 + $0x30] sm:$0xff] }
 0xc4b   :  { %v4403_v62 = vmul.f32 1.442695, %v4390_v49 }
 0xc4c   :  { %8123 = vpow2.f32 %v4401_v51  ;;  %v8138_v51 = vld [vmem:[#allocation19 + $0x38] sm:$0xff] }
 0xc4d   :  { %8125 = vpow2.f32 %v4403_v62 }
 0xc56   :  { %v8124_v44 = vpop.eup %8123 }
 0xc57   :  { %v8126_v45 = vpop.eup %8125  ;;  %v4413_v46 = vmul.f32 %v8124_v44, %v4381_v33 }
 0xc58   :  { %v4414_v48 = vmul.f32 %v8126_v45, %v4382_v2 }
 0xc59   :  { %v4421_v58 = vadd.f32 %v8135_v53, %v4413_v46 }
 0xc5a   :  { %v4422_v17 = vadd.f32 %v8136_v1, %v4414_v48 }
 0xc5b   :  { %v9171_v26 = vpack.c.bf16 %v4421_v58, %v4421_v58 }
 0xc5c   :  { %v9173_v38 = vpack.c.bf16 %v4422_v17, %v4422_v17 }
 0xc81   :  { %v4181_v39 = vpop.f32.mrb[88].mxu0 }
 0xc82   :  { %v4222_v50 = vpop.f32.mrb[88].mxu1  ;;  %v4183_v32 = vpop.f32.mrb[89].mxu0 }
 0xc83   :  { %v4223_v27 = vadd.f32 %v4222_v50, %v4181_v39  ;;  %v4224_v6 = vpop.f32.mrb[89].mxu1  ;;  %v4185_v37 = vpop.f32.mrb[90].mxu0 }
 0xc84   :  { %v4225_v18 = vadd.f32 %v4224_v6, %v4183_v32  ;;  %v4226_v54 = vpop.f32.mrb[90].mxu1  ;;  %v4186_v55 = vpop.f32.mrb[91].mxu0 }
 0xc85   :  { %v4227_v59 = vpop.f32.mrb[91].mxu1 }
 0xcc1   :  { %v4263_v60 = vpop.f32.mrb[92].mxu0 }
 0xcc2   :  { %v4304_v28 = vpop.f32.mrb[92].mxu1  ;;  %v4264_v31 = vadd.f32 %v4263_v60, %v4223_v27  ;;  %v4265_v63 = vpop.f32.mrb[93].mxu0 }
 0xcc3   :  { %v4306_v0 = vpop.f32.mrb[93].mxu1  ;;  %v4266_v3 = vadd.f32 %v4265_v63, %v4225_v18  ;;  %v4267_v14 = vpop.f32.mrb[94].mxu0 }
 0xcc4   :  { %v4308_v20 = vpop.f32.mrb[94].mxu1  ;;  %v4305_v21 = vadd.f32 %v4304_v28, %v4264_v31  ;;  %v4268_v34 = vpop.f32.mrb[95].mxu0 }
 0xcc5   :  { %v4309_v24 = vpop.f32.mrb[95].mxu1  ;;  %v4307_v35 = vadd.f32 %v4306_v0, %v4266_v3 }
 0xcc6   :  { %v4359_v25 = vadd.f32 %v4340_v61, %v4305_v21 }
 0xcc7   :  { %v4360_v30 = vadd.f32 %v4344_v4, %v4307_v35 }
 0xcc8   :  { %4375 = vst [vmem:[#allocation20 + $0x30] sm:$0xff] %v4359_v25  ;;  %v4391_v15 = vmul.f32 0.5, %v4359_v25 }
 0xcc9   :  { %4376 = vst [vmem:[#allocation20 + $0x38] sm:$0xff] %v4360_v30  ;;  %v4392_v36 = vmul.f32 0.5, %v4360_v30 }
 0xcca   :  { %v4405_v52 = vmul.f32 1.442695, %v4391_v15 }
 0xccb   :  { %v4407_v23 = vmul.f32 1.442695, %v4392_v36 }
 0xccc   :  { %8127 = vpow2.f32 %v4405_v52 }
 0xccd   :  { %8129 = vpow2.f32 %v4407_v23 }
 0xcd6   :  { %v8128_v19 = vpop.eup %8127 }
 0xcd7   :  { %v8130_v22 = vpop.eup %8129  ;;  %v4415_v41 = vmul.f32 %v8128_v19, %v4383_v40 }
 0xcd8   :  { %v4416_v42 = vmul.f32 %v8130_v22, %v4384_v16 }
 0xcd9   :  { %v4423_v49 = vadd.f32 %v8137_v43, %v4415_v41 }
 0xcda   :  { %v4424_v62 = vadd.f32 %v8138_v51, %v4416_v42 }
 0xcdb   :  { %v9179_v33 = vpack.c.bf16 %v4423_v49, %v4423_v49 }
 0xcdc   :  { %v9181_v2 = vpack.c.bf16 %v4424_v62, %v4424_v62 }
 0xcdd   :  { %8499 = dma.done.wait [#allocation3], 32768 }
 0xcde   :  { %8500 = vsyncadd [#allocation3], 4294934528  ;;  %4758 = vmatprep.mubr.bf16.mxu0 %v9159_v56  ;;  %4799 = vmatprep.mubr.bf16.mxu1 %v9163_v29  ;;  %4451 = sst [smem:[#allocation37]] %s8520_s25  ;;  %s4435_s19 = scalar_lea.hbm %s9639_s2, 229376 }
 0xcdf   :  { %4453 = sst [smem:[#allocation37 + $0x1]] %s8520_s25  ;;  %s8539_s20 = smov [#allocation36]  }
 0xce0   :  { %4455 = sst [smem:[#allocation37 + $0x2]] %s8522_s26 }
 0xce1   :  { %4457 = sst [smem:[#allocation37 + $0x3]] %s8523_s11 }
 0xce2   :  { %4459 = sst [smem:[#allocation37 + $0x4]] %s8524_s7 }
 0xce3   :  { %4461 = sst [smem:[#allocation37 + $0x5]] %s8525_s22 }
 0xce4   :  { %4463 = sst [smem:[#allocation37 + $0x6]] %s8526_s29 }
 0xce5   :  { %4465 = sst [smem:[#allocation37 + $0x7]] %s8523_s11 }
 0xce6   :  { %4467 = sst [smem:[#allocation37 + $0x8]] %s8522_s26 }
 0xce7   :  { %4469 = dma.general %s4435_s19, 32768, %s8835_s9, %s8532_s4, %s8539_s20, [#allocation37], %s8734_s1, 0  }
 0xce8   :  { %v4471_v44 = vld [vmem:[#allocation2 + $0x8] sm:$0xff]  ;;  %v4470_v46 = vld [vmem:[#allocation2] sm:$0xff] }
 0xce9   :  { %v4535_v45 = vld [vmem:[#allocation2 + $0x208] sm:$0xff]  ;;  %4726 = vmatprep.subr.bf16.mxu0 %v4471_v44  ;;  %v4534_v48 = vld [vmem:[#allocation2 + $0x200] sm:$0xff] }
 0xcea   :  { %4767 = vmatprep.subr.bf16.mxu1 %v4535_v45  ;;  %v4475_v53 = vld [vmem:[#allocation2 + $0x28] sm:$0xff]  ;;  %4727 = vmatpush1.bf16.msra.mxu0 %v4470_v46  ;;  %v4474_v1 = vld [vmem:[#allocation2 + $0x20] sm:$0xff] }
 0xceb   :  { %v4539_v58 = vld [vmem:[#allocation2 + $0x228] sm:$0xff]  ;;  %4768 = vmatpush1.bf16.msra.mxu1 %v4534_v48  ;;  %4728 = vmatprep.subr.bf16.mxu0 %v4475_v53  ;;  %v4538_v17 = vld [vmem:[#allocation2 + $0x220] sm:$0xff] }
 0xcec   :  { %4769 = vmatprep.subr.bf16.mxu1 %v4539_v58  ;;  %v4479_v39 = vld [vmem:[#allocation2 + $0x48] sm:$0xff]  ;;  %v4478_v27 = vld [vmem:[#allocation2 + $0x40] sm:$0xff] }
 0xced   :  { %v4543_v50 = vld [vmem:[#allocation2 + $0x248] sm:$0xff]  ;;  %v4542_v32 = vld [vmem:[#allocation2 + $0x240] sm:$0xff] }
 0xcee   :  { %4729 = vmatpush1.bf16.msra.mxu0 %v4474_v1  ;;  %v4483_v6 = vld [vmem:[#allocation2 + $0x68] sm:$0xff]  ;;  %v4482_v37 = vld [vmem:[#allocation2 + $0x60] sm:$0xff] }
 0xcef   :  { %4770 = vmatpush1.bf16.msra.mxu1 %v4538_v17  ;;  %4730 = vmatprep.subr.bf16.mxu0 %v4479_v39  ;;  %v4547_v18 = vld [vmem:[#allocation2 + $0x268] sm:$0xff]  ;;  %v4546_v54 = vld [vmem:[#allocation2 + $0x260] sm:$0xff] }
 0xcf0   :  { %4771 = vmatprep.subr.bf16.mxu1 %v4543_v50  ;;  %v4487_v55 = vld [vmem:[#allocation2 + $0x88] sm:$0xff]  ;;  %v4486_v60 = vld [vmem:[#allocation2 + $0x80] sm:$0xff] }
 0xcf1   :  { %v4551_v59 = vld [vmem:[#allocation2 + $0x288] sm:$0xff]  ;;  %v4550_v28 = vld [vmem:[#allocation2 + $0x280] sm:$0xff] }
 0xcf2   :  { %4731 = vmatpush1.bf16.msra.mxu0 %v4478_v27  ;;  %v4491_v31 = vld [vmem:[#allocation2 + $0xa8] sm:$0xff]  ;;  %v4490_v63 = vld [vmem:[#allocation2 + $0xa0] sm:$0xff] }
 0xcf3   :  { %4772 = vmatpush1.bf16.msra.mxu1 %v4542_v32  ;;  %4732 = vmatprep.subr.bf16.mxu0 %v4483_v6  ;;  %v4555_v61 = vld [vmem:[#allocation2 + $0x2a8] sm:$0xff]  ;;  %v4554_v0 = vld [vmem:[#allocation2 + $0x2a0] sm:$0xff] }
 0xcf4   :  { %4773 = vmatprep.subr.bf16.mxu1 %v4547_v18  ;;  %v4495_v3 = vld [vmem:[#allocation2 + $0xc8] sm:$0xff]  ;;  %v4494_v14 = vld [vmem:[#allocation2 + $0xc0] sm:$0xff] }
 0xcf5   :  { %v4559_v4 = vld [vmem:[#allocation2 + $0x2c8] sm:$0xff]  ;;  %v4558_v20 = vld [vmem:[#allocation2 + $0x2c0] sm:$0xff] }
 0xcf6   :  { %4733 = vmatpush1.bf16.msra.mxu0 %v4482_v37  ;;  %v4499_v21 = vld [vmem:[#allocation2 + $0xe8] sm:$0xff]  ;;  %v4498_v24 = vld [vmem:[#allocation2 + $0xe0] sm:$0xff] }
 0xcf7   :  { %4774 = vmatpush1.bf16.msra.mxu1 %v4546_v54  ;;  %4734 = vmatprep.subr.bf16.mxu0 %v4487_v55  ;;  %v4563_v34 = vld [vmem:[#allocation2 + $0x2e8] sm:$0xff]  ;;  %v4562_v35 = vld [vmem:[#allocation2 + $0x2e0] sm:$0xff] }
 0xcf8   :  { %4775 = vmatprep.subr.bf16.mxu1 %v4551_v59  ;;  %v4503_v25 = vld [vmem:[#allocation2 + $0x108] sm:$0xff]  ;;  %v4502_v15 = vld [vmem:[#allocation2 + $0x100] sm:$0xff] }
 0xcf9   :  { %v4567_v30 = vld [vmem:[#allocation2 + $0x308] sm:$0xff]  ;;  %v4566_v36 = vld [vmem:[#allocation2 + $0x300] sm:$0xff] }
 0xcfa   :  { %4735 = vmatpush1.bf16.msra.mxu0 %v4486_v60  ;;  %v4507_v52 = vld [vmem:[#allocation2 + $0x128] sm:$0xff]  ;;  %v4506_v40 = vld [vmem:[#allocation2 + $0x120] sm:$0xff] }
 0xcfb   :  { %4776 = vmatpush1.bf16.msra.mxu1 %v4550_v28  ;;  %4736 = vmatprep.subr.bf16.mxu0 %v4491_v31  ;;  %v4571_v23 = vld [vmem:[#allocation2 + $0x328] sm:$0xff]  ;;  %v4570_v16 = vld [vmem:[#allocation2 + $0x320] sm:$0xff] }
 0xcfc   :  { %4777 = vmatprep.subr.bf16.mxu1 %v4555_v61  ;;  %v4511_v19 = vld [vmem:[#allocation2 + $0x148] sm:$0xff]  ;;  %v4510_v41 = vld [vmem:[#allocation2 + $0x140] sm:$0xff] }
 0xcfd   :  { %v4575_v22 = vld [vmem:[#allocation2 + $0x348] sm:$0xff]  ;;  %v4574_v42 = vld [vmem:[#allocation2 + $0x340] sm:$0xff] }
 0xcfe   :  { %4737 = vmatpush1.bf16.msra.mxu0 %v4490_v63  ;;  %v4515_v43 = vld [vmem:[#allocation2 + $0x168] sm:$0xff]  ;;  %v4514_v51 = vld [vmem:[#allocation2 + $0x160] sm:$0xff] }
 0xcff   :  { %4778 = vmatpush1.bf16.msra.mxu1 %v4554_v0  ;;  %4738 = vmatprep.subr.bf16.mxu0 %v4495_v3  ;;  %v4579_v49 = vld [vmem:[#allocation2 + $0x368] sm:$0xff]  ;;  %v4578_v62 = vld [vmem:[#allocation2 + $0x360] sm:$0xff] }
 0xd00   :  { %4779 = vmatprep.subr.bf16.mxu1 %v4559_v4  ;;  %v4519_v44 = vld [vmem:[#allocation2 + $0x188] sm:$0xff]  ;;  %v4518_v46 = vld [vmem:[#allocation2 + $0x180] sm:$0xff] }
 0xd01   :  { %v4583_v45 = vld [vmem:[#allocation2 + $0x388] sm:$0xff]  ;;  %v4582_v48 = vld [vmem:[#allocation2 + $0x380] sm:$0xff] }
 0xd02   :  { %4739 = vmatpush1.bf16.msra.mxu0 %v4494_v14  ;;  %v4523_v53 = vld [vmem:[#allocation2 + $0x1a8] sm:$0xff]  ;;  %v4522_v1 = vld [vmem:[#allocation2 + $0x1a0] sm:$0xff] }
 0xd03   :  { %4780 = vmatpush1.bf16.msra.mxu1 %v4558_v20  ;;  %4740 = vmatprep.subr.bf16.mxu0 %v4499_v21  ;;  %v4587_v58 = vld [vmem:[#allocation2 + $0x3a8] sm:$0xff]  ;;  %v4586_v17 = vld [vmem:[#allocation2 + $0x3a0] sm:$0xff] }
 0xd04   :  { %4781 = vmatprep.subr.bf16.mxu1 %v4563_v34  ;;  %v4527_v39 = vld [vmem:[#allocation2 + $0x1c8] sm:$0xff]  ;;  %v4526_v27 = vld [vmem:[#allocation2 + $0x1c0] sm:$0xff] }
 0xd05   :  { %v4591_v50 = vld [vmem:[#allocation2 + $0x3c8] sm:$0xff]  ;;  %v4590_v32 = vld [vmem:[#allocation2 + $0x3c0] sm:$0xff] }
 0xd06   :  { %4741 = vmatpush1.bf16.msra.mxu0 %v4498_v24  ;;  %v4531_v6 = vld [vmem:[#allocation2 + $0x1e8] sm:$0xff]  ;;  %v4530_v37 = vld [vmem:[#allocation2 + $0x1e0] sm:$0xff] }
 0xd07   :  { %4782 = vmatpush1.bf16.msra.mxu1 %v4562_v35  ;;  %4742 = vmatprep.subr.bf16.mxu0 %v4503_v25  ;;  %v4595_v18 = vld [vmem:[#allocation2 + $0x3e8] sm:$0xff]  ;;  %v4594_v54 = vld [vmem:[#allocation2 + $0x3e0] sm:$0xff] }
 0xd08   :  { %4783 = vmatprep.subr.bf16.mxu1 %v4567_v30  ;;  %v4599_v55 = vld [vmem:[#allocation2 + $0x408] sm:$0xff]  ;;  %v4598_v60 = vld [vmem:[#allocation2 + $0x400] sm:$0xff] }
 0xd09   :  { %v4663_v59 = vld [vmem:[#allocation2 + $0x608] sm:$0xff]  ;;  %v4662_v28 = vld [vmem:[#allocation2 + $0x600] sm:$0xff] }
 0xd0a   :  { %4743 = vmatpush1.bf16.msra.mxu0 %v4502_v15  ;;  %v4603_v31 = vld [vmem:[#allocation2 + $0x428] sm:$0xff]  ;;  %v4602_v63 = vld [vmem:[#allocation2 + $0x420] sm:$0xff] }
 0xd0b   :  { %4784 = vmatpush1.bf16.msra.mxu1 %v4566_v36  ;;  %4744 = vmatprep.subr.bf16.mxu0 %v4507_v52  ;;  %v4667_v61 = vld [vmem:[#allocation2 + $0x628] sm:$0xff]  ;;  %v4666_v0 = vld [vmem:[#allocation2 + $0x620] sm:$0xff] }
 0xd0c   :  { %4785 = vmatprep.subr.bf16.mxu1 %v4571_v23  ;;  %v4607_v3 = vld [vmem:[#allocation2 + $0x448] sm:$0xff]  ;;  %v4606_v14 = vld [vmem:[#allocation2 + $0x440] sm:$0xff] }
 0xd0d   :  { %v4671_v4 = vld [vmem:[#allocation2 + $0x648] sm:$0xff]  ;;  %v4670_v20 = vld [vmem:[#allocation2 + $0x640] sm:$0xff] }
 0xd0e   :  { %4745 = vmatpush1.bf16.msra.mxu0 %v4506_v40  ;;  %v4611_v21 = vld [vmem:[#allocation2 + $0x468] sm:$0xff]  ;;  %v4610_v24 = vld [vmem:[#allocation2 + $0x460] sm:$0xff] }
 0xd0f   :  { %4786 = vmatpush1.bf16.msra.mxu1 %v4570_v16  ;;  %4746 = vmatprep.subr.bf16.mxu0 %v4511_v19  ;;  %v4675_v34 = vld [vmem:[#allocation2 + $0x668] sm:$0xff]  ;;  %v4674_v35 = vld [vmem:[#allocation2 + $0x660] sm:$0xff] }
 0xd10   :  { %4787 = vmatprep.subr.bf16.mxu1 %v4575_v22  ;;  %v4615_v25 = vld [vmem:[#allocation2 + $0x488] sm:$0xff]  ;;  %v4614_v15 = vld [vmem:[#allocation2 + $0x480] sm:$0xff] }
 0xd11   :  { %v4679_v30 = vld [vmem:[#allocation2 + $0x688] sm:$0xff]  ;;  %v4678_v36 = vld [vmem:[#allocation2 + $0x680] sm:$0xff] }
 0xd12   :  { %4747 = vmatpush1.bf16.msra.mxu0 %v4510_v41  ;;  %v4619_v52 = vld [vmem:[#allocation2 + $0x4a8] sm:$0xff]  ;;  %v4618_v40 = vld [vmem:[#allocation2 + $0x4a0] sm:$0xff] }
 0xd13   :  { %4788 = vmatpush1.bf16.msra.mxu1 %v4574_v42  ;;  %4748 = vmatprep.subr.bf16.mxu0 %v4515_v43  ;;  %v4683_v23 = vld [vmem:[#allocation2 + $0x6a8] sm:$0xff]  ;;  %v4682_v16 = vld [vmem:[#allocation2 + $0x6a0] sm:$0xff] }
 0xd14   :  { %4789 = vmatprep.subr.bf16.mxu1 %v4579_v49  ;;  %v4623_v19 = vld [vmem:[#allocation2 + $0x4c8] sm:$0xff]  ;;  %v4622_v41 = vld [vmem:[#allocation2 + $0x4c0] sm:$0xff] }
 0xd15   :  { %v4687_v22 = vld [vmem:[#allocation2 + $0x6c8] sm:$0xff]  ;;  %v4686_v42 = vld [vmem:[#allocation2 + $0x6c0] sm:$0xff] }
 0xd16   :  { %4749 = vmatpush1.bf16.msra.mxu0 %v4514_v51  ;;  %v4627_v43 = vld [vmem:[#allocation2 + $0x4e8] sm:$0xff]  ;;  %v4626_v51 = vld [vmem:[#allocation2 + $0x4e0] sm:$0xff] }
 0xd17   :  { %4790 = vmatpush1.bf16.msra.mxu1 %v4578_v62  ;;  %4750 = vmatprep.subr.bf16.mxu0 %v4519_v44  ;;  %v4691_v49 = vld [vmem:[#allocation2 + $0x6e8] sm:$0xff]  ;;  %v4690_v62 = vld [vmem:[#allocation2 + $0x6e0] sm:$0xff] }
 0xd18   :  { %4791 = vmatprep.subr.bf16.mxu1 %v4583_v45  ;;  %v4631_v44 = vld [vmem:[#allocation2 + $0x508] sm:$0xff] }
 0xd19   :  { %v4695_v45 = vld [vmem:[#allocation2 + $0x708] sm:$0xff] }
 0xd1a   :  { %4751 = vmatpush1.bf16.msra.mxu0 %v4518_v46  ;;  %v4630_v46 = vld [vmem:[#allocation2 + $0x500] sm:$0xff] }
 0xd1b   :  { %4792 = vmatpush1.bf16.msra.mxu1 %v4582_v48  ;;  %4752 = vmatprep.subr.bf16.mxu0 %v4523_v53  ;;  %v4694_v48 = vld [vmem:[#allocation2 + $0x700] sm:$0xff]  ;;  %v4635_v53 = vld [vmem:[#allocation2 + $0x528] sm:$0xff] }
 0xd1c   :  { %4793 = vmatprep.subr.bf16.mxu1 %v4587_v58  ;;  %v4699_v58 = vld [vmem:[#allocation2 + $0x728] sm:$0xff] }
 0xd1e   :  { %4753 = vmatpush1.bf16.msra.mxu0 %v4522_v1  ;;  %v4634_v1 = vld [vmem:[#allocation2 + $0x520] sm:$0xff] }
 0xd1f   :  { %4794 = vmatpush1.bf16.msra.mxu1 %v4586_v17  ;;  %4754 = vmatprep.subr.bf16.mxu0 %v4527_v39  ;;  %v4698_v17 = vld [vmem:[#allocation2 + $0x720] sm:$0xff]  ;;  %v4639_v39 = vld [vmem:[#allocation2 + $0x548] sm:$0xff] }
 0xd20   :  { %4795 = vmatprep.subr.bf16.mxu1 %v4591_v50  ;;  %v4703_v50 = vld [vmem:[#allocation2 + $0x748] sm:$0xff] }
 0xd22   :  { %4755 = vmatpush1.bf16.msra.mxu0 %v4526_v27  ;;  %v4638_v27 = vld [vmem:[#allocation2 + $0x540] sm:$0xff] }
 0xd23   :  { %4796 = vmatpush1.bf16.msra.mxu1 %v4590_v32  ;;  %4756 = vmatprep.subr.bf16.mxu0 %v4531_v6  ;;  %v4702_v32 = vld [vmem:[#allocation2 + $0x740] sm:$0xff]  ;;  %v4643_v6 = vld [vmem:[#allocation2 + $0x568] sm:$0xff] }
 0xd24   :  { %4797 = vmatprep.subr.bf16.mxu1 %v4595_v18  ;;  %v4707_v18 = vld [vmem:[#allocation2 + $0x768] sm:$0xff] }
 0xd26   :  { %4757 = vmatpush1.bf16.msra.mxu0 %v4530_v37  ;;  %v4642_v37 = vld [vmem:[#allocation2 + $0x560] sm:$0xff] }
 0xd27   :  { %4798 = vmatpush1.bf16.msra.mxu1 %v4594_v54  ;;  %4808 = vmatprep.subr.bf16.mxu0 %v4599_v55  ;;  %v4706_v54 = vld [vmem:[#allocation2 + $0x760] sm:$0xff]  ;;  %v4647_v55 = vld [vmem:[#allocation2 + $0x588] sm:$0xff] }
 0xd28   :  { %4849 = vmatprep.subr.bf16.mxu1 %v4663_v59  ;;  %v4711_v59 = vld [vmem:[#allocation2 + $0x788] sm:$0xff] }
 0xd29   :  { %4759 = vmatmul.mubr.bf16.vlgmr.msra.gmra.mrb[96].mxu0 %v9157_v47 }
 0xd2a   :  { %4800 = vmatmul.mubr.bf16.vlgmr.msra.gmra.mrb[96].mxu1 %v9161_v57  ;;  %4809 = vmatpush1.bf16.msra.mxu0 %v4598_v60  ;;  %v4646_v60 = vld [vmem:[#allocation2 + $0x580] sm:$0xff] }
 0xd2b   :  { %4850 = vmatpush1.bf16.msra.mxu1 %v4662_v28  ;;  %4810 = vmatprep.subr.bf16.mxu0 %v4603_v31  ;;  %v4710_v28 = vld [vmem:[#allocation2 + $0x780] sm:$0xff]  ;;  %v4651_v31 = vld [vmem:[#allocation2 + $0x5a8] sm:$0xff] }
 0xd2c   :  { %4851 = vmatprep.subr.bf16.mxu1 %v4667_v61  ;;  %4840 = vmatprep.mubr.bf16.mxu0 %v9173_v38  ;;  %v4715_v61 = vld [vmem:[#allocation2 + $0x7a8] sm:$0xff] }
 0xd2d   :  { %4881 = vmatprep.mubr.bf16.mxu1 %v9181_v2 }
 0xd2e   :  { %4811 = vmatpush1.bf16.msra.mxu0 %v4602_v63  ;;  %v4650_v63 = vld [vmem:[#allocation2 + $0x5a0] sm:$0xff] }
 0xd2f   :  { %4852 = vmatpush1.bf16.msra.mxu1 %v4666_v0  ;;  %4812 = vmatprep.subr.bf16.mxu0 %v4607_v3  ;;  %v4714_v0 = vld [vmem:[#allocation2 + $0x7a0] sm:$0xff]  ;;  %v4655_v3 = vld [vmem:[#allocation2 + $0x5c8] sm:$0xff] }
 0xd30   :  { %4853 = vmatprep.subr.bf16.mxu1 %v4671_v4  ;;  %v4719_v4 = vld [vmem:[#allocation2 + $0x7c8] sm:$0xff] }
 0xd32   :  { %4813 = vmatpush1.bf16.msra.mxu0 %v4606_v14  ;;  %v4654_v14 = vld [vmem:[#allocation2 + $0x5c0] sm:$0xff] }
 0xd33   :  { %4854 = vmatpush1.bf16.msra.mxu1 %v4670_v20  ;;  %4814 = vmatprep.subr.bf16.mxu0 %v4611_v21  ;;  %v4718_v20 = vld [vmem:[#allocation2 + $0x7c0] sm:$0xff]  ;;  %v4659_v21 = vld [vmem:[#allocation2 + $0x5e8] sm:$0xff] }
 0xd34   :  { %4855 = vmatprep.subr.bf16.mxu1 %v4675_v34  ;;  %v4723_v34 = vld [vmem:[#allocation2 + $0x7e8] sm:$0xff] }
 0xd36   :  { %4815 = vmatpush1.bf16.msra.mxu0 %v4610_v24  ;;  %v4658_v24 = vld [vmem:[#allocation2 + $0x5e0] sm:$0xff] }
 0xd37   :  { %4856 = vmatpush1.bf16.msra.mxu1 %v4674_v35  ;;  %4816 = vmatprep.subr.bf16.mxu0 %v4615_v25  ;;  %v4722_v35 = vld [vmem:[#allocation2 + $0x7e0] sm:$0xff]  ;;  %v4473_v25 = vld [vmem:[#allocation2 + $0x18] sm:$0xff] }
 0xd38   :  { %4857 = vmatprep.subr.bf16.mxu1 %v4679_v30  ;;  %v4537_v30 = vld [vmem:[#allocation2 + $0x218] sm:$0xff] }
 0xd3a   :  { %4817 = vmatpush1.bf16.msra.mxu0 %v4614_v15  ;;  %v4472_v15 = vld [vmem:[#allocation2 + $0x10] sm:$0xff] }
 0xd3b   :  { %4858 = vmatpush1.bf16.msra.mxu1 %v4678_v36  ;;  %4818 = vmatprep.subr.bf16.mxu0 %v4619_v52  ;;  %v4536_v36 = vld [vmem:[#allocation2 + $0x210] sm:$0xff]  ;;  %v4477_v52 = vld [vmem:[#allocation2 + $0x38] sm:$0xff] }
 0xd3c   :  { %4859 = vmatprep.subr.bf16.mxu1 %v4683_v23  ;;  %v4541_v23 = vld [vmem:[#allocation2 + $0x238] sm:$0xff] }
 0xd3e   :  { %4819 = vmatpush1.bf16.msra.mxu0 %v4618_v40  ;;  %v4476_v40 = vld [vmem:[#allocation2 + $0x30] sm:$0xff] }
 0xd3f   :  { %4860 = vmatpush1.bf16.msra.mxu1 %v4682_v16  ;;  %4820 = vmatprep.subr.bf16.mxu0 %v4623_v19  ;;  %v4540_v16 = vld [vmem:[#allocation2 + $0x230] sm:$0xff]  ;;  %v4481_v19 = vld [vmem:[#allocation2 + $0x58] sm:$0xff] }
 0xd40   :  { %4861 = vmatprep.subr.bf16.mxu1 %v4687_v22  ;;  %v4545_v22 = vld [vmem:[#allocation2 + $0x258] sm:$0xff] }
 0xd42   :  { %4821 = vmatpush1.bf16.msra.mxu0 %v4622_v41  ;;  %v4480_v41 = vld [vmem:[#allocation2 + $0x50] sm:$0xff] }
 0xd43   :  { %4862 = vmatpush1.bf16.msra.mxu1 %v4686_v42  ;;  %4822 = vmatprep.subr.bf16.mxu0 %v4627_v43  ;;  %v4544_v42 = vld [vmem:[#allocation2 + $0x250] sm:$0xff]  ;;  %v4485_v43 = vld [vmem:[#allocation2 + $0x78] sm:$0xff] }
 0xd44   :  { %4863 = vmatprep.subr.bf16.mxu1 %v4691_v49  ;;  %v4549_v49 = vld [vmem:[#allocation2 + $0x278] sm:$0xff] }
 0xd46   :  { %4823 = vmatpush1.bf16.msra.mxu0 %v4626_v51  ;;  %v4484_v51 = vld [vmem:[#allocation2 + $0x70] sm:$0xff] }
 0xd47   :  { %4864 = vmatpush1.bf16.msra.mxu1 %v4690_v62  ;;  %4824 = vmatprep.subr.bf16.mxu0 %v4631_v44  ;;  %v4548_v62 = vld [vmem:[#allocation2 + $0x270] sm:$0xff]  ;;  %v4489_v44 = vld [vmem:[#allocation2 + $0x98] sm:$0xff] }
 0xd48   :  { %4865 = vmatprep.subr.bf16.mxu1 %v4695_v45  ;;  %v4553_v45 = vld [vmem:[#allocation2 + $0x298] sm:$0xff] }
 0xd4a   :  { %4825 = vmatpush1.bf16.msra.mxu0 %v4630_v46  ;;  %v4488_v46 = vld [vmem:[#allocation2 + $0x90] sm:$0xff] }
 0xd4b   :  { %4866 = vmatpush1.bf16.msra.mxu1 %v4694_v48  ;;  %4826 = vmatprep.subr.bf16.mxu0 %v4635_v53  ;;  %v4552_v48 = vld [vmem:[#allocation2 + $0x290] sm:$0xff]  ;;  %v4493_v53 = vld [vmem:[#allocation2 + $0xb8] sm:$0xff] }
 0xd4c   :  { %4867 = vmatprep.subr.bf16.mxu1 %v4699_v58  ;;  %v4557_v58 = vld [vmem:[#allocation2 + $0x2b8] sm:$0xff] }
 0xd4e   :  { %4827 = vmatpush1.bf16.msra.mxu0 %v4634_v1  ;;  %v4492_v1 = vld [vmem:[#allocation2 + $0xb0] sm:$0xff] }
 0xd4f   :  { %4868 = vmatpush1.bf16.msra.mxu1 %v4698_v17  ;;  %4828 = vmatprep.subr.bf16.mxu0 %v4639_v39  ;;  %v4556_v17 = vld [vmem:[#allocation2 + $0x2b0] sm:$0xff]  ;;  %v4497_v39 = vld [vmem:[#allocation2 + $0xd8] sm:$0xff] }
 0xd50   :  { %4869 = vmatprep.subr.bf16.mxu1 %v4703_v50  ;;  %v4561_v50 = vld [vmem:[#allocation2 + $0x2d8] sm:$0xff] }
 0xd52   :  { %4829 = vmatpush1.bf16.msra.mxu0 %v4638_v27  ;;  %v4496_v27 = vld [vmem:[#allocation2 + $0xd0] sm:$0xff] }
 0xd53   :  { %4870 = vmatpush1.bf16.msra.mxu1 %v4702_v32  ;;  %4830 = vmatprep.subr.bf16.mxu0 %v4643_v6  ;;  %v4560_v32 = vld [vmem:[#allocation2 + $0x2d0] sm:$0xff]  ;;  %v4501_v6 = vld [vmem:[#allocation2 + $0xf8] sm:$0xff] }
 0xd54   :  { %4871 = vmatprep.subr.bf16.mxu1 %v4707_v18  ;;  %v4565_v18 = vld [vmem:[#allocation2 + $0x2f8] sm:$0xff] }
 0xd56   :  { %4831 = vmatpush1.bf16.msra.mxu0 %v4642_v37  ;;  %v4500_v37 = vld [vmem:[#allocation2 + $0xf0] sm:$0xff] }
 0xd57   :  { %4872 = vmatpush1.bf16.msra.mxu1 %v4706_v54  ;;  %4832 = vmatprep.subr.bf16.mxu0 %v4647_v55  ;;  %v4564_v54 = vld [vmem:[#allocation2 + $0x2f0] sm:$0xff]  ;;  %v4505_v55 = vld [vmem:[#allocation2 + $0x118] sm:$0xff] }
 0xd58   :  { %4873 = vmatprep.subr.bf16.mxu1 %v4711_v59  ;;  %v4569_v59 = vld [vmem:[#allocation2 + $0x318] sm:$0xff] }
 0xd5a   :  { %4833 = vmatpush1.bf16.msra.mxu0 %v4646_v60  ;;  %v4504_v60 = vld [vmem:[#allocation2 + $0x110] sm:$0xff] }
 0xd5b   :  { %4874 = vmatpush1.bf16.msra.mxu1 %v4710_v28  ;;  %4834 = vmatprep.subr.bf16.mxu0 %v4651_v31  ;;  %v4568_v28 = vld [vmem:[#allocation2 + $0x310] sm:$0xff]  ;;  %v4509_v31 = vld [vmem:[#allocation2 + $0x138] sm:$0xff] }
 0xd5c   :  { %4875 = vmatprep.subr.bf16.mxu1 %v4715_v61  ;;  %v4573_v61 = vld [vmem:[#allocation2 + $0x338] sm:$0xff] }
 0xd5e   :  { %4835 = vmatpush1.bf16.msra.mxu0 %v4650_v63  ;;  %v4508_v63 = vld [vmem:[#allocation2 + $0x130] sm:$0xff] }
 0xd5f   :  { %4876 = vmatpush1.bf16.msra.mxu1 %v4714_v0  ;;  %4836 = vmatprep.subr.bf16.mxu0 %v4655_v3  ;;  %v4572_v0 = vld [vmem:[#allocation2 + $0x330] sm:$0xff]  ;;  %v4513_v3 = vld [vmem:[#allocation2 + $0x158] sm:$0xff] }
 0xd60   :  { %4877 = vmatprep.subr.bf16.mxu1 %v4719_v4  ;;  %v4577_v4 = vld [vmem:[#allocation2 + $0x358] sm:$0xff] }
 0xd62   :  { %4837 = vmatpush1.bf16.msra.mxu0 %v4654_v14  ;;  %v4512_v14 = vld [vmem:[#allocation2 + $0x150] sm:$0xff] }
 0xd63   :  { %4878 = vmatpush1.bf16.msra.mxu1 %v4718_v20  ;;  %4838 = vmatprep.subr.bf16.mxu0 %v4659_v21  ;;  %v4576_v20 = vld [vmem:[#allocation2 + $0x350] sm:$0xff]  ;;  %v4517_v21 = vld [vmem:[#allocation2 + $0x178] sm:$0xff] }
 0xd64   :  { %4879 = vmatprep.subr.bf16.mxu1 %v4723_v34  ;;  %v4581_v34 = vld [vmem:[#allocation2 + $0x378] sm:$0xff] }
 0xd66   :  { %4839 = vmatpush1.bf16.msra.mxu0 %v4658_v24  ;;  %v4516_v24 = vld [vmem:[#allocation2 + $0x170] sm:$0xff] }
 0xd67   :  { %4880 = vmatpush1.bf16.msra.mxu1 %v4722_v35  ;;  %4890 = vmatprep.subr.bf16.mxu0 %v4473_v25  ;;  %v4580_v35 = vld [vmem:[#allocation2 + $0x370] sm:$0xff]  ;;  %v4521_v25 = vld [vmem:[#allocation2 + $0x198] sm:$0xff] }
 0xd68   :  { %4931 = vmatprep.subr.bf16.mxu1 %v4537_v30  ;;  %v4585_v30 = vld [vmem:[#allocation2 + $0x398] sm:$0xff] }
 0xd69   :  { %4841 = vmatmul.mubr.bf16.vlgmr.msra.gmra.mrb[100].mxu0 %v9171_v26 }
 0xd6a   :  { %4882 = vmatmul.mubr.bf16.vlgmr.msra.gmra.mrb[100].mxu1 %v9179_v33  ;;  %4891 = vmatpush1.bf16.msra.mxu0 %v4472_v15  ;;  %v4520_v15 = vld [vmem:[#allocation2 + $0x190] sm:$0xff] }
 0xd6b   :  { %4932 = vmatpush1.bf16.msra.mxu1 %v4536_v36  ;;  %4892 = vmatprep.subr.bf16.mxu0 %v4477_v52  ;;  %v4584_v36 = vld [vmem:[#allocation2 + $0x390] sm:$0xff]  ;;  %v4525_v52 = vld [vmem:[#allocation2 + $0x1b8] sm:$0xff] }
 0xd6c   :  { %4933 = vmatprep.subr.bf16.mxu1 %v4541_v23  ;;  %4922 = vmatprep.mubr.bf16.mxu0 %v9159_v56  ;;  %v4589_v23 = vld [vmem:[#allocation2 + $0x3b8] sm:$0xff] }
 0xd6d   :  { %4963 = vmatprep.mubr.bf16.mxu1 %v9163_v29 }
 0xd6e   :  { %4893 = vmatpush1.bf16.msra.mxu0 %v4476_v40  ;;  %v4524_v40 = vld [vmem:[#allocation2 + $0x1b0] sm:$0xff] }
 0xd6f   :  { %4934 = vmatpush1.bf16.msra.mxu1 %v4540_v16  ;;  %4894 = vmatprep.subr.bf16.mxu0 %v4481_v19  ;;  %v4588_v16 = vld [vmem:[#allocation2 + $0x3b0] sm:$0xff]  ;;  %v4529_v19 = vld [vmem:[#allocation2 + $0x1d8] sm:$0xff] }
 0xd70   :  { %4935 = vmatprep.subr.bf16.mxu1 %v4545_v22  ;;  %v4593_v22 = vld [vmem:[#allocation2 + $0x3d8] sm:$0xff] }
 0xd72   :  { %4895 = vmatpush1.bf16.msra.mxu0 %v4480_v41  ;;  %v4528_v41 = vld [vmem:[#allocation2 + $0x1d0] sm:$0xff] }
 0xd73   :  { %4936 = vmatpush1.bf16.msra.mxu1 %v4544_v42  ;;  %4896 = vmatprep.subr.bf16.mxu0 %v4485_v43  ;;  %v4592_v42 = vld [vmem:[#allocation2 + $0x3d0] sm:$0xff]  ;;  %v4533_v43 = vld [vmem:[#allocation2 + $0x1f8] sm:$0xff] }
 0xd74   :  { %4937 = vmatprep.subr.bf16.mxu1 %v4549_v49  ;;  %v4597_v49 = vld [vmem:[#allocation2 + $0x3f8] sm:$0xff] }
 0xd76   :  { %4897 = vmatpush1.bf16.msra.mxu0 %v4484_v51  ;;  %v4532_v51 = vld [vmem:[#allocation2 + $0x1f0] sm:$0xff] }
 0xd77   :  { %4938 = vmatpush1.bf16.msra.mxu1 %v4548_v62  ;;  %4898 = vmatprep.subr.bf16.mxu0 %v4489_v44  ;;  %v4596_v62 = vld [vmem:[#allocation2 + $0x3f0] sm:$0xff]  ;;  %v4601_v44 = vld [vmem:[#allocation2 + $0x418] sm:$0xff] }
 0xd78   :  { %4939 = vmatprep.subr.bf16.mxu1 %v4553_v45  ;;  %v4665_v45 = vld [vmem:[#allocation2 + $0x618] sm:$0xff] }
 0xd7a   :  { %4899 = vmatpush1.bf16.msra.mxu0 %v4488_v46  ;;  %v4600_v46 = vld [vmem:[#allocation2 + $0x410] sm:$0xff] }
 0xd7b   :  { %4940 = vmatpush1.bf16.msra.mxu1 %v4552_v48  ;;  %4900 = vmatprep.subr.bf16.mxu0 %v4493_v53  ;;  %v4664_v48 = vld [vmem:[#allocation2 + $0x610] sm:$0xff]  ;;  %v4605_v53 = vld [vmem:[#allocation2 + $0x438] sm:$0xff] }
 0xd7c   :  { %4941 = vmatprep.subr.bf16.mxu1 %v4557_v58  ;;  %v4669_v58 = vld [vmem:[#allocation2 + $0x638] sm:$0xff] }
 0xd7e   :  { %4901 = vmatpush1.bf16.msra.mxu0 %v4492_v1  ;;  %v4604_v1 = vld [vmem:[#allocation2 + $0x430] sm:$0xff] }
 0xd7f   :  { %4942 = vmatpush1.bf16.msra.mxu1 %v4556_v17  ;;  %4902 = vmatprep.subr.bf16.mxu0 %v4497_v39  ;;  %v4668_v17 = vld [vmem:[#allocation2 + $0x630] sm:$0xff]  ;;  %v4609_v39 = vld [vmem:[#allocation2 + $0x458] sm:$0xff] }
 0xd80   :  { %4943 = vmatprep.subr.bf16.mxu1 %v4561_v50  ;;  %v4673_v50 = vld [vmem:[#allocation2 + $0x658] sm:$0xff] }
 0xd82   :  { %4903 = vmatpush1.bf16.msra.mxu0 %v4496_v27  ;;  %v4608_v27 = vld [vmem:[#allocation2 + $0x450] sm:$0xff] }
 0xd83   :  { %4944 = vmatpush1.bf16.msra.mxu1 %v4560_v32  ;;  %4904 = vmatprep.subr.bf16.mxu0 %v4501_v6  ;;  %v4672_v32 = vld [vmem:[#allocation2 + $0x650] sm:$0xff]  ;;  %v4613_v6 = vld [vmem:[#allocation2 + $0x478] sm:$0xff] }
 0xd84   :  { %4945 = vmatprep.subr.bf16.mxu1 %v4565_v18  ;;  %v4677_v18 = vld [vmem:[#allocation2 + $0x678] sm:$0xff] }
 0xd86   :  { %4905 = vmatpush1.bf16.msra.mxu0 %v4500_v37  ;;  %v4612_v37 = vld [vmem:[#allocation2 + $0x470] sm:$0xff] }
 0xd87   :  { %4946 = vmatpush1.bf16.msra.mxu1 %v4564_v54  ;;  %4906 = vmatprep.subr.bf16.mxu0 %v4505_v55  ;;  %v4676_v54 = vld [vmem:[#allocation2 + $0x670] sm:$0xff]  ;;  %v4617_v55 = vld [vmem:[#allocation2 + $0x498] sm:$0xff] }
 0xd88   :  { %4947 = vmatprep.subr.bf16.mxu1 %v4569_v59  ;;  %v4681_v59 = vld [vmem:[#allocation2 + $0x698] sm:$0xff] }
 0xd8a   :  { %4907 = vmatpush1.bf16.msra.mxu0 %v4504_v60  ;;  %v4616_v60 = vld [vmem:[#allocation2 + $0x490] sm:$0xff] }
 0xd8b   :  { %4948 = vmatpush1.bf16.msra.mxu1 %v4568_v28  ;;  %4908 = vmatprep.subr.bf16.mxu0 %v4509_v31  ;;  %v4680_v28 = vld [vmem:[#allocation2 + $0x690] sm:$0xff]  ;;  %v4621_v31 = vld [vmem:[#allocation2 + $0x4b8] sm:$0xff] }
 0xd8c   :  { %4949 = vmatprep.subr.bf16.mxu1 %v4573_v61  ;;  %v4685_v61 = vld [vmem:[#allocation2 + $0x6b8] sm:$0xff] }
 0xd8e   :  { %4909 = vmatpush1.bf16.msra.mxu0 %v4508_v63  ;;  %v4620_v63 = vld [vmem:[#allocation2 + $0x4b0] sm:$0xff] }
 0xd8f   :  { %4950 = vmatpush1.bf16.msra.mxu1 %v4572_v0  ;;  %4910 = vmatprep.subr.bf16.mxu0 %v4513_v3  ;;  %v4684_v0 = vld [vmem:[#allocation2 + $0x6b0] sm:$0xff]  ;;  %v4625_v3 = vld [vmem:[#allocation2 + $0x4d8] sm:$0xff] }
 0xd90   :  { %4951 = vmatprep.subr.bf16.mxu1 %v4577_v4  ;;  %v4689_v4 = vld [vmem:[#allocation2 + $0x6d8] sm:$0xff] }
 0xd92   :  { %4911 = vmatpush1.bf16.msra.mxu0 %v4512_v14  ;;  %v4624_v14 = vld [vmem:[#allocation2 + $0x4d0] sm:$0xff] }
 0xd93   :  { %4952 = vmatpush1.bf16.msra.mxu1 %v4576_v20  ;;  %4912 = vmatprep.subr.bf16.mxu0 %v4517_v21  ;;  %v4688_v20 = vld [vmem:[#allocation2 + $0x6d0] sm:$0xff]  ;;  %v4629_v21 = vld [vmem:[#allocation2 + $0x4f8] sm:$0xff] }
 0xd94   :  { %4953 = vmatprep.subr.bf16.mxu1 %v4581_v34  ;;  %v4693_v34 = vld [vmem:[#allocation2 + $0x6f8] sm:$0xff] }
 0xd96   :  { %4913 = vmatpush1.bf16.msra.mxu0 %v4516_v24  ;;  %v4628_v24 = vld [vmem:[#allocation2 + $0x4f0] sm:$0xff] }
 0xd97   :  { %4954 = vmatpush1.bf16.msra.mxu1 %v4580_v35  ;;  %4914 = vmatprep.subr.bf16.mxu0 %v4521_v25  ;;  %v4692_v35 = vld [vmem:[#allocation2 + $0x6f0] sm:$0xff]  ;;  %v4633_v25 = vld [vmem:[#allocation2 + $0x518] sm:$0xff] }
 0xd98   :  { %4955 = vmatprep.subr.bf16.mxu1 %v4585_v30  ;;  %v4697_v30 = vld [vmem:[#allocation2 + $0x718] sm:$0xff] }
 0xd9a   :  { %4915 = vmatpush1.bf16.msra.mxu0 %v4520_v15  ;;  %v4632_v15 = vld [vmem:[#allocation2 + $0x510] sm:$0xff] }
 0xd9b   :  { %4956 = vmatpush1.bf16.msra.mxu1 %v4584_v36  ;;  %4916 = vmatprep.subr.bf16.mxu0 %v4525_v52  ;;  %v4696_v36 = vld [vmem:[#allocation2 + $0x710] sm:$0xff]  ;;  %v4637_v52 = vld [vmem:[#allocation2 + $0x538] sm:$0xff] }
 0xd9c   :  { %4957 = vmatprep.subr.bf16.mxu1 %v4589_v23  ;;  %v4701_v23 = vld [vmem:[#allocation2 + $0x738] sm:$0xff] }
 0xd9e   :  { %4917 = vmatpush1.bf16.msra.mxu0 %v4524_v40  ;;  %v4636_v40 = vld [vmem:[#allocation2 + $0x530] sm:$0xff] }
 0xd9f   :  { %4958 = vmatpush1.bf16.msra.mxu1 %v4588_v16  ;;  %4918 = vmatprep.subr.bf16.mxu0 %v4529_v19  ;;  %v4700_v16 = vld [vmem:[#allocation2 + $0x730] sm:$0xff]  ;;  %v4641_v19 = vld [vmem:[#allocation2 + $0x558] sm:$0xff] }
 0xda0   :  { %4959 = vmatprep.subr.bf16.mxu1 %v4593_v22  ;;  %v4705_v22 = vld [vmem:[#allocation2 + $0x758] sm:$0xff] }
 0xda2   :  { %4919 = vmatpush1.bf16.msra.mxu0 %v4528_v41  ;;  %v4640_v41 = vld [vmem:[#allocation2 + $0x550] sm:$0xff] }
 0xda3   :  { %4960 = vmatpush1.bf16.msra.mxu1 %v4592_v42  ;;  %4920 = vmatprep.subr.bf16.mxu0 %v4533_v43  ;;  %v4704_v42 = vld [vmem:[#allocation2 + $0x750] sm:$0xff]  ;;  %v4645_v43 = vld [vmem:[#allocation2 + $0x578] sm:$0xff] }
 0xda4   :  { %4961 = vmatprep.subr.bf16.mxu1 %v4597_v49  ;;  %v4709_v49 = vld [vmem:[#allocation2 + $0x778] sm:$0xff] }
 0xda6   :  { %4921 = vmatpush1.bf16.msra.mxu0 %v4532_v51  ;;  %v4644_v51 = vld [vmem:[#allocation2 + $0x570] sm:$0xff] }
 0xda7   :  { %4962 = vmatpush1.bf16.msra.mxu1 %v4596_v62  ;;  %4972 = vmatprep.subr.bf16.mxu0 %v4601_v44  ;;  %v4708_v62 = vld [vmem:[#allocation2 + $0x770] sm:$0xff]  ;;  %v4649_v44 = vld [vmem:[#allocation2 + $0x598] sm:$0xff] }
 0xda8   :  { %5013 = vmatprep.subr.bf16.mxu1 %v4665_v45  ;;  %v4713_v45 = vld [vmem:[#allocation2 + $0x798] sm:$0xff] }
 0xda9   :  { %4923 = vmatmul.mubr.bf16.vlgmr.msra.gmra.mrb[104].mxu0 %v9157_v47 }
 0xdaa   :  { %4964 = vmatmul.mubr.bf16.vlgmr.msra.gmra.mrb[104].mxu1 %v9161_v57  ;;  %4973 = vmatpush1.bf16.msra.mxu0 %v4600_v46  ;;  %v4648_v46 = vld [vmem:[#allocation2 + $0x590] sm:$0xff] }
 0xdab   :  { %5014 = vmatpush1.bf16.msra.mxu1 %v4664_v48  ;;  %4974 = vmatprep.subr.bf16.mxu0 %v4605_v53  ;;  %v4712_v48 = vld [vmem:[#allocation2 + $0x790] sm:$0xff]  ;;  %v4653_v53 = vld [vmem:[#allocation2 + $0x5b8] sm:$0xff] }
 0xdac   :  { %5015 = vmatprep.subr.bf16.mxu1 %v4669_v58  ;;  %5004 = vmatprep.mubr.bf16.mxu0 %v9173_v38  ;;  %v4717_v58 = vld [vmem:[#allocation2 + $0x7b8] sm:$0xff] }
 0xdad   :  { %5045 = vmatprep.mubr.bf16.mxu1 %v9181_v2 }
 0xdae   :  { %4975 = vmatpush1.bf16.msra.mxu0 %v4604_v1  ;;  %v4652_v1 = vld [vmem:[#allocation2 + $0x5b0] sm:$0xff] }
 0xdaf   :  { %5016 = vmatpush1.bf16.msra.mxu1 %v4668_v17  ;;  %4976 = vmatprep.subr.bf16.mxu0 %v4609_v39  ;;  %v4716_v17 = vld [vmem:[#allocation2 + $0x7b0] sm:$0xff]  ;;  %v4657_v39 = vld [vmem:[#allocation2 + $0x5d8] sm:$0xff] }
 0xdb0   :  { %5017 = vmatprep.subr.bf16.mxu1 %v4673_v50  ;;  %v4721_v50 = vld [vmem:[#allocation2 + $0x7d8] sm:$0xff] }
 0xdb2   :  { %4977 = vmatpush1.bf16.msra.mxu0 %v4608_v27  ;;  %v4656_v27 = vld [vmem:[#allocation2 + $0x5d0] sm:$0xff] }
 0xdb3   :  { %5018 = vmatpush1.bf16.msra.mxu1 %v4672_v32  ;;  %4978 = vmatprep.subr.bf16.mxu0 %v4613_v6  ;;  %v4720_v32 = vld [vmem:[#allocation2 + $0x7d0] sm:$0xff]  ;;  %v4661_v6 = vld [vmem:[#allocation2 + $0x5f8] sm:$0xff] }
 0xdb4   :  { %5019 = vmatprep.subr.bf16.mxu1 %v4677_v18  ;;  %v4725_v18 = vld [vmem:[#allocation2 + $0x7f8] sm:$0xff] }
 0xdb6   :  { %4979 = vmatpush1.bf16.msra.mxu0 %v4612_v37  ;;  %v4660_v37 = vld [vmem:[#allocation2 + $0x5f0] sm:$0xff] }
 0xdb7   :  { %5020 = vmatpush1.bf16.msra.mxu1 %v4676_v54  ;;  %4980 = vmatprep.subr.bf16.mxu0 %v4617_v55  ;;  %v4724_v54 = vld [vmem:[#allocation2 + $0x7f0] sm:$0xff] }
 0xdb8   :  { %5021 = vmatprep.subr.bf16.mxu1 %v4681_v59 }
 0xdba   :  { %4981 = vmatpush1.bf16.msra.mxu0 %v4616_v60 }
 0xdbb   :  { %5022 = vmatpush1.bf16.msra.mxu1 %v4680_v28  ;;  %4982 = vmatprep.subr.bf16.mxu0 %v4621_v31 }
 0xdbc   :  { %5023 = vmatprep.subr.bf16.mxu1 %v4685_v61 }
 0xdbe   :  { %4983 = vmatpush1.bf16.msra.mxu0 %v4620_v63 }
 0xdbf   :  { %5024 = vmatpush1.bf16.msra.mxu1 %v4684_v0  ;;  %4984 = vmatprep.subr.bf16.mxu0 %v4625_v3 }
 0xdc0   :  { %5025 = vmatprep.subr.bf16.mxu1 %v4689_v4 }
 0xdc2   :  { %4985 = vmatpush1.bf16.msra.mxu0 %v4624_v14 }
 0xdc3   :  { %5026 = vmatpush1.bf16.msra.mxu1 %v4688_v20  ;;  %4986 = vmatprep.subr.bf16.mxu0 %v4629_v21 }
 0xdc4   :  { %5027 = vmatprep.subr.bf16.mxu1 %v4693_v34 }
 0xdc6   :  { %4987 = vmatpush1.bf16.msra.mxu0 %v4628_v24 }
 0xdc7   :  { %5028 = vmatpush1.bf16.msra.mxu1 %v4692_v35  ;;  %4988 = vmatprep.subr.bf16.mxu0 %v4633_v25 }
 0xdc8   :  { %5029 = vmatprep.subr.bf16.mxu1 %v4697_v30 }
 0xdca   :  { %4989 = vmatpush1.bf16.msra.mxu0 %v4632_v15 }
 0xdcb   :  { %5030 = vmatpush1.bf16.msra.mxu1 %v4696_v36  ;;  %4990 = vmatprep.subr.bf16.mxu0 %v4637_v52 }
 0xdcc   :  { %5031 = vmatprep.subr.bf16.mxu1 %v4701_v23 }
 0xdce   :  { %4991 = vmatpush1.bf16.msra.mxu0 %v4636_v40 }
 0xdcf   :  { %5032 = vmatpush1.bf16.msra.mxu1 %v4700_v16  ;;  %4992 = vmatprep.subr.bf16.mxu0 %v4641_v19 }
 0xdd0   :  { %5033 = vmatprep.subr.bf16.mxu1 %v4705_v22 }
 0xdd2   :  { %4993 = vmatpush1.bf16.msra.mxu0 %v4640_v41 }
 0xdd3   :  { %5034 = vmatpush1.bf16.msra.mxu1 %v4704_v42  ;;  %4994 = vmatprep.subr.bf16.mxu0 %v4645_v43 }
 0xdd4   :  { %5035 = vmatprep.subr.bf16.mxu1 %v4709_v49 }
 0xdd6   :  { %4995 = vmatpush1.bf16.msra.mxu0 %v4644_v51 }
 0xdd7   :  { %5036 = vmatpush1.bf16.msra.mxu1 %v4708_v62  ;;  %4996 = vmatprep.subr.bf16.mxu0 %v4649_v44 }
 0xdd8   :  { %5037 = vmatprep.subr.bf16.mxu1 %v4713_v45 }
 0xdda   :  { %4997 = vmatpush1.bf16.msra.mxu0 %v4648_v46 }
 0xddb   :  { %5038 = vmatpush1.bf16.msra.mxu1 %v4712_v48  ;;  %4998 = vmatprep.subr.bf16.mxu0 %v4653_v53 }
 0xddc   :  { %5039 = vmatprep.subr.bf16.mxu1 %v4717_v58 }
 0xdde   :  { %4999 = vmatpush1.bf16.msra.mxu0 %v4652_v1 }
 0xddf   :  { %5040 = vmatpush1.bf16.msra.mxu1 %v4716_v17  ;;  %5000 = vmatprep.subr.bf16.mxu0 %v4657_v39 }
 0xde0   :  { %5041 = vmatprep.subr.bf16.mxu1 %v4721_v50 }
 0xde2   :  { %5001 = vmatpush1.bf16.msra.mxu0 %v4656_v27 }
 0xde3   :  { %5042 = vmatpush1.bf16.msra.mxu1 %v4720_v32  ;;  %5002 = vmatprep.subr.bf16.mxu0 %v4661_v6 }
 0xde4   :  { %5043 = vmatprep.subr.bf16.mxu1 %v4725_v18 }
 0xde6   :  { %5003 = vmatpush1.bf16.msra.mxu0 %v4660_v37 }
 0xde7   :  { %5044 = vmatpush1.bf16.msra.mxu1 %v4724_v54 }
 0xde9   :  { %5005 = vmatmul.mubr.bf16.vlgmr.msra.gmra.mrb[108].mxu0 %v9171_v26 }
 0xdea   :  { %5046 = vmatmul.mubr.bf16.vlgmr.msra.gmra.mrb[108].mxu1 %v9179_v33 }
 0xdfc   :  { %v4760_v55 = vpop.f32.mrb[96].mxu0 }
 0xdfd   :  { %v4801_v59 = vpop.f32.mrb[96].mxu1  ;;  %v4762_v28 = vpop.f32.mrb[97].mxu0 }
 0xdfe   :  { %v4802_v60 = vadd.f32 %v4801_v59, %v4760_v55  ;;  %v4803_v31 = vpop.f32.mrb[97].mxu1  ;;  %v4764_v63 = vpop.f32.mrb[98].mxu0 }
 0xdff   :  { %v4804_v61 = vadd.f32 %v4803_v31, %v4762_v28  ;;  %v4805_v0 = vpop.f32.mrb[98].mxu1  ;;  %v4765_v3 = vpop.f32.mrb[99].mxu0 }
 0xe00   :  { %v4806_v4 = vpop.f32.mrb[99].mxu1 }
 0xe3c   :  { %v4842_v14 = vpop.f32.mrb[100].mxu0 }
 0xe3d   :  { %v4883_v20 = vpop.f32.mrb[100].mxu1  ;;  %v4843_v21 = vadd.f32 %v4842_v14, %v4802_v60  ;;  %v4844_v34 = vpop.f32.mrb[101].mxu0 }
 0xe3e   :  { %v4885_v24 = vpop.f32.mrb[101].mxu1  ;;  %v4845_v35 = vadd.f32 %v4844_v34, %v4804_v61  ;;  %v4846_v25 = vpop.f32.mrb[102].mxu0 }
 0xe3f   :  { %v4887_v30 = vpop.f32.mrb[102].mxu1  ;;  %v9214_v15 = vadd.f32 %v4883_v20, %v4843_v21  ;;  %v4847_v36 = vpop.f32.mrb[103].mxu0 }
 0xe40   :  { %v4888_v52 = vpop.f32.mrb[103].mxu1  ;;  %v9216_v23 = vadd.f32 %v4885_v24, %v4845_v35 }
 0xe7c   :  { %v4924_v40 = vpop.f32.mrb[104].mxu0 }
 0xe7d   :  { %v4965_v16 = vpop.f32.mrb[104].mxu1  ;;  %v4926_v22 = vpop.f32.mrb[105].mxu0 }
 0xe7e   :  { %v4966_v19 = vadd.f32 %v4965_v16, %v4924_v40  ;;  %v4967_v41 = vpop.f32.mrb[105].mxu1  ;;  %v4928_v43 = vpop.f32.mrb[106].mxu0 }
 0xe7f   :  { %v4968_v42 = vadd.f32 %v4967_v41, %v4926_v22  ;;  %v4969_v49 = vpop.f32.mrb[106].mxu1  ;;  %v4929_v51 = vpop.f32.mrb[107].mxu0 }
 0xe80   :  { %v4970_v62 = vpop.f32.mrb[107].mxu1 }
 0xebc   :  { %v5006_v44 = vpop.f32.mrb[108].mxu0 }
 0xebd   :  { %v5047_v45 = vpop.f32.mrb[108].mxu1  ;;  %v5007_v46 = vadd.f32 %v5006_v44, %v4966_v19  ;;  %v5008_v48 = vpop.f32.mrb[109].mxu0 }
 0xebe   :  { %v5049_v53 = vpop.f32.mrb[109].mxu1  ;;  %v5009_v58 = vadd.f32 %v5008_v48, %v4968_v42  ;;  %v5010_v1 = vpop.f32.mrb[110].mxu0 }
 0xebf   :  { %v5051_v17 = vpop.f32.mrb[110].mxu1  ;;  %v9218_v39 = vadd.f32 %v5047_v45, %v5007_v46  ;;  %v5011_v50 = vpop.f32.mrb[111].mxu0 }
 0xec0   :  { %v5052_v27 = vpop.f32.mrb[111].mxu1  ;;  %v9220_v32 = vadd.f32 %v5049_v53, %v5009_v58 }
 0xec1   :  { %8501 = dma.done.wait [#allocation3 + $0x1], 32768 }
 0xec2   :  { %8502 = vsyncadd [#allocation3 + $0x1], 4294934528  ;;  %5379 = vmatprep.mubr.bf16.mxu0 %v9159_v56  ;;  %5420 = vmatprep.mubr.bf16.mxu1 %v9163_v29  ;;  %5072 = sst [smem:[#allocation39]] %s8520_s25  ;;  %s5056_s24 = scalar_lea.hbm %s9639_s2, 262144 }
 0xec3   :  { %5074 = sst [smem:[#allocation39 + $0x1]] %s8520_s25  ;;  %s8540_s30 = smov [#allocation38]  }
 0xec4   :  { %5076 = sst [smem:[#allocation39 + $0x2]] %s8522_s26 }
 0xec5   :  { %5078 = sst [smem:[#allocation39 + $0x3]] %s8523_s11 }
 0xec6   :  { %5080 = sst [smem:[#allocation39 + $0x4]] %s8524_s7 }
 0xec7   :  { %5082 = sst [smem:[#allocation39 + $0x5]] %s8525_s22 }
 0xec8   :  { %5084 = sst [smem:[#allocation39 + $0x6]] %s8526_s29 }
 0xec9   :  { %5086 = sst [smem:[#allocation39 + $0x7]] %s8523_s11 }
 0xeca   :  { %5088 = sst [smem:[#allocation39 + $0x8]] %s8522_s26 }
 0xecb   :  { %5090 = dma.general %s5056_s24, 32768, %s8738_s6, %s8528_s17, %s8540_s30, [#allocation39], %s8734_s1, 0  }
 0xecc   :  { %v5092_v6 = vld [vmem:[#allocation2 + $0x808] sm:$0xff]  ;;  %v5091_v37 = vld [vmem:[#allocation2 + $0x800] sm:$0xff] }
 0xecd   :  { %v5156_v18 = vld [vmem:[#allocation2 + $0xa08] sm:$0xff]  ;;  %5347 = vmatprep.subr.bf16.mxu0 %v5092_v6  ;;  %v5155_v54 = vld [vmem:[#allocation2 + $0xa00] sm:$0xff] }
 0xece   :  { %5388 = vmatprep.subr.bf16.mxu1 %v5156_v18  ;;  %v5096_v55 = vld [vmem:[#allocation2 + $0x828] sm:$0xff]  ;;  %5348 = vmatpush1.bf16.msra.mxu0 %v5091_v37  ;;  %v5095_v60 = vld [vmem:[#allocation2 + $0x820] sm:$0xff] }
 0xecf   :  { %v5160_v59 = vld [vmem:[#allocation2 + $0xa28] sm:$0xff]  ;;  %5389 = vmatpush1.bf16.msra.mxu1 %v5155_v54  ;;  %5349 = vmatprep.subr.bf16.mxu0 %v5096_v55  ;;  %v5159_v28 = vld [vmem:[#allocation2 + $0xa20] sm:$0xff] }
 0xed0   :  { %5390 = vmatprep.subr.bf16.mxu1 %v5160_v59  ;;  %v5100_v31 = vld [vmem:[#allocation2 + $0x848] sm:$0xff]  ;;  %v5099_v63 = vld [vmem:[#allocation2 + $0x840] sm:$0xff] }
 0xed1   :  { %v5164_v61 = vld [vmem:[#allocation2 + $0xa48] sm:$0xff]  ;;  %v5163_v0 = vld [vmem:[#allocation2 + $0xa40] sm:$0xff] }
 0xed2   :  { %5350 = vmatpush1.bf16.msra.mxu0 %v5095_v60  ;;  %v5104_v3 = vld [vmem:[#allocation2 + $0x868] sm:$0xff]  ;;  %v5103_v14 = vld [vmem:[#allocation2 + $0x860] sm:$0xff] }
 0xed3   :  { %5391 = vmatpush1.bf16.msra.mxu1 %v5159_v28  ;;  %5351 = vmatprep.subr.bf16.mxu0 %v5100_v31  ;;  %v5168_v4 = vld [vmem:[#allocation2 + $0xa68] sm:$0xff]  ;;  %v5167_v20 = vld [vmem:[#allocation2 + $0xa60] sm:$0xff] }
 0xed4   :  { %5392 = vmatprep.subr.bf16.mxu1 %v5164_v61  ;;  %v5108_v21 = vld [vmem:[#allocation2 + $0x888] sm:$0xff]  ;;  %v5107_v24 = vld [vmem:[#allocation2 + $0x880] sm:$0xff] }
 0xed5   :  { %v5172_v34 = vld [vmem:[#allocation2 + $0xa88] sm:$0xff]  ;;  %v5171_v35 = vld [vmem:[#allocation2 + $0xa80] sm:$0xff] }
 0xed6   :  { %5352 = vmatpush1.bf16.msra.mxu0 %v5099_v63  ;;  %v5112_v25 = vld [vmem:[#allocation2 + $0x8a8] sm:$0xff]  ;;  %v5111_v36 = vld [vmem:[#allocation2 + $0x8a0] sm:$0xff] }
 0xed7   :  { %5393 = vmatpush1.bf16.msra.mxu1 %v5163_v0  ;;  %5353 = vmatprep.subr.bf16.mxu0 %v5104_v3  ;;  %v5176_v30 = vld [vmem:[#allocation2 + $0xaa8] sm:$0xff]  ;;  %v5175_v52 = vld [vmem:[#allocation2 + $0xaa0] sm:$0xff] }
 0xed8   :  { %5394 = vmatprep.subr.bf16.mxu1 %v5168_v4  ;;  %v5116_v40 = vld [vmem:[#allocation2 + $0x8c8] sm:$0xff]  ;;  %v5115_v19 = vld [vmem:[#allocation2 + $0x8c0] sm:$0xff] }
 0xed9   :  { %v5180_v16 = vld [vmem:[#allocation2 + $0xac8] sm:$0xff]  ;;  %v5179_v22 = vld [vmem:[#allocation2 + $0xac0] sm:$0xff] }
 0xeda   :  { %5354 = vmatpush1.bf16.msra.mxu0 %v5103_v14  ;;  %v5120_v41 = vld [vmem:[#allocation2 + $0x8e8] sm:$0xff]  ;;  %v5119_v43 = vld [vmem:[#allocation2 + $0x8e0] sm:$0xff] }
 0xedb   :  { %5395 = vmatpush1.bf16.msra.mxu1 %v5167_v20  ;;  %5355 = vmatprep.subr.bf16.mxu0 %v5108_v21  ;;  %v5184_v42 = vld [vmem:[#allocation2 + $0xae8] sm:$0xff]  ;;  %v5183_v49 = vld [vmem:[#allocation2 + $0xae0] sm:$0xff] }
 0xedc   :  { %5396 = vmatprep.subr.bf16.mxu1 %v5172_v34  ;;  %v5124_v51 = vld [vmem:[#allocation2 + $0x908] sm:$0xff]  ;;  %v5123_v44 = vld [vmem:[#allocation2 + $0x900] sm:$0xff] }
 0xedd   :  { %v5188_v62 = vld [vmem:[#allocation2 + $0xb08] sm:$0xff]  ;;  %v5187_v45 = vld [vmem:[#allocation2 + $0xb00] sm:$0xff] }
 0xede   :  { %5356 = vmatpush1.bf16.msra.mxu0 %v5107_v24  ;;  %v5128_v46 = vld [vmem:[#allocation2 + $0x928] sm:$0xff]  ;;  %v5127_v53 = vld [vmem:[#allocation2 + $0x920] sm:$0xff] }
 0xedf   :  { %5397 = vmatpush1.bf16.msra.mxu1 %v5171_v35  ;;  %5357 = vmatprep.subr.bf16.mxu0 %v5112_v25  ;;  %v5192_v48 = vld [vmem:[#allocation2 + $0xb28] sm:$0xff]  ;;  %v5191_v58 = vld [vmem:[#allocation2 + $0xb20] sm:$0xff] }
 0xee0   :  { %5398 = vmatprep.subr.bf16.mxu1 %v5176_v30  ;;  %v5132_v1 = vld [vmem:[#allocation2 + $0x948] sm:$0xff]  ;;  %v5131_v50 = vld [vmem:[#allocation2 + $0x940] sm:$0xff] }
 0xee1   :  { %v5196_v17 = vld [vmem:[#allocation2 + $0xb48] sm:$0xff]  ;;  %v5195_v27 = vld [vmem:[#allocation2 + $0xb40] sm:$0xff] }
 0xee2   :  { %5358 = vmatpush1.bf16.msra.mxu0 %v5111_v36  ;;  %v5136_v6 = vld [vmem:[#allocation2 + $0x968] sm:$0xff]  ;;  %v5135_v37 = vld [vmem:[#allocation2 + $0x960] sm:$0xff] }
 0xee3   :  { %5399 = vmatpush1.bf16.msra.mxu1 %v5175_v52  ;;  %5359 = vmatprep.subr.bf16.mxu0 %v5116_v40  ;;  %v5200_v18 = vld [vmem:[#allocation2 + $0xb68] sm:$0xff]  ;;  %v5199_v54 = vld [vmem:[#allocation2 + $0xb60] sm:$0xff] }
 0xee4   :  { %5400 = vmatprep.subr.bf16.mxu1 %v5180_v16  ;;  %v5140_v55 = vld [vmem:[#allocation2 + $0x988] sm:$0xff]  ;;  %v5139_v60 = vld [vmem:[#allocation2 + $0x980] sm:$0xff] }
 0xee5   :  { %v5204_v59 = vld [vmem:[#allocation2 + $0xb88] sm:$0xff]  ;;  %v5203_v28 = vld [vmem:[#allocation2 + $0xb80] sm:$0xff] }
 0xee6   :  { %5360 = vmatpush1.bf16.msra.mxu0 %v5115_v19  ;;  %v5144_v31 = vld [vmem:[#allocation2 + $0x9a8] sm:$0xff]  ;;  %v5143_v63 = vld [vmem:[#allocation2 + $0x9a0] sm:$0xff] }
 0xee7   :  { %5401 = vmatpush1.bf16.msra.mxu1 %v5179_v22  ;;  %5361 = vmatprep.subr.bf16.mxu0 %v5120_v41  ;;  %v5208_v61 = vld [vmem:[#allocation2 + $0xba8] sm:$0xff]  ;;  %v5207_v0 = vld [vmem:[#allocation2 + $0xba0] sm:$0xff] }
 0xee8   :  { %5402 = vmatprep.subr.bf16.mxu1 %v5184_v42  ;;  %v5148_v3 = vld [vmem:[#allocation2 + $0x9c8] sm:$0xff]  ;;  %v5147_v14 = vld [vmem:[#allocation2 + $0x9c0] sm:$0xff] }
 0xee9   :  { %v5212_v4 = vld [vmem:[#allocation2 + $0xbc8] sm:$0xff]  ;;  %v5211_v20 = vld [vmem:[#allocation2 + $0xbc0] sm:$0xff] }
 0xeea   :  { %5362 = vmatpush1.bf16.msra.mxu0 %v5119_v43  ;;  %v5152_v21 = vld [vmem:[#allocation2 + $0x9e8] sm:$0xff]  ;;  %v5151_v24 = vld [vmem:[#allocation2 + $0x9e0] sm:$0xff] }
 0xeeb   :  { %5403 = vmatpush1.bf16.msra.mxu1 %v5183_v49  ;;  %5363 = vmatprep.subr.bf16.mxu0 %v5124_v51  ;;  %v5216_v34 = vld [vmem:[#allocation2 + $0xbe8] sm:$0xff]  ;;  %v5215_v35 = vld [vmem:[#allocation2 + $0xbe0] sm:$0xff] }
 0xeec   :  { %5404 = vmatprep.subr.bf16.mxu1 %v5188_v62  ;;  %v5220_v25 = vld [vmem:[#allocation2 + $0xc08] sm:$0xff]  ;;  %v5219_v36 = vld [vmem:[#allocation2 + $0xc00] sm:$0xff] }
 0xeed   :  { %v5284_v30 = vld [vmem:[#allocation2 + $0xe08] sm:$0xff]  ;;  %v5283_v52 = vld [vmem:[#allocation2 + $0xe00] sm:$0xff] }
 0xeee   :  { %5364 = vmatpush1.bf16.msra.mxu0 %v5123_v44  ;;  %v5224_v40 = vld [vmem:[#allocation2 + $0xc28] sm:$0xff]  ;;  %v5223_v19 = vld [vmem:[#allocation2 + $0xc20] sm:$0xff] }
 0xeef   :  { %5405 = vmatpush1.bf16.msra.mxu1 %v5187_v45  ;;  %5365 = vmatprep.subr.bf16.mxu0 %v5128_v46  ;;  %v5288_v16 = vld [vmem:[#allocation2 + $0xe28] sm:$0xff]  ;;  %v5287_v22 = vld [vmem:[#allocation2 + $0xe20] sm:$0xff] }
 0xef0   :  { %5406 = vmatprep.subr.bf16.mxu1 %v5192_v48  ;;  %v5228_v41 = vld [vmem:[#allocation2 + $0xc48] sm:$0xff]  ;;  %v5227_v43 = vld [vmem:[#allocation2 + $0xc40] sm:$0xff] }
 0xef1   :  { %v5292_v42 = vld [vmem:[#allocation2 + $0xe48] sm:$0xff]  ;;  %v5291_v49 = vld [vmem:[#allocation2 + $0xe40] sm:$0xff] }
 0xef2   :  { %5366 = vmatpush1.bf16.msra.mxu0 %v5127_v53  ;;  %v5232_v51 = vld [vmem:[#allocation2 + $0xc68] sm:$0xff]  ;;  %v5231_v44 = vld [vmem:[#allocation2 + $0xc60] sm:$0xff] }
 0xef3   :  { %5407 = vmatpush1.bf16.msra.mxu1 %v5191_v58  ;;  %5367 = vmatprep.subr.bf16.mxu0 %v5132_v1  ;;  %v5296_v62 = vld [vmem:[#allocation2 + $0xe68] sm:$0xff]  ;;  %v5295_v45 = vld [vmem:[#allocation2 + $0xe60] sm:$0xff] }
 0xef4   :  { %5408 = vmatprep.subr.bf16.mxu1 %v5196_v17  ;;  %v5236_v46 = vld [vmem:[#allocation2 + $0xc88] sm:$0xff]  ;;  %v5235_v53 = vld [vmem:[#allocation2 + $0xc80] sm:$0xff] }
 0xef5   :  { %v5300_v48 = vld [vmem:[#allocation2 + $0xe88] sm:$0xff]  ;;  %v5299_v58 = vld [vmem:[#allocation2 + $0xe80] sm:$0xff] }
 0xef6   :  { %5368 = vmatpush1.bf16.msra.mxu0 %v5131_v50  ;;  %v5240_v1 = vld [vmem:[#allocation2 + $0xca8] sm:$0xff]  ;;  %v5239_v50 = vld [vmem:[#allocation2 + $0xca0] sm:$0xff] }
 0xef7   :  { %5409 = vmatpush1.bf16.msra.mxu1 %v5195_v27  ;;  %5369 = vmatprep.subr.bf16.mxu0 %v5136_v6  ;;  %v5304_v17 = vld [vmem:[#allocation2 + $0xea8] sm:$0xff]  ;;  %v5303_v27 = vld [vmem:[#allocation2 + $0xea0] sm:$0xff] }
 0xef8   :  { %5410 = vmatprep.subr.bf16.mxu1 %v5200_v18  ;;  %v5244_v6 = vld [vmem:[#allocation2 + $0xcc8] sm:$0xff] }
 0xef9   :  { %v5308_v18 = vld [vmem:[#allocation2 + $0xec8] sm:$0xff] }
 0xefa   :  { %5370 = vmatpush1.bf16.msra.mxu0 %v5135_v37  ;;  %v5243_v37 = vld [vmem:[#allocation2 + $0xcc0] sm:$0xff] }
 0xefb   :  { %5411 = vmatpush1.bf16.msra.mxu1 %v5199_v54  ;;  %5371 = vmatprep.subr.bf16.mxu0 %v5140_v55  ;;  %v5307_v54 = vld [vmem:[#allocation2 + $0xec0] sm:$0xff]  ;;  %v5248_v55 = vld [vmem:[#allocation2 + $0xce8] sm:$0xff] }
 0xefc   :  { %5412 = vmatprep.subr.bf16.mxu1 %v5204_v59  ;;  %v5312_v59 = vld [vmem:[#allocation2 + $0xee8] sm:$0xff] }
 0xefe   :  { %5372 = vmatpush1.bf16.msra.mxu0 %v5139_v60  ;;  %v5247_v60 = vld [vmem:[#allocation2 + $0xce0] sm:$0xff] }
 0xeff   :  { %5413 = vmatpush1.bf16.msra.mxu1 %v5203_v28  ;;  %5373 = vmatprep.subr.bf16.mxu0 %v5144_v31  ;;  %v5311_v28 = vld [vmem:[#allocation2 + $0xee0] sm:$0xff]  ;;  %v5252_v31 = vld [vmem:[#allocation2 + $0xd08] sm:$0xff] }
 0xf00   :  { %5414 = vmatprep.subr.bf16.mxu1 %v5208_v61  ;;  %v5316_v61 = vld [vmem:[#allocation2 + $0xf08] sm:$0xff] }
 0xf02   :  { %5374 = vmatpush1.bf16.msra.mxu0 %v5143_v63  ;;  %v5251_v63 = vld [vmem:[#allocation2 + $0xd00] sm:$0xff] }
 0xf03   :  { %5415 = vmatpush1.bf16.msra.mxu1 %v5207_v0  ;;  %5375 = vmatprep.subr.bf16.mxu0 %v5148_v3  ;;  %v5315_v0 = vld [vmem:[#allocation2 + $0xf00] sm:$0xff]  ;;  %v5256_v3 = vld [vmem:[#allocation2 + $0xd28] sm:$0xff] }
 0xf04   :  { %5416 = vmatprep.subr.bf16.mxu1 %v5212_v4  ;;  %v5320_v4 = vld [vmem:[#allocation2 + $0xf28] sm:$0xff] }
 0xf06   :  { %5376 = vmatpush1.bf16.msra.mxu0 %v5147_v14  ;;  %v5255_v14 = vld [vmem:[#allocation2 + $0xd20] sm:$0xff] }
 0xf07   :  { %5417 = vmatpush1.bf16.msra.mxu1 %v5211_v20  ;;  %5377 = vmatprep.subr.bf16.mxu0 %v5152_v21  ;;  %v5319_v20 = vld [vmem:[#allocation2 + $0xf20] sm:$0xff]  ;;  %v5260_v21 = vld [vmem:[#allocation2 + $0xd48] sm:$0xff] }
 0xf08   :  { %5418 = vmatprep.subr.bf16.mxu1 %v5216_v34  ;;  %v5324_v34 = vld [vmem:[#allocation2 + $0xf48] sm:$0xff] }
 0xf0a   :  { %5378 = vmatpush1.bf16.msra.mxu0 %v5151_v24  ;;  %v5259_v24 = vld [vmem:[#allocation2 + $0xd40] sm:$0xff] }
 0xf0b   :  { %5419 = vmatpush1.bf16.msra.mxu1 %v5215_v35  ;;  %5429 = vmatprep.subr.bf16.mxu0 %v5220_v25  ;;  %v5323_v35 = vld [vmem:[#allocation2 + $0xf40] sm:$0xff]  ;;  %v5264_v25 = vld [vmem:[#allocation2 + $0xd68] sm:$0xff] }
 0xf0c   :  { %5470 = vmatprep.subr.bf16.mxu1 %v5284_v30  ;;  %v5328_v30 = vld [vmem:[#allocation2 + $0xf68] sm:$0xff] }
 0xf0d   :  { %5380 = vmatmul.mubr.bf16.vlgmr.msra.gmra.mrb[112].mxu0 %v9157_v47 }
 0xf0e   :  { %5421 = vmatmul.mubr.bf16.vlgmr.msra.gmra.mrb[112].mxu1 %v9161_v57  ;;  %5430 = vmatpush1.bf16.msra.mxu0 %v5219_v36  ;;  %v5263_v36 = vld [vmem:[#allocation2 + $0xd60] sm:$0xff] }
 0xf0f   :  { %5471 = vmatpush1.bf16.msra.mxu1 %v5283_v52  ;;  %5431 = vmatprep.subr.bf16.mxu0 %v5224_v40  ;;  %v5327_v52 = vld [vmem:[#allocation2 + $0xf60] sm:$0xff]  ;;  %v5268_v40 = vld [vmem:[#allocation2 + $0xd88] sm:$0xff] }
 0xf10   :  { %5472 = vmatprep.subr.bf16.mxu1 %v5288_v16  ;;  %5461 = vmatprep.mubr.bf16.mxu0 %v9173_v38  ;;  %v5332_v16 = vld [vmem:[#allocation2 + $0xf88] sm:$0xff] }
 0xf11   :  { %5502 = vmatprep.mubr.bf16.mxu1 %v9181_v2 }
 0xf12   :  { %5432 = vmatpush1.bf16.msra.mxu0 %v5223_v19  ;;  %v5267_v19 = vld [vmem:[#allocation2 + $0xd80] sm:$0xff] }
 0xf13   :  { %5473 = vmatpush1.bf16.msra.mxu1 %v5287_v22  ;;  %5433 = vmatprep.subr.bf16.mxu0 %v5228_v41  ;;  %v5331_v22 = vld [vmem:[#allocation2 + $0xf80] sm:$0xff]  ;;  %v5272_v41 = vld [vmem:[#allocation2 + $0xda8] sm:$0xff] }
 0xf14   :  { %5474 = vmatprep.subr.bf16.mxu1 %v5292_v42  ;;  %v5336_v42 = vld [vmem:[#allocation2 + $0xfa8] sm:$0xff] }
 0xf16   :  { %5434 = vmatpush1.bf16.msra.mxu0 %v5227_v43  ;;  %v5271_v43 = vld [vmem:[#allocation2 + $0xda0] sm:$0xff] }
 0xf17   :  { %5475 = vmatpush1.bf16.msra.mxu1 %v5291_v49  ;;  %5435 = vmatprep.subr.bf16.mxu0 %v5232_v51  ;;  %v5335_v49 = vld [vmem:[#allocation2 + $0xfa0] sm:$0xff]  ;;  %v5276_v51 = vld [vmem:[#allocation2 + $0xdc8] sm:$0xff] }
 0xf18   :  { %5476 = vmatprep.subr.bf16.mxu1 %v5296_v62  ;;  %v5340_v62 = vld [vmem:[#allocation2 + $0xfc8] sm:$0xff] }
 0xf1a   :  { %5436 = vmatpush1.bf16.msra.mxu0 %v5231_v44  ;;  %v5275_v44 = vld [vmem:[#allocation2 + $0xdc0] sm:$0xff] }
 0xf1b   :  { %5477 = vmatpush1.bf16.msra.mxu1 %v5295_v45  ;;  %5437 = vmatprep.subr.bf16.mxu0 %v5236_v46  ;;  %v5339_v45 = vld [vmem:[#allocation2 + $0xfc0] sm:$0xff]  ;;  %v5280_v46 = vld [vmem:[#allocation2 + $0xde8] sm:$0xff] }
 0xf1c   :  { %5478 = vmatprep.subr.bf16.mxu1 %v5300_v48  ;;  %v5344_v48 = vld [vmem:[#allocation2 + $0xfe8] sm:$0xff] }
 0xf1e   :  { %5438 = vmatpush1.bf16.msra.mxu0 %v5235_v53  ;;  %v5279_v53 = vld [vmem:[#allocation2 + $0xde0] sm:$0xff] }
 0xf1f   :  { %5479 = vmatpush1.bf16.msra.mxu1 %v5299_v58  ;;  %5439 = vmatprep.subr.bf16.mxu0 %v5240_v1  ;;  %v5343_v58 = vld [vmem:[#allocation2 + $0xfe0] sm:$0xff]  ;;  %v5094_v1 = vld [vmem:[#allocation2 + $0x818] sm:$0xff] }
 0xf20   :  { %5480 = vmatprep.subr.bf16.mxu1 %v5304_v17  ;;  %v5158_v17 = vld [vmem:[#allocation2 + $0xa18] sm:$0xff] }
 0xf22   :  { %5440 = vmatpush1.bf16.msra.mxu0 %v5239_v50  ;;  %v5093_v50 = vld [vmem:[#allocation2 + $0x810] sm:$0xff] }
 0xf23   :  { %5481 = vmatpush1.bf16.msra.mxu1 %v5303_v27  ;;  %5441 = vmatprep.subr.bf16.mxu0 %v5244_v6  ;;  %v5157_v27 = vld [vmem:[#allocation2 + $0xa10] sm:$0xff]  ;;  %v5098_v6 = vld [vmem:[#allocation2 + $0x838] sm:$0xff] }
 0xf24   :  { %5482 = vmatprep.subr.bf16.mxu1 %v5308_v18  ;;  %v5162_v18 = vld [vmem:[#allocation2 + $0xa38] sm:$0xff] }
 0xf26   :  { %5442 = vmatpush1.bf16.msra.mxu0 %v5243_v37  ;;  %v5097_v37 = vld [vmem:[#allocation2 + $0x830] sm:$0xff] }
 0xf27   :  { %5483 = vmatpush1.bf16.msra.mxu1 %v5307_v54  ;;  %5443 = vmatprep.subr.bf16.mxu0 %v5248_v55  ;;  %v5161_v54 = vld [vmem:[#allocation2 + $0xa30] sm:$0xff]  ;;  %v5102_v55 = vld [vmem:[#allocation2 + $0x858] sm:$0xff] }
 0xf28   :  { %5484 = vmatprep.subr.bf16.mxu1 %v5312_v59  ;;  %v5166_v59 = vld [vmem:[#allocation2 + $0xa58] sm:$0xff] }
 0xf2a   :  { %5444 = vmatpush1.bf16.msra.mxu0 %v5247_v60  ;;  %v5101_v60 = vld [vmem:[#allocation2 + $0x850] sm:$0xff] }
 0xf2b   :  { %5485 = vmatpush1.bf16.msra.mxu1 %v5311_v28  ;;  %5445 = vmatprep.subr.bf16.mxu0 %v5252_v31  ;;  %v5165_v28 = vld [vmem:[#allocation2 + $0xa50] sm:$0xff]  ;;  %v5106_v31 = vld [vmem:[#allocation2 + $0x878] sm:$0xff] }
 0xf2c   :  { %5486 = vmatprep.subr.bf16.mxu1 %v5316_v61  ;;  %v5170_v61 = vld [vmem:[#allocation2 + $0xa78] sm:$0xff] }
 0xf2e   :  { %5446 = vmatpush1.bf16.msra.mxu0 %v5251_v63  ;;  %v5105_v63 = vld [vmem:[#allocation2 + $0x870] sm:$0xff] }
 0xf2f   :  { %5487 = vmatpush1.bf16.msra.mxu1 %v5315_v0  ;;  %5447 = vmatprep.subr.bf16.mxu0 %v5256_v3  ;;  %v5169_v0 = vld [vmem:[#allocation2 + $0xa70] sm:$0xff]  ;;  %v5110_v3 = vld [vmem:[#allocation2 + $0x898] sm:$0xff] }
 0xf30   :  { %5488 = vmatprep.subr.bf16.mxu1 %v5320_v4  ;;  %v5174_v4 = vld [vmem:[#allocation2 + $0xa98] sm:$0xff] }
 0xf32   :  { %5448 = vmatpush1.bf16.msra.mxu0 %v5255_v14  ;;  %v5114_v14 = vld [vmem:[#allocation2 + $0x8b8] sm:$0xff] }
 0xf33   :  { %5489 = vmatpush1.bf16.msra.mxu1 %v5319_v20  ;;  %5449 = vmatprep.subr.bf16.mxu0 %v5260_v21  ;;  %v5178_v20 = vld [vmem:[#allocation2 + $0xab8] sm:$0xff]  ;;  %v5113_v21 = vld [vmem:[#allocation2 + $0x8b0] sm:$0xff] }
 0xf34   :  { %5490 = vmatprep.subr.bf16.mxu1 %v5324_v34  ;;  %v5177_v34 = vld [vmem:[#allocation2 + $0xab0] sm:$0xff] }
 0xf36   :  { %5450 = vmatpush1.bf16.msra.mxu0 %v5259_v24  ;;  %v5118_v24 = vld [vmem:[#allocation2 + $0x8d8] sm:$0xff] }
 0xf37   :  { %5491 = vmatpush1.bf16.msra.mxu1 %v5323_v35  ;;  %5451 = vmatprep.subr.bf16.mxu0 %v5264_v25  ;;  %v5182_v35 = vld [vmem:[#allocation2 + $0xad8] sm:$0xff]  ;;  %v5117_v25 = vld [vmem:[#allocation2 + $0x8d0] sm:$0xff] }
 0xf38   :  { %5492 = vmatprep.subr.bf16.mxu1 %v5328_v30  ;;  %v5181_v30 = vld [vmem:[#allocation2 + $0xad0] sm:$0xff] }
 0xf3a   :  { %5452 = vmatpush1.bf16.msra.mxu0 %v5263_v36  ;;  %v5122_v36 = vld [vmem:[#allocation2 + $0x8f8] sm:$0xff] }
 0xf3b   :  { %5493 = vmatpush1.bf16.msra.mxu1 %v5327_v52  ;;  %5453 = vmatprep.subr.bf16.mxu0 %v5268_v40  ;;  %v5186_v52 = vld [vmem:[#allocation2 + $0xaf8] sm:$0xff]  ;;  %v5121_v40 = vld [vmem:[#allocation2 + $0x8f0] sm:$0xff] }
 0xf3c   :  { %5494 = vmatprep.subr.bf16.mxu1 %v5332_v16  ;;  %v5185_v16 = vld [vmem:[#allocation2 + $0xaf0] sm:$0xff] }
 0xf3e   :  { %5454 = vmatpush1.bf16.msra.mxu0 %v5267_v19  ;;  %v5126_v19 = vld [vmem:[#allocation2 + $0x918] sm:$0xff] }
 0xf3f   :  { %5495 = vmatpush1.bf16.msra.mxu1 %v5331_v22  ;;  %5455 = vmatprep.subr.bf16.mxu0 %v5272_v41  ;;  %v5190_v22 = vld [vmem:[#allocation2 + $0xb18] sm:$0xff]  ;;  %v5125_v41 = vld [vmem:[#allocation2 + $0x910] sm:$0xff] }
 0xf40   :  { %5496 = vmatprep.subr.bf16.mxu1 %v5336_v42  ;;  %v5189_v42 = vld [vmem:[#allocation2 + $0xb10] sm:$0xff] }
 0xf42   :  { %5456 = vmatpush1.bf16.msra.mxu0 %v5271_v43  ;;  %v5130_v43 = vld [vmem:[#allocation2 + $0x938] sm:$0xff] }
 0xf43   :  { %5497 = vmatpush1.bf16.msra.mxu1 %v5335_v49  ;;  %5457 = vmatprep.subr.bf16.mxu0 %v5276_v51  ;;  %v5194_v49 = vld [vmem:[#allocation2 + $0xb38] sm:$0xff]  ;;  %v5129_v51 = vld [vmem:[#allocation2 + $0x930] sm:$0xff] }
 0xf44   :  { %5498 = vmatprep.subr.bf16.mxu1 %v5340_v62  ;;  %v5193_v62 = vld [vmem:[#allocation2 + $0xb30] sm:$0xff] }
 0xf46   :  { %5458 = vmatpush1.bf16.msra.mxu0 %v5275_v44  ;;  %v5134_v44 = vld [vmem:[#allocation2 + $0x958] sm:$0xff] }
 0xf47   :  { %5499 = vmatpush1.bf16.msra.mxu1 %v5339_v45  ;;  %5459 = vmatprep.subr.bf16.mxu0 %v5280_v46  ;;  %v5198_v45 = vld [vmem:[#allocation2 + $0xb58] sm:$0xff]  ;;  %v5133_v46 = vld [vmem:[#allocation2 + $0x950] sm:$0xff] }
 0xf48   :  { %5500 = vmatprep.subr.bf16.mxu1 %v5344_v48  ;;  %v5197_v48 = vld [vmem:[#allocation2 + $0xb50] sm:$0xff] }
 0xf4a   :  { %5460 = vmatpush1.bf16.msra.mxu0 %v5279_v53  ;;  %v5138_v53 = vld [vmem:[#allocation2 + $0x978] sm:$0xff] }
 0xf4b   :  { %5501 = vmatpush1.bf16.msra.mxu1 %v5343_v58  ;;  %5511 = vmatprep.subr.bf16.mxu0 %v5094_v1  ;;  %v5202_v58 = vld [vmem:[#allocation2 + $0xb78] sm:$0xff]  ;;  %v5137_v1 = vld [vmem:[#allocation2 + $0x970] sm:$0xff] }
 0xf4c   :  { %5552 = vmatprep.subr.bf16.mxu1 %v5158_v17  ;;  %v5201_v17 = vld [vmem:[#allocation2 + $0xb70] sm:$0xff] }
 0xf4d   :  { %5462 = vmatmul.mubr.bf16.vlgmr.msra.gmra.mrb[116].mxu0 %v9171_v26 }
 0xf4e   :  { %5503 = vmatmul.mubr.bf16.vlgmr.msra.gmra.mrb[116].mxu1 %v9179_v33  ;;  %5512 = vmatpush1.bf16.msra.mxu0 %v5093_v50  ;;  %v5142_v50 = vld [vmem:[#allocation2 + $0x998] sm:$0xff] }
 0xf4f   :  { %5553 = vmatpush1.bf16.msra.mxu1 %v5157_v27  ;;  %5513 = vmatprep.subr.bf16.mxu0 %v5098_v6  ;;  %v5206_v27 = vld [vmem:[#allocation2 + $0xb98] sm:$0xff]  ;;  %v5141_v6 = vld [vmem:[#allocation2 + $0x990] sm:$0xff] }
 0xf50   :  { %5554 = vmatprep.subr.bf16.mxu1 %v5162_v18  ;;  %5543 = vmatprep.mubr.bf16.mxu0 %v9159_v56  ;;  %v5109_v56 = vld [vmem:[#allocation2 + $0x890] sm:$0xff] }
 0xf51   :  { %5584 = vmatprep.mubr.bf16.mxu1 %v9163_v29  ;;  %v5173_v29 = vld [vmem:[#allocation2 + $0xa90] sm:$0xff] }
 0xf52   :  { %5514 = vmatpush1.bf16.msra.mxu0 %v5097_v37  ;;  %v5205_v18 = vld [vmem:[#allocation2 + $0xb90] sm:$0xff]  ;;  %v5146_v37 = vld [vmem:[#allocation2 + $0x9b8] sm:$0xff] }
 0xf53   :  { %5555 = vmatpush1.bf16.msra.mxu1 %v5161_v54  ;;  %5515 = vmatprep.subr.bf16.mxu0 %v5102_v55  ;;  %v5210_v54 = vld [vmem:[#allocation2 + $0xbb8] sm:$0xff]  ;;  %v5145_v55 = vld [vmem:[#allocation2 + $0x9b0] sm:$0xff] }
 0xf54   :  { %5556 = vmatprep.subr.bf16.mxu1 %v5166_v59  ;;  %v5209_v59 = vld [vmem:[#allocation2 + $0xbb0] sm:$0xff] }
 0xf56   :  { %5516 = vmatpush1.bf16.msra.mxu0 %v5101_v60  ;;  %v5150_v60 = vld [vmem:[#allocation2 + $0x9d8] sm:$0xff] }
 0xf57   :  { %5557 = vmatpush1.bf16.msra.mxu1 %v5165_v28  ;;  %5517 = vmatprep.subr.bf16.mxu0 %v5106_v31  ;;  %v5214_v28 = vld [vmem:[#allocation2 + $0xbd8] sm:$0xff]  ;;  %v5149_v31 = vld [vmem:[#allocation2 + $0x9d0] sm:$0xff] }
 0xf58   :  { %5558 = vmatprep.subr.bf16.mxu1 %v5170_v61  ;;  %v5213_v61 = vld [vmem:[#allocation2 + $0xbd0] sm:$0xff] }
 0xf5a   :  { %5518 = vmatpush1.bf16.msra.mxu0 %v5105_v63  ;;  %v5154_v63 = vld [vmem:[#allocation2 + $0x9f8] sm:$0xff] }
 0xf5b   :  { %5559 = vmatpush1.bf16.msra.mxu1 %v5169_v0  ;;  %5519 = vmatprep.subr.bf16.mxu0 %v5110_v3  ;;  %v5218_v0 = vld [vmem:[#allocation2 + $0xbf8] sm:$0xff]  ;;  %v5153_v3 = vld [vmem:[#allocation2 + $0x9f0] sm:$0xff] }
 0xf5c   :  { %5560 = vmatprep.subr.bf16.mxu1 %v5174_v4  ;;  %v5217_v4 = vld [vmem:[#allocation2 + $0xbf0] sm:$0xff] }
 0xf5e   :  { %5520 = vmatpush1.bf16.msra.mxu0 %v5109_v56  ;;  %v5222_v56 = vld [vmem:[#allocation2 + $0xc18] sm:$0xff] }
 0xf5f   :  { %5561 = vmatpush1.bf16.msra.mxu1 %v5173_v29  ;;  %5521 = vmatprep.subr.bf16.mxu0 %v5114_v14  ;;  %v5286_v29 = vld [vmem:[#allocation2 + $0xe18] sm:$0xff]  ;;  %v5221_v14 = vld [vmem:[#allocation2 + $0xc10] sm:$0xff] }
 0xf60   :  { %5562 = vmatprep.subr.bf16.mxu1 %v5178_v20  ;;  %v5285_v20 = vld [vmem:[#allocation2 + $0xe10] sm:$0xff] }
 0xf62   :  { %5522 = vmatpush1.bf16.msra.mxu0 %v5113_v21  ;;  %v5226_v21 = vld [vmem:[#allocation2 + $0xc38] sm:$0xff] }
 0xf63   :  { %5563 = vmatpush1.bf16.msra.mxu1 %v5177_v34  ;;  %5523 = vmatprep.subr.bf16.mxu0 %v5118_v24  ;;  %v5290_v34 = vld [vmem:[#allocation2 + $0xe38] sm:$0xff]  ;;  %v5225_v24 = vld [vmem:[#allocation2 + $0xc30] sm:$0xff] }
 0xf64   :  { %5564 = vmatprep.subr.bf16.mxu1 %v5182_v35  ;;  %v5289_v35 = vld [vmem:[#allocation2 + $0xe30] sm:$0xff] }
 0xf66   :  { %5524 = vmatpush1.bf16.msra.mxu0 %v5117_v25  ;;  %v5230_v25 = vld [vmem:[#allocation2 + $0xc58] sm:$0xff] }
 0xf67   :  { %5565 = vmatpush1.bf16.msra.mxu1 %v5181_v30  ;;  %5525 = vmatprep.subr.bf16.mxu0 %v5122_v36  ;;  %v5294_v30 = vld [vmem:[#allocation2 + $0xe58] sm:$0xff]  ;;  %v5229_v36 = vld [vmem:[#allocation2 + $0xc50] sm:$0xff] }
 0xf68   :  { %5566 = vmatprep.subr.bf16.mxu1 %v5186_v52  ;;  %v5234_v52 = vld [vmem:[#allocation2 + $0xc78] sm:$0xff] }
 0xf6a   :  { %5526 = vmatpush1.bf16.msra.mxu0 %v5121_v40  ;;  %v5233_v40 = vld [vmem:[#allocation2 + $0xc70] sm:$0xff] }
 0xf6b   :  { %5567 = vmatpush1.bf16.msra.mxu1 %v5185_v16  ;;  %5527 = vmatprep.subr.bf16.mxu0 %v5126_v19  ;;  %v5297_v16 = vld [vmem:[#allocation2 + $0xe70] sm:$0xff]  ;;  %v5238_v19 = vld [vmem:[#allocation2 + $0xc98] sm:$0xff] }
 0xf6c   :  { %5568 = vmatprep.subr.bf16.mxu1 %v5190_v22  ;;  %v5302_v22 = vld [vmem:[#allocation2 + $0xe98] sm:$0xff] }
 0xf6e   :  { %5528 = vmatpush1.bf16.msra.mxu0 %v5125_v41  ;;  %v5242_v41 = vld [vmem:[#allocation2 + $0xcb8] sm:$0xff] }
 0xf6f   :  { %5569 = vmatpush1.bf16.msra.mxu1 %v5189_v42  ;;  %5529 = vmatprep.subr.bf16.mxu0 %v5130_v43  ;;  %v5306_v42 = vld [vmem:[#allocation2 + $0xeb8] sm:$0xff]  ;;  %v5241_v43 = vld [vmem:[#allocation2 + $0xcb0] sm:$0xff] }
 0xf70   :  { %5570 = vmatprep.subr.bf16.mxu1 %v5194_v49  ;;  %v5305_v49 = vld [vmem:[#allocation2 + $0xeb0] sm:$0xff] }
 0xf72   :  { %5530 = vmatpush1.bf16.msra.mxu0 %v5129_v51  ;;  %v5246_v51 = vld [vmem:[#allocation2 + $0xcd8] sm:$0xff] }
 0xf73   :  { %5571 = vmatpush1.bf16.msra.mxu1 %v5193_v62  ;;  %5531 = vmatprep.subr.bf16.mxu0 %v5134_v44  ;;  %v5310_v62 = vld [vmem:[#allocation2 + $0xed8] sm:$0xff]  ;;  %v9251_v44 = vld [vmem:[#allocation15] sm:$0xff] }
 0xf74   :  { %5572 = vmatprep.subr.bf16.mxu1 %v5198_v45  ;;  %v5245_v45 = vld [vmem:[#allocation2 + $0xcd0] sm:$0xff] }
 0xf76   :  { %5532 = vmatpush1.bf16.msra.mxu0 %v5133_v46  ;;  %v5309_v46 = vld [vmem:[#allocation2 + $0xed0] sm:$0xff] }
 0xf77   :  { %5573 = vmatpush1.bf16.msra.mxu1 %v5197_v48  ;;  %5533 = vmatprep.subr.bf16.mxu0 %v5138_v53  ;;  %v5680_v48 = vrot.slane %v9251_v44, %v8749_v5  ;;  %v5684_v53 = vrot.slane %v9251_v44, %v8751_v7 }
 0xf78   :  { %5574 = vmatprep.subr.bf16.mxu1 %v5202_v58  ;;  %v5688_v58 = vrot.slane %v9251_v44, %v8753_v8 }
 0xf7a   :  { %5534 = vmatpush1.bf16.msra.mxu0 %v5137_v1  ;;  %v5250_v1 = vld [vmem:[#allocation2 + $0xcf8] sm:$0xff] }
 0xf7b   :  { %5575 = vmatpush1.bf16.msra.mxu1 %v5201_v17  ;;  %5535 = vmatprep.subr.bf16.mxu0 %v5142_v50  ;;  %v5314_v17 = vld [vmem:[#allocation2 + $0xef8] sm:$0xff]  ;;  %v5692_v50 = vrot.slane %v9251_v44, %v8755_v9 }
 0xf7c   :  { %5576 = vmatprep.subr.bf16.mxu1 %v5206_v27  ;;  %v9262_v27 = vadd.f32 %v5680_v48, %v9214_v15  ;;  %v5318_v15 = vld [vmem:[#allocation2 + $0xf18] sm:$0xff] }
 0xf7e   :  { %5536 = vmatpush1.bf16.msra.mxu0 %v5141_v6  ;;  %v9265_v6 = vadd.f32 %v5684_v53, %v9216_v23  ;;  %vm5725_vm0 = vcmp.gt.f32.partialorder %v9262_v27, 0.0 }
 0xf7f   :  { %5577 = vmatpush1.bf16.msra.mxu1 %v5205_v18  ;;  %5537 = vmatprep.subr.bf16.mxu0 %v5146_v37  ;;  %v9268_v18 = vadd.f32 %v5688_v58, %v9218_v39  ;;  %v9271_v37 = vadd.f32 %v5692_v50, %v9220_v32  ;;  %v5253_v32 = vld [vmem:[#allocation2 + $0xd10] sm:$0xff] }
 0xf80   :  { %5578 = vmatprep.subr.bf16.mxu1 %v5210_v54  ;;  %v5249_v54 = vld [vmem:[#allocation2 + $0xcf0] sm:$0xff]  ;;  %vm5726_vm1 = vcmp.gt.f32.partialorder %v9265_v6, 0.0 }
 0xf81   :  { %v5737_v23 = vmul.f32 1.442695, %v9268_v18  ;;  %v5739_v39 = vmul.f32 1.442695, %v9271_v37  ;;  %vm5727_vm2 = vcmp.gt.f32.partialorder %v9268_v18, 0.0  ;;  %vm5728_vm3 = vcmp.gt.f32.partialorder %v9271_v37, 0.0 }
 0xf82   :  { %5538 = vmatpush1.bf16.msra.mxu0 %v5145_v55  ;;  %v5313_v55 = vld [vmem:[#allocation2 + $0xef0] sm:$0xff] }
 0xf83   :  { %5579 = vmatpush1.bf16.msra.mxu1 %v5209_v59  ;;  %5539 = vmatprep.subr.bf16.mxu0 %v5150_v60  ;;  %v5733_v59 = vmul.f32 1.442695, %v9262_v27  ;;  %v5254_v60 = vld [vmem:[#allocation2 + $0xd18] sm:$0xff] }
 0xf84   :  { %5580 = vmatprep.subr.bf16.mxu1 %v5214_v28  ;;  %v5735_v28 = vmul.f32 1.442695, %v9265_v6 }
 0xf85   :  { %8139 = vpow2.f32 %v5733_v59  ;;  %v5278_v59 = vld [vmem:[#allocation2 + $0xdd8] sm:$0xff] }
 0xf86   :  { %5540 = vmatpush1.bf16.msra.mxu0 %v5149_v31  ;;  %8141 = vpow2.f32 %v5735_v28  ;;  %v5317_v31 = vld [vmem:[#allocation2 + $0xf10] sm:$0xff]  ;;  %v5282_v28 = vld [vmem:[#allocation2 + $0xdf8] sm:$0xff] }
 0xf87   :  { %5581 = vmatpush1.bf16.msra.mxu1 %v5213_v61  ;;  %5541 = vmatprep.subr.bf16.mxu0 %v5154_v63  ;;  %8143 = vpow2.f32 %v5737_v23  ;;  %v5258_v61 = vld [vmem:[#allocation2 + $0xd38] sm:$0xff] }
 0xf88   :  { %5582 = vmatprep.subr.bf16.mxu1 %v5218_v0  ;;  %v5322_v63 = vld [vmem:[#allocation2 + $0xf38] sm:$0xff]  ;;  %8145 = vpow2.f32 %v5739_v39  ;;  %v5257_v0 = vld [vmem:[#allocation2 + $0xd30] sm:$0xff] }
 0xf89   :  { %v5346_v23 = vld [vmem:[#allocation2 + $0xff8] sm:$0xff]  ;;  %v5281_v39 = vld [vmem:[#allocation2 + $0xdf0] sm:$0xff] }
 0xf8a   :  { %5542 = vmatpush1.bf16.msra.mxu0 %v5153_v3  ;;  %v5321_v3 = vld [vmem:[#allocation2 + $0xf30] sm:$0xff] }
 0xf8b   :  { %5583 = vmatpush1.bf16.msra.mxu1 %v5217_v4  ;;  %5593 = vmatprep.subr.bf16.mxu0 %v5222_v56  ;;  %v5262_v4 = vld [vmem:[#allocation2 + $0xd58] sm:$0xff] }
 0xf8c   :  { %5634 = vmatprep.subr.bf16.mxu1 %v5286_v29  ;;  %v5326_v56 = vld [vmem:[#allocation2 + $0xf58] sm:$0xff] }
 0xf8d   :  { %5544 = vmatmul.mubr.bf16.vlgmr.msra.gmra.mrb[120].mxu0 %v9157_v47  ;;  %v5293_v47 = vld [vmem:[#allocation2 + $0xe50] sm:$0xff] }
 0xf8e   :  { %5585 = vmatmul.mubr.bf16.vlgmr.msra.gmra.mrb[120].mxu1 %v9161_v57  ;;  %5594 = vmatpush1.bf16.msra.mxu0 %v5221_v14  ;;  %v5298_v57 = vld [vmem:[#allocation2 + $0xe78] sm:$0xff]  ;;  %v5261_v14 = vld [vmem:[#allocation2 + $0xd50] sm:$0xff] }
 0xf8f   :  { %5635 = vmatpush1.bf16.msra.mxu1 %v5285_v20  ;;  %5595 = vmatprep.subr.bf16.mxu0 %v5226_v21  ;;  %v8140_v29 = vpop.eup %8139  ;;  %v5325_v20 = vld [vmem:[#allocation2 + $0xf50] sm:$0xff] }
 0xf90   :  { %5636 = vmatprep.subr.bf16.mxu1 %v5290_v34  ;;  %5625 = vmatprep.mubr.bf16.mxu0 %v9173_v38  ;;  %v5237_v38 = vld [vmem:[#allocation2 + $0xc90] sm:$0xff]  ;;  %v8142_v21 = vpop.eup %8141  ;;  %v5266_v34 = vld [vmem:[#allocation2 + $0xd78] sm:$0xff] }
 0xf91   :  { %5666 = vmatprep.mubr.bf16.mxu1 %v9181_v2  ;;  %v5301_v2 = vld [vmem:[#allocation2 + $0xe90] sm:$0xff] }
 0xf92   :  { %5596 = vmatpush1.bf16.msra.mxu0 %v5225_v24  ;;  %v5330_v24 = vld [vmem:[#allocation2 + $0xf78] sm:$0xff] }
 0xf93   :  { %5637 = vmatpush1.bf16.msra.mxu1 %v5289_v35  ;;  %5597 = vmatprep.subr.bf16.mxu0 %v5230_v25  ;;  %v7875_v35 = vadd.f32 -1.0, %v8140_v29  ;;  %v8144_v25 = vpop.eup %8143 }
 0xf94   :  { %5638 = vmatprep.subr.bf16.mxu1 %v5294_v30  ;;  %v7876_v30 = vadd.f32 -1.0, %v8142_v21 }
 0xf96   :  { %5598 = vmatpush1.bf16.msra.mxu0 %v5229_v36  ;;  %v8146_v36 = vpop.eup %8145 }
 0xf97   :  { %5639 = vmatpush1.bf16.msra.mxu1 %v5293_v47  ;;  %5599 = vmatprep.subr.bf16.mxu0 %v5234_v52  ;;  %v7877_v47 = vadd.f32 -1.0, %v8144_v25  ;;  %v5757_v52 = vmul.f32 1.6732632, %v7875_v35  ;;  %v5696_v35 = vrot.slane %v9251_v44, %v8757_v10 }
 0xf98   :  { %5640 = vmatprep.subr.bf16.mxu1 %v5298_v57  ;;  %v5265_v57 = vld [vmem:[#allocation2 + $0xd70] sm:$0xff] }
 0xf9a   :  { %5600 = vmatpush1.bf16.msra.mxu0 %v5233_v40  ;;  %v5329_v40 = vld [vmem:[#allocation2 + $0xf70] sm:$0xff] }
 0xf9b   :  { %5641 = vmatpush1.bf16.msra.mxu1 %v5297_v16  ;;  %5601 = vmatprep.subr.bf16.mxu0 %v5238_v19  ;;  %v7878_v16 = vadd.f32 -1.0, %v8146_v36  ;;  %v5758_v19 = vmul.f32 1.6732632, %v7876_v30 }
 0xf9c   :  { %5642 = vmatprep.subr.bf16.mxu1 %v5302_v22  ;;  %v5270_v22 = vld [vmem:[#allocation2 + $0xd98] sm:$0xff] }
 0xf9e   :  { %5602 = vmatpush1.bf16.msra.mxu0 %v5237_v38  ;;  %v5334_v38 = vld [vmem:[#allocation2 + $0xf98] sm:$0xff] }
 0xf9f   :  { %5643 = vmatpush1.bf16.msra.mxu1 %v5301_v2  ;;  %5603 = vmatprep.subr.bf16.mxu0 %v5242_v41  ;;  %v5759_v2 = vmul.f32 1.6732632, %v7877_v47  ;;  %v5765_v41 = vsel %vm5725_vm0, %v9262_v27, %v5757_v52 }
 0xfa0   :  { %5644 = vmatprep.subr.bf16.mxu1 %v5306_v42  ;;  %v5760_v42 = vmul.f32 1.6732632, %v7878_v16 }
 0xfa2   :  { %5604 = vmatpush1.bf16.msra.mxu0 %v5241_v43  ;;  %v5766_v43 = vsel %vm5726_vm1, %v9265_v6, %v5758_v19  ;;  %v5768_v48 = vsel %vm5728_vm3, %v9271_v37, %v5760_v42  ;;  %v5342_v37 = vld [vmem:[#allocation2 + $0xfd8] sm:$0xff] }
 0xfa3   :  { %5645 = vmatpush1.bf16.msra.mxu1 %v5305_v49  ;;  %5605 = vmatprep.subr.bf16.mxu0 %v5246_v51  ;;  %v5773_v49 = vmul.f32 1.050701, %v5765_v41  ;;  %v5767_v51 = vsel %vm5727_vm2, %v9268_v18, %v5759_v2  ;;  %v5776_v50 = vmul.f32 1.050701, %v5768_v48 }
 0xfa4   :  { %5646 = vmatprep.subr.bf16.mxu1 %v5310_v62  ;;  %v5774_v62 = vmul.f32 1.050701, %v5766_v43  ;;  %v5775_v53 = vmul.f32 1.050701, %v5767_v51 }
 0xfa5   :  { %v9289_v58 = vpack.c.bf16 %v5773_v49, %v5773_v49  ;;  %v9295_v18 = vpack.c.bf16 %v5776_v50, %v5776_v50 }
 0xfa6   :  { %5606 = vmatpush1.bf16.msra.mxu0 %v5245_v45  ;;  %v5269_v45 = vld [vmem:[#allocation2 + $0xd90] sm:$0xff]  ;;  %v9291_v27 = vpack.c.bf16 %v5774_v62, %v5774_v62  ;;  %v9293_v6 = vpack.c.bf16 %v5775_v53, %v5775_v53 }
 0xfa7   :  { %5647 = vmatpush1.bf16.msra.mxu1 %v5309_v46  ;;  %5607 = vmatprep.subr.bf16.mxu0 %v5250_v1  ;;  %v5333_v46 = vld [vmem:[#allocation2 + $0xf90] sm:$0xff]  ;;  %v5274_v1 = vld [vmem:[#allocation2 + $0xdb8] sm:$0xff] }
 0xfa8   :  { %5648 = vmatprep.subr.bf16.mxu1 %v5314_v17  ;;  %v5338_v17 = vld [vmem:[#allocation2 + $0xfb8] sm:$0xff] }
 0xfaa   :  { %5608 = vmatpush1.bf16.msra.mxu0 %v5249_v54  ;;  %v5273_v54 = vld [vmem:[#allocation2 + $0xdb0] sm:$0xff] }
 0xfab   :  { %5649 = vmatpush1.bf16.msra.mxu1 %v5313_v55  ;;  %5609 = vmatprep.subr.bf16.mxu0 %v5254_v60  ;;  %v5337_v55 = vld [vmem:[#allocation2 + $0xfb0] sm:$0xff] }
 0xfac   :  { %5650 = vmatprep.subr.bf16.mxu1 %v5318_v15  ;;  %v5277_v60 = vld [vmem:[#allocation2 + $0xdd0] sm:$0xff] }
 0xfad   :  { %v5341_v15 = vld [vmem:[#allocation2 + $0xfd0] sm:$0xff] }
 0xfae   :  { %5610 = vmatpush1.bf16.msra.mxu0 %v5253_v32  ;;  %v5345_v32 = vld [vmem:[#allocation2 + $0xff0] sm:$0xff] }
 0xfaf   :  { %5651 = vmatpush1.bf16.msra.mxu1 %v5317_v31  ;;  %5611 = vmatprep.subr.bf16.mxu0 %v5258_v61 }
 0xfb0   :  { %5652 = vmatprep.subr.bf16.mxu1 %v5322_v63 }
 0xfb2   :  { %5612 = vmatpush1.bf16.msra.mxu0 %v5257_v0 }
 0xfb3   :  { %5653 = vmatpush1.bf16.msra.mxu1 %v5321_v3  ;;  %5613 = vmatprep.subr.bf16.mxu0 %v5262_v4 }
 0xfb4   :  { %5654 = vmatprep.subr.bf16.mxu1 %v5326_v56 }
 0xfb6   :  { %5614 = vmatpush1.bf16.msra.mxu0 %v5261_v14 }
 0xfb7   :  { %5655 = vmatpush1.bf16.msra.mxu1 %v5325_v20  ;;  %5615 = vmatprep.subr.bf16.mxu0 %v5266_v34 }
 0xfb8   :  { %5656 = vmatprep.subr.bf16.mxu1 %v5330_v24 }
 0xfba   :  { %5616 = vmatpush1.bf16.msra.mxu0 %v5265_v57 }
 0xfbb   :  { %5657 = vmatpush1.bf16.msra.mxu1 %v5329_v40  ;;  %5617 = vmatprep.subr.bf16.mxu0 %v5270_v22 }
 0xfbc   :  { %5658 = vmatprep.subr.bf16.mxu1 %v5334_v38 }
 0xfbe   :  { %5618 = vmatpush1.bf16.msra.mxu0 %v5269_v45 }
 0xfbf   :  { %5659 = vmatpush1.bf16.msra.mxu1 %v5333_v46  ;;  %5619 = vmatprep.subr.bf16.mxu0 %v5274_v1 }
 0xfc0   :  { %5660 = vmatprep.subr.bf16.mxu1 %v5338_v17 }
 0xfc2   :  { %5620 = vmatpush1.bf16.msra.mxu0 %v5273_v54 }
 0xfc3   :  { %5661 = vmatpush1.bf16.msra.mxu1 %v5337_v55  ;;  %5621 = vmatprep.subr.bf16.mxu0 %v5278_v59 }
 0xfc4   :  { %5662 = vmatprep.subr.bf16.mxu1 %v5342_v37 }
 0xfc6   :  { %5622 = vmatpush1.bf16.msra.mxu0 %v5277_v60 }
 0xfc7   :  { %5663 = vmatpush1.bf16.msra.mxu1 %v5341_v15  ;;  %5623 = vmatprep.subr.bf16.mxu0 %v5282_v28 }
 0xfc8   :  { %5664 = vmatprep.subr.bf16.mxu1 %v5346_v23 }
 0xfca   :  { %5624 = vmatpush1.bf16.msra.mxu0 %v5281_v39 }
 0xfcb   :  { %5665 = vmatpush1.bf16.msra.mxu1 %v5345_v32 }
 0xfcd   :  { %5626 = vmatmul.mubr.bf16.vlgmr.msra.gmra.mrb[124].mxu0 %v9171_v26 }
 0xfce   :  { %5667 = vmatmul.mubr.bf16.vlgmr.msra.gmra.mrb[124].mxu1 %v9179_v33  ;;  %v5700_v33 = vrot.slane %v9251_v44, %v8759_v11 }
 0xfe0   :  { %v5381_v31 = vpop.f32.mrb[112].mxu0 }
 0xfe1   :  { %v5422_v61 = vpop.f32.mrb[112].mxu1  ;;  %v5383_v0 = vpop.f32.mrb[113].mxu0 }
 0xfe2   :  { %v5423_v63 = vadd.f32 %v5422_v61, %v5381_v31  ;;  %v5424_v3 = vpop.f32.mrb[113].mxu1  ;;  %v5385_v56 = vpop.f32.mrb[114].mxu0 }
 0xfe3   :  { %v5425_v4 = vadd.f32 %v5424_v3, %v5383_v0  ;;  %v5426_v29 = vpop.f32.mrb[114].mxu1  ;;  %v5386_v14 = vpop.f32.mrb[115].mxu0  ;;  %v5708_v56 = vrot.slane %v9251_v44, %v8763_v13 }
 0xfe4   :  { %v5427_v20 = vpop.f32.mrb[115].mxu1 }
0x1020   :  { %v5463_v21 = vpop.f32.mrb[116].mxu0 }
0x1021   :  { %v5504_v34 = vpop.f32.mrb[116].mxu1  ;;  %v5464_v24 = vadd.f32 %v5463_v21, %v5423_v63  ;;  %v5465_v25 = vpop.f32.mrb[117].mxu0  ;;  %v5704_v63 = vrot.slane %v9251_v44, %v8761_v12 }
0x1022   :  { %v5506_v26 = vpop.f32.mrb[117].mxu1  ;;  %v5466_v30 = vadd.f32 %v5465_v25, %v5425_v4  ;;  %v5467_v36 = vpop.f32.mrb[118].mxu0 }
0x1023   :  { %v5508_v47 = vpop.f32.mrb[118].mxu1  ;;  %v5505_v52 = vadd.f32 %v5504_v34, %v5464_v24  ;;  %v5468_v57 = vpop.f32.mrb[119].mxu0 }
0x1024   :  { %v5509_v40 = vpop.f32.mrb[119].mxu1  ;;  %v5507_v16 = vadd.f32 %v5506_v26, %v5466_v30 }
0x1025   :  { %v5721_v19 = vadd.f32 %v5696_v35, %v5505_v52 }
0x1026   :  { %v5722_v22 = vadd.f32 %v5700_v33, %v5507_v16 }
0x1027   :  { %v5741_v38 = vmul.f32 1.442695, %v5721_v19  ;;  %vm5729_vm4 = vcmp.gt.f32.partialorder %v5721_v19, 0.0 }
0x1028   :  { %v5743_v2 = vmul.f32 1.442695, %v5722_v22  ;;  %vm5730_vm5 = vcmp.gt.f32.partialorder %v5722_v22, 0.0 }
0x1029   :  { %8147 = vpow2.f32 %v5741_v38 }
0x102a   :  { %8149 = vpow2.f32 %v5743_v2 }
0x1033   :  { %v8148_v41 = vpop.eup %8147 }
0x1034   :  { %v8150_v42 = vpop.eup %8149  ;;  %v7879_v43 = vadd.f32 -1.0, %v8148_v41 }
0x1035   :  { %v7880_v49 = vadd.f32 -1.0, %v8150_v42 }
0x1036   :  { %v5761_v51 = vmul.f32 1.6732632, %v7879_v43 }
0x1037   :  { %v5762_v62 = vmul.f32 1.6732632, %v7880_v49 }
0x1038   :  { %v5769_v45 = vsel %vm5729_vm4, %v5721_v19, %v5761_v51 }
0x1039   :  { %v5777_v46 = vmul.f32 1.050701, %v5769_v45  ;;  %v5770_v48 = vsel %vm5730_vm5, %v5722_v22, %v5762_v62 }
0x103a   :  { %v5778_v53 = vmul.f32 1.050701, %v5770_v48 }
0x103b   :  { %v9303_v1 = vpack.c.bf16 %v5777_v46, %v5777_v46 }
0x103c   :  { %v9305_v17 = vpack.c.bf16 %v5778_v53, %v5778_v53 }
0x1060   :  { %v5545_v50 = vpop.f32.mrb[120].mxu0 }
0x1061   :  { %v5586_v54 = vpop.f32.mrb[120].mxu1  ;;  %v5547_v59 = vpop.f32.mrb[121].mxu0 }
0x1062   :  { %v5587_v55 = vadd.f32 %v5586_v54, %v5545_v50  ;;  %v5588_v37 = vpop.f32.mrb[121].mxu1  ;;  %v5549_v15 = vpop.f32.mrb[122].mxu0 }
0x1063   :  { %v5589_v60 = vadd.f32 %v5588_v37, %v5547_v59  ;;  %v5590_v28 = vpop.f32.mrb[122].mxu1  ;;  %v5550_v23 = vpop.f32.mrb[123].mxu0 }
0x1064   :  { %v5591_v39 = vpop.f32.mrb[123].mxu1 }
0x10a0   :  { %v5627_v32 = vpop.f32.mrb[124].mxu0 }
0x10a1   :  { %v5668_v31 = vpop.f32.mrb[124].mxu1  ;;  %v5628_v61 = vadd.f32 %v5627_v32, %v5587_v55  ;;  %v5629_v0 = vpop.f32.mrb[125].mxu0 }
0x10a2   :  { %v5670_v3 = vpop.f32.mrb[125].mxu1  ;;  %v5630_v4 = vadd.f32 %v5629_v0, %v5589_v60  ;;  %v5631_v29 = vpop.f32.mrb[126].mxu0 }
0x10a3   :  { %v5672_v14 = vpop.f32.mrb[126].mxu1  ;;  %v5669_v20 = vadd.f32 %v5668_v31, %v5628_v61  ;;  %v5632_v21 = vpop.f32.mrb[127].mxu0 }
0x10a4   :  { %v5673_v34 = vpop.f32.mrb[127].mxu1  ;;  %v5671_v24 = vadd.f32 %v5670_v3, %v5630_v4 }
0x10a5   :  { %v5723_v35 = vadd.f32 %v5704_v63, %v5669_v20 }
0x10a6   :  { %v5724_v25 = vadd.f32 %v5708_v56, %v5671_v24 }
0x10a7   :  { %v5745_v26 = vmul.f32 1.442695, %v5723_v35  ;;  %vm5731_vm6 = vcmp.gt.f32.partialorder %v5723_v35, 0.0 }
0x10a8   :  { %v5747_v30 = vmul.f32 1.442695, %v5724_v25  ;;  %vm5732_vm7 = vcmp.gt.f32.partialorder %v5724_v25, 0.0 }
0x10a9   :  { %8151 = vpow2.f32 %v5745_v26 }
0x10aa   :  { %8153 = vpow2.f32 %v5747_v30 }
0x10b3   :  { %v8152_v33 = vpop.eup %8151 }
0x10b4   :  { %v8154_v36 = vpop.eup %8153  ;;  %v7881_v47 = vadd.f32 -1.0, %v8152_v33 }
0x10b5   :  { %v7882_v52 = vadd.f32 -1.0, %v8154_v36 }
0x10b6   :  { %v5763_v57 = vmul.f32 1.6732632, %v7881_v47 }
0x10b7   :  { %v5764_v40 = vmul.f32 1.6732632, %v7882_v52 }
0x10b8   :  { %v5771_v44 = vsel %vm5731_vm6, %v5723_v35, %v5763_v57 }
0x10b9   :  { %v5779_v16 = vmul.f32 1.050701, %v5771_v44  ;;  %v5772_v19 = vsel %vm5732_vm7, %v5724_v25, %v5764_v40 }
0x10ba   :  { %v5780_v22 = vmul.f32 1.050701, %v5772_v19 }
0x10bb   :  { %v9311_v38 = vpack.c.bf16 %v5779_v16, %v5779_v16 }
0x10bc   :  { %v9313_v2 = vpack.c.bf16 %v5780_v22, %v5780_v22 }
0x10bd   :  { %8503 = dma.done.wait [#allocation3], 32768 }
0x10be   :  { %8504 = vsyncadd [#allocation3], 4294934528  ;;  %6114 = vmatprep.mubr.bf16.mxu0 %v9291_v27  ;;  %6155 = vmatprep.mubr.bf16.mxu1 %v9295_v18  ;;  %5807 = sst [smem:[#allocation41]] %s8520_s25  ;;  %s5791_s21 = scalar_lea.hbm %s9639_s2, 294912 }
0x10bf   :  { %5809 = sst [smem:[#allocation41 + $0x1]] %s8520_s25  ;;  %s8541_s8 = smov [#allocation40]  }
0x10c0   :  { %5811 = sst [smem:[#allocation41 + $0x2]] %s8522_s26 }
0x10c1   :  { %5813 = sst [smem:[#allocation41 + $0x3]] %s8523_s11 }
0x10c2   :  { %5815 = sst [smem:[#allocation41 + $0x4]] %s8524_s7 }
0x10c3   :  { %5817 = sst [smem:[#allocation41 + $0x5]] %s8525_s22 }
0x10c4   :  { %5819 = sst [smem:[#allocation41 + $0x6]] %s8526_s29 }
0x10c5   :  { %5821 = sst [smem:[#allocation41 + $0x7]] %s8523_s11 }
0x10c6   :  { %5823 = sst [smem:[#allocation41 + $0x8]] %s8522_s26 }
0x10c7   :  { %5825 = dma.general %s5791_s21, 32768, %s8835_s9, %s8532_s4, %s8541_s8, [#allocation41], %s8734_s1, 0  }
0x10c8   :  { %v5827_v41 = vld [vmem:[#allocation2 + $0x8] sm:$0xff]  ;;  %v5826_v43 = vld [vmem:[#allocation2] sm:$0xff] }
0x10c9   :  { %v5891_v42 = vld [vmem:[#allocation2 + $0x208] sm:$0xff]  ;;  %6082 = vmatprep.subr.bf16.mxu0 %v5827_v41  ;;  %v5890_v49 = vld [vmem:[#allocation2 + $0x200] sm:$0xff] }
0x10ca   :  { %6123 = vmatprep.subr.bf16.mxu1 %v5891_v42  ;;  %v5831_v51 = vld [vmem:[#allocation2 + $0x28] sm:$0xff]  ;;  %6083 = vmatpush1.bf16.msra.mxu0 %v5826_v43  ;;  %v5830_v45 = vld [vmem:[#allocation2 + $0x20] sm:$0xff] }
0x10cb   :  { %v5895_v62 = vld [vmem:[#allocation2 + $0x228] sm:$0xff]  ;;  %6124 = vmatpush1.bf16.msra.mxu1 %v5890_v49  ;;  %6084 = vmatprep.subr.bf16.mxu0 %v5831_v51  ;;  %v5894_v46 = vld [vmem:[#allocation2 + $0x220] sm:$0xff] }
0x10cc   :  { %6125 = vmatprep.subr.bf16.mxu1 %v5895_v62  ;;  %v5835_v48 = vld [vmem:[#allocation2 + $0x48] sm:$0xff]  ;;  %v5834_v50 = vld [vmem:[#allocation2 + $0x40] sm:$0xff] }
0x10cd   :  { %v5899_v53 = vld [vmem:[#allocation2 + $0x248] sm:$0xff]  ;;  %v5898_v54 = vld [vmem:[#allocation2 + $0x240] sm:$0xff] }
0x10ce   :  { %6085 = vmatpush1.bf16.msra.mxu0 %v5830_v45  ;;  %v5839_v55 = vld [vmem:[#allocation2 + $0x68] sm:$0xff]  ;;  %v5838_v37 = vld [vmem:[#allocation2 + $0x60] sm:$0xff] }
0x10cf   :  { %6126 = vmatpush1.bf16.msra.mxu1 %v5894_v46  ;;  %6086 = vmatprep.subr.bf16.mxu0 %v5835_v48  ;;  %v5903_v59 = vld [vmem:[#allocation2 + $0x268] sm:$0xff]  ;;  %v5902_v60 = vld [vmem:[#allocation2 + $0x260] sm:$0xff] }
0x10d0   :  { %6127 = vmatprep.subr.bf16.mxu1 %v5899_v53  ;;  %v5843_v15 = vld [vmem:[#allocation2 + $0x88] sm:$0xff]  ;;  %v5842_v23 = vld [vmem:[#allocation2 + $0x80] sm:$0xff] }
0x10d1   :  { %v5907_v28 = vld [vmem:[#allocation2 + $0x288] sm:$0xff]  ;;  %v5906_v39 = vld [vmem:[#allocation2 + $0x280] sm:$0xff] }
0x10d2   :  { %6087 = vmatpush1.bf16.msra.mxu0 %v5834_v50  ;;  %v5847_v32 = vld [vmem:[#allocation2 + $0xa8] sm:$0xff]  ;;  %v5846_v61 = vld [vmem:[#allocation2 + $0xa0] sm:$0xff] }
0x10d3   :  { %6128 = vmatpush1.bf16.msra.mxu1 %v5898_v54  ;;  %6088 = vmatprep.subr.bf16.mxu0 %v5839_v55  ;;  %v5911_v31 = vld [vmem:[#allocation2 + $0x2a8] sm:$0xff]  ;;  %v5910_v63 = vld [vmem:[#allocation2 + $0x2a0] sm:$0xff] }
0x10d4   :  { %6129 = vmatprep.subr.bf16.mxu1 %v5903_v59  ;;  %v5851_v0 = vld [vmem:[#allocation2 + $0xc8] sm:$0xff]  ;;  %v5850_v4 = vld [vmem:[#allocation2 + $0xc0] sm:$0xff] }
0x10d5   :  { %v5915_v3 = vld [vmem:[#allocation2 + $0x2c8] sm:$0xff]  ;;  %v5914_v56 = vld [vmem:[#allocation2 + $0x2c0] sm:$0xff] }
0x10d6   :  { %6089 = vmatpush1.bf16.msra.mxu0 %v5838_v37  ;;  %v5855_v29 = vld [vmem:[#allocation2 + $0xe8] sm:$0xff]  ;;  %v5854_v20 = vld [vmem:[#allocation2 + $0xe0] sm:$0xff] }
0x10d7   :  { %6130 = vmatpush1.bf16.msra.mxu1 %v5902_v60  ;;  %6090 = vmatprep.subr.bf16.mxu0 %v5843_v15  ;;  %v5919_v14 = vld [vmem:[#allocation2 + $0x2e8] sm:$0xff]  ;;  %v5918_v21 = vld [vmem:[#allocation2 + $0x2e0] sm:$0xff] }
0x10d8   :  { %6131 = vmatprep.subr.bf16.mxu1 %v5907_v28  ;;  %v5859_v34 = vld [vmem:[#allocation2 + $0x108] sm:$0xff]  ;;  %v5858_v35 = vld [vmem:[#allocation2 + $0x100] sm:$0xff] }
0x10d9   :  { %v5923_v24 = vld [vmem:[#allocation2 + $0x308] sm:$0xff]  ;;  %v5922_v25 = vld [vmem:[#allocation2 + $0x300] sm:$0xff] }
0x10da   :  { %6091 = vmatpush1.bf16.msra.mxu0 %v5842_v23  ;;  %v5863_v26 = vld [vmem:[#allocation2 + $0x128] sm:$0xff]  ;;  %v5862_v33 = vld [vmem:[#allocation2 + $0x120] sm:$0xff] }
0x10db   :  { %6132 = vmatpush1.bf16.msra.mxu1 %v5906_v39  ;;  %6092 = vmatprep.subr.bf16.mxu0 %v5847_v32  ;;  %v5927_v30 = vld [vmem:[#allocation2 + $0x328] sm:$0xff]  ;;  %v5926_v36 = vld [vmem:[#allocation2 + $0x320] sm:$0xff] }
0x10dc   :  { %6133 = vmatprep.subr.bf16.mxu1 %v5911_v31  ;;  %v5867_v47 = vld [vmem:[#allocation2 + $0x148] sm:$0xff]  ;;  %v5866_v57 = vld [vmem:[#allocation2 + $0x140] sm:$0xff] }
0x10dd   :  { %v5931_v52 = vld [vmem:[#allocation2 + $0x348] sm:$0xff]  ;;  %v5930_v40 = vld [vmem:[#allocation2 + $0x340] sm:$0xff] }
0x10de   :  { %6093 = vmatpush1.bf16.msra.mxu0 %v5846_v61  ;;  %v5871_v44 = vld [vmem:[#allocation2 + $0x168] sm:$0xff]  ;;  %v5870_v19 = vld [vmem:[#allocation2 + $0x160] sm:$0xff] }
0x10df   :  { %6134 = vmatpush1.bf16.msra.mxu1 %v5910_v63  ;;  %6094 = vmatprep.subr.bf16.mxu0 %v5851_v0  ;;  %v5935_v16 = vld [vmem:[#allocation2 + $0x368] sm:$0xff]  ;;  %v5934_v22 = vld [vmem:[#allocation2 + $0x360] sm:$0xff] }
0x10e0   :  { %6135 = vmatprep.subr.bf16.mxu1 %v5915_v3  ;;  %v5875_v41 = vld [vmem:[#allocation2 + $0x188] sm:$0xff]  ;;  %v5874_v43 = vld [vmem:[#allocation2 + $0x180] sm:$0xff] }
0x10e1   :  { %v5939_v42 = vld [vmem:[#allocation2 + $0x388] sm:$0xff]  ;;  %v5938_v49 = vld [vmem:[#allocation2 + $0x380] sm:$0xff] }
0x10e2   :  { %6095 = vmatpush1.bf16.msra.mxu0 %v5850_v4  ;;  %v5879_v51 = vld [vmem:[#allocation2 + $0x1a8] sm:$0xff]  ;;  %v5878_v45 = vld [vmem:[#allocation2 + $0x1a0] sm:$0xff] }
0x10e3   :  { %6136 = vmatpush1.bf16.msra.mxu1 %v5914_v56  ;;  %6096 = vmatprep.subr.bf16.mxu0 %v5855_v29  ;;  %v5943_v62 = vld [vmem:[#allocation2 + $0x3a8] sm:$0xff]  ;;  %v5942_v46 = vld [vmem:[#allocation2 + $0x3a0] sm:$0xff] }
0x10e4   :  { %6137 = vmatprep.subr.bf16.mxu1 %v5919_v14  ;;  %v5883_v48 = vld [vmem:[#allocation2 + $0x1c8] sm:$0xff]  ;;  %v5882_v50 = vld [vmem:[#allocation2 + $0x1c0] sm:$0xff] }
0x10e5   :  { %v5947_v53 = vld [vmem:[#allocation2 + $0x3c8] sm:$0xff]  ;;  %v5946_v54 = vld [vmem:[#allocation2 + $0x3c0] sm:$0xff] }
0x10e6   :  { %6097 = vmatpush1.bf16.msra.mxu0 %v5854_v20  ;;  %v5887_v55 = vld [vmem:[#allocation2 + $0x1e8] sm:$0xff]  ;;  %v5886_v37 = vld [vmem:[#allocation2 + $0x1e0] sm:$0xff] }
0x10e7   :  { %6138 = vmatpush1.bf16.msra.mxu1 %v5918_v21  ;;  %6098 = vmatprep.subr.bf16.mxu0 %v5859_v34  ;;  %v5951_v59 = vld [vmem:[#allocation2 + $0x3e8] sm:$0xff]  ;;  %v5950_v60 = vld [vmem:[#allocation2 + $0x3e0] sm:$0xff] }
0x10e8   :  { %6139 = vmatprep.subr.bf16.mxu1 %v5923_v24  ;;  %v5955_v15 = vld [vmem:[#allocation2 + $0x408] sm:$0xff]  ;;  %v5954_v23 = vld [vmem:[#allocation2 + $0x400] sm:$0xff] }
0x10e9   :  { %v6019_v28 = vld [vmem:[#allocation2 + $0x608] sm:$0xff]  ;;  %v6018_v39 = vld [vmem:[#allocation2 + $0x600] sm:$0xff] }
0x10ea   :  { %6099 = vmatpush1.bf16.msra.mxu0 %v5858_v35  ;;  %v5959_v32 = vld [vmem:[#allocation2 + $0x428] sm:$0xff]  ;;  %v5958_v61 = vld [vmem:[#allocation2 + $0x420] sm:$0xff] }
0x10eb   :  { %6140 = vmatpush1.bf16.msra.mxu1 %v5922_v25  ;;  %6100 = vmatprep.subr.bf16.mxu0 %v5863_v26  ;;  %v6023_v31 = vld [vmem:[#allocation2 + $0x628] sm:$0xff]  ;;  %v6022_v63 = vld [vmem:[#allocation2 + $0x620] sm:$0xff] }
0x10ec   :  { %6141 = vmatprep.subr.bf16.mxu1 %v5927_v30  ;;  %v5963_v0 = vld [vmem:[#allocation2 + $0x448] sm:$0xff]  ;;  %v5962_v4 = vld [vmem:[#allocation2 + $0x440] sm:$0xff] }
0x10ed   :  { %v6027_v3 = vld [vmem:[#allocation2 + $0x648] sm:$0xff]  ;;  %v6026_v56 = vld [vmem:[#allocation2 + $0x640] sm:$0xff] }
0x10ee   :  { %6101 = vmatpush1.bf16.msra.mxu0 %v5862_v33  ;;  %v5967_v29 = vld [vmem:[#allocation2 + $0x468] sm:$0xff]  ;;  %v5966_v20 = vld [vmem:[#allocation2 + $0x460] sm:$0xff] }
0x10ef   :  { %6142 = vmatpush1.bf16.msra.mxu1 %v5926_v36  ;;  %6102 = vmatprep.subr.bf16.mxu0 %v5867_v47  ;;  %v6031_v14 = vld [vmem:[#allocation2 + $0x668] sm:$0xff]  ;;  %v6030_v21 = vld [vmem:[#allocation2 + $0x660] sm:$0xff] }
0x10f0   :  { %6143 = vmatprep.subr.bf16.mxu1 %v5931_v52  ;;  %v5971_v34 = vld [vmem:[#allocation2 + $0x488] sm:$0xff]  ;;  %v5970_v35 = vld [vmem:[#allocation2 + $0x480] sm:$0xff] }
0x10f1   :  { %v6035_v24 = vld [vmem:[#allocation2 + $0x688] sm:$0xff]  ;;  %v6034_v25 = vld [vmem:[#allocation2 + $0x680] sm:$0xff] }
0x10f2   :  { %6103 = vmatpush1.bf16.msra.mxu0 %v5866_v57  ;;  %v5975_v26 = vld [vmem:[#allocation2 + $0x4a8] sm:$0xff]  ;;  %v5974_v33 = vld [vmem:[#allocation2 + $0x4a0] sm:$0xff] }
0x10f3   :  { %6144 = vmatpush1.bf16.msra.mxu1 %v5930_v40  ;;  %6104 = vmatprep.subr.bf16.mxu0 %v5871_v44  ;;  %v6039_v30 = vld [vmem:[#allocation2 + $0x6a8] sm:$0xff]  ;;  %v6038_v36 = vld [vmem:[#allocation2 + $0x6a0] sm:$0xff] }
0x10f4   :  { %6145 = vmatprep.subr.bf16.mxu1 %v5935_v16  ;;  %v5979_v47 = vld [vmem:[#allocation2 + $0x4c8] sm:$0xff]  ;;  %v5978_v57 = vld [vmem:[#allocation2 + $0x4c0] sm:$0xff] }
0x10f5   :  { %v6043_v52 = vld [vmem:[#allocation2 + $0x6c8] sm:$0xff]  ;;  %v6042_v40 = vld [vmem:[#allocation2 + $0x6c0] sm:$0xff] }
0x10f6   :  { %6105 = vmatpush1.bf16.msra.mxu0 %v5870_v19  ;;  %v5983_v44 = vld [vmem:[#allocation2 + $0x4e8] sm:$0xff]  ;;  %v5982_v19 = vld [vmem:[#allocation2 + $0x4e0] sm:$0xff] }
0x10f7   :  { %6146 = vmatpush1.bf16.msra.mxu1 %v5934_v22  ;;  %6106 = vmatprep.subr.bf16.mxu0 %v5875_v41  ;;  %v6047_v16 = vld [vmem:[#allocation2 + $0x6e8] sm:$0xff]  ;;  %v6046_v22 = vld [vmem:[#allocation2 + $0x6e0] sm:$0xff] }
0x10f8   :  { %6147 = vmatprep.subr.bf16.mxu1 %v5939_v42  ;;  %v5987_v41 = vld [vmem:[#allocation2 + $0x508] sm:$0xff] }
0x10f9   :  { %v6051_v42 = vld [vmem:[#allocation2 + $0x708] sm:$0xff] }
0x10fa   :  { %6107 = vmatpush1.bf16.msra.mxu0 %v5874_v43  ;;  %v5986_v43 = vld [vmem:[#allocation2 + $0x500] sm:$0xff] }
0x10fb   :  { %6148 = vmatpush1.bf16.msra.mxu1 %v5938_v49  ;;  %6108 = vmatprep.subr.bf16.mxu0 %v5879_v51  ;;  %v6050_v49 = vld [vmem:[#allocation2 + $0x700] sm:$0xff]  ;;  %v5991_v51 = vld [vmem:[#allocation2 + $0x528] sm:$0xff] }
0x10fc   :  { %6149 = vmatprep.subr.bf16.mxu1 %v5943_v62  ;;  %v6055_v62 = vld [vmem:[#allocation2 + $0x728] sm:$0xff] }
0x10fe   :  { %6109 = vmatpush1.bf16.msra.mxu0 %v5878_v45  ;;  %v5990_v45 = vld [vmem:[#allocation2 + $0x520] sm:$0xff] }
0x10ff   :  { %6150 = vmatpush1.bf16.msra.mxu1 %v5942_v46  ;;  %6110 = vmatprep.subr.bf16.mxu0 %v5883_v48  ;;  %v6054_v46 = vld [vmem:[#allocation2 + $0x720] sm:$0xff]  ;;  %v5995_v48 = vld [vmem:[#allocation2 + $0x548] sm:$0xff] }
0x1100   :  { %6151 = vmatprep.subr.bf16.mxu1 %v5947_v53  ;;  %v6059_v53 = vld [vmem:[#allocation2 + $0x748] sm:$0xff] }
0x1102   :  { %6111 = vmatpush1.bf16.msra.mxu0 %v5882_v50  ;;  %v5994_v50 = vld [vmem:[#allocation2 + $0x540] sm:$0xff] }
0x1103   :  { %6152 = vmatpush1.bf16.msra.mxu1 %v5946_v54  ;;  %6112 = vmatprep.subr.bf16.mxu0 %v5887_v55  ;;  %v6058_v54 = vld [vmem:[#allocation2 + $0x740] sm:$0xff]  ;;  %v5999_v55 = vld [vmem:[#allocation2 + $0x568] sm:$0xff] }
0x1104   :  { %6153 = vmatprep.subr.bf16.mxu1 %v5951_v59  ;;  %v6063_v59 = vld [vmem:[#allocation2 + $0x768] sm:$0xff] }
0x1106   :  { %6113 = vmatpush1.bf16.msra.mxu0 %v5886_v37  ;;  %v5998_v37 = vld [vmem:[#allocation2 + $0x560] sm:$0xff] }
0x1107   :  { %6154 = vmatpush1.bf16.msra.mxu1 %v5950_v60  ;;  %6164 = vmatprep.subr.bf16.mxu0 %v5955_v15  ;;  %v6062_v60 = vld [vmem:[#allocation2 + $0x760] sm:$0xff]  ;;  %v6003_v15 = vld [vmem:[#allocation2 + $0x588] sm:$0xff] }
0x1108   :  { %6205 = vmatprep.subr.bf16.mxu1 %v6019_v28  ;;  %v6067_v28 = vld [vmem:[#allocation2 + $0x788] sm:$0xff] }
0x1109   :  { %6115 = vmatmul.mubr.bf16.vlgmr.msra.gmra.mrb[128].mxu0 %v9289_v58 }
0x110a   :  { %6156 = vmatmul.mubr.bf16.vlgmr.msra.gmra.mrb[128].mxu1 %v9293_v6  ;;  %6165 = vmatpush1.bf16.msra.mxu0 %v5954_v23  ;;  %v6002_v23 = vld [vmem:[#allocation2 + $0x580] sm:$0xff] }
0x110b   :  { %6206 = vmatpush1.bf16.msra.mxu1 %v6018_v39  ;;  %6166 = vmatprep.subr.bf16.mxu0 %v5959_v32  ;;  %v6066_v39 = vld [vmem:[#allocation2 + $0x780] sm:$0xff]  ;;  %v6007_v32 = vld [vmem:[#allocation2 + $0x5a8] sm:$0xff] }
0x110c   :  { %6207 = vmatprep.subr.bf16.mxu1 %v6023_v31  ;;  %6196 = vmatprep.mubr.bf16.mxu0 %v9305_v17  ;;  %v6071_v31 = vld [vmem:[#allocation2 + $0x7a8] sm:$0xff] }
0x110d   :  { %6237 = vmatprep.mubr.bf16.mxu1 %v9313_v2 }
0x110e   :  { %6167 = vmatpush1.bf16.msra.mxu0 %v5958_v61  ;;  %v6006_v61 = vld [vmem:[#allocation2 + $0x5a0] sm:$0xff] }
0x110f   :  { %6208 = vmatpush1.bf16.msra.mxu1 %v6022_v63  ;;  %6168 = vmatprep.subr.bf16.mxu0 %v5963_v0  ;;  %v6070_v63 = vld [vmem:[#allocation2 + $0x7a0] sm:$0xff]  ;;  %v6011_v0 = vld [vmem:[#allocation2 + $0x5c8] sm:$0xff] }
0x1110   :  { %6209 = vmatprep.subr.bf16.mxu1 %v6027_v3  ;;  %v6075_v3 = vld [vmem:[#allocation2 + $0x7c8] sm:$0xff] }
0x1112   :  { %6169 = vmatpush1.bf16.msra.mxu0 %v5962_v4  ;;  %v6010_v4 = vld [vmem:[#allocation2 + $0x5c0] sm:$0xff] }
0x1113   :  { %6210 = vmatpush1.bf16.msra.mxu1 %v6026_v56  ;;  %6170 = vmatprep.subr.bf16.mxu0 %v5967_v29  ;;  %v6074_v56 = vld [vmem:[#allocation2 + $0x7c0] sm:$0xff]  ;;  %v6015_v29 = vld [vmem:[#allocation2 + $0x5e8] sm:$0xff] }
0x1114   :  { %6211 = vmatprep.subr.bf16.mxu1 %v6031_v14  ;;  %v6079_v14 = vld [vmem:[#allocation2 + $0x7e8] sm:$0xff] }
0x1116   :  { %6171 = vmatpush1.bf16.msra.mxu0 %v5966_v20  ;;  %v6014_v20 = vld [vmem:[#allocation2 + $0x5e0] sm:$0xff] }
0x1117   :  { %6212 = vmatpush1.bf16.msra.mxu1 %v6030_v21  ;;  %6172 = vmatprep.subr.bf16.mxu0 %v5971_v34  ;;  %v6078_v21 = vld [vmem:[#allocation2 + $0x7e0] sm:$0xff]  ;;  %v5829_v34 = vld [vmem:[#allocation2 + $0x18] sm:$0xff] }
0x1118   :  { %6213 = vmatprep.subr.bf16.mxu1 %v6035_v24  ;;  %v5893_v24 = vld [vmem:[#allocation2 + $0x218] sm:$0xff] }
0x111a   :  { %6173 = vmatpush1.bf16.msra.mxu0 %v5970_v35  ;;  %v5828_v35 = vld [vmem:[#allocation2 + $0x10] sm:$0xff] }
0x111b   :  { %6214 = vmatpush1.bf16.msra.mxu1 %v6034_v25  ;;  %6174 = vmatprep.subr.bf16.mxu0 %v5975_v26  ;;  %v5892_v25 = vld [vmem:[#allocation2 + $0x210] sm:$0xff]  ;;  %v5833_v26 = vld [vmem:[#allocation2 + $0x38] sm:$0xff] }
0x111c   :  { %6215 = vmatprep.subr.bf16.mxu1 %v6039_v30  ;;  %v5897_v30 = vld [vmem:[#allocation2 + $0x238] sm:$0xff] }
0x111e   :  { %6175 = vmatpush1.bf16.msra.mxu0 %v5974_v33  ;;  %v5832_v33 = vld [vmem:[#allocation2 + $0x30] sm:$0xff] }
0x111f   :  { %6216 = vmatpush1.bf16.msra.mxu1 %v6038_v36  ;;  %6176 = vmatprep.subr.bf16.mxu0 %v5979_v47  ;;  %v5896_v36 = vld [vmem:[#allocation2 + $0x230] sm:$0xff]  ;;  %v5837_v47 = vld [vmem:[#allocation2 + $0x58] sm:$0xff] }
0x1120   :  { %6217 = vmatprep.subr.bf16.mxu1 %v6043_v52  ;;  %v5901_v52 = vld [vmem:[#allocation2 + $0x258] sm:$0xff] }
0x1122   :  { %6177 = vmatpush1.bf16.msra.mxu0 %v5978_v57  ;;  %v5836_v57 = vld [vmem:[#allocation2 + $0x50] sm:$0xff] }
0x1123   :  { %6218 = vmatpush1.bf16.msra.mxu1 %v6042_v40  ;;  %6178 = vmatprep.subr.bf16.mxu0 %v5983_v44  ;;  %v5900_v40 = vld [vmem:[#allocation2 + $0x250] sm:$0xff]  ;;  %v5841_v44 = vld [vmem:[#allocation2 + $0x78] sm:$0xff] }
0x1124   :  { %6219 = vmatprep.subr.bf16.mxu1 %v6047_v16  ;;  %v5905_v16 = vld [vmem:[#allocation2 + $0x278] sm:$0xff] }
0x1126   :  { %6179 = vmatpush1.bf16.msra.mxu0 %v5982_v19  ;;  %v5840_v19 = vld [vmem:[#allocation2 + $0x70] sm:$0xff] }
0x1127   :  { %6220 = vmatpush1.bf16.msra.mxu1 %v6046_v22  ;;  %6180 = vmatprep.subr.bf16.mxu0 %v5987_v41  ;;  %v5904_v22 = vld [vmem:[#allocation2 + $0x270] sm:$0xff]  ;;  %v5845_v41 = vld [vmem:[#allocation2 + $0x98] sm:$0xff] }
0x1128   :  { %6221 = vmatprep.subr.bf16.mxu1 %v6051_v42  ;;  %v5909_v42 = vld [vmem:[#allocation2 + $0x298] sm:$0xff] }
0x112a   :  { %6181 = vmatpush1.bf16.msra.mxu0 %v5986_v43  ;;  %v5844_v43 = vld [vmem:[#allocation2 + $0x90] sm:$0xff] }
0x112b   :  { %6222 = vmatpush1.bf16.msra.mxu1 %v6050_v49  ;;  %6182 = vmatprep.subr.bf16.mxu0 %v5991_v51  ;;  %v5908_v49 = vld [vmem:[#allocation2 + $0x290] sm:$0xff]  ;;  %v5849_v51 = vld [vmem:[#allocation2 + $0xb8] sm:$0xff] }
0x112c   :  { %6223 = vmatprep.subr.bf16.mxu1 %v6055_v62  ;;  %v5913_v62 = vld [vmem:[#allocation2 + $0x2b8] sm:$0xff] }
0x112e   :  { %6183 = vmatpush1.bf16.msra.mxu0 %v5990_v45  ;;  %v5848_v45 = vld [vmem:[#allocation2 + $0xb0] sm:$0xff] }
0x112f   :  { %6224 = vmatpush1.bf16.msra.mxu1 %v6054_v46  ;;  %6184 = vmatprep.subr.bf16.mxu0 %v5995_v48  ;;  %v5912_v46 = vld [vmem:[#allocation2 + $0x2b0] sm:$0xff]  ;;  %v5853_v48 = vld [vmem:[#allocation2 + $0xd8] sm:$0xff] }
0x1130   :  { %6225 = vmatprep.subr.bf16.mxu1 %v6059_v53  ;;  %v5917_v53 = vld [vmem:[#allocation2 + $0x2d8] sm:$0xff] }
0x1132   :  { %6185 = vmatpush1.bf16.msra.mxu0 %v5994_v50  ;;  %v5852_v50 = vld [vmem:[#allocation2 + $0xd0] sm:$0xff] }
0x1133   :  { %6226 = vmatpush1.bf16.msra.mxu1 %v6058_v54  ;;  %6186 = vmatprep.subr.bf16.mxu0 %v5999_v55  ;;  %v5916_v54 = vld [vmem:[#allocation2 + $0x2d0] sm:$0xff]  ;;  %v5857_v55 = vld [vmem:[#allocation2 + $0xf8] sm:$0xff] }
0x1134   :  { %6227 = vmatprep.subr.bf16.mxu1 %v6063_v59  ;;  %v5921_v59 = vld [vmem:[#allocation2 + $0x2f8] sm:$0xff] }
0x1136   :  { %6187 = vmatpush1.bf16.msra.mxu0 %v5998_v37  ;;  %v5856_v37 = vld [vmem:[#allocation2 + $0xf0] sm:$0xff] }
0x1137   :  { %6228 = vmatpush1.bf16.msra.mxu1 %v6062_v60  ;;  %6188 = vmatprep.subr.bf16.mxu0 %v6003_v15  ;;  %v5920_v60 = vld [vmem:[#allocation2 + $0x2f0] sm:$0xff]  ;;  %v5861_v15 = vld [vmem:[#allocation2 + $0x118] sm:$0xff] }
0x1138   :  { %6229 = vmatprep.subr.bf16.mxu1 %v6067_v28  ;;  %v5925_v28 = vld [vmem:[#allocation2 + $0x318] sm:$0xff] }
0x113a   :  { %6189 = vmatpush1.bf16.msra.mxu0 %v6002_v23  ;;  %v5860_v23 = vld [vmem:[#allocation2 + $0x110] sm:$0xff] }
0x113b   :  { %6230 = vmatpush1.bf16.msra.mxu1 %v6066_v39  ;;  %6190 = vmatprep.subr.bf16.mxu0 %v6007_v32  ;;  %v5924_v39 = vld [vmem:[#allocation2 + $0x310] sm:$0xff]  ;;  %v5865_v32 = vld [vmem:[#allocation2 + $0x138] sm:$0xff] }
0x113c   :  { %6231 = vmatprep.subr.bf16.mxu1 %v6071_v31  ;;  %v5929_v31 = vld [vmem:[#allocation2 + $0x338] sm:$0xff] }
0x113e   :  { %6191 = vmatpush1.bf16.msra.mxu0 %v6006_v61  ;;  %v5864_v61 = vld [vmem:[#allocation2 + $0x130] sm:$0xff] }
0x113f   :  { %6232 = vmatpush1.bf16.msra.mxu1 %v6070_v63  ;;  %6192 = vmatprep.subr.bf16.mxu0 %v6011_v0  ;;  %v5928_v63 = vld [vmem:[#allocation2 + $0x330] sm:$0xff]  ;;  %v5869_v0 = vld [vmem:[#allocation2 + $0x158] sm:$0xff] }
0x1140   :  { %6233 = vmatprep.subr.bf16.mxu1 %v6075_v3  ;;  %v5933_v3 = vld [vmem:[#allocation2 + $0x358] sm:$0xff] }
0x1142   :  { %6193 = vmatpush1.bf16.msra.mxu0 %v6010_v4  ;;  %v5868_v4 = vld [vmem:[#allocation2 + $0x150] sm:$0xff] }
0x1143   :  { %6234 = vmatpush1.bf16.msra.mxu1 %v6074_v56  ;;  %6194 = vmatprep.subr.bf16.mxu0 %v6015_v29  ;;  %v5932_v56 = vld [vmem:[#allocation2 + $0x350] sm:$0xff]  ;;  %v5873_v29 = vld [vmem:[#allocation2 + $0x178] sm:$0xff] }
0x1144   :  { %6235 = vmatprep.subr.bf16.mxu1 %v6079_v14  ;;  %v5937_v14 = vld [vmem:[#allocation2 + $0x378] sm:$0xff] }
0x1146   :  { %6195 = vmatpush1.bf16.msra.mxu0 %v6014_v20  ;;  %v5872_v20 = vld [vmem:[#allocation2 + $0x170] sm:$0xff] }
0x1147   :  { %6236 = vmatpush1.bf16.msra.mxu1 %v6078_v21  ;;  %6246 = vmatprep.subr.bf16.mxu0 %v5829_v34  ;;  %v5936_v21 = vld [vmem:[#allocation2 + $0x370] sm:$0xff]  ;;  %v5877_v34 = vld [vmem:[#allocation2 + $0x198] sm:$0xff] }
0x1148   :  { %6287 = vmatprep.subr.bf16.mxu1 %v5893_v24  ;;  %v5941_v24 = vld [vmem:[#allocation2 + $0x398] sm:$0xff] }
0x1149   :  { %6197 = vmatmul.mubr.bf16.vlgmr.msra.gmra.mrb[132].mxu0 %v9303_v1 }
0x114a   :  { %6238 = vmatmul.mubr.bf16.vlgmr.msra.gmra.mrb[132].mxu1 %v9311_v38  ;;  %6247 = vmatpush1.bf16.msra.mxu0 %v5828_v35  ;;  %v5876_v35 = vld [vmem:[#allocation2 + $0x190] sm:$0xff] }
0x114b   :  { %6288 = vmatpush1.bf16.msra.mxu1 %v5892_v25  ;;  %6248 = vmatprep.subr.bf16.mxu0 %v5833_v26  ;;  %v5940_v25 = vld [vmem:[#allocation2 + $0x390] sm:$0xff]  ;;  %v5881_v26 = vld [vmem:[#allocation2 + $0x1b8] sm:$0xff] }
0x114c   :  { %6289 = vmatprep.subr.bf16.mxu1 %v5897_v30  ;;  %6278 = vmatprep.mubr.bf16.mxu0 %v9291_v27  ;;  %v5945_v30 = vld [vmem:[#allocation2 + $0x3b8] sm:$0xff] }
0x114d   :  { %6319 = vmatprep.mubr.bf16.mxu1 %v9295_v18 }
0x114e   :  { %6249 = vmatpush1.bf16.msra.mxu0 %v5832_v33  ;;  %v5880_v33 = vld [vmem:[#allocation2 + $0x1b0] sm:$0xff] }
0x114f   :  { %6290 = vmatpush1.bf16.msra.mxu1 %v5896_v36  ;;  %6250 = vmatprep.subr.bf16.mxu0 %v5837_v47  ;;  %v5944_v36 = vld [vmem:[#allocation2 + $0x3b0] sm:$0xff]  ;;  %v5885_v47 = vld [vmem:[#allocation2 + $0x1d8] sm:$0xff] }
0x1150   :  { %6291 = vmatprep.subr.bf16.mxu1 %v5901_v52  ;;  %v5949_v52 = vld [vmem:[#allocation2 + $0x3d8] sm:$0xff] }
0x1152   :  { %6251 = vmatpush1.bf16.msra.mxu0 %v5836_v57  ;;  %v5884_v57 = vld [vmem:[#allocation2 + $0x1d0] sm:$0xff] }
0x1153   :  { %6292 = vmatpush1.bf16.msra.mxu1 %v5900_v40  ;;  %6252 = vmatprep.subr.bf16.mxu0 %v5841_v44  ;;  %v5948_v40 = vld [vmem:[#allocation2 + $0x3d0] sm:$0xff]  ;;  %v5889_v44 = vld [vmem:[#allocation2 + $0x1f8] sm:$0xff] }
0x1154   :  { %6293 = vmatprep.subr.bf16.mxu1 %v5905_v16  ;;  %v5953_v16 = vld [vmem:[#allocation2 + $0x3f8] sm:$0xff] }
0x1156   :  { %6253 = vmatpush1.bf16.msra.mxu0 %v5840_v19  ;;  %v5888_v19 = vld [vmem:[#allocation2 + $0x1f0] sm:$0xff] }
0x1157   :  { %6294 = vmatpush1.bf16.msra.mxu1 %v5904_v22  ;;  %6254 = vmatprep.subr.bf16.mxu0 %v5845_v41  ;;  %v5952_v22 = vld [vmem:[#allocation2 + $0x3f0] sm:$0xff]  ;;  %v5957_v41 = vld [vmem:[#allocation2 + $0x418] sm:$0xff] }
0x1158   :  { %6295 = vmatprep.subr.bf16.mxu1 %v5909_v42  ;;  %v6021_v42 = vld [vmem:[#allocation2 + $0x618] sm:$0xff] }
0x115a   :  { %6255 = vmatpush1.bf16.msra.mxu0 %v5844_v43  ;;  %v5956_v43 = vld [vmem:[#allocation2 + $0x410] sm:$0xff] }
0x115b   :  { %6296 = vmatpush1.bf16.msra.mxu1 %v5908_v49  ;;  %6256 = vmatprep.subr.bf16.mxu0 %v5849_v51  ;;  %v6020_v49 = vld [vmem:[#allocation2 + $0x610] sm:$0xff]  ;;  %v5961_v51 = vld [vmem:[#allocation2 + $0x438] sm:$0xff] }
0x115c   :  { %6297 = vmatprep.subr.bf16.mxu1 %v5913_v62  ;;  %v6025_v62 = vld [vmem:[#allocation2 + $0x638] sm:$0xff] }
0x115e   :  { %6257 = vmatpush1.bf16.msra.mxu0 %v5848_v45  ;;  %v5960_v45 = vld [vmem:[#allocation2 + $0x430] sm:$0xff] }
0x115f   :  { %6298 = vmatpush1.bf16.msra.mxu1 %v5912_v46  ;;  %6258 = vmatprep.subr.bf16.mxu0 %v5853_v48  ;;  %v6024_v46 = vld [vmem:[#allocation2 + $0x630] sm:$0xff]  ;;  %v5965_v48 = vld [vmem:[#allocation2 + $0x458] sm:$0xff] }
0x1160   :  { %6299 = vmatprep.subr.bf16.mxu1 %v5917_v53  ;;  %v6029_v53 = vld [vmem:[#allocation2 + $0x658] sm:$0xff] }
0x1162   :  { %6259 = vmatpush1.bf16.msra.mxu0 %v5852_v50  ;;  %v5964_v50 = vld [vmem:[#allocation2 + $0x450] sm:$0xff] }
0x1163   :  { %6300 = vmatpush1.bf16.msra.mxu1 %v5916_v54  ;;  %6260 = vmatprep.subr.bf16.mxu0 %v5857_v55  ;;  %v6028_v54 = vld [vmem:[#allocation2 + $0x650] sm:$0xff]  ;;  %v5969_v55 = vld [vmem:[#allocation2 + $0x478] sm:$0xff] }
0x1164   :  { %6301 = vmatprep.subr.bf16.mxu1 %v5921_v59  ;;  %v6033_v59 = vld [vmem:[#allocation2 + $0x678] sm:$0xff] }
0x1166   :  { %6261 = vmatpush1.bf16.msra.mxu0 %v5856_v37  ;;  %v5968_v37 = vld [vmem:[#allocation2 + $0x470] sm:$0xff] }
0x1167   :  { %6302 = vmatpush1.bf16.msra.mxu1 %v5920_v60  ;;  %6262 = vmatprep.subr.bf16.mxu0 %v5861_v15  ;;  %v6032_v60 = vld [vmem:[#allocation2 + $0x670] sm:$0xff]  ;;  %v5973_v15 = vld [vmem:[#allocation2 + $0x498] sm:$0xff] }
0x1168   :  { %6303 = vmatprep.subr.bf16.mxu1 %v5925_v28  ;;  %v6037_v28 = vld [vmem:[#allocation2 + $0x698] sm:$0xff] }
0x116a   :  { %6263 = vmatpush1.bf16.msra.mxu0 %v5860_v23  ;;  %v5972_v23 = vld [vmem:[#allocation2 + $0x490] sm:$0xff] }
0x116b   :  { %6304 = vmatpush1.bf16.msra.mxu1 %v5924_v39  ;;  %6264 = vmatprep.subr.bf16.mxu0 %v5865_v32  ;;  %v6036_v39 = vld [vmem:[#allocation2 + $0x690] sm:$0xff]  ;;  %v5977_v32 = vld [vmem:[#allocation2 + $0x4b8] sm:$0xff] }
0x116c   :  { %6305 = vmatprep.subr.bf16.mxu1 %v5929_v31  ;;  %v6041_v31 = vld [vmem:[#allocation2 + $0x6b8] sm:$0xff] }
0x116e   :  { %6265 = vmatpush1.bf16.msra.mxu0 %v5864_v61  ;;  %v5976_v61 = vld [vmem:[#allocation2 + $0x4b0] sm:$0xff] }
0x116f   :  { %6306 = vmatpush1.bf16.msra.mxu1 %v5928_v63  ;;  %6266 = vmatprep.subr.bf16.mxu0 %v5869_v0  ;;  %v6040_v63 = vld [vmem:[#allocation2 + $0x6b0] sm:$0xff]  ;;  %v5981_v0 = vld [vmem:[#allocation2 + $0x4d8] sm:$0xff] }
0x1170   :  { %6307 = vmatprep.subr.bf16.mxu1 %v5933_v3  ;;  %v6045_v3 = vld [vmem:[#allocation2 + $0x6d8] sm:$0xff] }
0x1172   :  { %6267 = vmatpush1.bf16.msra.mxu0 %v5868_v4  ;;  %v5980_v4 = vld [vmem:[#allocation2 + $0x4d0] sm:$0xff] }
0x1173   :  { %6308 = vmatpush1.bf16.msra.mxu1 %v5932_v56  ;;  %6268 = vmatprep.subr.bf16.mxu0 %v5873_v29  ;;  %v6044_v56 = vld [vmem:[#allocation2 + $0x6d0] sm:$0xff]  ;;  %v5985_v29 = vld [vmem:[#allocation2 + $0x4f8] sm:$0xff] }
0x1174   :  { %6309 = vmatprep.subr.bf16.mxu1 %v5937_v14  ;;  %v6049_v14 = vld [vmem:[#allocation2 + $0x6f8] sm:$0xff] }
0x1176   :  { %6269 = vmatpush1.bf16.msra.mxu0 %v5872_v20  ;;  %v5984_v20 = vld [vmem:[#allocation2 + $0x4f0] sm:$0xff] }
0x1177   :  { %6310 = vmatpush1.bf16.msra.mxu1 %v5936_v21  ;;  %6270 = vmatprep.subr.bf16.mxu0 %v5877_v34  ;;  %v6048_v21 = vld [vmem:[#allocation2 + $0x6f0] sm:$0xff]  ;;  %v5989_v34 = vld [vmem:[#allocation2 + $0x518] sm:$0xff] }
0x1178   :  { %6311 = vmatprep.subr.bf16.mxu1 %v5941_v24  ;;  %v6053_v24 = vld [vmem:[#allocation2 + $0x718] sm:$0xff] }
0x117a   :  { %6271 = vmatpush1.bf16.msra.mxu0 %v5876_v35  ;;  %v5988_v35 = vld [vmem:[#allocation2 + $0x510] sm:$0xff] }
0x117b   :  { %6312 = vmatpush1.bf16.msra.mxu1 %v5940_v25  ;;  %6272 = vmatprep.subr.bf16.mxu0 %v5881_v26  ;;  %v6052_v25 = vld [vmem:[#allocation2 + $0x710] sm:$0xff]  ;;  %v5993_v26 = vld [vmem:[#allocation2 + $0x538] sm:$0xff] }
0x117c   :  { %6313 = vmatprep.subr.bf16.mxu1 %v5945_v30  ;;  %v6057_v30 = vld [vmem:[#allocation2 + $0x738] sm:$0xff] }
0x117e   :  { %6273 = vmatpush1.bf16.msra.mxu0 %v5880_v33  ;;  %v5992_v33 = vld [vmem:[#allocation2 + $0x530] sm:$0xff] }
0x117f   :  { %6314 = vmatpush1.bf16.msra.mxu1 %v5944_v36  ;;  %6274 = vmatprep.subr.bf16.mxu0 %v5885_v47  ;;  %v6056_v36 = vld [vmem:[#allocation2 + $0x730] sm:$0xff]  ;;  %v5997_v47 = vld [vmem:[#allocation2 + $0x558] sm:$0xff] }
0x1180   :  { %6315 = vmatprep.subr.bf16.mxu1 %v5949_v52  ;;  %v6061_v52 = vld [vmem:[#allocation2 + $0x758] sm:$0xff] }
0x1182   :  { %6275 = vmatpush1.bf16.msra.mxu0 %v5884_v57  ;;  %v5996_v57 = vld [vmem:[#allocation2 + $0x550] sm:$0xff] }
0x1183   :  { %6316 = vmatpush1.bf16.msra.mxu1 %v5948_v40  ;;  %6276 = vmatprep.subr.bf16.mxu0 %v5889_v44  ;;  %v6060_v40 = vld [vmem:[#allocation2 + $0x750] sm:$0xff]  ;;  %v6001_v44 = vld [vmem:[#allocation2 + $0x578] sm:$0xff] }
0x1184   :  { %6317 = vmatprep.subr.bf16.mxu1 %v5953_v16  ;;  %v6065_v16 = vld [vmem:[#allocation2 + $0x778] sm:$0xff] }
0x1186   :  { %6277 = vmatpush1.bf16.msra.mxu0 %v5888_v19  ;;  %v6000_v19 = vld [vmem:[#allocation2 + $0x570] sm:$0xff] }
0x1187   :  { %6318 = vmatpush1.bf16.msra.mxu1 %v5952_v22  ;;  %6328 = vmatprep.subr.bf16.mxu0 %v5957_v41  ;;  %v6064_v22 = vld [vmem:[#allocation2 + $0x770] sm:$0xff]  ;;  %v6005_v41 = vld [vmem:[#allocation2 + $0x598] sm:$0xff] }
0x1188   :  { %6369 = vmatprep.subr.bf16.mxu1 %v6021_v42  ;;  %v6069_v42 = vld [vmem:[#allocation2 + $0x798] sm:$0xff] }
0x1189   :  { %6279 = vmatmul.mubr.bf16.vlgmr.msra.gmra.mrb[136].mxu0 %v9289_v58 }
0x118a   :  { %6320 = vmatmul.mubr.bf16.vlgmr.msra.gmra.mrb[136].mxu1 %v9293_v6  ;;  %6329 = vmatpush1.bf16.msra.mxu0 %v5956_v43  ;;  %v6004_v43 = vld [vmem:[#allocation2 + $0x590] sm:$0xff] }
0x118b   :  { %6370 = vmatpush1.bf16.msra.mxu1 %v6020_v49  ;;  %6330 = vmatprep.subr.bf16.mxu0 %v5961_v51  ;;  %v6068_v49 = vld [vmem:[#allocation2 + $0x790] sm:$0xff]  ;;  %v6009_v51 = vld [vmem:[#allocation2 + $0x5b8] sm:$0xff] }
0x118c   :  { %6371 = vmatprep.subr.bf16.mxu1 %v6025_v62  ;;  %6360 = vmatprep.mubr.bf16.mxu0 %v9305_v17  ;;  %v6073_v62 = vld [vmem:[#allocation2 + $0x7b8] sm:$0xff] }
0x118d   :  { %6401 = vmatprep.mubr.bf16.mxu1 %v9313_v2 }
0x118e   :  { %6331 = vmatpush1.bf16.msra.mxu0 %v5960_v45  ;;  %v6008_v45 = vld [vmem:[#allocation2 + $0x5b0] sm:$0xff] }
0x118f   :  { %6372 = vmatpush1.bf16.msra.mxu1 %v6024_v46  ;;  %6332 = vmatprep.subr.bf16.mxu0 %v5965_v48  ;;  %v6072_v46 = vld [vmem:[#allocation2 + $0x7b0] sm:$0xff]  ;;  %v6013_v48 = vld [vmem:[#allocation2 + $0x5d8] sm:$0xff] }
0x1190   :  { %6373 = vmatprep.subr.bf16.mxu1 %v6029_v53  ;;  %v6077_v53 = vld [vmem:[#allocation2 + $0x7d8] sm:$0xff] }
0x1192   :  { %6333 = vmatpush1.bf16.msra.mxu0 %v5964_v50  ;;  %v6012_v50 = vld [vmem:[#allocation2 + $0x5d0] sm:$0xff] }
0x1193   :  { %6374 = vmatpush1.bf16.msra.mxu1 %v6028_v54  ;;  %6334 = vmatprep.subr.bf16.mxu0 %v5969_v55  ;;  %v6076_v54 = vld [vmem:[#allocation2 + $0x7d0] sm:$0xff]  ;;  %v6017_v55 = vld [vmem:[#allocation2 + $0x5f8] sm:$0xff] }
0x1194   :  { %6375 = vmatprep.subr.bf16.mxu1 %v6033_v59  ;;  %v6081_v59 = vld [vmem:[#allocation2 + $0x7f8] sm:$0xff] }
0x1196   :  { %6335 = vmatpush1.bf16.msra.mxu0 %v5968_v37  ;;  %v6016_v37 = vld [vmem:[#allocation2 + $0x5f0] sm:$0xff] }
0x1197   :  { %6376 = vmatpush1.bf16.msra.mxu1 %v6032_v60  ;;  %6336 = vmatprep.subr.bf16.mxu0 %v5973_v15  ;;  %v6080_v60 = vld [vmem:[#allocation2 + $0x7f0] sm:$0xff] }
0x1198   :  { %6377 = vmatprep.subr.bf16.mxu1 %v6037_v28 }
0x119a   :  { %6337 = vmatpush1.bf16.msra.mxu0 %v5972_v23 }
0x119b   :  { %6378 = vmatpush1.bf16.msra.mxu1 %v6036_v39  ;;  %6338 = vmatprep.subr.bf16.mxu0 %v5977_v32 }
0x119c   :  { %6379 = vmatprep.subr.bf16.mxu1 %v6041_v31 }
0x119e   :  { %6339 = vmatpush1.bf16.msra.mxu0 %v5976_v61 }
0x119f   :  { %6380 = vmatpush1.bf16.msra.mxu1 %v6040_v63  ;;  %6340 = vmatprep.subr.bf16.mxu0 %v5981_v0 }
0x11a0   :  { %6381 = vmatprep.subr.bf16.mxu1 %v6045_v3 }
0x11a2   :  { %6341 = vmatpush1.bf16.msra.mxu0 %v5980_v4 }
0x11a3   :  { %6382 = vmatpush1.bf16.msra.mxu1 %v6044_v56  ;;  %6342 = vmatprep.subr.bf16.mxu0 %v5985_v29 }
0x11a4   :  { %6383 = vmatprep.subr.bf16.mxu1 %v6049_v14 }
0x11a6   :  { %6343 = vmatpush1.bf16.msra.mxu0 %v5984_v20 }
0x11a7   :  { %6384 = vmatpush1.bf16.msra.mxu1 %v6048_v21  ;;  %6344 = vmatprep.subr.bf16.mxu0 %v5989_v34 }
0x11a8   :  { %6385 = vmatprep.subr.bf16.mxu1 %v6053_v24 }
0x11aa   :  { %6345 = vmatpush1.bf16.msra.mxu0 %v5988_v35 }
0x11ab   :  { %6386 = vmatpush1.bf16.msra.mxu1 %v6052_v25  ;;  %6346 = vmatprep.subr.bf16.mxu0 %v5993_v26 }
0x11ac   :  { %6387 = vmatprep.subr.bf16.mxu1 %v6057_v30 }
0x11ae   :  { %6347 = vmatpush1.bf16.msra.mxu0 %v5992_v33 }
0x11af   :  { %6388 = vmatpush1.bf16.msra.mxu1 %v6056_v36  ;;  %6348 = vmatprep.subr.bf16.mxu0 %v5997_v47 }
0x11b0   :  { %6389 = vmatprep.subr.bf16.mxu1 %v6061_v52 }
0x11b2   :  { %6349 = vmatpush1.bf16.msra.mxu0 %v5996_v57 }
0x11b3   :  { %6390 = vmatpush1.bf16.msra.mxu1 %v6060_v40  ;;  %6350 = vmatprep.subr.bf16.mxu0 %v6001_v44 }
0x11b4   :  { %6391 = vmatprep.subr.bf16.mxu1 %v6065_v16 }
0x11b6   :  { %6351 = vmatpush1.bf16.msra.mxu0 %v6000_v19 }
0x11b7   :  { %6392 = vmatpush1.bf16.msra.mxu1 %v6064_v22  ;;  %6352 = vmatprep.subr.bf16.mxu0 %v6005_v41 }
0x11b8   :  { %6393 = vmatprep.subr.bf16.mxu1 %v6069_v42 }
0x11ba   :  { %6353 = vmatpush1.bf16.msra.mxu0 %v6004_v43 }
0x11bb   :  { %6394 = vmatpush1.bf16.msra.mxu1 %v6068_v49  ;;  %6354 = vmatprep.subr.bf16.mxu0 %v6009_v51 }
0x11bc   :  { %6395 = vmatprep.subr.bf16.mxu1 %v6073_v62 }
0x11be   :  { %6355 = vmatpush1.bf16.msra.mxu0 %v6008_v45 }
0x11bf   :  { %6396 = vmatpush1.bf16.msra.mxu1 %v6072_v46  ;;  %6356 = vmatprep.subr.bf16.mxu0 %v6013_v48 }
0x11c0   :  { %6397 = vmatprep.subr.bf16.mxu1 %v6077_v53 }
0x11c2   :  { %6357 = vmatpush1.bf16.msra.mxu0 %v6012_v50 }
0x11c3   :  { %6398 = vmatpush1.bf16.msra.mxu1 %v6076_v54  ;;  %6358 = vmatprep.subr.bf16.mxu0 %v6017_v55 }
0x11c4   :  { %6399 = vmatprep.subr.bf16.mxu1 %v6081_v59 }
0x11c6   :  { %6359 = vmatpush1.bf16.msra.mxu0 %v6016_v37 }
0x11c7   :  { %6400 = vmatpush1.bf16.msra.mxu1 %v6080_v60 }
0x11c9   :  { %6361 = vmatmul.mubr.bf16.vlgmr.msra.gmra.mrb[140].mxu0 %v9303_v1 }
0x11ca   :  { %6402 = vmatmul.mubr.bf16.vlgmr.msra.gmra.mrb[140].mxu1 %v9311_v38 }
0x11dc   :  { %v6116_v15 = vpop.f32.mrb[128].mxu0 }
0x11dd   :  { %v6157_v28 = vpop.f32.mrb[128].mxu1  ;;  %v6118_v39 = vpop.f32.mrb[129].mxu0 }
0x11de   :  { %v6158_v23 = vadd.f32 %v6157_v28, %v6116_v15  ;;  %v6159_v32 = vpop.f32.mrb[129].mxu1  ;;  %v6120_v61 = vpop.f32.mrb[130].mxu0 }
0x11df   :  { %v6160_v31 = vadd.f32 %v6159_v32, %v6118_v39  ;;  %v6161_v63 = vpop.f32.mrb[130].mxu1  ;;  %v6121_v0 = vpop.f32.mrb[131].mxu0 }
0x11e0   :  { %v6162_v3 = vpop.f32.mrb[131].mxu1 }
0x121c   :  { %v6198_v4 = vpop.f32.mrb[132].mxu0 }
0x121d   :  { %v6239_v56 = vpop.f32.mrb[132].mxu1  ;;  %v6199_v29 = vadd.f32 %v6198_v4, %v6158_v23  ;;  %v6200_v14 = vpop.f32.mrb[133].mxu0 }
0x121e   :  { %v6241_v20 = vpop.f32.mrb[133].mxu1  ;;  %v6201_v21 = vadd.f32 %v6200_v14, %v6160_v31  ;;  %v6202_v34 = vpop.f32.mrb[134].mxu0 }
0x121f   :  { %v6243_v24 = vpop.f32.mrb[134].mxu1  ;;  %v9346_v35 = vadd.f32 %v6239_v56, %v6199_v29  ;;  %v6203_v25 = vpop.f32.mrb[135].mxu0 }
0x1220   :  { %v6244_v26 = vpop.f32.mrb[135].mxu1  ;;  %v9348_v30 = vadd.f32 %v6241_v20, %v6201_v21 }
0x125c   :  { %v6280_v33 = vpop.f32.mrb[136].mxu0 }
0x125d   :  { %v6321_v36 = vpop.f32.mrb[136].mxu1  ;;  %v6282_v52 = vpop.f32.mrb[137].mxu0 }
0x125e   :  { %v6322_v47 = vadd.f32 %v6321_v36, %v6280_v33  ;;  %v6323_v57 = vpop.f32.mrb[137].mxu1  ;;  %v6284_v44 = vpop.f32.mrb[138].mxu0 }
0x125f   :  { %v6324_v40 = vadd.f32 %v6323_v57, %v6282_v52  ;;  %v6325_v16 = vpop.f32.mrb[138].mxu1  ;;  %v6285_v19 = vpop.f32.mrb[139].mxu0 }
0x1260   :  { %v6326_v22 = vpop.f32.mrb[139].mxu1 }
0x129c   :  { %v6362_v41 = vpop.f32.mrb[140].mxu0 }
0x129d   :  { %v6403_v42 = vpop.f32.mrb[140].mxu1  ;;  %v6363_v43 = vadd.f32 %v6362_v41, %v6322_v47  ;;  %v6364_v49 = vpop.f32.mrb[141].mxu0 }
0x129e   :  { %v6405_v51 = vpop.f32.mrb[141].mxu1  ;;  %v6365_v62 = vadd.f32 %v6364_v49, %v6324_v40  ;;  %v6366_v45 = vpop.f32.mrb[142].mxu0 }
0x129f   :  { %v6407_v46 = vpop.f32.mrb[142].mxu1  ;;  %v9350_v48 = vadd.f32 %v6403_v42, %v6363_v43  ;;  %v6367_v53 = vpop.f32.mrb[143].mxu0 }
0x12a0   :  { %v6408_v50 = vpop.f32.mrb[143].mxu1  ;;  %v9352_v54 = vadd.f32 %v6405_v51, %v6365_v62 }
0x12a1   :  { %8505 = dma.done.wait [#allocation3 + $0x1], 32768 }
0x12a2   :  { %8506 = vsyncadd [#allocation3 + $0x1], 4294934528  ;;  %6700 = vmatprep.mubr.bf16.mxu0 %v9291_v27  ;;  %6741 = vmatprep.mubr.bf16.mxu1 %v9295_v18  ;;  %v6413_v55 = vld [vmem:[#allocation2 + $0x808] sm:$0xff]  ;;  %v6412_v37 = vld [vmem:[#allocation2 + $0x800] sm:$0xff]  ;;  %s8543_s24 = smov [#allocation20]  }
0x12a3   :  { %v6477_v59 = vld [vmem:[#allocation2 + $0xa08] sm:$0xff]  ;;  %6668 = vmatprep.subr.bf16.mxu0 %v6413_v55  ;;  %v6476_v60 = vld [vmem:[#allocation2 + $0xa00] sm:$0xff]  ;;  %s7809_s30 = sshll.u32 %s8543_s24, 4  ;;  %s7810_s30 = int_to_ptr.vmem [resolvable:$true] %s7809_s30 }
0x12a4   :  { %6709 = vmatprep.subr.bf16.mxu1 %v6477_v59  ;;  %v6417_v15 = vld [vmem:[#allocation2 + $0x828] sm:$0xff]  ;;  %6669 = vmatpush1.bf16.msra.mxu0 %v6412_v37  ;;  %v6416_v23 = vld [vmem:[#allocation2 + $0x820] sm:$0xff] }
0x12a5   :  { %v6481_v28 = vld [vmem:[#allocation2 + $0xa28] sm:$0xff]  ;;  %6710 = vmatpush1.bf16.msra.mxu1 %v6476_v60  ;;  %6670 = vmatprep.subr.bf16.mxu0 %v6417_v15  ;;  %v6480_v39 = vld [vmem:[#allocation2 + $0xa20] sm:$0xff] }
0x12a6   :  { %6711 = vmatprep.subr.bf16.mxu1 %v6481_v28  ;;  %v6421_v32 = vld [vmem:[#allocation2 + $0x848] sm:$0xff]  ;;  %v6420_v61 = vld [vmem:[#allocation2 + $0x840] sm:$0xff] }
0x12a7   :  { %v6485_v31 = vld [vmem:[#allocation2 + $0xa48] sm:$0xff]  ;;  %v6484_v63 = vld [vmem:[#allocation2 + $0xa40] sm:$0xff] }
0x12a8   :  { %6671 = vmatpush1.bf16.msra.mxu0 %v6416_v23  ;;  %v6425_v0 = vld [vmem:[#allocation2 + $0x868] sm:$0xff]  ;;  %v6424_v4 = vld [vmem:[#allocation2 + $0x860] sm:$0xff] }
0x12a9   :  { %6712 = vmatpush1.bf16.msra.mxu1 %v6480_v39  ;;  %6672 = vmatprep.subr.bf16.mxu0 %v6421_v32  ;;  %v6489_v3 = vld [vmem:[#allocation2 + $0xa68] sm:$0xff]  ;;  %v6488_v56 = vld [vmem:[#allocation2 + $0xa60] sm:$0xff] }
0x12aa   :  { %6713 = vmatprep.subr.bf16.mxu1 %v6485_v31  ;;  %v6429_v29 = vld [vmem:[#allocation2 + $0x888] sm:$0xff]  ;;  %v6428_v20 = vld [vmem:[#allocation2 + $0x880] sm:$0xff] }
0x12ab   :  { %v6493_v14 = vld [vmem:[#allocation2 + $0xa88] sm:$0xff]  ;;  %v6492_v21 = vld [vmem:[#allocation2 + $0xa80] sm:$0xff] }
0x12ac   :  { %6673 = vmatpush1.bf16.msra.mxu0 %v6420_v61  ;;  %v6433_v34 = vld [vmem:[#allocation2 + $0x8a8] sm:$0xff]  ;;  %v6432_v25 = vld [vmem:[#allocation2 + $0x8a0] sm:$0xff] }
0x12ad   :  { %6714 = vmatpush1.bf16.msra.mxu1 %v6484_v63  ;;  %6674 = vmatprep.subr.bf16.mxu0 %v6425_v0  ;;  %v6497_v24 = vld [vmem:[#allocation2 + $0xaa8] sm:$0xff]  ;;  %v6496_v26 = vld [vmem:[#allocation2 + $0xaa0] sm:$0xff] }
0x12ae   :  { %6715 = vmatprep.subr.bf16.mxu1 %v6489_v3  ;;  %v6437_v33 = vld [vmem:[#allocation2 + $0x8c8] sm:$0xff]  ;;  %v6436_v47 = vld [vmem:[#allocation2 + $0x8c0] sm:$0xff] }
0x12af   :  { %v6501_v36 = vld [vmem:[#allocation2 + $0xac8] sm:$0xff]  ;;  %v6500_v52 = vld [vmem:[#allocation2 + $0xac0] sm:$0xff] }
0x12b0   :  { %6675 = vmatpush1.bf16.msra.mxu0 %v6424_v4  ;;  %v6441_v57 = vld [vmem:[#allocation2 + $0x8e8] sm:$0xff]  ;;  %v6440_v44 = vld [vmem:[#allocation2 + $0x8e0] sm:$0xff] }
0x12b1   :  { %6716 = vmatpush1.bf16.msra.mxu1 %v6488_v56  ;;  %6676 = vmatprep.subr.bf16.mxu0 %v6429_v29  ;;  %v6505_v40 = vld [vmem:[#allocation2 + $0xae8] sm:$0xff]  ;;  %v6504_v16 = vld [vmem:[#allocation2 + $0xae0] sm:$0xff] }
0x12b2   :  { %6717 = vmatprep.subr.bf16.mxu1 %v6493_v14  ;;  %v6445_v19 = vld [vmem:[#allocation2 + $0x908] sm:$0xff]  ;;  %v6444_v41 = vld [vmem:[#allocation2 + $0x900] sm:$0xff] }
0x12b3   :  { %v6509_v22 = vld [vmem:[#allocation2 + $0xb08] sm:$0xff]  ;;  %v6508_v42 = vld [vmem:[#allocation2 + $0xb00] sm:$0xff] }
0x12b4   :  { %6677 = vmatpush1.bf16.msra.mxu0 %v6428_v20  ;;  %v6449_v43 = vld [vmem:[#allocation2 + $0x928] sm:$0xff]  ;;  %v6448_v51 = vld [vmem:[#allocation2 + $0x920] sm:$0xff] }
0x12b5   :  { %6718 = vmatpush1.bf16.msra.mxu1 %v6492_v21  ;;  %6678 = vmatprep.subr.bf16.mxu0 %v6433_v34  ;;  %v6513_v49 = vld [vmem:[#allocation2 + $0xb28] sm:$0xff]  ;;  %v6512_v62 = vld [vmem:[#allocation2 + $0xb20] sm:$0xff] }
0x12b6   :  { %6719 = vmatprep.subr.bf16.mxu1 %v6497_v24  ;;  %v6453_v45 = vld [vmem:[#allocation2 + $0x948] sm:$0xff]  ;;  %v6452_v53 = vld [vmem:[#allocation2 + $0x940] sm:$0xff] }
0x12b7   :  { %v6517_v46 = vld [vmem:[#allocation2 + $0xb48] sm:$0xff]  ;;  %v6516_v50 = vld [vmem:[#allocation2 + $0xb40] sm:$0xff] }
0x12b8   :  { %6679 = vmatpush1.bf16.msra.mxu0 %v6432_v25  ;;  %v6457_v55 = vld [vmem:[#allocation2 + $0x968] sm:$0xff]  ;;  %v6456_v37 = vld [vmem:[#allocation2 + $0x960] sm:$0xff] }
0x12b9   :  { %6720 = vmatpush1.bf16.msra.mxu1 %v6496_v26  ;;  %6680 = vmatprep.subr.bf16.mxu0 %v6437_v33  ;;  %v6521_v59 = vld [vmem:[#allocation2 + $0xb68] sm:$0xff]  ;;  %v6520_v60 = vld [vmem:[#allocation2 + $0xb60] sm:$0xff] }
0x12ba   :  { %6721 = vmatprep.subr.bf16.mxu1 %v6501_v36  ;;  %v6461_v15 = vld [vmem:[#allocation2 + $0x988] sm:$0xff]  ;;  %v6460_v23 = vld [vmem:[#allocation2 + $0x980] sm:$0xff] }
0x12bb   :  { %v6525_v28 = vld [vmem:[#allocation2 + $0xb88] sm:$0xff]  ;;  %v6524_v39 = vld [vmem:[#allocation2 + $0xb80] sm:$0xff] }
0x12bc   :  { %6681 = vmatpush1.bf16.msra.mxu0 %v6436_v47  ;;  %v6465_v32 = vld [vmem:[#allocation2 + $0x9a8] sm:$0xff]  ;;  %v6464_v61 = vld [vmem:[#allocation2 + $0x9a0] sm:$0xff] }
0x12bd   :  { %6722 = vmatpush1.bf16.msra.mxu1 %v6500_v52  ;;  %6682 = vmatprep.subr.bf16.mxu0 %v6441_v57  ;;  %v6529_v31 = vld [vmem:[#allocation2 + $0xba8] sm:$0xff]  ;;  %v6528_v63 = vld [vmem:[#allocation2 + $0xba0] sm:$0xff] }
0x12be   :  { %6723 = vmatprep.subr.bf16.mxu1 %v6505_v40  ;;  %v6469_v0 = vld [vmem:[#allocation2 + $0x9c8] sm:$0xff]  ;;  %v6468_v4 = vld [vmem:[#allocation2 + $0x9c0] sm:$0xff] }
0x12bf   :  { %v6533_v3 = vld [vmem:[#allocation2 + $0xbc8] sm:$0xff]  ;;  %v6532_v56 = vld [vmem:[#allocation2 + $0xbc0] sm:$0xff] }
0x12c0   :  { %6683 = vmatpush1.bf16.msra.mxu0 %v6440_v44  ;;  %v6473_v29 = vld [vmem:[#allocation2 + $0x9e8] sm:$0xff]  ;;  %v6472_v20 = vld [vmem:[#allocation2 + $0x9e0] sm:$0xff] }
0x12c1   :  { %6724 = vmatpush1.bf16.msra.mxu1 %v6504_v16  ;;  %6684 = vmatprep.subr.bf16.mxu0 %v6445_v19  ;;  %v6537_v14 = vld [vmem:[#allocation2 + $0xbe8] sm:$0xff]  ;;  %v6536_v21 = vld [vmem:[#allocation2 + $0xbe0] sm:$0xff] }
0x12c2   :  { %6725 = vmatprep.subr.bf16.mxu1 %v6509_v22  ;;  %v6541_v34 = vld [vmem:[#allocation2 + $0xc08] sm:$0xff]  ;;  %v6540_v25 = vld [vmem:[#allocation2 + $0xc00] sm:$0xff] }
0x12c3   :  { %v6605_v24 = vld [vmem:[#allocation2 + $0xe08] sm:$0xff]  ;;  %v6604_v26 = vld [vmem:[#allocation2 + $0xe00] sm:$0xff] }
0x12c4   :  { %6685 = vmatpush1.bf16.msra.mxu0 %v6444_v41  ;;  %v6545_v33 = vld [vmem:[#allocation2 + $0xc28] sm:$0xff]  ;;  %v6544_v47 = vld [vmem:[#allocation2 + $0xc20] sm:$0xff] }
0x12c5   :  { %6726 = vmatpush1.bf16.msra.mxu1 %v6508_v42  ;;  %6686 = vmatprep.subr.bf16.mxu0 %v6449_v43  ;;  %v6609_v36 = vld [vmem:[#allocation2 + $0xe28] sm:$0xff]  ;;  %v6608_v52 = vld [vmem:[#allocation2 + $0xe20] sm:$0xff] }
0x12c6   :  { %6727 = vmatprep.subr.bf16.mxu1 %v6513_v49  ;;  %v6549_v57 = vld [vmem:[#allocation2 + $0xc48] sm:$0xff]  ;;  %v6548_v44 = vld [vmem:[#allocation2 + $0xc40] sm:$0xff] }
0x12c7   :  { %v6613_v40 = vld [vmem:[#allocation2 + $0xe48] sm:$0xff]  ;;  %v6612_v16 = vld [vmem:[#allocation2 + $0xe40] sm:$0xff] }
0x12c8   :  { %6687 = vmatpush1.bf16.msra.mxu0 %v6448_v51  ;;  %v6553_v19 = vld [vmem:[#allocation2 + $0xc68] sm:$0xff]  ;;  %v6552_v41 = vld [vmem:[#allocation2 + $0xc60] sm:$0xff] }
0x12c9   :  { %6728 = vmatpush1.bf16.msra.mxu1 %v6512_v62  ;;  %6688 = vmatprep.subr.bf16.mxu0 %v6453_v45  ;;  %v6617_v22 = vld [vmem:[#allocation2 + $0xe68] sm:$0xff]  ;;  %v6616_v42 = vld [vmem:[#allocation2 + $0xe60] sm:$0xff] }
0x12ca   :  { %6729 = vmatprep.subr.bf16.mxu1 %v6517_v46  ;;  %v6557_v43 = vld [vmem:[#allocation2 + $0xc88] sm:$0xff]  ;;  %v6556_v51 = vld [vmem:[#allocation2 + $0xc80] sm:$0xff] }
0x12cb   :  { %v6621_v49 = vld [vmem:[#allocation2 + $0xe88] sm:$0xff]  ;;  %v6620_v62 = vld [vmem:[#allocation2 + $0xe80] sm:$0xff] }
0x12cc   :  { %6689 = vmatpush1.bf16.msra.mxu0 %v6452_v53  ;;  %v6561_v45 = vld [vmem:[#allocation2 + $0xca8] sm:$0xff]  ;;  %v6560_v53 = vld [vmem:[#allocation2 + $0xca0] sm:$0xff] }
0x12cd   :  { %6730 = vmatpush1.bf16.msra.mxu1 %v6516_v50  ;;  %6690 = vmatprep.subr.bf16.mxu0 %v6457_v55  ;;  %v6625_v46 = vld [vmem:[#allocation2 + $0xea8] sm:$0xff]  ;;  %v6624_v50 = vld [vmem:[#allocation2 + $0xea0] sm:$0xff] }
0x12ce   :  { %6731 = vmatprep.subr.bf16.mxu1 %v6521_v59  ;;  %v6565_v55 = vld [vmem:[#allocation2 + $0xcc8] sm:$0xff] }
0x12cf   :  { %v6629_v59 = vld [vmem:[#allocation2 + $0xec8] sm:$0xff] }
0x12d0   :  { %6691 = vmatpush1.bf16.msra.mxu0 %v6456_v37  ;;  %v6564_v37 = vld [vmem:[#allocation2 + $0xcc0] sm:$0xff] }
0x12d1   :  { %6732 = vmatpush1.bf16.msra.mxu1 %v6520_v60  ;;  %6692 = vmatprep.subr.bf16.mxu0 %v6461_v15  ;;  %v6628_v60 = vld [vmem:[#allocation2 + $0xec0] sm:$0xff]  ;;  %v6569_v15 = vld [vmem:[#allocation2 + $0xce8] sm:$0xff] }
0x12d2   :  { %6733 = vmatprep.subr.bf16.mxu1 %v6525_v28  ;;  %v6633_v28 = vld [vmem:[#allocation2 + $0xee8] sm:$0xff] }
0x12d4   :  { %6693 = vmatpush1.bf16.msra.mxu0 %v6460_v23  ;;  %v6568_v23 = vld [vmem:[#allocation2 + $0xce0] sm:$0xff] }
0x12d5   :  { %6734 = vmatpush1.bf16.msra.mxu1 %v6524_v39  ;;  %6694 = vmatprep.subr.bf16.mxu0 %v6465_v32  ;;  %v6632_v39 = vld [vmem:[#allocation2 + $0xee0] sm:$0xff]  ;;  %v6573_v32 = vld [vmem:[#allocation2 + $0xd08] sm:$0xff] }
0x12d6   :  { %6735 = vmatprep.subr.bf16.mxu1 %v6529_v31  ;;  %v6637_v31 = vld [vmem:[#allocation2 + $0xf08] sm:$0xff] }
0x12d8   :  { %6695 = vmatpush1.bf16.msra.mxu0 %v6464_v61  ;;  %v6572_v61 = vld [vmem:[#allocation2 + $0xd00] sm:$0xff] }
0x12d9   :  { %6736 = vmatpush1.bf16.msra.mxu1 %v6528_v63  ;;  %6696 = vmatprep.subr.bf16.mxu0 %v6469_v0  ;;  %v6636_v63 = vld [vmem:[#allocation2 + $0xf00] sm:$0xff]  ;;  %v6577_v0 = vld [vmem:[#allocation2 + $0xd28] sm:$0xff] }
0x12da   :  { %6737 = vmatprep.subr.bf16.mxu1 %v6533_v3  ;;  %v6641_v3 = vld [vmem:[#allocation2 + $0xf28] sm:$0xff] }
0x12dc   :  { %6697 = vmatpush1.bf16.msra.mxu0 %v6468_v4  ;;  %v6576_v4 = vld [vmem:[#allocation2 + $0xd20] sm:$0xff] }
0x12dd   :  { %6738 = vmatpush1.bf16.msra.mxu1 %v6532_v56  ;;  %6698 = vmatprep.subr.bf16.mxu0 %v6473_v29  ;;  %v6640_v56 = vld [vmem:[#allocation2 + $0xf20] sm:$0xff]  ;;  %v6581_v29 = vld [vmem:[#allocation2 + $0xd48] sm:$0xff] }
0x12de   :  { %6739 = vmatprep.subr.bf16.mxu1 %v6537_v14  ;;  %v6645_v14 = vld [vmem:[#allocation2 + $0xf48] sm:$0xff] }
0x12e0   :  { %6699 = vmatpush1.bf16.msra.mxu0 %v6472_v20  ;;  %v6580_v20 = vld [vmem:[#allocation2 + $0xd40] sm:$0xff] }
0x12e1   :  { %6740 = vmatpush1.bf16.msra.mxu1 %v6536_v21  ;;  %6750 = vmatprep.subr.bf16.mxu0 %v6541_v34  ;;  %v6644_v21 = vld [vmem:[#allocation2 + $0xf40] sm:$0xff]  ;;  %v6585_v34 = vld [vmem:[#allocation2 + $0xd68] sm:$0xff] }
0x12e2   :  { %6791 = vmatprep.subr.bf16.mxu1 %v6605_v24  ;;  %v6649_v24 = vld [vmem:[#allocation2 + $0xf68] sm:$0xff] }
0x12e3   :  { %6701 = vmatmul.mubr.bf16.vlgmr.msra.gmra.mrb[144].mxu0 %v9289_v58 }
0x12e4   :  { %6742 = vmatmul.mubr.bf16.vlgmr.msra.gmra.mrb[144].mxu1 %v9293_v6  ;;  %6751 = vmatpush1.bf16.msra.mxu0 %v6540_v25  ;;  %v6584_v25 = vld [vmem:[#allocation2 + $0xd60] sm:$0xff] }
0x12e5   :  { %6792 = vmatpush1.bf16.msra.mxu1 %v6604_v26  ;;  %6752 = vmatprep.subr.bf16.mxu0 %v6545_v33  ;;  %v6648_v26 = vld [vmem:[#allocation2 + $0xf60] sm:$0xff]  ;;  %v6589_v33 = vld [vmem:[#allocation2 + $0xd88] sm:$0xff] }
0x12e6   :  { %6793 = vmatprep.subr.bf16.mxu1 %v6609_v36  ;;  %6782 = vmatprep.mubr.bf16.mxu0 %v9305_v17  ;;  %v6653_v36 = vld [vmem:[#allocation2 + $0xf88] sm:$0xff] }
0x12e7   :  { %6823 = vmatprep.mubr.bf16.mxu1 %v9313_v2 }
0x12e8   :  { %6753 = vmatpush1.bf16.msra.mxu0 %v6544_v47  ;;  %v6588_v47 = vld [vmem:[#allocation2 + $0xd80] sm:$0xff] }
0x12e9   :  { %6794 = vmatpush1.bf16.msra.mxu1 %v6608_v52  ;;  %6754 = vmatprep.subr.bf16.mxu0 %v6549_v57  ;;  %v6652_v52 = vld [vmem:[#allocation2 + $0xf80] sm:$0xff]  ;;  %v6593_v57 = vld [vmem:[#allocation2 + $0xda8] sm:$0xff] }
0x12ea   :  { %6795 = vmatprep.subr.bf16.mxu1 %v6613_v40  ;;  %v6657_v40 = vld [vmem:[#allocation2 + $0xfa8] sm:$0xff] }
0x12ec   :  { %6755 = vmatpush1.bf16.msra.mxu0 %v6548_v44  ;;  %v6592_v44 = vld [vmem:[#allocation2 + $0xda0] sm:$0xff] }
0x12ed   :  { %6796 = vmatpush1.bf16.msra.mxu1 %v6612_v16  ;;  %6756 = vmatprep.subr.bf16.mxu0 %v6553_v19  ;;  %v6656_v16 = vld [vmem:[#allocation2 + $0xfa0] sm:$0xff]  ;;  %v6597_v19 = vld [vmem:[#allocation2 + $0xdc8] sm:$0xff] }
0x12ee   :  { %6797 = vmatprep.subr.bf16.mxu1 %v6617_v22  ;;  %v6661_v22 = vld [vmem:[#allocation2 + $0xfc8] sm:$0xff] }
0x12f0   :  { %6757 = vmatpush1.bf16.msra.mxu0 %v6552_v41  ;;  %v6596_v41 = vld [vmem:[#allocation2 + $0xdc0] sm:$0xff] }
0x12f1   :  { %6798 = vmatpush1.bf16.msra.mxu1 %v6616_v42  ;;  %6758 = vmatprep.subr.bf16.mxu0 %v6557_v43  ;;  %v6660_v42 = vld [vmem:[#allocation2 + $0xfc0] sm:$0xff]  ;;  %v6601_v43 = vld [vmem:[#allocation2 + $0xde8] sm:$0xff] }
0x12f2   :  { %6799 = vmatprep.subr.bf16.mxu1 %v6621_v49  ;;  %v6665_v49 = vld [vmem:[#allocation2 + $0xfe8] sm:$0xff] }
0x12f4   :  { %6759 = vmatpush1.bf16.msra.mxu0 %v6556_v51  ;;  %v6600_v51 = vld [vmem:[#allocation2 + $0xde0] sm:$0xff] }
0x12f5   :  { %6800 = vmatpush1.bf16.msra.mxu1 %v6620_v62  ;;  %6760 = vmatprep.subr.bf16.mxu0 %v6561_v45  ;;  %v6664_v62 = vld [vmem:[#allocation2 + $0xfe0] sm:$0xff]  ;;  %v6415_v45 = vld [vmem:[#allocation2 + $0x818] sm:$0xff] }
0x12f6   :  { %6801 = vmatprep.subr.bf16.mxu1 %v6625_v46  ;;  %v6479_v46 = vld [vmem:[#allocation2 + $0xa18] sm:$0xff] }
0x12f8   :  { %6761 = vmatpush1.bf16.msra.mxu0 %v6560_v53  ;;  %v6414_v53 = vld [vmem:[#allocation2 + $0x810] sm:$0xff] }
0x12f9   :  { %6802 = vmatpush1.bf16.msra.mxu1 %v6624_v50  ;;  %6762 = vmatprep.subr.bf16.mxu0 %v6565_v55  ;;  %v6478_v50 = vld [vmem:[#allocation2 + $0xa10] sm:$0xff]  ;;  %v6419_v55 = vld [vmem:[#allocation2 + $0x838] sm:$0xff] }
0x12fa   :  { %6803 = vmatprep.subr.bf16.mxu1 %v6629_v59  ;;  %v6483_v59 = vld [vmem:[#allocation2 + $0xa38] sm:$0xff] }
0x12fc   :  { %6763 = vmatpush1.bf16.msra.mxu0 %v6564_v37  ;;  %v6418_v37 = vld [vmem:[#allocation2 + $0x830] sm:$0xff] }
0x12fd   :  { %6804 = vmatpush1.bf16.msra.mxu1 %v6628_v60  ;;  %6764 = vmatprep.subr.bf16.mxu0 %v6569_v15  ;;  %v6482_v60 = vld [vmem:[#allocation2 + $0xa30] sm:$0xff]  ;;  %v6423_v15 = vld [vmem:[#allocation2 + $0x858] sm:$0xff] }
0x12fe   :  { %6805 = vmatprep.subr.bf16.mxu1 %v6633_v28  ;;  %v6487_v28 = vld [vmem:[#allocation2 + $0xa58] sm:$0xff] }
0x1300   :  { %6765 = vmatpush1.bf16.msra.mxu0 %v6568_v23  ;;  %v6422_v23 = vld [vmem:[#allocation2 + $0x850] sm:$0xff] }
0x1301   :  { %6806 = vmatpush1.bf16.msra.mxu1 %v6632_v39  ;;  %6766 = vmatprep.subr.bf16.mxu0 %v6573_v32  ;;  %v6486_v39 = vld [vmem:[#allocation2 + $0xa50] sm:$0xff]  ;;  %v6427_v32 = vld [vmem:[#allocation2 + $0x878] sm:$0xff] }
0x1302   :  { %6807 = vmatprep.subr.bf16.mxu1 %v6637_v31  ;;  %v6491_v31 = vld [vmem:[#allocation2 + $0xa78] sm:$0xff] }
0x1304   :  { %6767 = vmatpush1.bf16.msra.mxu0 %v6572_v61  ;;  %v6426_v61 = vld [vmem:[#allocation2 + $0x870] sm:$0xff] }
0x1305   :  { %6808 = vmatpush1.bf16.msra.mxu1 %v6636_v63  ;;  %6768 = vmatprep.subr.bf16.mxu0 %v6577_v0  ;;  %v6490_v63 = vld [vmem:[#allocation2 + $0xa70] sm:$0xff]  ;;  %v6431_v0 = vld [vmem:[#allocation2 + $0x898] sm:$0xff] }
0x1306   :  { %6809 = vmatprep.subr.bf16.mxu1 %v6641_v3  ;;  %v6495_v3 = vld [vmem:[#allocation2 + $0xa98] sm:$0xff] }
0x1308   :  { %6769 = vmatpush1.bf16.msra.mxu0 %v6576_v4  ;;  %v6435_v4 = vld [vmem:[#allocation2 + $0x8b8] sm:$0xff] }
0x1309   :  { %6810 = vmatpush1.bf16.msra.mxu1 %v6640_v56  ;;  %6770 = vmatprep.subr.bf16.mxu0 %v6581_v29  ;;  %v6499_v56 = vld [vmem:[#allocation2 + $0xab8] sm:$0xff]  ;;  %v6434_v29 = vld [vmem:[#allocation2 + $0x8b0] sm:$0xff] }
0x130a   :  { %6811 = vmatprep.subr.bf16.mxu1 %v6645_v14  ;;  %v6498_v14 = vld [vmem:[#allocation2 + $0xab0] sm:$0xff] }
0x130c   :  { %6771 = vmatpush1.bf16.msra.mxu0 %v6580_v20  ;;  %v6439_v20 = vld [vmem:[#allocation2 + $0x8d8] sm:$0xff] }
0x130d   :  { %6812 = vmatpush1.bf16.msra.mxu1 %v6644_v21  ;;  %6772 = vmatprep.subr.bf16.mxu0 %v6585_v34  ;;  %v6503_v21 = vld [vmem:[#allocation2 + $0xad8] sm:$0xff]  ;;  %v6438_v34 = vld [vmem:[#allocation2 + $0x8d0] sm:$0xff] }
0x130e   :  { %6813 = vmatprep.subr.bf16.mxu1 %v6649_v24  ;;  %v6502_v24 = vld [vmem:[#allocation2 + $0xad0] sm:$0xff] }
0x1310   :  { %6773 = vmatpush1.bf16.msra.mxu0 %v6584_v25  ;;  %v6443_v25 = vld [vmem:[#allocation2 + $0x8f8] sm:$0xff] }
0x1311   :  { %6814 = vmatpush1.bf16.msra.mxu1 %v6648_v26  ;;  %6774 = vmatprep.subr.bf16.mxu0 %v6589_v33  ;;  %v6507_v26 = vld [vmem:[#allocation2 + $0xaf8] sm:$0xff]  ;;  %v6442_v33 = vld [vmem:[#allocation2 + $0x8f0] sm:$0xff] }
0x1312   :  { %6815 = vmatprep.subr.bf16.mxu1 %v6653_v36  ;;  %v6506_v36 = vld [vmem:[#allocation2 + $0xaf0] sm:$0xff] }
0x1314   :  { %6775 = vmatpush1.bf16.msra.mxu0 %v6588_v47  ;;  %v6447_v47 = vld [vmem:[#allocation2 + $0x918] sm:$0xff] }
0x1315   :  { %6816 = vmatpush1.bf16.msra.mxu1 %v6652_v52  ;;  %6776 = vmatprep.subr.bf16.mxu0 %v6593_v57  ;;  %v6511_v52 = vld [vmem:[#allocation2 + $0xb18] sm:$0xff]  ;;  %v6446_v57 = vld [vmem:[#allocation2 + $0x910] sm:$0xff] }
0x1316   :  { %6817 = vmatprep.subr.bf16.mxu1 %v6657_v40  ;;  %v6510_v40 = vld [vmem:[#allocation2 + $0xb10] sm:$0xff] }
0x1318   :  { %6777 = vmatpush1.bf16.msra.mxu0 %v6592_v44  ;;  %v6451_v44 = vld [vmem:[#allocation2 + $0x938] sm:$0xff] }
0x1319   :  { %6818 = vmatpush1.bf16.msra.mxu1 %v6656_v16  ;;  %6778 = vmatprep.subr.bf16.mxu0 %v6597_v19  ;;  %v6515_v16 = vld [vmem:[#allocation2 + $0xb38] sm:$0xff]  ;;  %v6450_v19 = vld [vmem:[#allocation2 + $0x930] sm:$0xff] }
0x131a   :  { %6819 = vmatprep.subr.bf16.mxu1 %v6661_v22  ;;  %v6514_v22 = vld [vmem:[#allocation2 + $0xb30] sm:$0xff] }
0x131c   :  { %6779 = vmatpush1.bf16.msra.mxu0 %v6596_v41  ;;  %v6455_v41 = vld [vmem:[#allocation2 + $0x958] sm:$0xff] }
0x131d   :  { %6820 = vmatpush1.bf16.msra.mxu1 %v6660_v42  ;;  %6780 = vmatprep.subr.bf16.mxu0 %v6601_v43  ;;  %v6519_v42 = vld [vmem:[#allocation2 + $0xb58] sm:$0xff]  ;;  %v6454_v43 = vld [vmem:[#allocation2 + $0x950] sm:$0xff] }
0x131e   :  { %6821 = vmatprep.subr.bf16.mxu1 %v6665_v49  ;;  %v6518_v49 = vld [vmem:[#allocation2 + $0xb50] sm:$0xff] }
0x1320   :  { %6781 = vmatpush1.bf16.msra.mxu0 %v6600_v51  ;;  %v6459_v51 = vld [vmem:[#allocation2 + $0x978] sm:$0xff] }
0x1321   :  { %6822 = vmatpush1.bf16.msra.mxu1 %v6664_v62  ;;  %6832 = vmatprep.subr.bf16.mxu0 %v6415_v45  ;;  %v6523_v62 = vld [vmem:[#allocation2 + $0xb78] sm:$0xff]  ;;  %v6458_v45 = vld [vmem:[#allocation2 + $0x970] sm:$0xff] }
0x1322   :  { %6873 = vmatprep.subr.bf16.mxu1 %v6479_v46  ;;  %v6522_v46 = vld [vmem:[#allocation2 + $0xb70] sm:$0xff] }
0x1323   :  { %6783 = vmatmul.mubr.bf16.vlgmr.msra.gmra.mrb[148].mxu0 %v9303_v1 }
0x1324   :  { %6824 = vmatmul.mubr.bf16.vlgmr.msra.gmra.mrb[148].mxu1 %v9311_v38  ;;  %6833 = vmatpush1.bf16.msra.mxu0 %v6414_v53  ;;  %v6463_v53 = vld [vmem:[#allocation2 + $0x998] sm:$0xff] }
0x1325   :  { %6874 = vmatpush1.bf16.msra.mxu1 %v6478_v50  ;;  %6834 = vmatprep.subr.bf16.mxu0 %v6419_v55  ;;  %v6527_v50 = vld [vmem:[#allocation2 + $0xb98] sm:$0xff]  ;;  %v6462_v55 = vld [vmem:[#allocation2 + $0x990] sm:$0xff] }
0x1326   :  { %6875 = vmatprep.subr.bf16.mxu1 %v6483_v59  ;;  %6864 = vmatprep.mubr.bf16.mxu0 %v9291_v27  ;;  %v6430_v27 = vld [vmem:[#allocation2 + $0x890] sm:$0xff] }
0x1327   :  { %6905 = vmatprep.mubr.bf16.mxu1 %v9295_v18  ;;  %v6494_v18 = vld [vmem:[#allocation2 + $0xa90] sm:$0xff] }
0x1328   :  { %6835 = vmatpush1.bf16.msra.mxu0 %v6418_v37  ;;  %v6526_v59 = vld [vmem:[#allocation2 + $0xb90] sm:$0xff]  ;;  %v6467_v37 = vld [vmem:[#allocation2 + $0x9b8] sm:$0xff] }
0x1329   :  { %6876 = vmatpush1.bf16.msra.mxu1 %v6482_v60  ;;  %6836 = vmatprep.subr.bf16.mxu0 %v6423_v15  ;;  %v6531_v60 = vld [vmem:[#allocation2 + $0xbb8] sm:$0xff]  ;;  %v6466_v15 = vld [vmem:[#allocation2 + $0x9b0] sm:$0xff] }
0x132a   :  { %6877 = vmatprep.subr.bf16.mxu1 %v6487_v28  ;;  %v6530_v28 = vld [vmem:[#allocation2 + $0xbb0] sm:$0xff] }
0x132c   :  { %6837 = vmatpush1.bf16.msra.mxu0 %v6422_v23  ;;  %v6471_v23 = vld [vmem:[#allocation2 + $0x9d8] sm:$0xff] }
0x132d   :  { %6878 = vmatpush1.bf16.msra.mxu1 %v6486_v39  ;;  %6838 = vmatprep.subr.bf16.mxu0 %v6427_v32  ;;  %v6535_v39 = vld [vmem:[#allocation2 + $0xbd8] sm:$0xff]  ;;  %v6470_v32 = vld [vmem:[#allocation2 + $0x9d0] sm:$0xff] }
0x132e   :  { %6879 = vmatprep.subr.bf16.mxu1 %v6491_v31  ;;  %v6534_v31 = vld [vmem:[#allocation2 + $0xbd0] sm:$0xff] }
0x1330   :  { %6839 = vmatpush1.bf16.msra.mxu0 %v6426_v61  ;;  %v6475_v61 = vld [vmem:[#allocation2 + $0x9f8] sm:$0xff] }
0x1331   :  { %6880 = vmatpush1.bf16.msra.mxu1 %v6490_v63  ;;  %6840 = vmatprep.subr.bf16.mxu0 %v6431_v0  ;;  %v6539_v63 = vld [vmem:[#allocation2 + $0xbf8] sm:$0xff]  ;;  %v6474_v0 = vld [vmem:[#allocation2 + $0x9f0] sm:$0xff] }
0x1332   :  { %6881 = vmatprep.subr.bf16.mxu1 %v6495_v3  ;;  %v6538_v3 = vld [vmem:[#allocation2 + $0xbf0] sm:$0xff] }
0x1334   :  { %6841 = vmatpush1.bf16.msra.mxu0 %v6430_v27  ;;  %v6543_v27 = vld [vmem:[#allocation2 + $0xc18] sm:$0xff] }
0x1335   :  { %6882 = vmatpush1.bf16.msra.mxu1 %v6494_v18  ;;  %6842 = vmatprep.subr.bf16.mxu0 %v6435_v4  ;;  %v6607_v18 = vld [vmem:[#allocation2 + $0xe18] sm:$0xff]  ;;  %v6542_v4 = vld [vmem:[#allocation2 + $0xc10] sm:$0xff] }
0x1336   :  { %6883 = vmatprep.subr.bf16.mxu1 %v6499_v56  ;;  %v6606_v56 = vld [vmem:[#allocation2 + $0xe10] sm:$0xff] }
0x1338   :  { %6843 = vmatpush1.bf16.msra.mxu0 %v6434_v29  ;;  %v6547_v29 = vld [vmem:[#allocation2 + $0xc38] sm:$0xff] }
0x1339   :  { %6884 = vmatpush1.bf16.msra.mxu1 %v6498_v14  ;;  %6844 = vmatprep.subr.bf16.mxu0 %v6439_v20  ;;  %v6611_v14 = vld [vmem:[#allocation2 + $0xe38] sm:$0xff]  ;;  %v6546_v20 = vld [vmem:[#allocation2 + $0xc30] sm:$0xff] }
0x133a   :  { %6885 = vmatprep.subr.bf16.mxu1 %v6503_v21  ;;  %v6610_v21 = vld [vmem:[#allocation2 + $0xe30] sm:$0xff] }
0x133c   :  { %6845 = vmatpush1.bf16.msra.mxu0 %v6438_v34  ;;  %v6551_v34 = vld [vmem:[#allocation2 + $0xc58] sm:$0xff] }
0x133d   :  { %6886 = vmatpush1.bf16.msra.mxu1 %v6502_v24  ;;  %6846 = vmatprep.subr.bf16.mxu0 %v6443_v25  ;;  %v6615_v24 = vld [vmem:[#allocation2 + $0xe58] sm:$0xff]  ;;  %v6550_v25 = vld [vmem:[#allocation2 + $0xc50] sm:$0xff] }
0x133e   :  { %6887 = vmatprep.subr.bf16.mxu1 %v6507_v26  ;;  %v6555_v26 = vld [vmem:[#allocation2 + $0xc78] sm:$0xff] }
0x1340   :  { %6847 = vmatpush1.bf16.msra.mxu0 %v6442_v33  ;;  %v6554_v33 = vld [vmem:[#allocation2 + $0xc70] sm:$0xff] }
0x1341   :  { %6888 = vmatpush1.bf16.msra.mxu1 %v6506_v36  ;;  %6848 = vmatprep.subr.bf16.mxu0 %v6447_v47  ;;  %v6618_v36 = vld [vmem:[#allocation2 + $0xe70] sm:$0xff]  ;;  %v6559_v47 = vld [vmem:[#allocation2 + $0xc98] sm:$0xff] }
0x1342   :  { %6889 = vmatprep.subr.bf16.mxu1 %v6511_v52  ;;  %v6623_v52 = vld [vmem:[#allocation2 + $0xe98] sm:$0xff] }
0x1344   :  { %6849 = vmatpush1.bf16.msra.mxu0 %v6446_v57  ;;  %v6563_v57 = vld [vmem:[#allocation2 + $0xcb8] sm:$0xff] }
0x1345   :  { %6890 = vmatpush1.bf16.msra.mxu1 %v6510_v40  ;;  %6850 = vmatprep.subr.bf16.mxu0 %v6451_v44  ;;  %v6627_v40 = vld [vmem:[#allocation2 + $0xeb8] sm:$0xff]  ;;  %v6562_v44 = vld [vmem:[#allocation2 + $0xcb0] sm:$0xff] }
0x1346   :  { %6891 = vmatprep.subr.bf16.mxu1 %v6515_v16  ;;  %v6626_v16 = vld [vmem:[#allocation2 + $0xeb0] sm:$0xff] }
0x1348   :  { %6851 = vmatpush1.bf16.msra.mxu0 %v6450_v19  ;;  %v6567_v19 = vld [vmem:[#allocation2 + $0xcd8] sm:$0xff] }
0x1349   :  { %6892 = vmatpush1.bf16.msra.mxu1 %v6514_v22  ;;  %6852 = vmatprep.subr.bf16.mxu0 %v6455_v41  ;;  %v6631_v22 = vld [vmem:[#allocation2 + $0xed8] sm:$0xff] }
0x134a   :  { %6893 = vmatprep.subr.bf16.mxu1 %v6519_v42  ;;  %v9368_v41 = vld [vmem:[#allocation16] sm:$0xff]  ;;  %v6566_v42 = vld [vmem:[#allocation2 + $0xcd0] sm:$0xff] }
0x134c   :  { %6853 = vmatpush1.bf16.msra.mxu0 %v6454_v43  ;;  %v6630_v43 = vld [vmem:[#allocation2 + $0xed0] sm:$0xff] }
0x134d   :  { %6894 = vmatpush1.bf16.msra.mxu1 %v6518_v49  ;;  %6854 = vmatprep.subr.bf16.mxu0 %v6459_v51  ;;  %v7005_v49 = vrot.slane %v9368_v41, %v8751_v7  ;;  %v6571_v51 = vld [vmem:[#allocation2 + $0xcf8] sm:$0xff]  ;;  %v6574_v7 = vld [vmem:[#allocation2 + $0xd10] sm:$0xff] }
0x134e   :  { %6895 = vmatprep.subr.bf16.mxu1 %v6523_v62  ;;  %v6635_v62 = vld [vmem:[#allocation2 + $0xef8] sm:$0xff] }
0x1350   :  { %6855 = vmatpush1.bf16.msra.mxu0 %v6458_v45  ;;  %v7013_v45 = vrot.slane %v9368_v41, %v8755_v9  ;;  %v6638_v9 = vld [vmem:[#allocation2 + $0xf10] sm:$0xff] }
0x1351   :  { %6896 = vmatpush1.bf16.msra.mxu1 %v6522_v46  ;;  %6856 = vmatprep.subr.bf16.mxu0 %v6463_v53  ;;  %v6570_v46 = vld [vmem:[#allocation2 + $0xcf0] sm:$0xff] }
0x1352   :  { %6897 = vmatprep.subr.bf16.mxu1 %v6527_v50  ;;  %v6634_v53 = vld [vmem:[#allocation2 + $0xef0] sm:$0xff]  ;;  %v9375_v50 = vadd.f32 %v7005_v49, %v9348_v30 }
0x1353   :  { %v6578_v30 = vld [vmem:[#allocation2 + $0xd30] sm:$0xff] }
0x1354   :  { %6857 = vmatpush1.bf16.msra.mxu0 %v6462_v55  ;;  %v6575_v55 = vld [vmem:[#allocation2 + $0xd18] sm:$0xff]  ;;  %vm7047_vm8 = vcmp.gt.f32.partialorder %v9375_v50, 0.0 }
0x1355   :  { %6898 = vmatpush1.bf16.msra.mxu1 %v6526_v59  ;;  %6858 = vmatprep.subr.bf16.mxu0 %v6467_v37  ;;  %v6639_v59 = vld [vmem:[#allocation2 + $0xf18] sm:$0xff]  ;;  %v9378_v37 = vadd.f32 %v7013_v45, %v9352_v54  ;;  %v8156_v45 = vld [vmem:[%s9647_s10] sm:$0xff]  }
0x1356   :  { %6899 = vmatprep.subr.bf16.mxu1 %v6531_v60  ;;  %v7056_v60 = vmul.f32 1.442695, %v9375_v50  ;;  %v6583_v54 = vld [vmem:[#allocation2 + $0xd58] sm:$0xff] }
0x1357   :  { %vm7049_vm9 = vcmp.gt.f32.partialorder %v9378_v37, 0.0 }
0x1358   :  { %6859 = vmatpush1.bf16.msra.mxu0 %v6466_v15  ;;  %v6579_v15 = vld [vmem:[#allocation2 + $0xd38] sm:$0xff]  ;;  %8219 = vpow2.f32 %v7056_v60  ;;  %v8180_v60 = vld [vmem:[%s9647_s10 + $0x90] sm:$0xff]  }
0x1359   :  { %6900 = vmatpush1.bf16.msra.mxu1 %v6530_v28  ;;  %6860 = vmatprep.subr.bf16.mxu0 %v6471_v23  ;;  %v6643_v28 = vld [vmem:[#allocation2 + $0xf38] sm:$0xff]  ;;  %v7060_v23 = vmul.f32 1.442695, %v9378_v37 }
0x135a   :  { %6901 = vmatprep.subr.bf16.mxu1 %v6535_v39  ;;  %v6642_v39 = vld [vmem:[#allocation2 + $0xf30] sm:$0xff] }
0x135b   :  { %8221 = vpow2.f32 %v7060_v23 }
0x135c   :  { %6861 = vmatpush1.bf16.msra.mxu0 %v6470_v32  ;;  %v6647_v32 = vld [vmem:[#allocation2 + $0xf58] sm:$0xff] }
0x135d   :  { %6902 = vmatpush1.bf16.msra.mxu1 %v6534_v31  ;;  %6862 = vmatprep.subr.bf16.mxu0 %v6475_v61  ;;  %v6582_v31 = vld [vmem:[#allocation2 + $0xd50] sm:$0xff] }
0x135e   :  { %6903 = vmatprep.subr.bf16.mxu1 %v6539_v63  ;;  %v6646_v61 = vld [vmem:[#allocation2 + $0xf50] sm:$0xff]  ;;  %v6587_v63 = vld [vmem:[#allocation2 + $0xd78] sm:$0xff] }
0x1360   :  { %6863 = vmatpush1.bf16.msra.mxu0 %v6474_v0  ;;  %v6651_v0 = vld [vmem:[#allocation2 + $0xf78] sm:$0xff] }
0x1361   :  { %6904 = vmatpush1.bf16.msra.mxu1 %v6538_v3  ;;  %6914 = vmatprep.subr.bf16.mxu0 %v6543_v27  ;;  %v6586_v3 = vld [vmem:[#allocation2 + $0xd70] sm:$0xff] }
0x1362   :  { %6955 = vmatprep.subr.bf16.mxu1 %v6607_v18  ;;  %v6650_v27 = vld [vmem:[#allocation2 + $0xf70] sm:$0xff]  ;;  %v6591_v18 = vld [vmem:[#allocation2 + $0xd98] sm:$0xff] }
0x1363   :  { %6865 = vmatmul.mubr.bf16.vlgmr.msra.gmra.mrb[152].mxu0 %v9289_v58  ;;  %v6614_v58 = vld [vmem:[#allocation2 + $0xe50] sm:$0xff] }
0x1364   :  { %6906 = vmatmul.mubr.bf16.vlgmr.msra.gmra.mrb[152].mxu1 %v9293_v6  ;;  %6915 = vmatpush1.bf16.msra.mxu0 %v6542_v4  ;;  %v6619_v6 = vld [vmem:[#allocation2 + $0xe78] sm:$0xff] }
0x1365   :  { %6956 = vmatpush1.bf16.msra.mxu1 %v6606_v56  ;;  %6916 = vmatprep.subr.bf16.mxu0 %v6547_v29  ;;  %v6655_v4 = vld [vmem:[#allocation2 + $0xf98] sm:$0xff]  ;;  %v8220_v56 = vpop.eup %8219 }
0x1366   :  { %6957 = vmatprep.subr.bf16.mxu1 %v6611_v14  ;;  %6946 = vmatprep.mubr.bf16.mxu0 %v9305_v17  ;;  %v6558_v17 = vld [vmem:[#allocation2 + $0xc90] sm:$0xff]  ;;  %v8222_v29 = vpop.eup %8221 }
0x1367   :  { %6987 = vmatprep.mubr.bf16.mxu1 %v9313_v2  ;;  %v6622_v2 = vld [vmem:[#allocation2 + $0xe90] sm:$0xff] }
0x1368   :  { %6917 = vmatpush1.bf16.msra.mxu0 %v6546_v20  ;;  %v6590_v14 = vld [vmem:[#allocation2 + $0xd90] sm:$0xff] }
0x1369   :  { %6958 = vmatpush1.bf16.msra.mxu1 %v6610_v21  ;;  %6918 = vmatprep.subr.bf16.mxu0 %v6551_v34  ;;  %v6654_v20 = vld [vmem:[#allocation2 + $0xf90] sm:$0xff]  ;;  %v6595_v21 = vld [vmem:[#allocation2 + $0xdb8] sm:$0xff] }
0x136a   :  { %6959 = vmatprep.subr.bf16.mxu1 %v6615_v24  ;;  %v6659_v34 = vld [vmem:[#allocation2 + $0xfb8] sm:$0xff]  ;;  %v7886_v24 = vadd.f32 -1.0, %v8220_v56 }
0x136c   :  { %6919 = vmatpush1.bf16.msra.mxu0 %v6550_v25  ;;  %v7888_v25 = vadd.f32 -1.0, %v8222_v29  ;;  %v8192_v29 = vld [vmem:[%s9647_s10 + $0xa8] sm:$0xff]  }
0x136d   :  { %6960 = vmatpush1.bf16.msra.mxu1 %v6614_v58  ;;  %6920 = vmatprep.subr.bf16.mxu0 %v6555_v26  ;;  %v6594_v58 = vld [vmem:[#allocation2 + $0xdb0] sm:$0xff] }
0x136e   :  { %6961 = vmatprep.subr.bf16.mxu1 %v6619_v6  ;;  %v6658_v26 = vld [vmem:[#allocation2 + $0xfb0] sm:$0xff]  ;;  %v6599_v6 = vld [vmem:[#allocation2 + $0xdd8] sm:$0xff] }
0x1370   :  { %6921 = vmatpush1.bf16.msra.mxu0 %v6554_v33  ;;  %v6663_v33 = vld [vmem:[#allocation2 + $0xfd8] sm:$0xff] }
0x1371   :  { %6962 = vmatpush1.bf16.msra.mxu1 %v6618_v36  ;;  %6922 = vmatprep.subr.bf16.mxu0 %v6559_v47  ;;  %v7079_v36 = vmul.f32 1.6732632, %v7886_v24  ;;  %v7001_v47 = vrot.slane %v9368_v41, %v8749_v5 }
0x1372   :  { %6963 = vmatprep.subr.bf16.mxu1 %v6623_v52  ;;  %v7081_v52 = vmul.f32 1.6732632, %v7888_v25 }
0x1373   :  { %v9390_v5 = vadd.f32 %v7001_v47, %v9346_v35  ;;  %v8171_v35 = vld [vmem:[%s9647_s10 + $0xc0] sm:$0xff]   ;;  %v8168_v47 = vld [vmem:[%s9647_s10 + $0x30] sm:$0xff]  }
0x1374   :  { %6923 = vmatpush1.bf16.msra.mxu0 %v6558_v17  ;;  %v7009_v17 = vrot.slane %v9368_v41, %v8753_v8  ;;  %v6602_v8 = vld [vmem:[#allocation2 + $0xdf0] sm:$0xff] }
0x1375   :  { %6964 = vmatpush1.bf16.msra.mxu1 %v6622_v2  ;;  %6924 = vmatprep.subr.bf16.mxu0 %v6563_v57  ;;  %v6598_v2 = vld [vmem:[#allocation2 + $0xdd0] sm:$0xff]  ;;  %vm7046_vm10 = vcmp.gt.f32.partialorder %v9390_v5, 0.0 }
0x1376   :  { %6965 = vmatprep.subr.bf16.mxu1 %v6627_v40  ;;  %v6662_v57 = vld [vmem:[#allocation2 + $0xfd0] sm:$0xff]  ;;  %v6603_v40 = vld [vmem:[#allocation2 + $0xdf8] sm:$0xff] }
0x1378   :  { %6925 = vmatpush1.bf16.msra.mxu0 %v6562_v44  ;;  %v6667_v44 = vld [vmem:[#allocation2 + $0xff8] sm:$0xff] }
0x1379   :  { %6966 = vmatpush1.bf16.msra.mxu1 %v6626_v16  ;;  %6926 = vmatprep.subr.bf16.mxu0 %v6567_v19  ;;  %v7087_v16 = vsel %vm7047_vm8, %v9375_v50, %v7079_v36  ;;  %v7089_v19 = vsel %vm7049_vm9, %v9378_v37, %v7081_v52  ;;  %v8158_v37 = vld [vmem:[%s9647_s10 + $0x8] sm:$0xff]  }
0x137a   :  { %6967 = vmatprep.subr.bf16.mxu1 %v6631_v22  ;;  %v9394_v22 = vadd.f32 %v7009_v17, %v9350_v48  ;;  %v7095_v49 = vmul.f32 1.050701, %v7087_v16  ;;  %v8196_v17 = vld [vmem:[%s9647_s10 + $0xb0] sm:$0xff]   ;;  %v8199_v16 = vld [vmem:[%s9647_s10 + $0xf8] sm:$0xff]  }
0x137c   :  { %6927 = vmatpush1.bf16.msra.mxu0 %v6566_v42  ;;  %v6666_v42 = vld [vmem:[#allocation2 + $0xff0] sm:$0xff]  ;;  %v7058_v48 = vmul.f32 1.442695, %v9394_v22  ;;  %v7103_v50 = vpack.c.bf16 %v7095_v49, %v7095_v49  ;;  %vm7048_vm11 = vcmp.gt.f32.partialorder %v9394_v22, 0.0 }
0x137d   :  { %6968 = vmatpush1.bf16.msra.mxu1 %v6630_v43  ;;  %6928 = vmatprep.subr.bf16.mxu0 %v6571_v51  ;;  %v8155_v43 = vld [vmem:[%s9647_s10 + $0x40] sm:$0xff]   ;;  %v7054_v51 = vmul.f32 1.442695, %v9390_v5 }
0x137e   :  { %6969 = vmatprep.subr.bf16.mxu1 %v6635_v62  ;;  %v7097_v62 = vmul.f32 1.050701, %v7089_v19 }
0x137f   :  { %8223 = vpow2.f32 %v7054_v51  ;;  %v8174_v51 = vld [vmem:[%s9647_s10 + $0x100] sm:$0xff]  }
0x1380   :  { %6929 = vmatpush1.bf16.msra.mxu0 %v6570_v46  ;;  %v8172_v46 = vld [vmem:[%s9647_s10 + $0x80] sm:$0xff]   ;;  %8225 = vpow2.f32 %v7058_v48  ;;  %v8178_v48 = vld [vmem:[%s9647_s10 + $0x108] sm:$0xff]  }
0x1381   :  { %6970 = vmatpush1.bf16.msra.mxu1 %v6634_v53  ;;  %6930 = vmatprep.subr.bf16.mxu0 %v6575_v55  ;;  %v8157_v53 = vld [vmem:[%s9647_s10 + $0x48] sm:$0xff]  }
0x1382   :  { %6971 = vmatprep.subr.bf16.mxu1 %v6639_v59  ;;  %v8175_v55 = vld [vmem:[%s9647_s10 + $0xc8] sm:$0xff]   ;;  %v7105_v59 = vpack.c.bf16 %v7097_v62, %v7097_v62 }
0x1383   :  { %v8177_v62 = vld [vmem:[%s9647_s10 + $0x148] sm:$0xff]  }
0x1384   :  { %6931 = vmatpush1.bf16.msra.mxu0 %v6574_v7  ;;  %v8176_v7 = vld [vmem:[%s9647_s10 + $0x88] sm:$0xff]  }
0x1385   :  { %6972 = vmatpush1.bf16.msra.mxu1 %v6638_v9  ;;  %6932 = vmatprep.subr.bf16.mxu0 %v6579_v15  ;;  %v8159_v9 = vld [vmem:[%s9647_s10 + $0x50] sm:$0xff]   ;;  %v8161_v15 = vld [vmem:[%s9647_s10 + $0x58] sm:$0xff]  }
0x1386   :  { %6973 = vmatprep.subr.bf16.mxu1 %v6643_v28  ;;  %v8183_v28 = vld [vmem:[%s9647_s10 + $0xd8] sm:$0xff]  }
0x1388   :  { %6933 = vmatpush1.bf16.msra.mxu0 %v6578_v30  ;;  %v8162_v30 = vld [vmem:[%s9647_s10 + $0x18] sm:$0xff]  }
0x1389   :  { %6974 = vmatpush1.bf16.msra.mxu1 %v6642_v39  ;;  %6934 = vmatprep.subr.bf16.mxu0 %v6583_v54  ;;  %v8224_v23 = vpop.eup %8223  ;;  %v8184_v39 = vld [vmem:[%s9647_s10 + $0x98] sm:$0xff]  }
0x138a   :  { %6975 = vmatprep.subr.bf16.mxu1 %v6647_v32  ;;  %v8226_v54 = vpop.eup %8225  ;;  %v8163_v32 = vld [vmem:[%s9647_s10 + $0x60] sm:$0xff]  }
0x138c   :  { %6935 = vmatpush1.bf16.msra.mxu0 %v6582_v31  ;;  %v8187_v31 = vld [vmem:[%s9647_s10 + $0xe0] sm:$0xff]  }
0x138d   :  { %6976 = vmatpush1.bf16.msra.mxu1 %v6646_v61  ;;  %6936 = vmatprep.subr.bf16.mxu0 %v6587_v63  ;;  %v8164_v61 = vld [vmem:[%s9647_s10 + $0x20] sm:$0xff]   ;;  %v7885_v63 = vadd.f32 -1.0, %v8224_v23 }
0x138e   :  { %6977 = vmatprep.subr.bf16.mxu1 %v6651_v0  ;;  %v8188_v0 = vld [vmem:[%s9647_s10 + $0xa0] sm:$0xff]  }
0x138f   :  { %v7078_v56 = vmul.f32 1.6732632, %v7885_v63  ;;  %v7021_v63 = vrot.slane %v9368_v41, %v8759_v11  ;;  %v8208_v11 = vld [vmem:[%s9647_s10 + $0x190] sm:$0xff]  }
0x1390   :  { %6937 = vmatpush1.bf16.msra.mxu0 %v6586_v3  ;;  %v7887_v3 = vadd.f32 -1.0, %v8226_v54 }
0x1391   :  { %6978 = vmatpush1.bf16.msra.mxu1 %v6650_v27  ;;  %6938 = vmatprep.subr.bf16.mxu0 %v6591_v18  ;;  %v8165_v27 = vld [vmem:[%s9647_s10 + $0x68] sm:$0xff]   ;;  %v7086_v52 = vsel %vm7046_vm10, %v9390_v5, %v7078_v56 }
0x1392   :  { %6979 = vmatprep.subr.bf16.mxu1 %v6655_v4  ;;  %v8191_v18 = vld [vmem:[%s9647_s10 + $0xe8] sm:$0xff]   ;;  %v7094_v5 = vmul.f32 1.050701, %v7086_v52 }
0x1393   :  { %v8166_v4 = vld [vmem:[%s9647_s10 + $0x28] sm:$0xff]  }
0x1394   :  { %6939 = vmatpush1.bf16.msra.mxu0 %v6590_v14  ;;  %v7080_v14 = vmul.f32 1.6732632, %v7887_v3 }
0x1395   :  { %6980 = vmatpush1.bf16.msra.mxu1 %v6654_v20  ;;  %6940 = vmatprep.subr.bf16.mxu0 %v6595_v21  ;;  %v8167_v20 = vld [vmem:[%s9647_s10 + $0x70] sm:$0xff]  }
0x1396   :  { %6981 = vmatprep.subr.bf16.mxu1 %v6659_v34  ;;  %v8195_v21 = vld [vmem:[%s9647_s10 + $0xf0] sm:$0xff]  }
0x1398   :  { %6941 = vmatpush1.bf16.msra.mxu0 %v6594_v58 }
0x1399   :  { %6982 = vmatpush1.bf16.msra.mxu1 %v6658_v26  ;;  %6942 = vmatprep.subr.bf16.mxu0 %v6599_v6 }
0x139a   :  { %6983 = vmatprep.subr.bf16.mxu1 %v6663_v33 }
0x139c   :  { %6943 = vmatpush1.bf16.msra.mxu0 %v6598_v2  ;;  %v7088_v2 = vsel %vm7048_vm11, %v9394_v22, %v7080_v14  ;;  %v8200_v22 = vld [vmem:[%s9647_s10 + $0xb8] sm:$0xff]   ;;  %v8207_v14 = vld [vmem:[%s9647_s10 + $0x1d0] sm:$0xff]  }
0x139d   :  { %6984 = vmatpush1.bf16.msra.mxu1 %v6662_v57  ;;  %6944 = vmatprep.subr.bf16.mxu0 %v6603_v40  ;;  %v7096_v19 = vmul.f32 1.050701, %v7088_v2  ;;  %v8215_v2 = vld [vmem:[%s9647_s10 + $0x1f0] sm:$0xff]  }
0x139e   :  { %6985 = vmatprep.subr.bf16.mxu1 %v6667_v44  ;;  %v8169_v44 = vld [vmem:[%s9647_s10 + $0x78] sm:$0xff]  }
0x139f   :  { %v7104_v49 = vpack.c.bf16 %v7096_v19, %v7096_v19 }
0x13a0   :  { %6945 = vmatpush1.bf16.msra.mxu0 %v6602_v8  ;;  %v8170_v8 = vld [vmem:[%s9647_s10 + $0x38] sm:$0xff]  }
0x13a1   :  { %6986 = vmatpush1.bf16.msra.mxu1 %v6666_v42  ;;  %7960 = vmatprep.subr.bf16.mxu0 %v8155_v43  ;;  %v8173_v42 = vld [vmem:[%s9647_s10 + $0x140] sm:$0xff]  }
0x13a2   :  { %7982 = vmatprep.subr.bf16.mxu1 %v8171_v35  ;;  %v8203_v43 = vld [vmem:[%s9647_s10 + $0x1c0] sm:$0xff]   ;;  %v7102_v35 = vpack.c.bf16 %v7094_v5, %v7094_v5 }
0x13a3   :  { %6947 = vmatmul.mubr.bf16.vlgmr.msra.gmra.mrb[156].mxu0 %v9303_v1  ;;  %v8179_v1 = vld [vmem:[%s9647_s10 + $0xd0] sm:$0xff]  }
0x13a4   :  { %6988 = vmatmul.mubr.bf16.vlgmr.msra.gmra.mrb[156].mxu1 %v9311_v38  ;;  %7961 = vmatpush3.bf16.msra.mxu0 %v8156_v45  ;;  %v8160_v38 = vld [vmem:[%s9647_s10 + $0x10] sm:$0xff]  }
0x13a5   :  { %7983 = vmatpush3.bf16.msra.mxu1 %v8172_v46  ;;  %7962 = vmatprep.subr.bf16.mxu0 %v8157_v53  ;;  %v8181_v45 = vld [vmem:[%s9647_s10 + $0x150] sm:$0xff]   ;;  %v8185_v53 = vld [vmem:[%s9647_s10 + $0x158] sm:$0xff]  }
0x13a6   :  { %7661 = vmatprep.mubr.bf16.mxu0 %v7103_v50  ;;  %7984 = vmatprep.subr.bf16.mxu1 %v8175_v55  ;;  %v8182_v46 = vld [vmem:[%s9647_s10 + $0x110] sm:$0xff]   ;;  %v8186_v50 = vld [vmem:[%s9647_s10 + $0x118] sm:$0xff]   ;;  %v8189_v55 = vld [vmem:[%s9647_s10 + $0x160] sm:$0xff]  }
0x13a7   :  { %7701 = vmatprep.mubr.bf16.mxu1 %v7105_v59  ;;  %v8190_v59 = vld [vmem:[%s9647_s10 + $0x120] sm:$0xff]  }
0x13a8   :  { %7963 = vmatpush3.bf16.msra.mxu0 %v8158_v37  ;;  %v8193_v37 = vld [vmem:[%s9647_s10 + $0x168] sm:$0xff]  }
0x13a9   :  { %7985 = vmatpush3.bf16.msra.mxu1 %v8176_v7  ;;  %7964 = vmatprep.subr.bf16.mxu0 %v8159_v9  ;;  %v8194_v7 = vld [vmem:[%s9647_s10 + $0x128] sm:$0xff]   ;;  %v8197_v9 = vld [vmem:[%s9647_s10 + $0x170] sm:$0xff]  }
0x13aa   :  { %7986 = vmatprep.subr.bf16.mxu1 %v8179_v1  ;;  %v8198_v1 = vld [vmem:[%s9647_s10 + $0x130] sm:$0xff]  }
0x13ac   :  { %7965 = vmatpush3.bf16.msra.mxu0 %v8160_v38  ;;  %v8201_v38 = vld [vmem:[%s9647_s10 + $0x178] sm:$0xff]  }
0x13ad   :  { %7987 = vmatpush3.bf16.msra.mxu1 %v8180_v60  ;;  %7966 = vmatprep.subr.bf16.mxu0 %v8161_v15  ;;  %v8202_v60 = vld [vmem:[%s9647_s10 + $0x138] sm:$0xff]   ;;  %v8204_v15 = vld [vmem:[%s9647_s10 + $0x180] sm:$0xff]  }
0x13ae   :  { %7988 = vmatprep.subr.bf16.mxu1 %v8183_v28 }
0x13b0   :  { %7967 = vmatpush3.bf16.msra.mxu0 %v8162_v30 }
0x13b1   :  { %7989 = vmatpush3.bf16.msra.mxu1 %v8184_v39  ;;  %7968 = vmatprep.subr.bf16.mxu0 %v8163_v32  ;;  %v7017_v39 = vrot.slane %v9368_v41, %v8757_v10 }
0x13b2   :  { %7990 = vmatprep.subr.bf16.mxu1 %v8187_v31  ;;  %v8205_v31 = vld [vmem:[%s9647_s10 + $0x1c8] sm:$0xff]  }
0x13b4   :  { %7969 = vmatpush3.bf16.msra.mxu0 %v8164_v61 }
0x13b5   :  { %7991 = vmatpush3.bf16.msra.mxu1 %v8188_v0  ;;  %7970 = vmatprep.subr.bf16.mxu0 %v8165_v27  ;;  %v8206_v27 = vld [vmem:[%s9647_s10 + $0x188] sm:$0xff]  }
0x13b6   :  { %7992 = vmatprep.subr.bf16.mxu1 %v8191_v18  ;;  %v6702_v34 = vpop.f32.mrb[144].mxu0 }
0x13b7   :  { %v6743_v24 = vpop.f32.mrb[144].mxu1  ;;  %v6704_v58 = vpop.f32.mrb[145].mxu0 }
0x13b8   :  { %v9480_v25 = vadd.f32 %v6743_v24, %v6702_v34  ;;  %v6745_v26 = vpop.f32.mrb[145].mxu1  ;;  %v6706_v33 = vpop.f32.mrb[146].mxu0  ;;  %7971 = vmatpush3.bf16.msra.mxu0 %v8166_v4  ;;  %v8209_v24 = vld [vmem:[%s9647_s10 + $0x1d8] sm:$0xff]  }
0x13b9   :  { %v9482_v6 = vadd.f32 %v6745_v26, %v6704_v58  ;;  %v6747_v36 = vpop.f32.mrb[146].mxu1  ;;  %7993 = vmatpush3.bf16.msra.mxu1 %v8192_v29  ;;  %v6707_v57 = vpop.f32.mrb[147].mxu0  ;;  %7972 = vmatprep.subr.bf16.mxu0 %v8167_v20  ;;  %v8211_v58 = vld [vmem:[%s9647_s10 + $0x1e0] sm:$0xff]   ;;  %v8214_v33 = vld [vmem:[%s9647_s10 + $0x1a8] sm:$0xff]  }
0x13ba   :  { %v6748_v40 = vpop.f32.mrb[147].mxu1  ;;  %7994 = vmatprep.subr.bf16.mxu1 %v8195_v21  ;;  %v8212_v26 = vld [vmem:[%s9647_s10 + $0x1a0] sm:$0xff]  }
0x13bb   :  { %v8216_v40 = vld [vmem:[%s9647_s10 + $0x1b0] sm:$0xff]  }
0x13bc   :  { %7973 = vmatpush3.bf16.msra.mxu0 %v8168_v47 }
0x13bd   :  { %7995 = vmatpush3.bf16.msra.mxu1 %v8196_v17  ;;  %7974 = vmatprep.subr.bf16.mxu0 %v8169_v44 }
0x13be   :  { %7996 = vmatprep.subr.bf16.mxu1 %v8199_v16 }
0x13c0   :  { %7975 = vmatpush3.bf16.msra.mxu0 %v8170_v8  ;;  %v8217_v8 = vld [vmem:[%s9647_s10 + $0x1f8] sm:$0xff]  }
0x13c1   :  { %7997 = vmatpush3.bf16.msra.mxu1 %v8200_v22  ;;  %8004 = vmatprep.subr.bf16.mxu0 %v8173_v42  ;;  %v8218_v22 = vld [vmem:[%s9647_s10 + $0x1b8] sm:$0xff]  }
0x13c2   :  { %8026 = vmatprep.subr.bf16.mxu1 %v8203_v43 }
0x13c3   :  { %7662 = vmatmul.mubr.bf16.vlgmr.msra.gmra.mrb[160].mxu0 %v7102_v35 }
0x13c4   :  { %7702 = vmatmul.mubr.bf16.vlgmr.msra.gmra.mrb[160].mxu1 %v7104_v49  ;;  %8005 = vmatpush3.bf16.msra.mxu0 %v8174_v51 }
0x13c5   :  { %8006 = vmatprep.subr.bf16.mxu0 %v8177_v62  ;;  %8027 = vmatpush3.bf16.msra.mxu1 %v8204_v15 }
0x13c6   :  { %8028 = vmatprep.subr.bf16.mxu1 %v8205_v31 }
0x13c8   :  { %8007 = vmatpush3.bf16.msra.mxu0 %v8178_v48 }
0x13c9   :  { %8008 = vmatprep.subr.bf16.mxu0 %v8181_v45  ;;  %8029 = vmatpush3.bf16.msra.mxu1 %v8206_v27 }
0x13ca   :  { %8030 = vmatprep.subr.bf16.mxu1 %v8207_v14 }
0x13cc   :  { %8009 = vmatpush3.bf16.msra.mxu0 %v8182_v46 }
0x13cd   :  { %8010 = vmatprep.subr.bf16.mxu0 %v8185_v53  ;;  %8031 = vmatpush3.bf16.msra.mxu1 %v8208_v11 }
0x13ce   :  { %8032 = vmatprep.subr.bf16.mxu1 %v8209_v24  ;;  %v7893_v24 = vld [vmem:[#allocation18] ss:$0 sm:$0xff] }
0x13d0   :  { %8011 = vmatpush3.bf16.msra.mxu0 %v8186_v50 }
0x13d1   :  { %8012 = vmatprep.subr.bf16.mxu0 %v8189_v55 }
0x13d4   :  { %8013 = vmatpush3.bf16.msra.mxu0 %v8190_v59 }
0x13d5   :  { %8014 = vmatprep.subr.bf16.mxu0 %v8193_v37 }
0x13d8   :  { %8015 = vmatpush3.bf16.msra.mxu0 %v8194_v7 }
0x13d9   :  { %8016 = vmatprep.subr.bf16.mxu0 %v8197_v9 }
0x13dc   :  { %8017 = vmatpush3.bf16.msra.mxu0 %v8198_v1  ;;  %v7025_v1 = vrot.slane %v9368_v41, %v8761_v12 }
0x13dd   :  { %8018 = vmatprep.subr.bf16.mxu0 %v8201_v38 }
0x13e0   :  { %8019 = vmatpush3.bf16.msra.mxu0 %v8202_v60 }
0x13f6   :  { %v6784_v28 = vpop.f32.mrb[148].mxu0 }
0x13f7   :  { %v6825_v23 = vpop.f32.mrb[148].mxu1  ;;  %v6785_v30 = vadd.f32 %v6784_v28, %v9480_v25  ;;  %v6786_v54 = vpop.f32.mrb[149].mxu0  ;;  %v8210_v25 = vld [vmem:[%s9647_s10 + $0x198] sm:$0xff]   ;;  %v7029_v28 = vrot.slane %v9368_v41, %v8763_v13 }
0x13f8   :  { %v6827_v32 = vpop.f32.mrb[149].mxu1  ;;  %v6787_v61 = vadd.f32 %v6786_v54, %v9482_v6  ;;  %v6788_v0 = vpop.f32.mrb[150].mxu0  ;;  %8033 = vmatpush3.bf16.msra.mxu1 %v8210_v25  ;;  %v8213_v6 = vld [vmem:[%s9647_s10 + $0x1e8] sm:$0xff]   ;;  %s8542_s10 = smov [#allocation19]  }
0x13f9   :  { %v6829_v3 = vpop.f32.mrb[150].mxu1  ;;  %v6826_v18 = vadd.f32 %v6825_v23, %v6785_v30  ;;  %v6789_v4 = vpop.f32.mrb[151].mxu0  ;;  %8034 = vmatprep.subr.bf16.mxu1 %v8211_v58  ;;  %s7799_s0 = sshll.u32 %s8542_s10, 4  ;;  %s7800_s0 = int_to_ptr.vmem [resolvable:$true] %s7799_s0 }
0x13fa   :  { %v6830_v10 = vpop.f32.mrb[151].mxu1  ;;  %v6828_v56 = vadd.f32 %v6827_v32, %v6787_v61  ;;  %s8433_s6 = scalar_lea.vmem %s7800_s0, 1024  ;;  %p8438_p3 = scmp.lt.s32.totalorder %s7800_s0, %s7800_s0 }
0x13fb   :  { %v7042_v29 = vadd.f32 %v7017_v39, %v6826_v18  ;;  %p8434_p2 = scmp.ne.s32.totalorder %s7800_s0, %s8433_s6  ;;  %p8439_p4 = scmp.lt.s32.totalorder %s8433_s6, %s8433_s6 }
0x13fc   :  { %v7043_v20 = vadd.f32 %v7021_v63, %v6828_v56  ;;  %8035 = vmatpush3.bf16.msra.mxu1 %v8212_v26 }
0x13fd   :  { %v7062_v21 = vmul.f32 1.442695, %v7042_v29  ;;  %8036 = vmatprep.subr.bf16.mxu1 %v8213_v6  ;;  %vm7050_vm12 = vcmp.gt.f32.partialorder %v7042_v29, 0.0  ;;  %p8440_p5 = por %p8439_p4, %p8438_p3 }
0x13fe   :  { %v7064_v34 = vmul.f32 1.442695, %v7043_v20  ;;  %vm7051_vm13 = vcmp.gt.f32.partialorder %v7043_v20, 0.0 }
0x13ff   :  { %8227 = vpow2.f32 %v7062_v21  ;;  %p8441_p6 = pnand %p8440_p5, %p8434_p2 }
0x1400   :  { %8229 = vpow2.f32 %v7064_v34  ;;  %8037 = vmatpush3.bf16.msra.mxu1 %v8214_v33 }
0x1401   :  { %8038 = vmatprep.subr.bf16.mxu1 %v8215_v2 }
0x1404   :  { %8039 = vmatpush3.bf16.msra.mxu1 %v8216_v40 }
0x1405   :  { %8040 = vmatprep.subr.bf16.mxu1 %v8217_v8 }
0x1408   :  { %8041 = vmatpush3.bf16.msra.mxu1 %v8218_v22 }
0x1409   :  { %v8228_v36 = vpop.eup %8227 }
0x140a   :  { %v8230_v47 = vpop.eup %8229  ;;  %v7889_v52 = vadd.f32 -1.0, %v8228_v36 }
0x140b   :  { %v7890_v17 = vadd.f32 -1.0, %v8230_v47 }
0x140c   :  { %v7082_v57 = vmul.f32 1.6732632, %v7889_v52 }
0x140d   :  { %v7083_v44 = vmul.f32 1.6732632, %v7890_v17 }
0x140e   :  { %v7090_v16 = vsel %vm7050_vm12, %v7042_v29, %v7082_v57 }
0x140f   :  { %v7098_v5 = vmul.f32 1.050701, %v7090_v16  ;;  %v7091_v19 = vsel %vm7051_vm13, %v7043_v20, %v7083_v44 }
0x1410   :  { %v7099_v42 = vmul.f32 1.050701, %v7091_v19 }
0x1411   :  { %v7106_v35 = vpack.c.bf16 %v7098_v5, %v7098_v5 }
0x1412   :  { %v7107_v43 = vpack.c.bf16 %v7099_v42, %v7099_v42 }
0x1414   :  { %7741 = vmatprep.mubr.bf16.mxu0 %v7107_v43 }
0x1415   :  { %7742 = vmatmul.mubr.bf16.vlgmr.msra.gmra.mrb[164].mxu0 %v7106_v35 }
0x1436   :  { %v6866_v49 = vpop.f32.mrb[152].mxu0 }
0x1437   :  { %v6907_v51 = vpop.f32.mrb[152].mxu1  ;;  %v6868_v48 = vpop.f32.mrb[153].mxu0 }
0x1438   :  { %v6908_v62 = vadd.f32 %v6907_v51, %v6866_v49  ;;  %v6909_v45 = vpop.f32.mrb[153].mxu1  ;;  %v6870_v53 = vpop.f32.mrb[154].mxu0 }
0x1439   :  { %v6910_v46 = vadd.f32 %v6909_v45, %v6868_v48  ;;  %v6911_v50 = vpop.f32.mrb[154].mxu1  ;;  %v6871_v55 = vpop.f32.mrb[155].mxu0 }
0x143a   :  { %v6912_v59 = vpop.f32.mrb[155].mxu1 }
0x1476   :  { %v6948_v37 = vpop.f32.mrb[156].mxu0 }
0x1477   :  { %v6989_v7 = vpop.f32.mrb[156].mxu1  ;;  %v6949_v9 = vadd.f32 %v6948_v37, %v6908_v62  ;;  %v6950_v38 = vpop.f32.mrb[157].mxu0 }
0x1478   :  { %v6991_v60 = vpop.f32.mrb[157].mxu1  ;;  %v6951_v15 = vadd.f32 %v6950_v38, %v6910_v46  ;;  %v6952_v23 = vpop.f32.mrb[158].mxu0 }
0x1479   :  { %v6993_v30 = vpop.f32.mrb[158].mxu1  ;;  %v6990_v39 = vadd.f32 %v6989_v7, %v6949_v9  ;;  %v6953_v54 = vpop.f32.mrb[159].mxu0 }
0x147a   :  { %v6994_v32 = vpop.f32.mrb[159].mxu1  ;;  %v6992_v31 = vadd.f32 %v6991_v60, %v6951_v15 }
0x147b   :  { %v7044_v61 = vadd.f32 %v7025_v1, %v6990_v39 }
0x147c   :  { %v7045_v63 = vadd.f32 %v7029_v28, %v6992_v31 }
0x147d   :  { %v7066_v0 = vmul.f32 1.442695, %v7044_v61  ;;  %vm7052_vm14 = vcmp.gt.f32.partialorder %v7044_v61, 0.0 }
0x147e   :  { %v7068_v3 = vmul.f32 1.442695, %v7045_v63  ;;  %vm7053_vm15 = vcmp.gt.f32.partialorder %v7045_v63, 0.0 }
0x147f   :  { %8231 = vpow2.f32 %v7066_v0 }
0x1480   :  { %8233 = vpow2.f32 %v7068_v3 }
0x1489   :  { %v8232_v27 = vpop.eup %8231 }
0x148a   :  { %v8234_v12 = vpop.eup %8233  ;;  %v7891_v18 = vadd.f32 -1.0, %v8232_v27 }
0x148b   :  { %v7892_v4 = vadd.f32 -1.0, %v8234_v12 }
0x148c   :  { %v7084_v10 = vmul.f32 1.6732632, %v7891_v18 }
0x148d   :  { %v7085_v56 = vmul.f32 1.6732632, %v7892_v4 }
0x148e   :  { %v7092_v13 = vsel %vm7052_vm14, %v7044_v61, %v7084_v10 }
0x148f   :  { %v7100_v41 = vmul.f32 1.050701, %v7092_v13  ;;  %v7093_v29 = vsel %vm7053_vm15, %v7045_v63, %v7085_v56 }
0x1490   :  { %v7101_v14 = vmul.f32 1.050701, %v7093_v29 }
0x1491   :  { %v7108_v11 = vpack.c.bf16 %v7100_v41, %v7100_v41 }
0x1492   :  { %v7109_v20 = vpack.c.bf16 %v7101_v14, %v7101_v14 }
0x1494   :  { %7781 = vmatprep.mubr.bf16.mxu1 %v7109_v20 }
0x1495   :  { %7782 = vmatmul.mubr.bf16.vlgmr.msra.gmra.mrb[164].mxu1 %v7108_v11 }
0x1496   :  { %v7976_v21 = vpop.f32.mrb[160].mxu0 }
0x1497   :  { %v7998_v34 = vpop.f32.mrb[160].mxu1  ;;  %v7977_v25 = vpop.f32.mrb[161].mxu0 }
0x1498   :  { %v7999_v58 = vpop.f32.mrb[161].mxu1  ;;  %v7978_v26 = vadd.f32 %v7977_v25, %v7976_v21  ;;  %v7979_v6 = vpop.f32.mrb[162].mxu0 }
0x1499   :  { %v8000_v33 = vadd.f32 %v7999_v58, %v7998_v34  ;;  %v8001_v36 = vpop.f32.mrb[162].mxu1  ;;  %v7980_v47 = vpop.f32.mrb[163].mxu0 }
0x149a   :  { %v8002_v52 = vpop.f32.mrb[163].mxu1  ;;  %v7664_v17 = vadd.f32 %v7978_v26, %v7893_v24 }
0x149c   :  { %v7704_v2 = vadd.f32 %v8000_v33, %v7664_v17 }
0x14e8   :  { %v8020_v57 = vpop.f32.mrb[164].mxu0 }
0x14e9   :  { %v8021_v40 = vpop.f32.mrb[165].mxu0 }
0x14ea   :  { %v8022_v44 = vadd.f32 %v8021_v40, %v8020_v57  ;;  %v8023_v16 = vpop.f32.mrb[166].mxu0 }
0x14eb   :  { %v8024_v5 = vpop.f32.mrb[167].mxu0 }
0x14ec   :  { %v7744_v19 = vadd.f32 %v8022_v44, %v7704_v2 }
0x14ed   :  { %8444 = shalt.err (!%p8441_p6)
}
0x14ee   :  { %s8445_s8 = scalar_lea.hbm %s9650_s13, 1024 }
0x14ef   :  { %p8446_p7 = scmp.ne.s32.totalorder %s9650_s13, %s8445_s8  ;;  %p8449_p8 = scmp.lt.u32.totalorder %s8445_s8, %s9650_s13 }
0x14f1   :  { %p8451_p9 = pnand %p8449_p8, %p8446_p7 }
0x14f3   :  { %8454 = shalt.err (!%p8451_p9)
}
0x14f4   :  { %7802 = dma.vmem_to_hbm [thread:$0]  %s7800_s0, 1024, %s9650_s13, [#allocation6]  }
0x14f5   :  { %s8455_s29 = scalar_lea.vmem %s7810_s30, 1024  ;;  %p8460_p11 = scmp.lt.s32.totalorder %s7810_s30, %s7810_s30 }
0x14f6   :  { %p8456_p10 = scmp.ne.s32.totalorder %s7810_s30, %s8455_s29  ;;  %p8461_p12 = scmp.lt.s32.totalorder %s8455_s29, %s8455_s29 }
0x14f8   :  { %p8462_p13 = por %p8461_p12, %p8460_p11 }
0x14fa   :  { %p8463_p0 = pnand %p8462_p13, %p8456_p10 }
0x14fc   :  { %8466 = shalt.err (!%p8463_p0)
}
0x14fd   :  { %s8467_s4 = scalar_lea.hbm %s9651_s14, 1024 }
0x14fe   :  { %p8468_p1 = scmp.ne.s32.totalorder %s9651_s14, %s8467_s4  ;;  %p8471_p2 = scmp.lt.u32.totalorder %s8467_s4, %s9651_s14 }
0x1500   :  { %p8473_p3 = pnand %p8471_p2, %p8468_p1 }
0x1502   :  { %8476 = shalt.err (!%p8473_p3)
}
0x1503   :  { %7812 = dma.vmem_to_hbm [thread:$0]  %s7810_s30, 1024, %s9651_s14, [#allocation21]   ;;  %vm7789_vm0 = vcmask 64512  }
0x1568   :  { %v8042_v8 = vpop.f32.mrb[164].mxu1 }
0x1569   :  { %v8043_v22 = vpop.f32.mrb[165].mxu1 }
0x156a   :  { %v8044_v42 = vadd.f32 %v8043_v22, %v8042_v8  ;;  %v8045_v43 = vpop.f32.mrb[166].mxu1 }
0x156b   :  { %v8046_v35 = vpop.f32.mrb[167].mxu1 }
0x156c   :  { %v7784_v49 = vadd.f32 %v8044_v42, %v7744_v19 }
0x156e   :  { %7790 = vst.msk [vmem:[%s9649_s12] sm:$0xff] %vm7789_vm0, %v7784_v49 }
0x156f   :  { %8507 = dma.done.wait [#allocation6], 1024  }
0x1570   :  { %8508 = vsyncadd [#allocation6], 4294966272 }
0x1571   :  { %8509 = dma.done.wait [#allocation21], 1024  }
0x1572   :  { %8510 = vsyncadd [#allocation21], 4294966272 }
0x1573   :  { %7821 = vsyncpa [#allocation5], 1 }
0x1574   :  { %7822 = vsyncpa [#allocation8], 1 }
0x1575   :  { %7823 = vsyncpa [#allocation11], 1 }
0x1576   :  { %7824 = vsyncpa [#allocation14], 1 }
0x1577   :  { %7825 = vsyncpa [#allocation17], 1 }
0x1578   :  { %7826 = vsyncpa [#allocation6], 1 }
0x1579   :  { %7827 = vsyncpa [#allocation21], 1 }
0x157a   :  { %7828 = vsyncmov [#allocation3] }
0x157d   :  { %s7829_s14 = vpop.sfrf %7828 }
0x157e   :  { %p7958_p4 = scmp.ne.s32.totalorder %s7829_s14, 0 }
0x1580   :  { %7833 = shalt.err (%p7958_p4)  }
0x1581   :  { %7835 = vsyncmov [#allocation3 + $0x1] }
0x1584   :  { %s7836_s19 = vpop.sfrf %7835 }
0x1585   :  { %p7959_p5 = scmp.ne.s32.totalorder %s7836_s19, 0 }
0x1587   :  { %7840 = shalt.err (%p7959_p5)  }

</bundles_post_ra>
